<compile_context>
chip_gen: v7x
topology: tpu7x:2x2x1
jax: 0.10.0
libtpu: 0.0.40
codegen_flags: <defaults>
</compile_context>

<pallas_src>
import jax
import jax.numpy as jnp
from jax.experimental import pallas as pl
from jax.experimental.pallas import tpu as pltpu

EPS = 1e-6
_LP = 8          # sublane-aligned left/right padding of the dwconv scratch


def _row_tile(m, cap=2048):
    """Largest row tile <= cap that divides m and is a multiple of 8."""
    if m <= cap:
        return m
    t = cap - (cap % 8)
    while t >= 8:
        if m % t == 0:
            return t
        t -= 8
    return m


def _dw_compute_dtype():
    """bf16 VPU math for the depthwise conv on v6e/v7x only (v5e: no bf16 VALU)."""
    try:
        kind = jax.devices()[0].device_kind.lower()
    except Exception:
        return jnp.float32
    return jnp.bfloat16 if ("v6" in kind or "v7" in kind) else jnp.float32


# ----------------------------- stem kernel ----------------------------------

def _stem_kernel(x_ref, w_ref, b_ref, g_ref, beta_ref, o_ref):
    # patchified 4x4/stride-4 conv (bf16 MXU, f32 acc) + channels-first LN
    y = jnp.dot(x_ref[...], w_ref[...],
                preferred_element_type=jnp.float32) + b_ref[...]
    mu = jnp.mean(y, axis=-1, keepdims=True)
    var = jnp.mean((y - mu) ** 2, axis=-1, keepdims=True)
    o_ref[...] = ((y - mu) * jax.lax.rsqrt(var + EPS) * g_ref[...]
                  + beta_ref[...]).astype(o_ref.dtype)


def stem_conv_ln(xp_bf16, w_bf16, b, g, beta):
    M, K = xp_bf16.shape
    N = w_bf16.shape[1]
    tm = _row_tile(M)
    return pl.pallas_call(
        _stem_kernel,
        out_shape=jax.ShapeDtypeStruct((M, N), jnp.bfloat16),
        grid=(M // tm,),
        in_specs=[
            pl.BlockSpec((tm, K), lambda i: (i, 0)),
            pl.BlockSpec((K, N), lambda i: (0, 0)),
            pl.BlockSpec((1, N), lambda i: (0, 0)),
            pl.BlockSpec((1, N), lambda i: (0, 0)),
            pl.BlockSpec((1, N), lambda i: (0, 0)),
        ],
        out_specs=pl.BlockSpec((tm, N), lambda i: (i, 0)),
        compiler_params=pltpu.CompilerParams(dimension_semantics=("parallel",)),
    )(xp_bf16, w_bf16, b.reshape(1, N), g.reshape(1, N), beta.reshape(1, N))


# ----------------------- fused downsample (LN + 2x2 conv) -------------------

def _downsample_kernel(x0_ref, x1_ref, x2_ref, x3_ref, g_ref, b_ref,
                       w_ref, bias_ref, o_ref):
    # LayerNorm (per pixel, over channels) fused with the 2x2/stride-2 conv:
    # each x{p}_ref holds one of the four patch offsets, so LN-before-conv ==
    # LN on each offset slab; the conv is 4 small MXU matmuls summed.
    acc = None
    for p, xr in enumerate((x0_ref, x1_ref, x2_ref, x3_ref)):
        xp = xr[...].astype(jnp.float32)
        mu = jnp.mean(xp, axis=-1, keepdims=True)
        var = jnp.mean((xp - mu) ** 2, axis=-1, keepdims=True)
        xn = ((xp - mu) * jax.lax.rsqrt(var + EPS) * g_ref[...]
              + b_ref[...]).astype(jnp.bfloat16)
        d = jnp.dot(xn, w_ref[p], preferred_element_type=jnp.float32)
        acc = d if acc is None else acc + d
    o_ref[...] = (acc + bias_ref[...]).astype(o_ref.dtype)


def downsample(h_nhwc, ds):
    B, H, W, C = h_nhwc.shape
    Ho, Wo = H // 2, W // 2
    C2 = ds["w"].shape[-1]
    M = B * Ho * Wo
    # four 2x2-patch offsets; the im2col/LN tensors never touch HBM separately
    xs = [h_nhwc[:, dy::2, dx::2, :].reshape(M, C)
          for dy in range(2) for dx in range(2)]
    tm = _row_tile(M)
    out = pl.pallas_call(
        _downsample_kernel,
        out_shape=jax.ShapeDtypeStruct((M, C2), jnp.bfloat16),
        grid=(M // tm,),
        in_specs=[pl.BlockSpec((tm, C), lambda i: (i, 0))] * 4 + [
            pl.BlockSpec((1, C), lambda i: (0, 0)),
            pl.BlockSpec((1, C), lambda i: (0, 0)),
            pl.BlockSpec((4, C, C2), lambda i: (0, 0, 0)),
            pl.BlockSpec((1, C2), lambda i: (0, 0)),
        ],
        out_specs=pl.BlockSpec((tm, C2), lambda i: (i, 0)),
        compiler_params=pltpu.CompilerParams(dimension_semantics=("parallel",)),
    )(*xs, ds["ln_g"].reshape(1, C), ds["ln_b"].reshape(1, C),
      ds["w"].astype(jnp.bfloat16), ds["b"].reshape(1, C2))
    return out.reshape(B, Ho, Wo, C2)


# --------------------------- fused ConvNeXt block ----------------------------

def _make_block_kernel(H, W, C, Wp, Hp, cdt):
    LP = _LP

    def kernel(x_ref, dww_ref, dwb_ref, lng_ref, lnb_ref,
               w1_ref, b1_ref, gg_ref, gb_ref, w2_ref, b2_ref,
               o_ref, xpad_ref):
        x = x_ref[0]                                            # (H, W, C) bf16

        # --- refresh only the zero halo (interior is fully overwritten) ------
        xpad_ref[0:3, :, :] = jnp.zeros((3, Wp, C), jnp.float32)
        xpad_ref[3 + H:Hp, :, :] = jnp.zeros((Hp - 3 - H, Wp, C), jnp.float32)
        xpad_ref[3:3 + H, 0:LP, :] = jnp.zeros((H, LP, C), jnp.float32)
        xpad_ref[3:3 + H, LP + W:Wp, :] = jnp.zeros((H, Wp - LP - W, C),
                                                    jnp.float32)
        # sublane-aligned interior store (LP == 8)
        xpad_ref[3:3 + H, LP:LP + W, :] = x.astype(jnp.float32)

        # --- depthwise 7x7, padding=3 ----------------------------------------
        # Load padded image + weights once; one shifted column window per kw
        # (7 total), then the 7 kh taps per window are free leading-dim views,
        # so each of the 49 taps is a single FMA.
        xpad = xpad_ref[...]                                    # (Hp, Wp, C)
        wv = dww_ref[...].astype(cdt)                           # (7, 7, C)
        acc = jnp.zeros((H, W, C), jnp.float32)
        for kw in range(7):
            j0 = LP - 3 + kw
            col = xpad[:, j0:j0 + W, :].astype(cdt)             # (Hp, W, C)
            for kh in range(7):
                acc = acc + col[kh:kh + H] * wv[kh, kw]
        xd = acc.reshape(H * W, C) + dwb_ref[...]

        # --- LayerNorm -> pwconv1 (MXU) -> GELU -> GRN -> pwconv2 (MXU) ------
        mu = jnp.mean(xd, axis=-1, keepdims=True)
        var = jnp.mean((xd - mu) ** 2, axis=-1, keepdims=True)
        xn = (xd - mu) * jax.lax.rsqrt(var + EPS) * lng_ref[...] + lnb_ref[...]

        h = jnp.dot(xn.astype(jnp.bfloat16), w1_ref[...],
                    preferred_element_type=jnp.float32) + b1_ref[...]
        # tanh-approx GELU (single EUP op); ~1e-3 off the exact erf form.
        h = jax.nn.gelu(h, approximate=True)

        # GRN: L2 norm over spatial positions per channel / channel mean.
        gx = jnp.sqrt(jnp.sum(h * h, axis=0, keepdims=True))    # (1, 4C)
        nx = gx / (jnp.mean(gx, axis=-1, keepdims=True) + EPS)
        h = gg_ref[...] * (h * nx) + gb_ref[...] + h

        y = jnp.dot(h.astype(jnp.bfloat16), w2_ref[...],
                    preferred_element_type=jnp.float32) + b2_ref[...]

        res = x.astype(jnp.float32).reshape(H * W, C)
        o_ref[...] = (y + res).reshape(1, H, W, C).astype(o_ref.dtype)

    return kernel


def convnext_block(x_nhwc, blk, compute_dtype):
    """One fused ConvNeXt-V2 block (dwconv7 + LN + MLP + GRN + residual)."""
    B, H, W, C = x_nhwc.shape
    hid = blk["w1"].shape[1]
    Hp = H + 6
    Wp = ((_LP + W + 3 + 7) // 8) * 8          # aligned left pad + >=3 right pad

    def rep(shape):
        return pl.BlockSpec(shape, lambda i, s=shape: (0,) * len(s))

    kernel = _make_block_kernel(H, W, C, Wp, Hp, compute_dtype)
    return pl.pallas_call(
        kernel,
        out_shape=jax.ShapeDtypeStruct((B, H, W, C), jnp.bfloat16),
        grid=(B,),
        in_specs=[
            pl.BlockSpec((1, H, W, C), lambda i: (i, 0, 0, 0)),   # x / residual
            rep((7, 7, C)), rep((1, C)),                          # dw conv
            rep((1, C)), rep((1, C)),                             # LN
            rep((C, hid)), rep((1, hid)),                         # pwconv1
            rep((1, hid)), rep((1, hid)),                         # GRN
            rep((hid, C)), rep((1, C)),                           # pwconv2
        ],
        out_specs=pl.BlockSpec((1, H, W, C), lambda i: (i, 0, 0, 0)),
        scratch_shapes=[pltpu.VMEM((Hp, Wp, C), jnp.float32)],
        input_output_aliases={0: 0},     # residual buffer reused for output
        compiler_params=pltpu.CompilerParams(dimension_semantics=("parallel",)),
    )(x_nhwc,
      blk["dw_w"], blk["dw_b"].reshape(1, C),
      blk["ln_g"].reshape(1, C), blk["ln_b"].reshape(1, C),
      blk["w1"].astype(jnp.bfloat16), blk["b1"].reshape(1, hid),
      blk["grn_g"].reshape(1, hid), blk["grn_b"].reshape(1, hid),
      blk["w2"].astype(jnp.bfloat16), blk["b2"].reshape(1, C))


# ------------------------------ JAX glue -------------------------------------

def patchify(x_nhwc, p):
    """Non-overlapping pxp patch extraction (stride-p conv im2col)."""
    B, H, W, C = x_nhwc.shape
    Ho, Wo = H // p, W // p
    x = x_nhwc.reshape(B, Ho, p, Wo, p, C).transpose(0, 1, 3, 2, 4, 5)
    return x.reshape(B * Ho * Wo, p * p * C), (B, Ho, Wo)


def init_params(key, in_ch=3, dims=(32, 64), depths=(2, 2)):
    # TODO(synk): loading real pretrained ConvNextV2 weights needs a
    #             (C_out, C_in, kh, kw) -> (kh, kw, C_in, C_out) permutation.
    keys = iter(jax.random.split(key, 256))

    def nrm(shape, scale=0.02):
        return (scale * jax.random.normal(next(keys), shape)).astype(jnp.float32)

    params = {
        "stem": dict(
            w=nrm((4 * 4 * in_ch, dims[0])),
            b=jnp.zeros((dims[0],), jnp.float32),
            ln_g=jnp.ones((dims[0],), jnp.float32),
            ln_b=jnp.zeros((dims[0],), jnp.float32),
        ),
        "stages": [],
    }
    for si, (depth, c) in enumerate(zip(depths, dims)):
        stage = {}
        if si > 0:
            cin = dims[si - 1]
            stage["downsample"] = dict(
                ln_g=jnp.ones((cin,), jnp.float32),
                ln_b=jnp.zeros((cin,), jnp.float32),
                w=nrm((4, cin, c)),            # (patch offset, C_in, C_out)
                b=jnp.zeros((c,), jnp.float32),
            )
        stage["blocks"] = [
            dict(
                dw_w=nrm((7, 7, c)),
                dw_b=jnp.zeros((c,), jnp.float32),
                ln_g=jnp.ones((c,), jnp.float32),
                ln_b=jnp.zeros((c,), jnp.float32),
                w1=nrm((c, 4 * c)),
                b1=jnp.zeros((4 * c,), jnp.float32),
                # HF inits GRN gamma/beta to zero (identity); small random
                # values here so the GRN path is actually exercised.
                grn_g=nrm((4 * c,)),
                grn_b=nrm((4 * c,)),
                w2=nrm((4 * c, c)),
                b2=jnp.zeros((c,), jnp.float32),
            )
            for _ in range(depth)
        ]
        params["stages"].append(stage)
    return params


def convnext_forward(params, x_nchw):
    """Returns last_hidden_state in NCHW, like ConvNextV2Model."""
    x = jnp.transpose(x_nchw, (0, 2, 3, 1)).astype(jnp.float32)       # NHWC

    # stem: 4x4 stride-4 conv + channels-first LayerNorm (one fused kernel)
    xp, (B, Ho, Wo) = patchify(x, 4)
    stem = params["stem"]
    h = stem_conv_ln(xp.astype(jnp.bfloat16), stem["w"].astype(jnp.bfloat16),
                     stem["b"], stem["ln_g"], stem["ln_b"])
    h = h.reshape(B, Ho, Wo, -1)                                       # bf16

    cdt = _dw_compute_dtype()
    for si, stage in enumerate(params["stages"]):
        if si > 0:
            h = downsample(h, stage["downsample"])    # fused LN + 2x2 conv
        for blk in stage["blocks"]:
            h = convnext_block(h, blk, cdt)            # single fused kernel

    return jnp.transpose(h, (0, 3, 1, 2)).astype(jnp.float32)         # NCHW


if __name__ == "__main__":
    key = jax.random.PRNGKey(0)
    pkey, xkey = jax.random.split(key)
    params = init_params(pkey, in_ch=3, dims=(32, 64), depths=(2, 2))
    img = jax.random.normal(xkey, (2, 3, 32, 32), dtype=jnp.float32)   # NCHW

    out = jax.jit(convnext_forward)(params, img)
    out = jax.block_until_ready(out)
    assert out.shape == (2, 64, 4, 4), out.shape
    assert bool(jnp.all(jnp.isfinite(out)))
    print("KERNEL_OK")
</pallas_src>

<mosaic_0001>
module attributes {stable_mosaic.version = 11 : i64} {
  func.func @_stem_kernel(%arg0: i32, %arg1: memref<128x48xbf16, #tpu.memory_space<vmem>>, %arg2: memref<48x32xbf16, #tpu.memory_space<vmem>>, %arg3: memref<1x32xf32, #tpu.memory_space<vmem>>, %arg4: memref<1x32xf32, #tpu.memory_space<vmem>>, %arg5: memref<1x32xf32, #tpu.memory_space<vmem>>, %arg6: memref<128x32xbf16, #tpu.memory_space<vmem>>) attributes {dimension_semantics = [#tpu.dimension_semantics<parallel>], iteration_bounds = array<i64: 1>, scalar_prefetch = 0 : i64, scratch_operands = 0 : i64, tpu.core_type = #tpu.core_type<tc>, window_params = [{transform_indices = @transform_0, window_bounds = array<i64: 128, 48>}, {pipeline_mode = #tpu.pipeline_mode<synchronous>, transform_indices = @transform_1, window_bounds = array<i64: 48, 32>}, {pipeline_mode = #tpu.pipeline_mode<synchronous>, transform_indices = @transform_2, window_bounds = array<i64: 1, 32>}, {pipeline_mode = #tpu.pipeline_mode<synchronous>, transform_indices = @transform_3, window_bounds = array<i64: 1, 32>}, {pipeline_mode = #tpu.pipeline_mode<synchronous>, transform_indices = @transform_4, window_bounds = array<i64: 1, 32>}, {transform_indices = @transform_5, window_bounds = array<i64: 128, 32>}]} {
    %c0 = arith.constant 0 : index
    %c0_0 = arith.constant 0 : index
    %0 = vector.load %arg1[%c0, %c0_0] : memref<128x48xbf16, #tpu.memory_space<vmem>>, vector<128x48xbf16>
    %c0_1 = arith.constant 0 : index
    %c0_2 = arith.constant 0 : index
    %1 = vector.load %arg2[%c0_1, %c0_2] : memref<48x32xbf16, #tpu.memory_space<vmem>>, vector<48x32xbf16>
    %cst = arith.constant dense<0.000000e+00> : vector<128x32xf32>
    %2 = tpu.matmul %0, %1, %cst {dimension_numbers = #tpu.dot_dimension_numbers<[1], [0], [0], [1], [0, 0, 1, 1], [], []>} : vector<128x48xbf16>, vector<48x32xbf16>, vector<128x32xf32> -> vector<128x32xf32>
    %c0_3 = arith.constant 0 : index
    %c0_4 = arith.constant 0 : index
    %3 = vector.load %arg3[%c0_3, %c0_4] : memref<1x32xf32, #tpu.memory_space<vmem>>, vector<1x32xf32>
    %4 = vector.broadcast %3 : vector<1x32xf32> to vector<128x32xf32>
    %5 = arith.addf %2, %4 : vector<128x32xf32>
    %cst_5 = arith.constant dense<0.000000e+00> : vector<128xf32>
    %6 = vector.multi_reduction <add>, %5, %cst_5 [1] : vector<128x32xf32> to vector<128xf32>
    %7 = vector.shape_cast %6 : vector<128xf32> to vector<128x1xf32>
    %cst_6 = arith.constant 3.200000e+01 : f32
    %8 = vector.broadcast %cst_6 : f32 to vector<128x1xf32>
    %9 = arith.divf %7, %8 : vector<128x1xf32>
    %10 = vector.broadcast %9 : vector<128x1xf32> to vector<128x32xf32>
    %11 = arith.subf %5, %10 : vector<128x32xf32>
    %12 = arith.mulf %11, %11 : vector<128x32xf32>
    %cst_7 = arith.constant dense<0.000000e+00> : vector<128xf32>
    %13 = vector.multi_reduction <add>, %12, %cst_7 [1] : vector<128x32xf32> to vector<128xf32>
    %14 = vector.shape_cast %13 : vector<128xf32> to vector<128x1xf32>
    %cst_8 = arith.constant 3.200000e+01 : f32
    %15 = vector.broadcast %cst_8 : f32 to vector<128x1xf32>
    %16 = arith.divf %14, %15 : vector<128x1xf32>
    %17 = vector.broadcast %9 : vector<128x1xf32> to vector<128x32xf32>
    %18 = arith.subf %5, %17 : vector<128x32xf32>
    %cst_9 = arith.constant 9.99999997E-7 : f32
    %19 = vector.broadcast %cst_9 : f32 to vector<128x1xf32>
    %20 = arith.addf %16, %19 : vector<128x1xf32>
    %21 = math.rsqrt %20 : vector<128x1xf32>
    %22 = vector.broadcast %21 : vector<128x1xf32> to vector<128x32xf32>
    %23 = arith.mulf %18, %22 : vector<128x32xf32>
    %c0_10 = arith.constant 0 : index
    %c0_11 = arith.constant 0 : index
    %24 = vector.load %arg4[%c0_10, %c0_11] : memref<1x32xf32, #tpu.memory_space<vmem>>, vector<1x32xf32>
    %25 = vector.broadcast %24 : vector<1x32xf32> to vector<128x32xf32>
    %26 = arith.mulf %23, %25 : vector<128x32xf32>
    %c0_12 = arith.constant 0 : index
    %c0_13 = arith.constant 0 : index
    %27 = vector.load %arg5[%c0_12, %c0_13] : memref<1x32xf32, #tpu.memory_space<vmem>>, vector<1x32xf32>
    %28 = vector.broadcast %27 : vector<1x32xf32> to vector<128x32xf32>
    %29 = arith.addf %26, %28 : vector<128x32xf32>
    %30 = arith.truncf %29 : vector<128x32xf32> to vector<128x32xbf16>
    %c0_14 = arith.constant 0 : index
    %c0_15 = arith.constant 0 : index
    %31 = vector.load %arg6[%c0_14, %c0_15] : memref<128x32xbf16, #tpu.memory_space<vmem>>, vector<128x32xbf16>
    tpu.vector_store %arg6[%c0_14, %c0_15], %30 {strides = array<i32>} : memref<128x32xbf16, #tpu.memory_space<vmem>>, vector<128x32xbf16>,
    return
  }
  func.func @transform_0(%arg0: i32) -> (i32, i32) {
    %c0_i32 = arith.constant 0 : i32
    %c0_i32_0 = arith.constant 0 : i32
    return %arg0, %c0_i32 : i32, i32
  }
  func.func @transform_1(%arg0: i32) -> (i32, i32) {
    %c0_i32 = arith.constant 0 : i32
    %c0_i32_0 = arith.constant 0 : i32
    %c0_i32_1 = arith.constant 0 : i32
    return %c0_i32, %c0_i32_0 : i32, i32
  }
  func.func @transform_2(%arg0: i32) -> (i32, i32) {
    %c0_i32 = arith.constant 0 : i32
    %c0_i32_0 = arith.constant 0 : i32
    %c0_i32_1 = arith.constant 0 : i32
    return %c0_i32, %c0_i32_0 : i32, i32
  }
  func.func @transform_3(%arg0: i32) -> (i32, i32) {
    %c0_i32 = arith.constant 0 : i32
    %c0_i32_0 = arith.constant 0 : i32
    %c0_i32_1 = arith.constant 0 : i32
    return %c0_i32, %c0_i32_0 : i32, i32
  }
  func.func @transform_4(%arg0: i32) -> (i32, i32) {
    %c0_i32 = arith.constant 0 : i32
    %c0_i32_0 = arith.constant 0 : i32
    %c0_i32_1 = arith.constant 0 : i32
    return %c0_i32, %c0_i32_0 : i32, i32
  }
  func.func @transform_5(%arg0: i32) -> (i32, i32) {
    %c0_i32 = arith.constant 0 : i32
    %c0_i32_0 = arith.constant 0 : i32
    return %arg0, %c0_i32 : i32, i32
  }
}

module attributes {stable_mosaic.version = 11 : i64} {
  func.func @kernel(%arg0: i32, %arg1: memref<1x8x8x32xbf16, #tpu.memory_space<vmem>>, %arg2: memref<7x7x32xf32, #tpu.memory_space<vmem>>, %arg3: memref<1x32xf32, #tpu.memory_space<vmem>>, %arg4: memref<1x32xf32, #tpu.memory_space<vmem>>, %arg5: memref<1x32xf32, #tpu.memory_space<vmem>>, %arg6: memref<32x128xbf16, #tpu.memory_space<vmem>>, %arg7: memref<1x128xf32, #tpu.memory_space<vmem>>, %arg8: memref<1x128xf32, #tpu.memory_space<vmem>>, %arg9: memref<1x128xf32, #tpu.memory_space<vmem>>, %arg10: memref<128x32xbf16, #tpu.memory_space<vmem>>, %arg11: memref<1x32xf32, #tpu.memory_space<vmem>>, %arg12: memref<1x8x8x32xbf16, #tpu.memory_space<vmem>>, %arg13: memref<14x24x32xf32, #tpu.memory_space<vmem>>) attributes {dimension_semantics = [#tpu.dimension_semantics<parallel>], iteration_bounds = array<i64: 2>, scalar_prefetch = 0 : i64, scratch_operands = 1 : i64, tpu.core_type = #tpu.core_type<tc>, window_params = [{transform_indices = @transform_0, window_bounds = array<i64: 1, 8, 8, 32>}, {pipeline_mode = #tpu.pipeline_mode<synchronous>, transform_indices = @transform_1, window_bounds = array<i64: 7, 7, 32>}, {pipeline_mode = #tpu.pipeline_mode<synchronous>, transform_indices = @transform_2, window_bounds = array<i64: 1, 32>}, {pipeline_mode = #tpu.pipeline_mode<synchronous>, transform_indices = @transform_3, window_bounds = array<i64: 1, 32>}, {pipeline_mode = #tpu.pipeline_mode<synchronous>, transform_indices = @transform_4, window_bounds = array<i64: 1, 32>}, {pipeline_mode = #tpu.pipeline_mode<synchronous>, transform_indices = @transform_5, window_bounds = array<i64: 32, 128>}, {pipeline_mode = #tpu.pipeline_mode<synchronous>, transform_indices = @transform_6, window_bounds = array<i64: 1, 128>}, {pipeline_mode = #tpu.pipeline_mode<synchronous>, transform_indices = @transform_7, window_bounds = array<i64: 1, 128>}, {pipeline_mode = #tpu.pipeline_mode<synchronous>, transform_indices = @transform_8, window_bounds = array<i64: 1, 128>}, {pipeline_mode = #tpu.pipeline_mode<synchronous>, transform_indices = @transform_9, window_bounds = array<i64: 128, 32>}, {pipeline_mode = #tpu.pipeline_mode<synchronous>, transform_indices = @transform_10, window_bounds = array<i64: 1, 32>}, {transform_indices = @transform_11, window_bounds = array<i64: 1, 8, 8, 32>}]} {
    %c0 = arith.constant 0 : index
    %c0_0 = arith.constant 0 : index
    %c0_1 = arith.constant 0 : index
    %c0_2 = arith.constant 0 : index
    %0 = vector.load %arg1[%c0, %c0_0, %c0_1, %c0_2] : memref<1x8x8x32xbf16, #tpu.memory_space<vmem>>, vector<1x8x8x32xbf16>
    %1 = vector.shape_cast %0 : vector<1x8x8x32xbf16> to vector<8x8x32xbf16>
    %cst = arith.constant 0.000000e+00 : f32
    %2 = vector.broadcast %cst : f32 to vector<3x24x32xf32>
    %c0_3 = arith.constant 0 : index
    %c0_4 = arith.constant 0 : index
    %c0_5 = arith.constant 0 : index
    %3 = vector.load %arg13[%c0_3, %c0_4, %c0_5] : memref<14x24x32xf32, #tpu.memory_space<vmem>>, vector<3x24x32xf32>
    tpu.vector_store %arg13[%c0_3, %c0_4, %c0_5], %2 {strides = array<i32>} : memref<14x24x32xf32, #tpu.memory_space<vmem>>, vector<3x24x32xf32>,
    %cst_6 = arith.constant 0.000000e+00 : f32
    %4 = vector.broadcast %cst_6 : f32 to vector<3x24x32xf32>
    %c11 = arith.constant 11 : index
    %c0_7 = arith.constant 0 : index
    %c0_8 = arith.constant 0 : index
    %5 = vector.load %arg13[%c11, %c0_7, %c0_8] : memref<14x24x32xf32, #tpu.memory_space<vmem>>, vector<3x24x32xf32>
    tpu.vector_store %arg13[%c11, %c0_7, %c0_8], %4 {strides = array<i32>} : memref<14x24x32xf32, #tpu.memory_space<vmem>>, vector<3x24x32xf32>,
    %cst_9 = arith.constant 0.000000e+00 : f32
    %6 = vector.broadcast %cst_9 : f32 to vector<8x8x32xf32>
    %c3 = arith.constant 3 : index
    %c0_10 = arith.constant 0 : index
    %c0_11 = arith.constant 0 : index
    %7 = vector.load %arg13[%c3, %c0_10, %c0_11] : memref<14x24x32xf32, #tpu.memory_space<vmem>>, vector<8x8x32xf32>
    tpu.vector_store %arg13[%c3, %c0_10, %c0_11], %6 {strides = array<i32>} : memref<14x24x32xf32, #tpu.memory_space<vmem>>, vector<8x8x32xf32>,
    %cst_12 = arith.constant 0.000000e+00 : f32
    %8 = vector.broadcast %cst_12 : f32 to vector<8x8x32xf32>
    %c3_13 = arith.constant 3 : index
    %c16 = arith.constant 16 : index
    %c0_14 = arith.constant 0 : index
    %9 = vector.load %arg13[%c3_13, %c16, %c0_14] : memref<14x24x32xf32, #tpu.memory_space<vmem>>, vector<8x8x32xf32>
    tpu.vector_store %arg13[%c3_13, %c16, %c0_14], %8 {strides = array<i32>} : memref<14x24x32xf32, #tpu.memory_space<vmem>>, vector<8x8x32xf32>,
    %10 = arith.extf %1 : vector<8x8x32xbf16> to vector<8x8x32xf32>
    %c3_15 = arith.constant 3 : index
    %c8 = arith.constant 8 : index
    %c0_16 = arith.constant 0 : index
    %11 = vector.load %arg13[%c3_15, %c8, %c0_16] : memref<14x24x32xf32, #tpu.memory_space<vmem>>, vector<8x8x32xf32>
    tpu.vector_store %arg13[%c3_15, %c8, %c0_16], %10 {strides = array<i32>} : memref<14x24x32xf32, #tpu.memory_space<vmem>>, vector<8x8x32xf32>,
    %c0_17 = arith.constant 0 : index
    %c0_18 = arith.constant 0 : index
    %c0_19 = arith.constant 0 : index
    %12 = vector.load %arg13[%c0_17, %c0_18, %c0_19] : memref<14x24x32xf32, #tpu.memory_space<vmem>>, vector<14x24x32xf32>
    %c0_20 = arith.constant 0 : index
    %c0_21 = arith.constant 0 : index
    %c0_22 = arith.constant 0 : index
    %13 = vector.load %arg2[%c0_20, %c0_21, %c0_22] : memref<7x7x32xf32, #tpu.memory_space<vmem>>, vector<7x7x32xf32>
    %cst_23 = arith.constant 0.000000e+00 : f32
    %14 = vector.broadcast %cst_23 : f32 to vector<8x8x32xf32>
    %15 = vector.extract_strided_slice %12 {offsets = [0, 5, 0], sizes = [14, 8, 32], strides = [1, 1, 1]} : vector<14x24x32xf32> to vector<14x8x32xf32>
    %16 = vector.extract_strided_slice %15 {offsets = [0, 0, 0], sizes = [8, 8, 32], strides = [1, 1, 1]} : vector<14x8x32xf32> to vector<8x8x32xf32>
    %17 = vector.extract_strided_slice %13 {offsets = [0, 0, 0], sizes = [1, 1, 32], strides = [1, 1, 1]} : vector<7x7x32xf32> to vector<1x1x32xf32>
    %18 = vector.shape_cast %17 : vector<1x1x32xf32> to vector<32xf32>
    %19 = vector.shape_cast %18 : vector<32xf32> to vector<1x1x32xf32>
    %20 = vector.broadcast %19 : vector<1x1x32xf32> to vector<8x8x32xf32>
    %21 = arith.mulf %16, %20 : vector<8x8x32xf32>
    %22 = arith.addf %14, %21 : vector<8x8x32xf32>
    %23 = vector.extract_strided_slice %15 {offsets = [1, 0, 0], sizes = [8, 8, 32], strides = [1, 1, 1]} : vector<14x8x32xf32> to vector<8x8x32xf32>
    %24 = vector.extract_strided_slice %13 {offsets = [1, 0, 0], sizes = [1, 1, 32], strides = [1, 1, 1]} : vector<7x7x32xf32> to vector<1x1x32xf32>
    %25 = vector.shape_cast %24 : vector<1x1x32xf32> to vector<32xf32>
    %26 = vector.shape_cast %25 : vector<32xf32> to vector<1x1x32xf32>
    %27 = vector.broadcast %26 : vector<1x1x32xf32> to vector<8x8x32xf32>
    %28 = arith.mulf %23, %27 : vector<8x8x32xf32>
    %29 = arith.addf %22, %28 : vector<8x8x32xf32>
    %30 = vector.extract_strided_slice %15 {offsets = [2, 0, 0], sizes = [8, 8, 32], strides = [1, 1, 1]} : vector<14x8x32xf32> to vector<8x8x32xf32>
    %31 = vector.extract_strided_slice %13 {offsets = [2, 0, 0], sizes = [1, 1, 32], strides = [1, 1, 1]} : vector<7x7x32xf32> to vector<1x1x32xf32>
    %32 = vector.shape_cast %31 : vector<1x1x32xf32> to vector<32xf32>
    %33 = vector.shape_cast %32 : vector<32xf32> to vector<1x1x32xf32>
    %34 = vector.broadcast %33 : vector<1x1x32xf32> to vector<8x8x32xf32>
    %35 = arith.mulf %30, %34 : vector<8x8x32xf32>
    %36 = arith.addf %29, %35 : vector<8x8x32xf32>
    %37 = vector.extract_strided_slice %15 {offsets = [3, 0, 0], sizes = [8, 8, 32], strides = [1, 1, 1]} : vector<14x8x32xf32> to vector<8x8x32xf32>
    %38 = vector.extract_strided_slice %13 {offsets = [3, 0, 0], sizes = [1, 1, 32], strides = [1, 1, 1]} : vector<7x7x32xf32> to vector<1x1x32xf32>
    %39 = vector.shape_cast %38 : vector<1x1x32xf32> to vector<32xf32>
    %40 = vector.shape_cast %39 : vector<32xf32> to vector<1x1x32xf32>
    %41 = vector.broadcast %40 : vector<1x1x32xf32> to vector<8x8x32xf32>
    %42 = arith.mulf %37, %41 : vector<8x8x32xf32>
    %43 = arith.addf %36, %42 : vector<8x8x32xf32>
    %44 = vector.extract_strided_slice %15 {offsets = [4, 0, 0], sizes = [8, 8, 32], strides = [1, 1, 1]} : vector<14x8x32xf32> to vector<8x8x32xf32>
    %45 = vector.extract_strided_slice %13 {offsets = [4, 0, 0], sizes = [1, 1, 32], strides = [1, 1, 1]} : vector<7x7x32xf32> to vector<1x1x32xf32>
    %46 = vector.shape_cast %45 : vector<1x1x32xf32> to vector<32xf32>
    %47 = vector.shape_cast %46 : vector<32xf32> to vector<1x1x32xf32>
    %48 = vector.broadcast %47 : vector<1x1x32xf32> to vector<8x8x32xf32>
    %49 = arith.mulf %44, %48 : vector<8x8x32xf32>
    %50 = arith.addf %43, %49 : vector<8x8x32xf32>
    %51 = vector.extract_strided_slice %15 {offsets = [5, 0, 0], sizes = [8, 8, 32], strides = [1, 1, 1]} : vector<14x8x32xf32> to vector<8x8x32xf32>
    %52 = vector.extract_strided_slice %13 {offsets = [5, 0, 0], sizes = [1, 1, 32], strides = [1, 1, 1]} : vector<7x7x32xf32> to vector<1x1x32xf32>
    %53 = vector.shape_cast %52 : vector<1x1x32xf32> to vector<32xf32>
    %54 = vector.shape_cast %53 : vector<32xf32> to vector<1x1x32xf32>
    %55 = vector.broadcast %54 : vector<1x1x32xf32> to vector<8x8x32xf32>
    %56 = arith.mulf %51, %55 : vector<8x8x32xf32>
    %57 = arith.addf %50, %56 : vector<8x8x32xf32>
    %58 = vector.extract_strided_slice %15 {offsets = [6, 0, 0], sizes = [8, 8, 32], strides = [1, 1, 1]} : vector<14x8x32xf32> to vector<8x8x32xf32>
    %59 = vector.extract_strided_slice %13 {offsets = [6, 0, 0], sizes = [1, 1, 32], strides = [1, 1, 1]} : vector<7x7x32xf32> to vector<1x1x32xf32>
    %60 = vector.shape_cast %59 : vector<1x1x32xf32> to vector<32xf32>
    %61 = vector.shape_cast %60 : vector<32xf32> to vector<1x1x32xf32>
    %62 = vector.broadcast %61 : vector<1x1x32xf32> to vector<8x8x32xf32>
    %63 = arith.mulf %58, %62 : vector<8x8x32xf32>
    %64 = arith.addf %57, %63 : vector<8x8x32xf32>
    %65 = vector.extract_strided_slice %12 {offsets = [0, 6, 0], sizes = [14, 8, 32], strides = [1, 1, 1]} : vector<14x24x32xf32> to vector<14x8x32xf32>
    %66 = vector.extract_strided_slice %65 {offsets = [0, 0, 0], sizes = [8, 8, 32], strides = [1, 1, 1]} : vector<14x8x32xf32> to vector<8x8x32xf32>
    %67 = vector.extract_strided_slice %13 {offsets = [0, 1, 0], sizes = [1, 1, 32], strides = [1, 1, 1]} : vector<7x7x32xf32> to vector<1x1x32xf32>
    %68 = vector.shape_cast %67 : vector<1x1x32xf32> to vector<32xf32>
    %69 = vector.shape_cast %68 : vector<32xf32> to vector<1x1x32xf32>
    %70 = vector.broadcast %69 : vector<1x1x32xf32> to vector<8x8x32xf32>
    %71 = arith.mulf %66, %70 : vector<8x8x32xf32>
    %72 = arith.addf %64, %71 : vector<8x8x32xf32>
    %73 = vector.extract_strided_slice %65 {offsets = [1, 0, 0], sizes = [8, 8, 32], strides = [1, 1, 1]} : vector<14x8x32xf32> to vector<8x8x32xf32>
    %74 = vector.extract_strided_slice %13 {offsets = [1, 1, 0], sizes = [1, 1, 32], strides = [1, 1, 1]} : vector<7x7x32xf32> to vector<1x1x32xf32>
    %75 = vector.shape_cast %74 : vector<1x1x32xf32> to vector<32xf32>
    %76 = vector.shape_cast %75 : vector<32xf32> to vector<1x1x32xf32>
    %77 = vector.broadcast %76 : vector<1x1x32xf32> to vector<8x8x32xf32>
    %78 = arith.mulf %73, %77 : vector<8x8x32xf32>
    %79 = arith.addf %72, %78 : vector<8x8x32xf32>
    %80 = vector.extract_strided_slice %65 {offsets = [2, 0, 0], sizes = [8, 8, 32], strides = [1, 1, 1]} : vector<14x8x32xf32> to vector<8x8x32xf32>
    %81 = vector.extract_strided_slice %13 {offsets = [2, 1, 0], sizes = [1, 1, 32], strides = [1, 1, 1]} : vector<7x7x32xf32> to vector<1x1x32xf32>
    %82 = vector.shape_cast %81 : vector<1x1x32xf32> to vector<32xf32>
    %83 = vector.shape_cast %82 : vector<32xf32> to vector<1x1x32xf32>
    %84 = vector.broadcast %83 : vector<1x1x32xf32> to vector<8x8x32xf32>
    %85 = arith.mulf %80, %84 : vector<8x8x32xf32>
    %86 = arith.addf %79, %85 : vector<8x8x32xf32>
    %87 = vector.extract_strided_slice %65 {offsets = [3, 0, 0], sizes = [8, 8, 32], strides = [1, 1, 1]} : vector<14x8x32xf32> to vector<8x8x32xf32>
    %88 = vector.extract_strided_slice %13 {offsets = [3, 1, 0], sizes = [1, 1, 32], strides = [1, 1, 1]} : vector<7x7x32xf32> to vector<1x1x32xf32>
    %89 = vector.shape_cast %88 : vector<1x1x32xf32> to vector<32xf32>
    %90 = vector.shape_cast %89 : vector<32xf32> to vector<1x1x32xf32>
    %91 = vector.broadcast %90 : vector<1x1x32xf32> to vector<8x8x32xf32>
    %92 = arith.mulf %87, %91 : vector<8x8x32xf32>
    %93 = arith.addf %86, %92 : vector<8x8x32xf32>
    %94 = vector.extract_strided_slice %65 {offsets = [4, 0, 0], sizes = [8, 8, 32], strides = [1, 1, 1]} : vector<14x8x32xf32> to vector<8x8x32xf32>
    %95 = vector.extract_strided_slice %13 {offsets = [4, 1, 0], sizes = [1, 1, 32], strides = [1, 1, 1]} : vector<7x7x32xf32> to vector<1x1x32xf32>
    %96 = vector.shape_cast %95 : vector<1x1x32xf32> to vector<32xf32>
    %97 = vector.shape_cast %96 : vector<32xf32> to vector<1x1x32xf32>
    %98 = vector.broadcast %97 : vector<1x1x32xf32> to vector<8x8x32xf32>
    %99 = arith.mulf %94, %98 : vector<8x8x32xf32>
    %100 = arith.addf %93, %99 : vector<8x8x32xf32>
    %101 = vector.extract_strided_slice %65 {offsets = [5, 0, 0], sizes = [8, 8, 32], strides = [1, 1, 1]} : vector<14x8x32xf32> to vector<8x8x32xf32>
    %102 = vector.extract_strided_slice %13 {offsets = [5, 1, 0], sizes = [1, 1, 32], strides = [1, 1, 1]} : vector<7x7x32xf32> to vector<1x1x32xf32>
    %103 = vector.shape_cast %102 : vector<1x1x32xf32> to vector<32xf32>
    %104 = vector.shape_cast %103 : vector<32xf32> to vector<1x1x32xf32>
    %105 = vector.broadcast %104 : vector<1x1x32xf32> to vector<8x8x32xf32>
    %106 = arith.mulf %101, %105 : vector<8x8x32xf32>
    %107 = arith.addf %100, %106 : vector<8x8x32xf32>
    %108 = vector.extract_strided_slice %65 {offsets = [6, 0, 0], sizes = [8, 8, 32], strides = [1, 1, 1]} : vector<14x8x32xf32> to vector<8x8x32xf32>
    %109 = vector.extract_strided_slice %13 {offsets = [6, 1, 0], sizes = [1, 1, 32], strides = [1, 1, 1]} : vector<7x7x32xf32> to vector<1x1x32xf32>
    %110 = vector.shape_cast %109 : vector<1x1x32xf32> to vector<32xf32>
    %111 = vector.shape_cast %110 : vector<32xf32> to vector<1x1x32xf32>
    %112 = vector.broadcast %111 : vector<1x1x32xf32> to vector<8x8x32xf32>
    %113 = arith.mulf %108, %112 : vector<8x8x32xf32>
    %114 = arith.addf %107, %113 : vector<8x8x32xf32>
    %115 = vector.extract_strided_slice %12 {offsets = [0, 7, 0], sizes = [14, 8, 32], strides = [1, 1, 1]} : vector<14x24x32xf32> to vector<14x8x32xf32>
    %116 = vector.extract_strided_slice %115 {offsets = [0, 0, 0], sizes = [8, 8, 32], strides = [1, 1, 1]} : vector<14x8x32xf32> to vector<8x8x32xf32>
    %117 = vector.extract_strided_slice %13 {offsets = [0, 2, 0], sizes = [1, 1, 32], strides = [1, 1, 1]} : vector<7x7x32xf32> to vector<1x1x32xf32>
    %118 = vector.shape_cast %117 : vector<1x1x32xf32> to vector<32xf32>
    %119 = vector.shape_cast %118 : vector<32xf32> to vector<1x1x32xf32>
    %120 = vector.broadcast %119 : vector<1x1x32xf32> to vector<8x8x32xf32>
    %121 = arith.mulf %116, %120 : vector<8x8x32xf32>
    %122 = arith.addf %114, %121 : vector<8x8x32xf32>
    %123 = vector.extract_strided_slice %115 {offsets = [1, 0, 0], sizes = [8, 8, 32], strides = [1, 1, 1]} : vector<14x8x32xf32> to vector<8x8x32xf32>
    %124 = vector.extract_strided_slice %13 {offsets = [1, 2, 0], sizes = [1, 1, 32], strides = [1, 1, 1]} : vector<7x7x32xf32> to vector<1x1x32xf32>
    %125 = vector.shape_cast %124 : vector<1x1x32xf32> to vector<32xf32>
    %126 = vector.shape_cast %125 : vector<32xf32> to vector<1x1x32xf32>
    %127 = vector.broadcast %126 : vector<1x1x32xf32> to vector<8x8x32xf32>
    %128 = arith.mulf %123, %127 : vector<8x8x32xf32>
    %129 = arith.addf %122, %128 : vector<8x8x32xf32>
    %130 = vector.extract_strided_slice %115 {offsets = [2, 0, 0], sizes = [8, 8, 32], strides = [1, 1, 1]} : vector<14x8x32xf32> to vector<8x8x32xf32>
    %131 = vector.extract_strided_slice %13 {offsets = [2, 2, 0], sizes = [1, 1, 32], strides = [1, 1, 1]} : vector<7x7x32xf32> to vector<1x1x32xf32>
    %132 = vector.shape_cast %131 : vector<1x1x32xf32> to vector<32xf32>
    %133 = vector.shape_cast %132 : vector<32xf32> to vector<1x1x32xf32>
    %134 = vector.broadcast %133 : vector<1x1x32xf32> to vector<8x8x32xf32>
    %135 = arith.mulf %130, %134 : vector<8x8x32xf32>
    %136 = arith.addf %129, %135 : vector<8x8x32xf32>
    %137 = vector.extract_strided_slice %115 {offsets = [3, 0, 0], sizes = [8, 8, 32], strides = [1, 1, 1]} : vector<14x8x32xf32> to vector<8x8x32xf32>
    %138 = vector.extract_strided_slice %13 {offsets = [3, 2, 0], sizes = [1, 1, 32], strides = [1, 1, 1]} : vector<7x7x32xf32> to vector<1x1x32xf32>
    %139 = vector.shape_cast %138 : vector<1x1x32xf32> to vector<32xf32>
    %140 = vector.shape_cast %139 : vector<32xf32> to vector<1x1x32xf32>
    %141 = vector.broadcast %140 : vector<1x1x32xf32> to vector<8x8x32xf32>
    %142 = arith.mulf %137, %141 : vector<8x8x32xf32>
    %143 = arith.addf %136, %142 : vector<8x8x32xf32>
    %144 = vector.extract_strided_slice %115 {offsets = [4, 0, 0], sizes = [8, 8, 32], strides = [1, 1, 1]} : vector<14x8x32xf32> to vector<8x8x32xf32>
    %145 = vector.extract_strided_slice %13 {offsets = [4, 2, 0], sizes = [1, 1, 32], strides = [1, 1, 1]} : vector<7x7x32xf32> to vector<1x1x32xf32>
    %146 = vector.shape_cast %145 : vector<1x1x32xf32> to vector<32xf32>
    %147 = vector.shape_cast %146 : vector<32xf32> to vector<1x1x32xf32>
    %148 = vector.broadcast %147 : vector<1x1x32xf32> to vector<8x8x32xf32>
    %149 = arith.mulf %144, %148 : vector<8x8x32xf32>
    %150 = arith.addf %143, %149 : vector<8x8x32xf32>
    %151 = vector.extract_strided_slice %115 {offsets = [5, 0, 0], sizes = [8, 8, 32], strides = [1, 1, 1]} : vector<14x8x32xf32> to vector<8x8x32xf32>
    %152 = vector.extract_strided_slice %13 {offsets = [5, 2, 0], sizes = [1, 1, 32], strides = [1, 1, 1]} : vector<7x7x32xf32> to vector<1x1x32xf32>
    %153 = vector.shape_cast %152 : vector<1x1x32xf32> to vector<32xf32>
    %154 = vector.shape_cast %153 : vector<32xf32> to vector<1x1x32xf32>
    %155 = vector.broadcast %154 : vector<1x1x32xf32> to vector<8x8x32xf32>
    %156 = arith.mulf %151, %155 : vector<8x8x32xf32>
    %157 = arith.addf %150, %156 : vector<8x8x32xf32>
    %158 = vector.extract_strided_slice %115 {offsets = [6, 0, 0], sizes = [8, 8, 32], strides = [1, 1, 1]} : vector<14x8x32xf32> to vector<8x8x32xf32>
    %159 = vector.extract_strided_slice %13 {offsets = [6, 2, 0], sizes = [1, 1, 32], strides = [1, 1, 1]} : vector<7x7x32xf32> to vector<1x1x32xf32>
    %160 = vector.shape_cast %159 : vector<1x1x32xf32> to vector<32xf32>
    %161 = vector.shape_cast %160 : vector<32xf32> to vector<1x1x32xf32>
    %162 = vector.broadcast %161 : vector<1x1x32xf32> to vector<8x8x32xf32>
    %163 = arith.mulf %158, %162 : vector<8x8x32xf32>
    %164 = arith.addf %157, %163 : vector<8x8x32xf32>
    %165 = vector.extract_strided_slice %12 {offsets = [0, 8, 0], sizes = [14, 8, 32], strides = [1, 1, 1]} : vector<14x24x32xf32> to vector<14x8x32xf32>
    %166 = vector.extract_strided_slice %165 {offsets = [0, 0, 0], sizes = [8, 8, 32], strides = [1, 1, 1]} : vector<14x8x32xf32> to vector<8x8x32xf32>
    %167 = vector.extract_strided_slice %13 {offsets = [0, 3, 0], sizes = [1, 1, 32], strides = [1, 1, 1]} : vector<7x7x32xf32> to vector<1x1x32xf32>
    %168 = vector.shape_cast %167 : vector<1x1x32xf32> to vector<32xf32>
    %169 = vector.shape_cast %168 : vector<32xf32> to vector<1x1x32xf32>
    %170 = vector.broadcast %169 : vector<1x1x32xf32> to vector<8x8x32xf32>
    %171 = arith.mulf %166, %170 : vector<8x8x32xf32>
    %172 = arith.addf %164, %171 : vector<8x8x32xf32>
    %173 = vector.extract_strided_slice %165 {offsets = [1, 0, 0], sizes = [8, 8, 32], strides = [1, 1, 1]} : vector<14x8x32xf32> to vector<8x8x32xf32>
    %174 = vector.extract_strided_slice %13 {offsets = [1, 3, 0], sizes = [1, 1, 32], strides = [1, 1, 1]} : vector<7x7x32xf32> to vector<1x1x32xf32>
    %175 = vector.shape_cast %174 : vector<1x1x32xf32> to vector<32xf32>
    %176 = vector.shape_cast %175 : vector<32xf32> to vector<1x1x32xf32>
    %177 = vector.broadcast %176 : vector<1x1x32xf32> to vector<8x8x32xf32>
    %178 = arith.mulf %173, %177 : vector<8x8x32xf32>
    %179 = arith.addf %172, %178 : vector<8x8x32xf32>
    %180 = vector.extract_strided_slice %165 {offsets = [2, 0, 0], sizes = [8, 8, 32], strides = [1, 1, 1]} : vector<14x8x32xf32> to vector<8x8x32xf32>
    %181 = vector.extract_strided_slice %13 {offsets = [2, 3, 0], sizes = [1, 1, 32], strides = [1, 1, 1]} : vector<7x7x32xf32> to vector<1x1x32xf32>
    %182 = vector.shape_cast %181 : vector<1x1x32xf32> to vector<32xf32>
    %183 = vector.shape_cast %182 : vector<32xf32> to vector<1x1x32xf32>
    %184 = vector.broadcast %183 : vector<1x1x32xf32> to vector<8x8x32xf32>
    %185 = arith.mulf %180, %184 : vector<8x8x32xf32>
    %186 = arith.addf %179, %185 : vector<8x8x32xf32>
    %187 = vector.extract_strided_slice %165 {offsets = [3, 0, 0], sizes = [8, 8, 32], strides = [1, 1, 1]} : vector<14x8x32xf32> to vector<8x8x32xf32>
    %188 = vector.extract_strided_slice %13 {offsets = [3, 3, 0], sizes = [1, 1, 32], strides = [1, 1, 1]} : vector<7x7x32xf32> to vector<1x1x32xf32>
    %189 = vector.shape_cast %188 : vector<1x1x32xf32> to vector<32xf32>
    %190 = vector.shape_cast %189 : vector<32xf32> to vector<1x1x32xf32>
    %191 = vector.broadcast %190 : vector<1x1x32xf32> to vector<8x8x32xf32>
    %192 = arith.mulf %187, %191 : vector<8x8x32xf32>
    %193 = arith.addf %186, %192 : vector<8x8x32xf32>
    %194 = vector.extract_strided_slice %165 {offsets = [4, 0, 0], sizes = [8, 8, 32], strides = [1, 1, 1]} : vector<14x8x32xf32> to vector<8x8x32xf32>
    %195 = vector.extract_strided_slice %13 {offsets = [4, 3, 0], sizes = [1, 1, 32], strides = [1, 1, 1]} : vector<7x7x32xf32> to vector<1x1x32xf32>
    %196 = vector.shape_cast %195 : vector<1x1x32xf32> to vector<32xf32>
    %197 = vector.shape_cast %196 : vector<32xf32> to vector<1x1x32xf32>
    %198 = vector.broadcast %197 : vector<1x1x32xf32> to vector<8x8x32xf32>
    %199 = arith.mulf %194, %198 : vector<8x8x32xf32>
    %200 = arith.addf %193, %199 : vector<8x8x32xf32>
    %201 = vector.extract_strided_slice %165 {offsets = [5, 0, 0], sizes = [8, 8, 32], strides = [1, 1, 1]} : vector<14x8x32xf32> to vector<8x8x32xf32>
    %202 = vector.extract_strided_slice %13 {offsets = [5, 3, 0], sizes = [1, 1, 32], strides = [1, 1, 1]} : vector<7x7x32xf32> to vector<1x1x32xf32>
    %203 = vector.shape_cast %202 : vector<1x1x32xf32> to vector<32xf32>
    %204 = vector.shape_cast %203 : vector<32xf32> to vector<1x1x32xf32>
    %205 = vector.broadcast %204 : vector<1x1x32xf32> to vector<8x8x32xf32>
    %206 = arith.mulf %201, %205 : vector<8x8x32xf32>
    %207 = arith.addf %200, %206 : vector<8x8x32xf32>
    %208 = vector.extract_strided_slice %165 {offsets = [6, 0, 0], sizes = [8, 8, 32], strides = [1, 1, 1]} : vector<14x8x32xf32> to vector<8x8x32xf32>
    %209 = vector.extract_strided_slice %13 {offsets = [6, 3, 0], sizes = [1, 1, 32], strides = [1, 1, 1]} : vector<7x7x32xf32> to vector<1x1x32xf32>
    %210 = vector.shape_cast %209 : vector<1x1x32xf32> to vector<32xf32>
    %211 = vector.shape_cast %210 : vector<32xf32> to vector<1x1x32xf32>
    %212 = vector.broadcast %211 : vector<1x1x32xf32> to vector<8x8x32xf32>
    %213 = arith.mulf %208, %212 : vector<8x8x32xf32>
    %214 = arith.addf %207, %213 : vector<8x8x32xf32>
    %215 = vector.extract_strided_slice %12 {offsets = [0, 9, 0], sizes = [14, 8, 32], strides = [1, 1, 1]} : vector<14x24x32xf32> to vector<14x8x32xf32>
    %216 = vector.extract_strided_slice %215 {offsets = [0, 0, 0], sizes = [8, 8, 32], strides = [1, 1, 1]} : vector<14x8x32xf32> to vector<8x8x32xf32>
    %217 = vector.extract_strided_slice %13 {offsets = [0, 4, 0], sizes = [1, 1, 32], strides = [1, 1, 1]} : vector<7x7x32xf32> to vector<1x1x32xf32>
    %218 = vector.shape_cast %217 : vector<1x1x32xf32> to vector<32xf32>
    %219 = vector.shape_cast %218 : vector<32xf32> to vector<1x1x32xf32>
    %220 = vector.broadcast %219 : vector<1x1x32xf32> to vector<8x8x32xf32>
    %221 = arith.mulf %216, %220 : vector<8x8x32xf32>
    %222 = arith.addf %214, %221 : vector<8x8x32xf32>
    %223 = vector.extract_strided_slice %215 {offsets = [1, 0, 0], sizes = [8, 8, 32], strides = [1, 1, 1]} : vector<14x8x32xf32> to vector<8x8x32xf32>
    %224 = vector.extract_strided_slice %13 {offsets = [1, 4, 0], sizes = [1, 1, 32], strides = [1, 1, 1]} : vector<7x7x32xf32> to vector<1x1x32xf32>
    %225 = vector.shape_cast %224 : vector<1x1x32xf32> to vector<32xf32>
    %226 = vector.shape_cast %225 : vector<32xf32> to vector<1x1x32xf32>
    %227 = vector.broadcast %226 : vector<1x1x32xf32> to vector<8x8x32xf32>
    %228 = arith.mulf %223, %227 : vector<8x8x32xf32>
    %229 = arith.addf %222, %228 : vector<8x8x32xf32>
    %230 = vector.extract_strided_slice %215 {offsets = [2, 0, 0], sizes = [8, 8, 32], strides = [1, 1, 1]} : vector<14x8x32xf32> to vector<8x8x32xf32>
    %231 = vector.extract_strided_slice %13 {offsets = [2, 4, 0], sizes = [1, 1, 32], strides = [1, 1, 1]} : vector<7x7x32xf32> to vector<1x1x32xf32>
    %232 = vector.shape_cast %231 : vector<1x1x32xf32> to vector<32xf32>
    %233 = vector.shape_cast %232 : vector<32xf32> to vector<1x1x32xf32>
    %234 = vector.broadcast %233 : vector<1x1x32xf32> to vector<8x8x32xf32>
    %235 = arith.mulf %230, %234 : vector<8x8x32xf32>
    %236 = arith.addf %229, %235 : vector<8x8x32xf32>
    %237 = vector.extract_strided_slice %215 {offsets = [3, 0, 0], sizes = [8, 8, 32], strides = [1, 1, 1]} : vector<14x8x32xf32> to vector<8x8x32xf32>
    %238 = vector.extract_strided_slice %13 {offsets = [3, 4, 0], sizes = [1, 1, 32], strides = [1, 1, 1]} : vector<7x7x32xf32> to vector<1x1x32xf32>
    %239 = vector.shape_cast %238 : vector<1x1x32xf32> to vector<32xf32>
    %240 = vector.shape_cast %239 : vector<32xf32> to vector<1x1x32xf32>
    %241 = vector.broadcast %240 : vector<1x1x32xf32> to vector<8x8x32xf32>
    %242 = arith.mulf %237, %241 : vector<8x8x32xf32>
    %243 = arith.addf %236, %242 : vector<8x8x32xf32>
    %244 = vector.extract_strided_slice %215 {offsets = [4, 0, 0], sizes = [8, 8, 32], strides = [1, 1, 1]} : vector<14x8x32xf32> to vector<8x8x32xf32>
    %245 = vector.extract_strided_slice %13 {offsets = [4, 4, 0], sizes = [1, 1, 32], strides = [1, 1, 1]} : vector<7x7x32xf32> to vector<1x1x32xf32>
    %246 = vector.shape_cast %245 : vector<1x1x32xf32> to vector<32xf32>
    %247 = vector.shape_cast %246 : vector<32xf32> to vector<1x1x32xf32>
    %248 = vector.broadcast %247 : vector<1x1x32xf32> to vector<8x8x32xf32>
    %249 = arith.mulf %244, %248 : vector<8x8x32xf32>
    %250 = arith.addf %243, %249 : vector<8x8x32xf32>
    %251 = vector.extract_strided_slice %215 {offsets = [5, 0, 0], sizes = [8, 8, 32], strides = [1, 1, 1]} : vector<14x8x32xf32> to vector<8x8x32xf32>
    %252 = vector.extract_strided_slice %13 {offsets = [5, 4, 0], sizes = [1, 1, 32], strides = [1, 1, 1]} : vector<7x7x32xf32> to vector<1x1x32xf32>
    %253 = vector.shape_cast %252 : vector<1x1x32xf32> to vector<32xf32>
    %254 = vector.shape_cast %253 : vector<32xf32> to vector<1x1x32xf32>
    %255 = vector.broadcast %254 : vector<1x1x32xf32> to vector<8x8x32xf32>
    %256 = arith.mulf %251, %255 : vector<8x8x32xf32>
    %257 = arith.addf %250, %256 : vector<8x8x32xf32>
    %258 = vector.extract_strided_slice %215 {offsets = [6, 0, 0], sizes = [8, 8, 32], strides = [1, 1, 1]} : vector<14x8x32xf32> to vector<8x8x32xf32>
    %259 = vector.extract_strided_slice %13 {offsets = [6, 4, 0], sizes = [1, 1, 32], strides = [1, 1, 1]} : vector<7x7x32xf32> to vector<1x1x32xf32>
    %260 = vector.shape_cast %259 : vector<1x1x32xf32> to vector<32xf32>
    %261 = vector.shape_cast %260 : vector<32xf32> to vector<1x1x32xf32>
    %262 = vector.broadcast %261 : vector<1x1x32xf32> to vector<8x8x32xf32>
    %263 = arith.mulf %258, %262 : vector<8x8x32xf32>
    %264 = arith.addf %257, %263 : vector<8x8x32xf32>
    %265 = vector.extract_strided_slice %12 {offsets = [0, 10, 0], sizes = [14, 8, 32], strides = [1, 1, 1]} : vector<14x24x32xf32> to vector<14x8x32xf32>
    %266 = vector.extract_strided_slice %265 {offsets = [0, 0, 0], sizes = [8, 8, 32], strides = [1, 1, 1]} : vector<14x8x32xf32> to vector<8x8x32xf32>
    %267 = vector.extract_strided_slice %13 {offsets = [0, 5, 0], sizes = [1, 1, 32], strides = [1, 1, 1]} : vector<7x7x32xf32> to vector<1x1x32xf32>
    %268 = vector.shape_cast %267 : vector<1x1x32xf32> to vector<32xf32>
    %269 = vector.shape_cast %268 : vector<32xf32> to vector<1x1x32xf32>
    %270 = vector.broadcast %269 : vector<1x1x32xf32> to vector<8x8x32xf32>
    %271 = arith.mulf %266, %270 : vector<8x8x32xf32>
    %272 = arith.addf %264, %271 : vector<8x8x32xf32>
    %273 = vector.extract_strided_slice %265 {offsets = [1, 0, 0], sizes = [8, 8, 32], strides = [1, 1, 1]} : vector<14x8x32xf32> to vector<8x8x32xf32>
    %274 = vector.extract_strided_slice %13 {offsets = [1, 5, 0], sizes = [1, 1, 32], strides = [1, 1, 1]} : vector<7x7x32xf32> to vector<1x1x32xf32>
    %275 = vector.shape_cast %274 : vector<1x1x32xf32> to vector<32xf32>
    %276 = vector.shape_cast %275 : vector<32xf32> to vector<1x1x32xf32>
    %277 = vector.broadcast %276 : vector<1x1x32xf32> to vector<8x8x32xf32>
    %278 = arith.mulf %273, %277 : vector<8x8x32xf32>
    %279 = arith.addf %272, %278 : vector<8x8x32xf32>
    %280 = vector.extract_strided_slice %265 {offsets = [2, 0, 0], sizes = [8, 8, 32], strides = [1, 1, 1]} : vector<14x8x32xf32> to vector<8x8x32xf32>
    %281 = vector.extract_strided_slice %13 {offsets = [2, 5, 0], sizes = [1, 1, 32], strides = [1, 1, 1]} : vector<7x7x32xf32> to vector<1x1x32xf32>
    %282 = vector.shape_cast %281 : vector<1x1x32xf32> to vector<32xf32>
    %283 = vector.shape_cast %282 : vector<32xf32> to vector<1x1x32xf32>
    %284 = vector.broadcast %283 : vector<1x1x32xf32> to vector<8x8x32xf32>
    %285 = arith.mulf %280, %284 : vector<8x8x32xf32>
    %286 = arith.addf %279, %285 : vector<8x8x32xf32>
    %287 = vector.extract_strided_slice %265 {offsets = [3, 0, 0], sizes = [8, 8, 32], strides = [1, 1, 1]} : vector<14x8x32xf32> to vector<8x8x32xf32>
    %288 = vector.extract_strided_slice %13 {offsets = [3, 5, 0], sizes = [1, 1, 32], strides = [1, 1, 1]} : vector<7x7x32xf32> to vector<1x1x32xf32>
    %289 = vector.shape_cast %288 : vector<1x1x32xf32> to vector<32xf32>
    %290 = vector.shape_cast %289 : vector<32xf32> to vector<1x1x32xf32>
    %291 = vector.broadcast %290 : vector<1x1x32xf32> to vector<8x8x32xf32>
    %292 = arith.mulf %287, %291 : vector<8x8x32xf32>
    %293 = arith.addf %286, %292 : vector<8x8x32xf32>
    %294 = vector.extract_strided_slice %265 {offsets = [4, 0, 0], sizes = [8, 8, 32], strides = [1, 1, 1]} : vector<14x8x32xf32> to vector<8x8x32xf32>
    %295 = vector.extract_strided_slice %13 {offsets = [4, 5, 0], sizes = [1, 1, 32], strides = [1, 1, 1]} : vector<7x7x32xf32> to vector<1x1x32xf32>
    %296 = vector.shape_cast %295 : vector<1x1x32xf32> to vector<32xf32>
    %297 = vector.shape_cast %296 : vector<32xf32> to vector<1x1x32xf32>
    %298 = vector.broadcast %297 : vector<1x1x32xf32> to vector<8x8x32xf32>
    %299 = arith.mulf %294, %298 : vector<8x8x32xf32>
    %300 = arith.addf %293, %299 : vector<8x8x32xf32>
    %301 = vector.extract_strided_slice %265 {offsets = [5, 0, 0], sizes = [8, 8, 32], strides = [1, 1, 1]} : vector<14x8x32xf32> to vector<8x8x32xf32>
    %302 = vector.extract_strided_slice %13 {offsets = [5, 5, 0], sizes = [1, 1, 32], strides = [1, 1, 1]} : vector<7x7x32xf32> to vector<1x1x32xf32>
    %303 = vector.shape_cast %302 : vector<1x1x32xf32> to vector<32xf32>
    %304 = vector.shape_cast %303 : vector<32xf32> to vector<1x1x32xf32>
    %305 = vector.broadcast %304 : vector<1x1x32xf32> to vector<8x8x32xf32>
    %306 = arith.mulf %301, %305 : vector<8x8x32xf32>
    %307 = arith.addf %300, %306 : vector<8x8x32xf32>
    %308 = vector.extract_strided_slice %265 {offsets = [6, 0, 0], sizes = [8, 8, 32], strides = [1, 1, 1]} : vector<14x8x32xf32> to vector<8x8x32xf32>
    %309 = vector.extract_strided_slice %13 {offsets = [6, 5, 0], sizes = [1, 1, 32], strides = [1, 1, 1]} : vector<7x7x32xf32> to vector<1x1x32xf32>
    %310 = vector.shape_cast %309 : vector<1x1x32xf32> to vector<32xf32>
    %311 = vector.shape_cast %310 : vector<32xf32> to vector<1x1x32xf32>
    %312 = vector.broadcast %311 : vector<1x1x32xf32> to vector<8x8x32xf32>
    %313 = arith.mulf %308, %312 : vector<8x8x32xf32>
    %314 = arith.addf %307, %313 : vector<8x8x32xf32>
    %315 = vector.extract_strided_slice %12 {offsets = [0, 11, 0], sizes = [14, 8, 32], strides = [1, 1, 1]} : vector<14x24x32xf32> to vector<14x8x32xf32>
    %316 = vector.extract_strided_slice %315 {offsets = [0, 0, 0], sizes = [8, 8, 32], strides = [1, 1, 1]} : vector<14x8x32xf32> to vector<8x8x32xf32>
    %317 = vector.extract_strided_slice %13 {offsets = [0, 6, 0], sizes = [1, 1, 32], strides = [1, 1, 1]} : vector<7x7x32xf32> to vector<1x1x32xf32>
    %318 = vector.shape_cast %317 : vector<1x1x32xf32> to vector<32xf32>
    %319 = vector.shape_cast %318 : vector<32xf32> to vector<1x1x32xf32>
    %320 = vector.broadcast %319 : vector<1x1x32xf32> to vector<8x8x32xf32>
    %321 = arith.mulf %316, %320 : vector<8x8x32xf32>
    %322 = arith.addf %314, %321 : vector<8x8x32xf32>
    %323 = vector.extract_strided_slice %315 {offsets = [1, 0, 0], sizes = [8, 8, 32], strides = [1, 1, 1]} : vector<14x8x32xf32> to vector<8x8x32xf32>
    %324 = vector.extract_strided_slice %13 {offsets = [1, 6, 0], sizes = [1, 1, 32], strides = [1, 1, 1]} : vector<7x7x32xf32> to vector<1x1x32xf32>
    %325 = vector.shape_cast %324 : vector<1x1x32xf32> to vector<32xf32>
    %326 = vector.shape_cast %325 : vector<32xf32> to vector<1x1x32xf32>
    %327 = vector.broadcast %326 : vector<1x1x32xf32> to vector<8x8x32xf32>
    %328 = arith.mulf %323, %327 : vector<8x8x32xf32>
    %329 = arith.addf %322, %328 : vector<8x8x32xf32>
    %330 = vector.extract_strided_slice %315 {offsets = [2, 0, 0], sizes = [8, 8, 32], strides = [1, 1, 1]} : vector<14x8x32xf32> to vector<8x8x32xf32>
    %331 = vector.extract_strided_slice %13 {offsets = [2, 6, 0], sizes = [1, 1, 32], strides = [1, 1, 1]} : vector<7x7x32xf32> to vector<1x1x32xf32>
    %332 = vector.shape_cast %331 : vector<1x1x32xf32> to vector<32xf32>
    %333 = vector.shape_cast %332 : vector<32xf32> to vector<1x1x32xf32>
    %334 = vector.broadcast %333 : vector<1x1x32xf32> to vector<8x8x32xf32>
    %335 = arith.mulf %330, %334 : vector<8x8x32xf32>
    %336 = arith.addf %329, %335 : vector<8x8x32xf32>
    %337 = vector.extract_strided_slice %315 {offsets = [3, 0, 0], sizes = [8, 8, 32], strides = [1, 1, 1]} : vector<14x8x32xf32> to vector<8x8x32xf32>
    %338 = vector.extract_strided_slice %13 {offsets = [3, 6, 0], sizes = [1, 1, 32], strides = [1, 1, 1]} : vector<7x7x32xf32> to vector<1x1x32xf32>
    %339 = vector.shape_cast %338 : vector<1x1x32xf32> to vector<32xf32>
    %340 = vector.shape_cast %339 : vector<32xf32> to vector<1x1x32xf32>
    %341 = vector.broadcast %340 : vector<1x1x32xf32> to vector<8x8x32xf32>
    %342 = arith.mulf %337, %341 : vector<8x8x32xf32>
    %343 = arith.addf %336, %342 : vector<8x8x32xf32>
    %344 = vector.extract_strided_slice %315 {offsets = [4, 0, 0], sizes = [8, 8, 32], strides = [1, 1, 1]} : vector<14x8x32xf32> to vector<8x8x32xf32>
    %345 = vector.extract_strided_slice %13 {offsets = [4, 6, 0], sizes = [1, 1, 32], strides = [1, 1, 1]} : vector<7x7x32xf32> to vector<1x1x32xf32>
    %346 = vector.shape_cast %345 : vector<1x1x32xf32> to vector<32xf32>
    %347 = vector.shape_cast %346 : vector<32xf32> to vector<1x1x32xf32>
    %348 = vector.broadcast %347 : vector<1x1x32xf32> to vector<8x8x32xf32>
    %349 = arith.mulf %344, %348 : vector<8x8x32xf32>
    %350 = arith.addf %343, %349 : vector<8x8x32xf32>
    %351 = vector.extract_strided_slice %315 {offsets = [5, 0, 0], sizes = [8, 8, 32], strides = [1, 1, 1]} : vector<14x8x32xf32> to vector<8x8x32xf32>
    %352 = vector.extract_strided_slice %13 {offsets = [5, 6, 0], sizes = [1, 1, 32], strides = [1, 1, 1]} : vector<7x7x32xf32> to vector<1x1x32xf32>
    %353 = vector.shape_cast %352 : vector<1x1x32xf32> to vector<32xf32>
    %354 = vector.shape_cast %353 : vector<32xf32> to vector<1x1x32xf32>
    %355 = vector.broadcast %354 : vector<1x1x32xf32> to vector<8x8x32xf32>
    %356 = arith.mulf %351, %355 : vector<8x8x32xf32>
    %357 = arith.addf %350, %356 : vector<8x8x32xf32>
    %358 = vector.extract_strided_slice %315 {offsets = [6, 0, 0], sizes = [8, 8, 32], strides = [1, 1, 1]} : vector<14x8x32xf32> to vector<8x8x32xf32>
    %359 = vector.extract_strided_slice %13 {offsets = [6, 6, 0], sizes = [1, 1, 32], strides = [1, 1, 1]} : vector<7x7x32xf32> to vector<1x1x32xf32>
    %360 = vector.shape_cast %359 : vector<1x1x32xf32> to vector<32xf32>
    %361 = vector.shape_cast %360 : vector<32xf32> to vector<1x1x32xf32>
    %362 = vector.broadcast %361 : vector<1x1x32xf32> to vector<8x8x32xf32>
    %363 = arith.mulf %358, %362 : vector<8x8x32xf32>
    %364 = arith.addf %357, %363 : vector<8x8x32xf32>
    %365 = vector.shape_cast %364 : vector<8x8x32xf32> to vector<64x32xf32>
    %c0_24 = arith.constant 0 : index
    %c0_25 = arith.constant 0 : index
    %366 = vector.load %arg3[%c0_24, %c0_25] : memref<1x32xf32, #tpu.memory_space<vmem>>, vector<1x32xf32>
    %367 = vector.broadcast %366 : vector<1x32xf32> to vector<64x32xf32>
    %368 = arith.addf %365, %367 : vector<64x32xf32>
    %cst_26 = arith.constant dense<0.000000e+00> : vector<64xf32>
    %369 = vector.multi_reduction <add>, %368, %cst_26 [1] : vector<64x32xf32> to vector<64xf32>
    %370 = vector.shape_cast %369 : vector<64xf32> to vector<64x1xf32>
    %cst_27 = arith.constant 3.200000e+01 : f32
    %371 = vector.broadcast %cst_27 : f32 to vector<64x1xf32>
    %372 = arith.divf %370, %371 : vector<64x1xf32>
    %373 = vector.broadcast %372 : vector<64x1xf32> to vector<64x32xf32>
    %374 = arith.subf %368, %373 : vector<64x32xf32>
    %375 = arith.mulf %374, %374 : vector<64x32xf32>
    %cst_28 = arith.constant dense<0.000000e+00> : vector<64xf32>
    %376 = vector.multi_reduction <add>, %375, %cst_28 [1] : vector<64x32xf32> to vector<64xf32>
    %377 = vector.shape_cast %376 : vector<64xf32> to vector<64x1xf32>
    %cst_29 = arith.constant 3.200000e+01 : f32
    %378 = vector.broadcast %cst_29 : f32 to vector<64x1xf32>
    %379 = arith.divf %377, %378 : vector<64x1xf32>
    %380 = vector.broadcast %372 : vector<64x1xf32> to vector<64x32xf32>
    %381 = arith.subf %368, %380 : vector<64x32xf32>
    %cst_30 = arith.constant 9.99999997E-7 : f32
    %382 = vector.broadcast %cst_30 : f32 to vector<64x1xf32>
    %383 = arith.addf %379, %382 : vector<64x1xf32>
    %384 = math.rsqrt %383 : vector<64x1xf32>
    %385 = vector.broadcast %384 : vector<64x1xf32> to vector<64x32xf32>
    %386 = arith.mulf %381, %385 : vector<64x32xf32>
    %c0_31 = arith.constant 0 : index
    %c0_32 = arith.constant 0 : index
    %387 = vector.load %arg4[%c0_31, %c0_32] : memref<1x32xf32, #tpu.memory_space<vmem>>, vector<1x32xf32>
    %388 = vector.broadcast %387 : vector<1x32xf32> to vector<64x32xf32>
    %389 = arith.mulf %386, %388 : vector<64x32xf32>
    %c0_33 = arith.constant 0 : index
    %c0_34 = arith.constant 0 : index
    %390 = vector.load %arg5[%c0_33, %c0_34] : memref<1x32xf32, #tpu.memory_space<vmem>>, vector<1x32xf32>
    %391 = vector.broadcast %390 : vector<1x32xf32> to vector<64x32xf32>
    %392 = arith.addf %389, %391 : vector<64x32xf32>
    %393 = arith.truncf %392 : vector<64x32xf32> to vector<64x32xbf16>
    %c0_35 = arith.constant 0 : index
    %c0_36 = arith.constant 0 : index
    %394 = vector.load %arg6[%c0_35, %c0_36] : memref<32x128xbf16, #tpu.memory_space<vmem>>, vector<32x128xbf16>
    %cst_37 = arith.constant dense<0.000000e+00> : vector<64x128xf32>
    %395 = tpu.matmul %393, %394, %cst_37 {dimension_numbers = #tpu.dot_dimension_numbers<[1], [0], [0], [1], [0, 0, 1, 1], [], []>} : vector<64x32xbf16>, vector<32x128xbf16>, vector<64x128xf32> -> vector<64x128xf32>
    %c0_38 = arith.constant 0 : index
    %c0_39 = arith.constant 0 : index
    %396 = vector.load %arg7[%c0_38, %c0_39] : memref<1x128xf32, #tpu.memory_space<vmem>>, vector<1x128xf32>
    %397 = vector.broadcast %396 : vector<1x128xf32> to vector<64x128xf32>
    %398 = arith.addf %395, %397 : vector<64x128xf32>
    %399 = arith.mulf %398, %398 : vector<64x128xf32>
    %400 = arith.mulf %398, %399 : vector<64x128xf32>
    %cst_40 = arith.constant 4.471500e-02 : f32
    %401 = vector.broadcast %cst_40 : f32 to vector<64x128xf32>
    %402 = arith.mulf %401, %400 : vector<64x128xf32>
    %403 = arith.addf %398, %402 : vector<64x128xf32>
    %cst_41 = arith.constant 0.797884583 : f32
    %404 = vector.broadcast %cst_41 : f32 to vector<64x128xf32>
    %405 = arith.mulf %404, %403 : vector<64x128xf32>
    %406 = math.tanh %405 : vector<64x128xf32>
    %cst_42 = arith.constant 1.000000e+00 : f32
    %407 = vector.broadcast %cst_42 : f32 to vector<64x128xf32>
    %408 = arith.addf %407, %406 : vector<64x128xf32>
    %cst_43 = arith.constant 5.000000e-01 : f32
    %409 = vector.broadcast %cst_43 : f32 to vector<64x128xf32>
    %410 = arith.mulf %409, %408 : vector<64x128xf32>
    %411 = arith.mulf %398, %410 : vector<64x128xf32>
    %412 = arith.mulf %411, %411 : vector<64x128xf32>
    %cst_44 = arith.constant dense<0.000000e+00> : vector<128xf32>
    %413 = vector.multi_reduction <add>, %412, %cst_44 [0] : vector<64x128xf32> to vector<128xf32>
    %414 = vector.shape_cast %413 : vector<128xf32> to vector<1x128xf32>
    %415 = math.sqrt %414 : vector<1x128xf32>
    %cst_45 = arith.constant dense<0.000000e+00> : vector<1xf32>
    %416 = vector.multi_reduction <add>, %415, %cst_45 [1] : vector<1x128xf32> to vector<1xf32>
    %417 = vector.shape_cast %416 : vector<1xf32> to vector<1x1xf32>
    %cst_46 = arith.constant 1.280000e+02 : f32
    %418 = vector.broadcast %cst_46 : f32 to vector<1x1xf32>
    %419 = arith.divf %417, %418 : vector<1x1xf32>
    %cst_47 = arith.constant 9.99999997E-7 : f32
    %420 = vector.broadcast %cst_47 : f32 to vector<1x1xf32>
    %421 = arith.addf %419, %420 : vector<1x1xf32>
    %422 = vector.broadcast %421 : vector<1x1xf32> to vector<1x128xf32>
    %423 = arith.divf %415, %422 : vector<1x128xf32>
    %c0_48 = arith.constant 0 : index
    %c0_49 = arith.constant 0 : index
    %424 = vector.load %arg8[%c0_48, %c0_49] : memref<1x128xf32, #tpu.memory_space<vmem>>, vector<1x128xf32>
    %425 = vector.broadcast %423 : vector<1x128xf32> to vector<64x128xf32>
    %426 = arith.mulf %411, %425 : vector<64x128xf32>
    %427 = vector.broadcast %424 : vector<1x128xf32> to vector<64x128xf32>
    %428 = arith.mulf %427, %426 : vector<64x128xf32>
    %c0_50 = arith.constant 0 : index
    %c0_51 = arith.constant 0 : index
    %429 = vector.load %arg9[%c0_50, %c0_51] : memref<1x128xf32, #tpu.memory_space<vmem>>, vector<1x128xf32>
    %430 = vector.broadcast %429 : vector<1x128xf32> to vector<64x128xf32>
    %431 = arith.addf %428, %430 : vector<64x128xf32>
    %432 = arith.addf %431, %411 : vector<64x128xf32>
    %433 = arith.truncf %432 : vector<64x128xf32> to vector<64x128xbf16>
    %c0_52 = arith.constant 0 : index
    %c0_53 = arith.constant 0 : index
    %434 = vector.load %arg10[%c0_52, %c0_53] : memref<128x32xbf16, #tpu.memory_space<vmem>>, vector<128x32xbf16>
    %cst_54 = arith.constant dense<0.000000e+00> : vector<64x32xf32>
    %435 = tpu.matmul %433, %434, %cst_54 {dimension_numbers = #tpu.dot_dimension_numbers<[1], [0], [0], [1], [0, 0, 1, 1], [], []>} : vector<64x128xbf16>, vector<128x32xbf16>, vector<64x32xf32> -> vector<64x32xf32>
    %c0_55 = arith.constant 0 : index
    %c0_56 = arith.constant 0 : index
    %436 = vector.load %arg11[%c0_55, %c0_56] : memref<1x32xf32, #tpu.memory_space<vmem>>, vector<1x32xf32>
    %437 = vector.broadcast %436 : vector<1x32xf32> to vector<64x32xf32>
    %438 = arith.addf %435, %437 : vector<64x32xf32>
    %439 = arith.extf %1 : vector<8x8x32xbf16> to vector<8x8x32xf32>
    %440 = vector.shape_cast %439 : vector<8x8x32xf32> to vector<64x32xf32>
    %441 = arith.addf %438, %440 : vector<64x32xf32>
    %442 = vector.shape_cast %441 : vector<64x32xf32> to vector<1x8x8x32xf32>
    %443 = arith.truncf %442 : vector<1x8x8x32xf32> to vector<1x8x8x32xbf16>
    %c0_57 = arith.constant 0 : index
    %c0_58 = arith.constant 0 : index
    %c0_59 = arith.constant 0 : index
    %c0_60 = arith.constant 0 : index
    %444 = vector.load %arg12[%c0_57, %c0_58, %c0_59, %c0_60] : memref<1x8x8x32xbf16, #tpu.memory_space<vmem>>, vector<1x8x8x32xbf16>
    tpu.vector_store %arg12[%c0_57, %c0_58, %c0_59, %c0_60], %443 {strides = array<i32>} : memref<1x8x8x32xbf16, #tpu.memory_space<vmem>>, vector<1x8x8x32xbf16>,
    return
  }
  func.func @transform_0(%arg0: i32) -> (i32, i32, i32, i32) {
    %c0_i32 = arith.constant 0 : i32
    %c0_i32_0 = arith.constant 0 : i32
    %c0_i32_1 = arith.constant 0 : i32
    %c0_i32_2 = arith.constant 0 : i32
    return %arg0, %c0_i32, %c0_i32_0, %c0_i32_1 : i32, i32, i32, i32
  }
  func.func @transform_1(%arg0: i32) -> (i32, i32, i32) {
    %c0_i32 = arith.constant 0 : i32
    %c0_i32_0 = arith.constant 0 : i32
    %c0_i32_1 = arith.constant 0 : i32
    %c0_i32_2 = arith.constant 0 : i32
    return %c0_i32, %c0_i32_0, %c0_i32_1 : i32, i32, i32
  }
  func.func @transform_2(%arg0: i32) -> (i32, i32) {
    %c0_i32 = arith.constant 0 : i32
    %c0_i32_0 = arith.constant 0 : i32
    %c0_i32_1 = arith.constant 0 : i32
    return %c0_i32, %c0_i32_0 : i32, i32
  }
  func.func @transform_3(%arg0: i32) -> (i32, i32) {
    %c0_i32 = arith.constant 0 : i32
    %c0_i32_0 = arith.constant 0 : i32
    %c0_i32_1 = arith.constant 0 : i32
    return %c0_i32, %c0_i32_0 : i32, i32
  }
  func.func @transform_4(%arg0: i32) -> (i32, i32) {
    %c0_i32 = arith.constant 0 : i32
    %c0_i32_0 = arith.constant 0 : i32
    %c0_i32_1 = arith.constant 0 : i32
    return %c0_i32, %c0_i32_0 : i32, i32
  }
  func.func @transform_5(%arg0: i32) -> (i32, i32) {
    %c0_i32 = arith.constant 0 : i32
    %c0_i32_0 = arith.constant 0 : i32
    %c0_i32_1 = arith.constant 0 : i32
    return %c0_i32, %c0_i32_0 : i32, i32
  }
  func.func @transform_6(%arg0: i32) -> (i32, i32) {
    %c0_i32 = arith.constant 0 : i32
    %c0_i32_0 = arith.constant 0 : i32
    %c0_i32_1 = arith.constant 0 : i32
    return %c0_i32, %c0_i32_0 : i32, i32
  }
  func.func @transform_7(%arg0: i32) -> (i32, i32) {
    %c0_i32 = arith.constant 0 : i32
    %c0_i32_0 = arith.constant 0 : i32
    %c0_i32_1 = arith.constant 0 : i32
    return %c0_i32, %c0_i32_0 : i32, i32
  }
  func.func @transform_8(%arg0: i32) -> (i32, i32) {
    %c0_i32 = arith.constant 0 : i32
    %c0_i32_0 = arith.constant 0 : i32
    %c0_i32_1 = arith.constant 0 : i32
    return %c0_i32, %c0_i32_0 : i32, i32
  }
  func.func @transform_9(%arg0: i32) -> (i32, i32) {
    %c0_i32 = arith.constant 0 : i32
    %c0_i32_0 = arith.constant 0 : i32
    %c0_i32_1 = arith.constant 0 : i32
    return %c0_i32, %c0_i32_0 : i32, i32
  }
  func.func @transform_10(%arg0: i32) -> (i32, i32) {
    %c0_i32 = arith.constant 0 : i32
    %c0_i32_0 = arith.constant 0 : i32
    %c0_i32_1 = arith.constant 0 : i32
    return %c0_i32, %c0_i32_0 : i32, i32
  }
  func.func @transform_11(%arg0: i32) -> (i32, i32, i32, i32) {
    %c0_i32 = arith.constant 0 : i32
    %c0_i32_0 = arith.constant 0 : i32
    %c0_i32_1 = arith.constant 0 : i32
    %c0_i32_2 = arith.constant 0 : i32
    return %arg0, %c0_i32, %c0_i32_0, %c0_i32_1 : i32, i32, i32, i32
  }
}

module attributes {stable_mosaic.version = 11 : i64} {
  func.func @_downsample_kernel(%arg0: i32, %arg1: memref<32x32xbf16, #tpu.memory_space<vmem>>, %arg2: memref<32x32xbf16, #tpu.memory_space<vmem>>, %arg3: memref<32x32xbf16, #tpu.memory_space<vmem>>, %arg4: memref<32x32xbf16, #tpu.memory_space<vmem>>, %arg5: memref<1x32xf32, #tpu.memory_space<vmem>>, %arg6: memref<1x32xf32, #tpu.memory_space<vmem>>, %arg7: memref<4x32x64xbf16, #tpu.memory_space<vmem>>, %arg8: memref<1x64xf32, #tpu.memory_space<vmem>>, %arg9: memref<32x64xbf16, #tpu.memory_space<vmem>>) attributes {dimension_semantics = [#tpu.dimension_semantics<parallel>], iteration_bounds = array<i64: 1>, scalar_prefetch = 0 : i64, scratch_operands = 0 : i64, tpu.core_type = #tpu.core_type<tc>, window_params = [{transform_indices = @transform_0, window_bounds = array<i64: 32, 32>}, {transform_indices = @transform_1, window_bounds = array<i64: 32, 32>}, {transform_indices = @transform_2, window_bounds = array<i64: 32, 32>}, {transform_indices = @transform_3, window_bounds = array<i64: 32, 32>}, {pipeline_mode = #tpu.pipeline_mode<synchronous>, transform_indices = @transform_4, window_bounds = array<i64: 1, 32>}, {pipeline_mode = #tpu.pipeline_mode<synchronous>, transform_indices = @transform_5, window_bounds = array<i64: 1, 32>}, {pipeline_mode = #tpu.pipeline_mode<synchronous>, transform_indices = @transform_6, window_bounds = array<i64: 4, 32, 64>}, {pipeline_mode = #tpu.pipeline_mode<synchronous>, transform_indices = @transform_7, window_bounds = array<i64: 1, 64>}, {transform_indices = @transform_8, window_bounds = array<i64: 32, 64>}]} {
    %c0 = arith.constant 0 : index
    %c0_0 = arith.constant 0 : index
    %0 = vector.load %arg1[%c0, %c0_0] : memref<32x32xbf16, #tpu.memory_space<vmem>>, vector<32x32xbf16>
    %1 = arith.extf %0 : vector<32x32xbf16> to vector<32x32xf32>
    %cst = arith.constant dense<0.000000e+00> : vector<32xf32>
    %2 = vector.multi_reduction <add>, %1, %cst [1] : vector<32x32xf32> to vector<32xf32>
    %3 = vector.shape_cast %2 : vector<32xf32> to vector<32x1xf32>
    %cst_1 = arith.constant 3.200000e+01 : f32
    %4 = vector.broadcast %cst_1 : f32 to vector<32x1xf32>
    %5 = arith.divf %3, %4 : vector<32x1xf32>
    %6 = vector.broadcast %5 : vector<32x1xf32> to vector<32x32xf32>
    %7 = arith.subf %1, %6 : vector<32x32xf32>
    %8 = arith.mulf %7, %7 : vector<32x32xf32>
    %cst_2 = arith.constant dense<0.000000e+00> : vector<32xf32>
    %9 = vector.multi_reduction <add>, %8, %cst_2 [1] : vector<32x32xf32> to vector<32xf32>
    %10 = vector.shape_cast %9 : vector<32xf32> to vector<32x1xf32>
    %cst_3 = arith.constant 3.200000e+01 : f32
    %11 = vector.broadcast %cst_3 : f32 to vector<32x1xf32>
    %12 = arith.divf %10, %11 : vector<32x1xf32>
    %13 = vector.broadcast %5 : vector<32x1xf32> to vector<32x32xf32>
    %14 = arith.subf %1, %13 : vector<32x32xf32>
    %cst_4 = arith.constant 9.99999997E-7 : f32
    %15 = vector.broadcast %cst_4 : f32 to vector<32x1xf32>
    %16 = arith.addf %12, %15 : vector<32x1xf32>
    %17 = math.rsqrt %16 : vector<32x1xf32>
    %18 = vector.broadcast %17 : vector<32x1xf32> to vector<32x32xf32>
    %19 = arith.mulf %14, %18 : vector<32x32xf32>
    %c0_5 = arith.constant 0 : index
    %c0_6 = arith.constant 0 : index
    %20 = vector.load %arg5[%c0_5, %c0_6] : memref<1x32xf32, #tpu.memory_space<vmem>>, vector<1x32xf32>
    %21 = vector.broadcast %20 : vector<1x32xf32> to vector<32x32xf32>
    %22 = arith.mulf %19, %21 : vector<32x32xf32>
    %c0_7 = arith.constant 0 : index
    %c0_8 = arith.constant 0 : index
    %23 = vector.load %arg6[%c0_7, %c0_8] : memref<1x32xf32, #tpu.memory_space<vmem>>, vector<1x32xf32>
    %24 = vector.broadcast %23 : vector<1x32xf32> to vector<32x32xf32>
    %25 = arith.addf %22, %24 : vector<32x32xf32>
    %26 = arith.truncf %25 : vector<32x32xf32> to vector<32x32xbf16>
    %c0_9 = arith.constant 0 : index
    %c0_10 = arith.constant 0 : index
    %c0_11 = arith.constant 0 : index
    %27 = vector.load %arg7[%c0_9, %c0_10, %c0_11] : memref<4x32x64xbf16, #tpu.memory_space<vmem>>, vector<1x32x64xbf16>
    %28 = vector.shape_cast %27 : vector<1x32x64xbf16> to vector<32x64xbf16>
    %cst_12 = arith.constant dense<0.000000e+00> : vector<32x64xf32>
    %29 = tpu.matmul %26, %28, %cst_12 {dimension_numbers = #tpu.dot_dimension_numbers<[1], [0], [0], [1], [0, 0, 1, 1], [], []>} : vector<32x32xbf16>, vector<32x64xbf16>, vector<32x64xf32> -> vector<32x64xf32>
    %c0_13 = arith.constant 0 : index
    %c0_14 = arith.constant 0 : index
    %30 = vector.load %arg2[%c0_13, %c0_14] : memref<32x32xbf16, #tpu.memory_space<vmem>>, vector<32x32xbf16>
    %31 = arith.extf %30 : vector<32x32xbf16> to vector<32x32xf32>
    %cst_15 = arith.constant dense<0.000000e+00> : vector<32xf32>
    %32 = vector.multi_reduction <add>, %31, %cst_15 [1] : vector<32x32xf32> to vector<32xf32>
    %33 = vector.shape_cast %32 : vector<32xf32> to vector<32x1xf32>
    %cst_16 = arith.constant 3.200000e+01 : f32
    %34 = vector.broadcast %cst_16 : f32 to vector<32x1xf32>
    %35 = arith.divf %33, %34 : vector<32x1xf32>
    %36 = vector.broadcast %35 : vector<32x1xf32> to vector<32x32xf32>
    %37 = arith.subf %31, %36 : vector<32x32xf32>
    %38 = arith.mulf %37, %37 : vector<32x32xf32>
    %cst_17 = arith.constant dense<0.000000e+00> : vector<32xf32>
    %39 = vector.multi_reduction <add>, %38, %cst_17 [1] : vector<32x32xf32> to vector<32xf32>
    %40 = vector.shape_cast %39 : vector<32xf32> to vector<32x1xf32>
    %cst_18 = arith.constant 3.200000e+01 : f32
    %41 = vector.broadcast %cst_18 : f32 to vector<32x1xf32>
    %42 = arith.divf %40, %41 : vector<32x1xf32>
    %43 = vector.broadcast %35 : vector<32x1xf32> to vector<32x32xf32>
    %44 = arith.subf %31, %43 : vector<32x32xf32>
    %cst_19 = arith.constant 9.99999997E-7 : f32
    %45 = vector.broadcast %cst_19 : f32 to vector<32x1xf32>
    %46 = arith.addf %42, %45 : vector<32x1xf32>
    %47 = math.rsqrt %46 : vector<32x1xf32>
    %48 = vector.broadcast %47 : vector<32x1xf32> to vector<32x32xf32>
    %49 = arith.mulf %44, %48 : vector<32x32xf32>
    %c0_20 = arith.constant 0 : index
    %c0_21 = arith.constant 0 : index
    %50 = vector.load %arg5[%c0_20, %c0_21] : memref<1x32xf32, #tpu.memory_space<vmem>>, vector<1x32xf32>
    %51 = vector.broadcast %50 : vector<1x32xf32> to vector<32x32xf32>
    %52 = arith.mulf %49, %51 : vector<32x32xf32>
    %c0_22 = arith.constant 0 : index
    %c0_23 = arith.constant 0 : index
    %53 = vector.load %arg6[%c0_22, %c0_23] : memref<1x32xf32, #tpu.memory_space<vmem>>, vector<1x32xf32>
    %54 = vector.broadcast %53 : vector<1x32xf32> to vector<32x32xf32>
    %55 = arith.addf %52, %54 : vector<32x32xf32>
    %56 = arith.truncf %55 : vector<32x32xf32> to vector<32x32xbf16>
    %c1 = arith.constant 1 : index
    %c0_24 = arith.constant 0 : index
    %c0_25 = arith.constant 0 : index
    %57 = vector.load %arg7[%c1, %c0_24, %c0_25] : memref<4x32x64xbf16, #tpu.memory_space<vmem>>, vector<1x32x64xbf16>
    %58 = vector.shape_cast %57 : vector<1x32x64xbf16> to vector<32x64xbf16>
    %cst_26 = arith.constant dense<0.000000e+00> : vector<32x64xf32>
    %59 = tpu.matmul %56, %58, %cst_26 {dimension_numbers = #tpu.dot_dimension_numbers<[1], [0], [0], [1], [0, 0, 1, 1], [], []>} : vector<32x32xbf16>, vector<32x64xbf16>, vector<32x64xf32> -> vector<32x64xf32>
    %60 = arith.addf %29, %59 : vector<32x64xf32>
    %c0_27 = arith.constant 0 : index
    %c0_28 = arith.constant 0 : index
    %61 = vector.load %arg3[%c0_27, %c0_28] : memref<32x32xbf16, #tpu.memory_space<vmem>>, vector<32x32xbf16>
    %62 = arith.extf %61 : vector<32x32xbf16> to vector<32x32xf32>
    %cst_29 = arith.constant dense<0.000000e+00> : vector<32xf32>
    %63 = vector.multi_reduction <add>, %62, %cst_29 [1] : vector<32x32xf32> to vector<32xf32>
    %64 = vector.shape_cast %63 : vector<32xf32> to vector<32x1xf32>
    %cst_30 = arith.constant 3.200000e+01 : f32
    %65 = vector.broadcast %cst_30 : f32 to vector<32x1xf32>
    %66 = arith.divf %64, %65 : vector<32x1xf32>
    %67 = vector.broadcast %66 : vector<32x1xf32> to vector<32x32xf32>
    %68 = arith.subf %62, %67 : vector<32x32xf32>
    %69 = arith.mulf %68, %68 : vector<32x32xf32>
    %cst_31 = arith.constant dense<0.000000e+00> : vector<32xf32>
    %70 = vector.multi_reduction <add>, %69, %cst_31 [1] : vector<32x32xf32> to vector<32xf32>
    %71 = vector.shape_cast %70 : vector<32xf32> to vector<32x1xf32>
    %cst_32 = arith.constant 3.200000e+01 : f32
    %72 = vector.broadcast %cst_32 : f32 to vector<32x1xf32>
    %73 = arith.divf %71, %72 : vector<32x1xf32>
    %74 = vector.broadcast %66 : vector<32x1xf32> to vector<32x32xf32>
    %75 = arith.subf %62, %74 : vector<32x32xf32>
    %cst_33 = arith.constant 9.99999997E-7 : f32
    %76 = vector.broadcast %cst_33 : f32 to vector<32x1xf32>
    %77 = arith.addf %73, %76 : vector<32x1xf32>
    %78 = math.rsqrt %77 : vector<32x1xf32>
    %79 = vector.broadcast %78 : vector<32x1xf32> to vector<32x32xf32>
    %80 = arith.mulf %75, %79 : vector<32x32xf32>
    %c0_34 = arith.constant 0 : index
    %c0_35 = arith.constant 0 : index
    %81 = vector.load %arg5[%c0_34, %c0_35] : memref<1x32xf32, #tpu.memory_space<vmem>>, vector<1x32xf32>
    %82 = vector.broadcast %81 : vector<1x32xf32> to vector<32x32xf32>
    %83 = arith.mulf %80, %82 : vector<32x32xf32>
    %c0_36 = arith.constant 0 : index
    %c0_37 = arith.constant 0 : index
    %84 = vector.load %arg6[%c0_36, %c0_37] : memref<1x32xf32, #tpu.memory_space<vmem>>, vector<1x32xf32>
    %85 = vector.broadcast %84 : vector<1x32xf32> to vector<32x32xf32>
    %86 = arith.addf %83, %85 : vector<32x32xf32>
    %87 = arith.truncf %86 : vector<32x32xf32> to vector<32x32xbf16>
    %c2 = arith.constant 2 : index
    %c0_38 = arith.constant 0 : index
    %c0_39 = arith.constant 0 : index
    %88 = vector.load %arg7[%c2, %c0_38, %c0_39] : memref<4x32x64xbf16, #tpu.memory_space<vmem>>, vector<1x32x64xbf16>
    %89 = vector.shape_cast %88 : vector<1x32x64xbf16> to vector<32x64xbf16>
    %cst_40 = arith.constant dense<0.000000e+00> : vector<32x64xf32>
    %90 = tpu.matmul %87, %89, %cst_40 {dimension_numbers = #tpu.dot_dimension_numbers<[1], [0], [0], [1], [0, 0, 1, 1], [], []>} : vector<32x32xbf16>, vector<32x64xbf16>, vector<32x64xf32> -> vector<32x64xf32>
    %91 = arith.addf %60, %90 : vector<32x64xf32>
    %c0_41 = arith.constant 0 : index
    %c0_42 = arith.constant 0 : index
    %92 = vector.load %arg4[%c0_41, %c0_42] : memref<32x32xbf16, #tpu.memory_space<vmem>>, vector<32x32xbf16>
    %93 = arith.extf %92 : vector<32x32xbf16> to vector<32x32xf32>
    %cst_43 = arith.constant dense<0.000000e+00> : vector<32xf32>
    %94 = vector.multi_reduction <add>, %93, %cst_43 [1] : vector<32x32xf32> to vector<32xf32>
    %95 = vector.shape_cast %94 : vector<32xf32> to vector<32x1xf32>
    %cst_44 = arith.constant 3.200000e+01 : f32
    %96 = vector.broadcast %cst_44 : f32 to vector<32x1xf32>
    %97 = arith.divf %95, %96 : vector<32x1xf32>
    %98 = vector.broadcast %97 : vector<32x1xf32> to vector<32x32xf32>
    %99 = arith.subf %93, %98 : vector<32x32xf32>
    %100 = arith.mulf %99, %99 : vector<32x32xf32>
    %cst_45 = arith.constant dense<0.000000e+00> : vector<32xf32>
    %101 = vector.multi_reduction <add>, %100, %cst_45 [1] : vector<32x32xf32> to vector<32xf32>
    %102 = vector.shape_cast %101 : vector<32xf32> to vector<32x1xf32>
    %cst_46 = arith.constant 3.200000e+01 : f32
    %103 = vector.broadcast %cst_46 : f32 to vector<32x1xf32>
    %104 = arith.divf %102, %103 : vector<32x1xf32>
    %105 = vector.broadcast %97 : vector<32x1xf32> to vector<32x32xf32>
    %106 = arith.subf %93, %105 : vector<32x32xf32>
    %cst_47 = arith.constant 9.99999997E-7 : f32
    %107 = vector.broadcast %cst_47 : f32 to vector<32x1xf32>
    %108 = arith.addf %104, %107 : vector<32x1xf32>
    %109 = math.rsqrt %108 : vector<32x1xf32>
    %110 = vector.broadcast %109 : vector<32x1xf32> to vector<32x32xf32>
    %111 = arith.mulf %106, %110 : vector<32x32xf32>
    %c0_48 = arith.constant 0 : index
    %c0_49 = arith.constant 0 : index
    %112 = vector.load %arg5[%c0_48, %c0_49] : memref<1x32xf32, #tpu.memory_space<vmem>>, vector<1x32xf32>
    %113 = vector.broadcast %112 : vector<1x32xf32> to vector<32x32xf32>
    %114 = arith.mulf %111, %113 : vector<32x32xf32>
    %c0_50 = arith.constant 0 : index
    %c0_51 = arith.constant 0 : index
    %115 = vector.load %arg6[%c0_50, %c0_51] : memref<1x32xf32, #tpu.memory_space<vmem>>, vector<1x32xf32>
    %116 = vector.broadcast %115 : vector<1x32xf32> to vector<32x32xf32>
    %117 = arith.addf %114, %116 : vector<32x32xf32>
    %118 = arith.truncf %117 : vector<32x32xf32> to vector<32x32xbf16>
    %c3 = arith.constant 3 : index
    %c0_52 = arith.constant 0 : index
    %c0_53 = arith.constant 0 : index
    %119 = vector.load %arg7[%c3, %c0_52, %c0_53] : memref<4x32x64xbf16, #tpu.memory_space<vmem>>, vector<1x32x64xbf16>
    %120 = vector.shape_cast %119 : vector<1x32x64xbf16> to vector<32x64xbf16>
    %cst_54 = arith.constant dense<0.000000e+00> : vector<32x64xf32>
    %121 = tpu.matmul %118, %120, %cst_54 {dimension_numbers = #tpu.dot_dimension_numbers<[1], [0], [0], [1], [0, 0, 1, 1], [], []>} : vector<32x32xbf16>, vector<32x64xbf16>, vector<32x64xf32> -> vector<32x64xf32>
    %122 = arith.addf %91, %121 : vector<32x64xf32>
    %c0_55 = arith.constant 0 : index
    %c0_56 = arith.constant 0 : index
    %123 = vector.load %arg8[%c0_55, %c0_56] : memref<1x64xf32, #tpu.memory_space<vmem>>, vector<1x64xf32>
    %124 = vector.broadcast %123 : vector<1x64xf32> to vector<32x64xf32>
    %125 = arith.addf %122, %124 : vector<32x64xf32>
    %126 = arith.truncf %125 : vector<32x64xf32> to vector<32x64xbf16>
    %c0_57 = arith.constant 0 : index
    %c0_58 = arith.constant 0 : index
    %127 = vector.load %arg9[%c0_57, %c0_58] : memref<32x64xbf16, #tpu.memory_space<vmem>>, vector<32x64xbf16>
    tpu.vector_store %arg9[%c0_57, %c0_58], %126 {strides = array<i32>} : memref<32x64xbf16, #tpu.memory_space<vmem>>, vector<32x64xbf16>,
    return
  }
  func.func @transform_0(%arg0: i32) -> (i32, i32) {
    %c0_i32 = arith.constant 0 : i32
    %c0_i32_0 = arith.constant 0 : i32
    return %arg0, %c0_i32 : i32, i32
  }
  func.func @transform_1(%arg0: i32) -> (i32, i32) {
    %c0_i32 = arith.constant 0 : i32
    %c0_i32_0 = arith.constant 0 : i32
    return %arg0, %c0_i32 : i32, i32
  }
  func.func @transform_2(%arg0: i32) -> (i32, i32) {
    %c0_i32 = arith.constant 0 : i32
    %c0_i32_0 = arith.constant 0 : i32
    return %arg0, %c0_i32 : i32, i32
  }
  func.func @transform_3(%arg0: i32) -> (i32, i32) {
    %c0_i32 = arith.constant 0 : i32
    %c0_i32_0 = arith.constant 0 : i32
    return %arg0, %c0_i32 : i32, i32
  }
  func.func @transform_4(%arg0: i32) -> (i32, i32) {
    %c0_i32 = arith.constant 0 : i32
    %c0_i32_0 = arith.constant 0 : i32
    %c0_i32_1 = arith.constant 0 : i32
    return %c0_i32, %c0_i32_0 : i32, i32
  }
  func.func @transform_5(%arg0: i32) -> (i32, i32) {
    %c0_i32 = arith.constant 0 : i32
    %c0_i32_0 = arith.constant 0 : i32
    %c0_i32_1 = arith.constant 0 : i32
    return %c0_i32, %c0_i32_0 : i32, i32
  }
  func.func @transform_6(%arg0: i32) -> (i32, i32, i32) {
    %c0_i32 = arith.constant 0 : i32
    %c0_i32_0 = arith.constant 0 : i32
    %c0_i32_1 = arith.constant 0 : i32
    %c0_i32_2 = arith.constant 0 : i32
    return %c0_i32, %c0_i32_0, %c0_i32_1 : i32, i32, i32
  }
  func.func @transform_7(%arg0: i32) -> (i32, i32) {
    %c0_i32 = arith.constant 0 : i32
    %c0_i32_0 = arith.constant 0 : i32
    %c0_i32_1 = arith.constant 0 : i32
    return %c0_i32, %c0_i32_0 : i32, i32
  }
  func.func @transform_8(%arg0: i32) -> (i32, i32) {
    %c0_i32 = arith.constant 0 : i32
    %c0_i32_0 = arith.constant 0 : i32
    return %arg0, %c0_i32 : i32, i32
  }
}

module attributes {stable_mosaic.version = 11 : i64} {
  func.func @kernel(%arg0: i32, %arg1: memref<1x4x4x64xbf16, #tpu.memory_space<vmem>>, %arg2: memref<7x7x64xf32, #tpu.memory_space<vmem>>, %arg3: memref<1x64xf32, #tpu.memory_space<vmem>>, %arg4: memref<1x64xf32, #tpu.memory_space<vmem>>, %arg5: memref<1x64xf32, #tpu.memory_space<vmem>>, %arg6: memref<64x256xbf16, #tpu.memory_space<vmem>>, %arg7: memref<1x256xf32, #tpu.memory_space<vmem>>, %arg8: memref<1x256xf32, #tpu.memory_space<vmem>>, %arg9: memref<1x256xf32, #tpu.memory_space<vmem>>, %arg10: memref<256x64xbf16, #tpu.memory_space<vmem>>, %arg11: memref<1x64xf32, #tpu.memory_space<vmem>>, %arg12: memref<1x4x4x64xbf16, #tpu.memory_space<vmem>>, %arg13: memref<10x16x64xf32, #tpu.memory_space<vmem>>) attributes {dimension_semantics = [#tpu.dimension_semantics<parallel>], iteration_bounds = array<i64: 2>, scalar_prefetch = 0 : i64, scratch_operands = 1 : i64, tpu.core_type = #tpu.core_type<tc>, window_params = [{transform_indices = @transform_0, window_bounds = array<i64: 1, 4, 4, 64>}, {pipeline_mode = #tpu.pipeline_mode<synchronous>, transform_indices = @transform_1, window_bounds = array<i64: 7, 7, 64>}, {pipeline_mode = #tpu.pipeline_mode<synchronous>, transform_indices = @transform_2, window_bounds = array<i64: 1, 64>}, {pipeline_mode = #tpu.pipeline_mode<synchronous>, transform_indices = @transform_3, window_bounds = array<i64: 1, 64>}, {pipeline_mode = #tpu.pipeline_mode<synchronous>, transform_indices = @transform_4, window_bounds = array<i64: 1, 64>}, {pipeline_mode = #tpu.pipeline_mode<synchronous>, transform_indices = @transform_5, window_bounds = array<i64: 64, 256>}, {pipeline_mode = #tpu.pipeline_mode<synchronous>, transform_indices = @transform_6, window_bounds = array<i64: 1, 256>}, {pipeline_mode = #tpu.pipeline_mode<synchronous>, transform_indices = @transform_7, window_bounds = array<i64: 1, 256>}, {pipeline_mode = #tpu.pipeline_mode<synchronous>, transform_indices = @transform_8, window_bounds = array<i64: 1, 256>}, {pipeline_mode = #tpu.pipeline_mode<synchronous>, transform_indices = @transform_9, window_bounds = array<i64: 256, 64>}, {pipeline_mode = #tpu.pipeline_mode<synchronous>, transform_indices = @transform_10, window_bounds = array<i64: 1, 64>}, {transform_indices = @transform_11, window_bounds = array<i64: 1, 4, 4, 64>}]} {
    %c0 = arith.constant 0 : index
    %c0_0 = arith.constant 0 : index
    %c0_1 = arith.constant 0 : index
    %c0_2 = arith.constant 0 : index
    %0 = vector.load %arg1[%c0, %c0_0, %c0_1, %c0_2] : memref<1x4x4x64xbf16, #tpu.memory_space<vmem>>, vector<1x4x4x64xbf16>
    %1 = vector.shape_cast %0 : vector<1x4x4x64xbf16> to vector<4x4x64xbf16>
    %cst = arith.constant 0.000000e+00 : f32
    %2 = vector.broadcast %cst : f32 to vector<3x16x64xf32>
    %c0_3 = arith.constant 0 : index
    %c0_4 = arith.constant 0 : index
    %c0_5 = arith.constant 0 : index
    %3 = vector.load %arg13[%c0_3, %c0_4, %c0_5] : memref<10x16x64xf32, #tpu.memory_space<vmem>>, vector<3x16x64xf32>
    tpu.vector_store %arg13[%c0_3, %c0_4, %c0_5], %2 {strides = array<i32>} : memref<10x16x64xf32, #tpu.memory_space<vmem>>, vector<3x16x64xf32>,
    %cst_6 = arith.constant 0.000000e+00 : f32
    %4 = vector.broadcast %cst_6 : f32 to vector<3x16x64xf32>
    %c7 = arith.constant 7 : index
    %c0_7 = arith.constant 0 : index
    %c0_8 = arith.constant 0 : index
    %5 = vector.load %arg13[%c7, %c0_7, %c0_8] : memref<10x16x64xf32, #tpu.memory_space<vmem>>, vector<3x16x64xf32>
    tpu.vector_store %arg13[%c7, %c0_7, %c0_8], %4 {strides = array<i32>} : memref<10x16x64xf32, #tpu.memory_space<vmem>>, vector<3x16x64xf32>,
    %cst_9 = arith.constant 0.000000e+00 : f32
    %6 = vector.broadcast %cst_9 : f32 to vector<4x8x64xf32>
    %c3 = arith.constant 3 : index
    %c0_10 = arith.constant 0 : index
    %c0_11 = arith.constant 0 : index
    %7 = vector.load %arg13[%c3, %c0_10, %c0_11] : memref<10x16x64xf32, #tpu.memory_space<vmem>>, vector<4x8x64xf32>
    tpu.vector_store %arg13[%c3, %c0_10, %c0_11], %6 {strides = array<i32>} : memref<10x16x64xf32, #tpu.memory_space<vmem>>, vector<4x8x64xf32>,
    %cst_12 = arith.constant 0.000000e+00 : f32
    %8 = vector.broadcast %cst_12 : f32 to vector<4x4x64xf32>
    %c3_13 = arith.constant 3 : index
    %c12 = arith.constant 12 : index
    %c0_14 = arith.constant 0 : index
    %9 = vector.load %arg13[%c3_13, %c12, %c0_14] : memref<10x16x64xf32, #tpu.memory_space<vmem>>, vector<4x4x64xf32>
    tpu.vector_store %arg13[%c3_13, %c12, %c0_14], %8 {strides = array<i32>} : memref<10x16x64xf32, #tpu.memory_space<vmem>>, vector<4x4x64xf32>,
    %10 = arith.extf %1 : vector<4x4x64xbf16> to vector<4x4x64xf32>
    %c3_15 = arith.constant 3 : index
    %c8 = arith.constant 8 : index
    %c0_16 = arith.constant 0 : index
    %11 = vector.load %arg13[%c3_15, %c8, %c0_16] : memref<10x16x64xf32, #tpu.memory_space<vmem>>, vector<4x4x64xf32>
    tpu.vector_store %arg13[%c3_15, %c8, %c0_16], %10 {strides = array<i32>} : memref<10x16x64xf32, #tpu.memory_space<vmem>>, vector<4x4x64xf32>,
    %c0_17 = arith.constant 0 : index
    %c0_18 = arith.constant 0 : index
    %c0_19 = arith.constant 0 : index
    %12 = vector.load %arg13[%c0_17, %c0_18, %c0_19] : memref<10x16x64xf32, #tpu.memory_space<vmem>>, vector<10x16x64xf32>
    %c0_20 = arith.constant 0 : index
    %c0_21 = arith.constant 0 : index
    %c0_22 = arith.constant 0 : index
    %13 = vector.load %arg2[%c0_20, %c0_21, %c0_22] : memref<7x7x64xf32, #tpu.memory_space<vmem>>, vector<7x7x64xf32>
    %cst_23 = arith.constant 0.000000e+00 : f32
    %14 = vector.broadcast %cst_23 : f32 to vector<4x4x64xf32>
    %15 = vector.extract_strided_slice %12 {offsets = [0, 5, 0], sizes = [10, 4, 64], strides = [1, 1, 1]} : vector<10x16x64xf32> to vector<10x4x64xf32>
    %16 = vector.extract_strided_slice %15 {offsets = [0, 0, 0], sizes = [4, 4, 64], strides = [1, 1, 1]} : vector<10x4x64xf32> to vector<4x4x64xf32>
    %17 = vector.extract_strided_slice %13 {offsets = [0, 0, 0], sizes = [1, 1, 64], strides = [1, 1, 1]} : vector<7x7x64xf32> to vector<1x1x64xf32>
    %18 = vector.shape_cast %17 : vector<1x1x64xf32> to vector<64xf32>
    %19 = vector.shape_cast %18 : vector<64xf32> to vector<1x1x64xf32>
    %20 = vector.broadcast %19 : vector<1x1x64xf32> to vector<4x4x64xf32>
    %21 = arith.mulf %16, %20 : vector<4x4x64xf32>
    %22 = arith.addf %14, %21 : vector<4x4x64xf32>
    %23 = vector.extract_strided_slice %15 {offsets = [1, 0, 0], sizes = [4, 4, 64], strides = [1, 1, 1]} : vector<10x4x64xf32> to vector<4x4x64xf32>
    %24 = vector.extract_strided_slice %13 {offsets = [1, 0, 0], sizes = [1, 1, 64], strides = [1, 1, 1]} : vector<7x7x64xf32> to vector<1x1x64xf32>
    %25 = vector.shape_cast %24 : vector<1x1x64xf32> to vector<64xf32>
    %26 = vector.shape_cast %25 : vector<64xf32> to vector<1x1x64xf32>
    %27 = vector.broadcast %26 : vector<1x1x64xf32> to vector<4x4x64xf32>
    %28 = arith.mulf %23, %27 : vector<4x4x64xf32>
    %29 = arith.addf %22, %28 : vector<4x4x64xf32>
    %30 = vector.extract_strided_slice %15 {offsets = [2, 0, 0], sizes = [4, 4, 64], strides = [1, 1, 1]} : vector<10x4x64xf32> to vector<4x4x64xf32>
    %31 = vector.extract_strided_slice %13 {offsets = [2, 0, 0], sizes = [1, 1, 64], strides = [1, 1, 1]} : vector<7x7x64xf32> to vector<1x1x64xf32>
    %32 = vector.shape_cast %31 : vector<1x1x64xf32> to vector<64xf32>
    %33 = vector.shape_cast %32 : vector<64xf32> to vector<1x1x64xf32>
    %34 = vector.broadcast %33 : vector<1x1x64xf32> to vector<4x4x64xf32>
    %35 = arith.mulf %30, %34 : vector<4x4x64xf32>
    %36 = arith.addf %29, %35 : vector<4x4x64xf32>
    %37 = vector.extract_strided_slice %15 {offsets = [3, 0, 0], sizes = [4, 4, 64], strides = [1, 1, 1]} : vector<10x4x64xf32> to vector<4x4x64xf32>
    %38 = vector.extract_strided_slice %13 {offsets = [3, 0, 0], sizes = [1, 1, 64], strides = [1, 1, 1]} : vector<7x7x64xf32> to vector<1x1x64xf32>
    %39 = vector.shape_cast %38 : vector<1x1x64xf32> to vector<64xf32>
    %40 = vector.shape_cast %39 : vector<64xf32> to vector<1x1x64xf32>
    %41 = vector.broadcast %40 : vector<1x1x64xf32> to vector<4x4x64xf32>
    %42 = arith.mulf %37, %41 : vector<4x4x64xf32>
    %43 = arith.addf %36, %42 : vector<4x4x64xf32>
    %44 = vector.extract_strided_slice %15 {offsets = [4, 0, 0], sizes = [4, 4, 64], strides = [1, 1, 1]} : vector<10x4x64xf32> to vector<4x4x64xf32>
    %45 = vector.extract_strided_slice %13 {offsets = [4, 0, 0], sizes = [1, 1, 64], strides = [1, 1, 1]} : vector<7x7x64xf32> to vector<1x1x64xf32>
    %46 = vector.shape_cast %45 : vector<1x1x64xf32> to vector<64xf32>
    %47 = vector.shape_cast %46 : vector<64xf32> to vector<1x1x64xf32>
    %48 = vector.broadcast %47 : vector<1x1x64xf32> to vector<4x4x64xf32>
    %49 = arith.mulf %44, %48 : vector<4x4x64xf32>
    %50 = arith.addf %43, %49 : vector<4x4x64xf32>
    %51 = vector.extract_strided_slice %15 {offsets = [5, 0, 0], sizes = [4, 4, 64], strides = [1, 1, 1]} : vector<10x4x64xf32> to vector<4x4x64xf32>
    %52 = vector.extract_strided_slice %13 {offsets = [5, 0, 0], sizes = [1, 1, 64], strides = [1, 1, 1]} : vector<7x7x64xf32> to vector<1x1x64xf32>
    %53 = vector.shape_cast %52 : vector<1x1x64xf32> to vector<64xf32>
    %54 = vector.shape_cast %53 : vector<64xf32> to vector<1x1x64xf32>
    %55 = vector.broadcast %54 : vector<1x1x64xf32> to vector<4x4x64xf32>
    %56 = arith.mulf %51, %55 : vector<4x4x64xf32>
    %57 = arith.addf %50, %56 : vector<4x4x64xf32>
    %58 = vector.extract_strided_slice %15 {offsets = [6, 0, 0], sizes = [4, 4, 64], strides = [1, 1, 1]} : vector<10x4x64xf32> to vector<4x4x64xf32>
    %59 = vector.extract_strided_slice %13 {offsets = [6, 0, 0], sizes = [1, 1, 64], strides = [1, 1, 1]} : vector<7x7x64xf32> to vector<1x1x64xf32>
    %60 = vector.shape_cast %59 : vector<1x1x64xf32> to vector<64xf32>
    %61 = vector.shape_cast %60 : vector<64xf32> to vector<1x1x64xf32>
    %62 = vector.broadcast %61 : vector<1x1x64xf32> to vector<4x4x64xf32>
    %63 = arith.mulf %58, %62 : vector<4x4x64xf32>
    %64 = arith.addf %57, %63 : vector<4x4x64xf32>
    %65 = vector.extract_strided_slice %12 {offsets = [0, 6, 0], sizes = [10, 4, 64], strides = [1, 1, 1]} : vector<10x16x64xf32> to vector<10x4x64xf32>
    %66 = vector.extract_strided_slice %65 {offsets = [0, 0, 0], sizes = [4, 4, 64], strides = [1, 1, 1]} : vector<10x4x64xf32> to vector<4x4x64xf32>
    %67 = vector.extract_strided_slice %13 {offsets = [0, 1, 0], sizes = [1, 1, 64], strides = [1, 1, 1]} : vector<7x7x64xf32> to vector<1x1x64xf32>
    %68 = vector.shape_cast %67 : vector<1x1x64xf32> to vector<64xf32>
    %69 = vector.shape_cast %68 : vector<64xf32> to vector<1x1x64xf32>
    %70 = vector.broadcast %69 : vector<1x1x64xf32> to vector<4x4x64xf32>
    %71 = arith.mulf %66, %70 : vector<4x4x64xf32>
    %72 = arith.addf %64, %71 : vector<4x4x64xf32>
    %73 = vector.extract_strided_slice %65 {offsets = [1, 0, 0], sizes = [4, 4, 64], strides = [1, 1, 1]} : vector<10x4x64xf32> to vector<4x4x64xf32>
    %74 = vector.extract_strided_slice %13 {offsets = [1, 1, 0], sizes = [1, 1, 64], strides = [1, 1, 1]} : vector<7x7x64xf32> to vector<1x1x64xf32>
    %75 = vector.shape_cast %74 : vector<1x1x64xf32> to vector<64xf32>
    %76 = vector.shape_cast %75 : vector<64xf32> to vector<1x1x64xf32>
    %77 = vector.broadcast %76 : vector<1x1x64xf32> to vector<4x4x64xf32>
    %78 = arith.mulf %73, %77 : vector<4x4x64xf32>
    %79 = arith.addf %72, %78 : vector<4x4x64xf32>
    %80 = vector.extract_strided_slice %65 {offsets = [2, 0, 0], sizes = [4, 4, 64], strides = [1, 1, 1]} : vector<10x4x64xf32> to vector<4x4x64xf32>
    %81 = vector.extract_strided_slice %13 {offsets = [2, 1, 0], sizes = [1, 1, 64], strides = [1, 1, 1]} : vector<7x7x64xf32> to vector<1x1x64xf32>
    %82 = vector.shape_cast %81 : vector<1x1x64xf32> to vector<64xf32>
    %83 = vector.shape_cast %82 : vector<64xf32> to vector<1x1x64xf32>
    %84 = vector.broadcast %83 : vector<1x1x64xf32> to vector<4x4x64xf32>
    %85 = arith.mulf %80, %84 : vector<4x4x64xf32>
    %86 = arith.addf %79, %85 : vector<4x4x64xf32>
    %87 = vector.extract_strided_slice %65 {offsets = [3, 0, 0], sizes = [4, 4, 64], strides = [1, 1, 1]} : vector<10x4x64xf32> to vector<4x4x64xf32>
    %88 = vector.extract_strided_slice %13 {offsets = [3, 1, 0], sizes = [1, 1, 64], strides = [1, 1, 1]} : vector<7x7x64xf32> to vector<1x1x64xf32>
    %89 = vector.shape_cast %88 : vector<1x1x64xf32> to vector<64xf32>
    %90 = vector.shape_cast %89 : vector<64xf32> to vector<1x1x64xf32>
    %91 = vector.broadcast %90 : vector<1x1x64xf32> to vector<4x4x64xf32>
    %92 = arith.mulf %87, %91 : vector<4x4x64xf32>
    %93 = arith.addf %86, %92 : vector<4x4x64xf32>
    %94 = vector.extract_strided_slice %65 {offsets = [4, 0, 0], sizes = [4, 4, 64], strides = [1, 1, 1]} : vector<10x4x64xf32> to vector<4x4x64xf32>
    %95 = vector.extract_strided_slice %13 {offsets = [4, 1, 0], sizes = [1, 1, 64], strides = [1, 1, 1]} : vector<7x7x64xf32> to vector<1x1x64xf32>
    %96 = vector.shape_cast %95 : vector<1x1x64xf32> to vector<64xf32>
    %97 = vector.shape_cast %96 : vector<64xf32> to vector<1x1x64xf32>
    %98 = vector.broadcast %97 : vector<1x1x64xf32> to vector<4x4x64xf32>
    %99 = arith.mulf %94, %98 : vector<4x4x64xf32>
    %100 = arith.addf %93, %99 : vector<4x4x64xf32>
    %101 = vector.extract_strided_slice %65 {offsets = [5, 0, 0], sizes = [4, 4, 64], strides = [1, 1, 1]} : vector<10x4x64xf32> to vector<4x4x64xf32>
    %102 = vector.extract_strided_slice %13 {offsets = [5, 1, 0], sizes = [1, 1, 64], strides = [1, 1, 1]} : vector<7x7x64xf32> to vector<1x1x64xf32>
    %103 = vector.shape_cast %102 : vector<1x1x64xf32> to vector<64xf32>
    %104 = vector.shape_cast %103 : vector<64xf32> to vector<1x1x64xf32>
    %105 = vector.broadcast %104 : vector<1x1x64xf32> to vector<4x4x64xf32>
    %106 = arith.mulf %101, %105 : vector<4x4x64xf32>
    %107 = arith.addf %100, %106 : vector<4x4x64xf32>
    %108 = vector.extract_strided_slice %65 {offsets = [6, 0, 0], sizes = [4, 4, 64], strides = [1, 1, 1]} : vector<10x4x64xf32> to vector<4x4x64xf32>
    %109 = vector.extract_strided_slice %13 {offsets = [6, 1, 0], sizes = [1, 1, 64], strides = [1, 1, 1]} : vector<7x7x64xf32> to vector<1x1x64xf32>
    %110 = vector.shape_cast %109 : vector<1x1x64xf32> to vector<64xf32>
    %111 = vector.shape_cast %110 : vector<64xf32> to vector<1x1x64xf32>
    %112 = vector.broadcast %111 : vector<1x1x64xf32> to vector<4x4x64xf32>
    %113 = arith.mulf %108, %112 : vector<4x4x64xf32>
    %114 = arith.addf %107, %113 : vector<4x4x64xf32>
    %115 = vector.extract_strided_slice %12 {offsets = [0, 7, 0], sizes = [10, 4, 64], strides = [1, 1, 1]} : vector<10x16x64xf32> to vector<10x4x64xf32>
    %116 = vector.extract_strided_slice %115 {offsets = [0, 0, 0], sizes = [4, 4, 64], strides = [1, 1, 1]} : vector<10x4x64xf32> to vector<4x4x64xf32>
    %117 = vector.extract_strided_slice %13 {offsets = [0, 2, 0], sizes = [1, 1, 64], strides = [1, 1, 1]} : vector<7x7x64xf32> to vector<1x1x64xf32>
    %118 = vector.shape_cast %117 : vector<1x1x64xf32> to vector<64xf32>
    %119 = vector.shape_cast %118 : vector<64xf32> to vector<1x1x64xf32>
    %120 = vector.broadcast %119 : vector<1x1x64xf32> to vector<4x4x64xf32>
    %121 = arith.mulf %116, %120 : vector<4x4x64xf32>
    %122 = arith.addf %114, %121 : vector<4x4x64xf32>
    %123 = vector.extract_strided_slice %115 {offsets = [1, 0, 0], sizes = [4, 4, 64], strides = [1, 1, 1]} : vector<10x4x64xf32> to vector<4x4x64xf32>
    %124 = vector.extract_strided_slice %13 {offsets = [1, 2, 0], sizes = [1, 1, 64], strides = [1, 1, 1]} : vector<7x7x64xf32> to vector<1x1x64xf32>
    %125 = vector.shape_cast %124 : vector<1x1x64xf32> to vector<64xf32>
    %126 = vector.shape_cast %125 : vector<64xf32> to vector<1x1x64xf32>
    %127 = vector.broadcast %126 : vector<1x1x64xf32> to vector<4x4x64xf32>
    %128 = arith.mulf %123, %127 : vector<4x4x64xf32>
    %129 = arith.addf %122, %128 : vector<4x4x64xf32>
    %130 = vector.extract_strided_slice %115 {offsets = [2, 0, 0], sizes = [4, 4, 64], strides = [1, 1, 1]} : vector<10x4x64xf32> to vector<4x4x64xf32>
    %131 = vector.extract_strided_slice %13 {offsets = [2, 2, 0], sizes = [1, 1, 64], strides = [1, 1, 1]} : vector<7x7x64xf32> to vector<1x1x64xf32>
    %132 = vector.shape_cast %131 : vector<1x1x64xf32> to vector<64xf32>
    %133 = vector.shape_cast %132 : vector<64xf32> to vector<1x1x64xf32>
    %134 = vector.broadcast %133 : vector<1x1x64xf32> to vector<4x4x64xf32>
    %135 = arith.mulf %130, %134 : vector<4x4x64xf32>
    %136 = arith.addf %129, %135 : vector<4x4x64xf32>
    %137 = vector.extract_strided_slice %115 {offsets = [3, 0, 0], sizes = [4, 4, 64], strides = [1, 1, 1]} : vector<10x4x64xf32> to vector<4x4x64xf32>
    %138 = vector.extract_strided_slice %13 {offsets = [3, 2, 0], sizes = [1, 1, 64], strides = [1, 1, 1]} : vector<7x7x64xf32> to vector<1x1x64xf32>
    %139 = vector.shape_cast %138 : vector<1x1x64xf32> to vector<64xf32>
    %140 = vector.shape_cast %139 : vector<64xf32> to vector<1x1x64xf32>
    %141 = vector.broadcast %140 : vector<1x1x64xf32> to vector<4x4x64xf32>
    %142 = arith.mulf %137, %141 : vector<4x4x64xf32>
    %143 = arith.addf %136, %142 : vector<4x4x64xf32>
    %144 = vector.extract_strided_slice %115 {offsets = [4, 0, 0], sizes = [4, 4, 64], strides = [1, 1, 1]} : vector<10x4x64xf32> to vector<4x4x64xf32>
    %145 = vector.extract_strided_slice %13 {offsets = [4, 2, 0], sizes = [1, 1, 64], strides = [1, 1, 1]} : vector<7x7x64xf32> to vector<1x1x64xf32>
    %146 = vector.shape_cast %145 : vector<1x1x64xf32> to vector<64xf32>
    %147 = vector.shape_cast %146 : vector<64xf32> to vector<1x1x64xf32>
    %148 = vector.broadcast %147 : vector<1x1x64xf32> to vector<4x4x64xf32>
    %149 = arith.mulf %144, %148 : vector<4x4x64xf32>
    %150 = arith.addf %143, %149 : vector<4x4x64xf32>
    %151 = vector.extract_strided_slice %115 {offsets = [5, 0, 0], sizes = [4, 4, 64], strides = [1, 1, 1]} : vector<10x4x64xf32> to vector<4x4x64xf32>
    %152 = vector.extract_strided_slice %13 {offsets = [5, 2, 0], sizes = [1, 1, 64], strides = [1, 1, 1]} : vector<7x7x64xf32> to vector<1x1x64xf32>
    %153 = vector.shape_cast %152 : vector<1x1x64xf32> to vector<64xf32>
    %154 = vector.shape_cast %153 : vector<64xf32> to vector<1x1x64xf32>
    %155 = vector.broadcast %154 : vector<1x1x64xf32> to vector<4x4x64xf32>
    %156 = arith.mulf %151, %155 : vector<4x4x64xf32>
    %157 = arith.addf %150, %156 : vector<4x4x64xf32>
    %158 = vector.extract_strided_slice %115 {offsets = [6, 0, 0], sizes = [4, 4, 64], strides = [1, 1, 1]} : vector<10x4x64xf32> to vector<4x4x64xf32>
    %159 = vector.extract_strided_slice %13 {offsets = [6, 2, 0], sizes = [1, 1, 64], strides = [1, 1, 1]} : vector<7x7x64xf32> to vector<1x1x64xf32>
    %160 = vector.shape_cast %159 : vector<1x1x64xf32> to vector<64xf32>
    %161 = vector.shape_cast %160 : vector<64xf32> to vector<1x1x64xf32>
    %162 = vector.broadcast %161 : vector<1x1x64xf32> to vector<4x4x64xf32>
    %163 = arith.mulf %158, %162 : vector<4x4x64xf32>
    %164 = arith.addf %157, %163 : vector<4x4x64xf32>
    %165 = vector.extract_strided_slice %12 {offsets = [0, 8, 0], sizes = [10, 4, 64], strides = [1, 1, 1]} : vector<10x16x64xf32> to vector<10x4x64xf32>
    %166 = vector.extract_strided_slice %165 {offsets = [0, 0, 0], sizes = [4, 4, 64], strides = [1, 1, 1]} : vector<10x4x64xf32> to vector<4x4x64xf32>
    %167 = vector.extract_strided_slice %13 {offsets = [0, 3, 0], sizes = [1, 1, 64], strides = [1, 1, 1]} : vector<7x7x64xf32> to vector<1x1x64xf32>
    %168 = vector.shape_cast %167 : vector<1x1x64xf32> to vector<64xf32>
    %169 = vector.shape_cast %168 : vector<64xf32> to vector<1x1x64xf32>
    %170 = vector.broadcast %169 : vector<1x1x64xf32> to vector<4x4x64xf32>
    %171 = arith.mulf %166, %170 : vector<4x4x64xf32>
    %172 = arith.addf %164, %171 : vector<4x4x64xf32>
    %173 = vector.extract_strided_slice %165 {offsets = [1, 0, 0], sizes = [4, 4, 64], strides = [1, 1, 1]} : vector<10x4x64xf32> to vector<4x4x64xf32>
    %174 = vector.extract_strided_slice %13 {offsets = [1, 3, 0], sizes = [1, 1, 64], strides = [1, 1, 1]} : vector<7x7x64xf32> to vector<1x1x64xf32>
    %175 = vector.shape_cast %174 : vector<1x1x64xf32> to vector<64xf32>
    %176 = vector.shape_cast %175 : vector<64xf32> to vector<1x1x64xf32>
    %177 = vector.broadcast %176 : vector<1x1x64xf32> to vector<4x4x64xf32>
    %178 = arith.mulf %173, %177 : vector<4x4x64xf32>
    %179 = arith.addf %172, %178 : vector<4x4x64xf32>
    %180 = vector.extract_strided_slice %165 {offsets = [2, 0, 0], sizes = [4, 4, 64], strides = [1, 1, 1]} : vector<10x4x64xf32> to vector<4x4x64xf32>
    %181 = vector.extract_strided_slice %13 {offsets = [2, 3, 0], sizes = [1, 1, 64], strides = [1, 1, 1]} : vector<7x7x64xf32> to vector<1x1x64xf32>
    %182 = vector.shape_cast %181 : vector<1x1x64xf32> to vector<64xf32>
    %183 = vector.shape_cast %182 : vector<64xf32> to vector<1x1x64xf32>
    %184 = vector.broadcast %183 : vector<1x1x64xf32> to vector<4x4x64xf32>
    %185 = arith.mulf %180, %184 : vector<4x4x64xf32>
    %186 = arith.addf %179, %185 : vector<4x4x64xf32>
    %187 = vector.extract_strided_slice %165 {offsets = [3, 0, 0], sizes = [4, 4, 64], strides = [1, 1, 1]} : vector<10x4x64xf32> to vector<4x4x64xf32>
    %188 = vector.extract_strided_slice %13 {offsets = [3, 3, 0], sizes = [1, 1, 64], strides = [1, 1, 1]} : vector<7x7x64xf32> to vector<1x1x64xf32>
    %189 = vector.shape_cast %188 : vector<1x1x64xf32> to vector<64xf32>
    %190 = vector.shape_cast %189 : vector<64xf32> to vector<1x1x64xf32>
    %191 = vector.broadcast %190 : vector<1x1x64xf32> to vector<4x4x64xf32>
    %192 = arith.mulf %187, %191 : vector<4x4x64xf32>
    %193 = arith.addf %186, %192 : vector<4x4x64xf32>
    %194 = vector.extract_strided_slice %165 {offsets = [4, 0, 0], sizes = [4, 4, 64], strides = [1, 1, 1]} : vector<10x4x64xf32> to vector<4x4x64xf32>
    %195 = vector.extract_strided_slice %13 {offsets = [4, 3, 0], sizes = [1, 1, 64], strides = [1, 1, 1]} : vector<7x7x64xf32> to vector<1x1x64xf32>
    %196 = vector.shape_cast %195 : vector<1x1x64xf32> to vector<64xf32>
    %197 = vector.shape_cast %196 : vector<64xf32> to vector<1x1x64xf32>
    %198 = vector.broadcast %197 : vector<1x1x64xf32> to vector<4x4x64xf32>
    %199 = arith.mulf %194, %198 : vector<4x4x64xf32>
    %200 = arith.addf %193, %199 : vector<4x4x64xf32>
    %201 = vector.extract_strided_slice %165 {offsets = [5, 0, 0], sizes = [4, 4, 64], strides = [1, 1, 1]} : vector<10x4x64xf32> to vector<4x4x64xf32>
    %202 = vector.extract_strided_slice %13 {offsets = [5, 3, 0], sizes = [1, 1, 64], strides = [1, 1, 1]} : vector<7x7x64xf32> to vector<1x1x64xf32>
    %203 = vector.shape_cast %202 : vector<1x1x64xf32> to vector<64xf32>
    %204 = vector.shape_cast %203 : vector<64xf32> to vector<1x1x64xf32>
    %205 = vector.broadcast %204 : vector<1x1x64xf32> to vector<4x4x64xf32>
    %206 = arith.mulf %201, %205 : vector<4x4x64xf32>
    %207 = arith.addf %200, %206 : vector<4x4x64xf32>
    %208 = vector.extract_strided_slice %165 {offsets = [6, 0, 0], sizes = [4, 4, 64], strides = [1, 1, 1]} : vector<10x4x64xf32> to vector<4x4x64xf32>
    %209 = vector.extract_strided_slice %13 {offsets = [6, 3, 0], sizes = [1, 1, 64], strides = [1, 1, 1]} : vector<7x7x64xf32> to vector<1x1x64xf32>
    %210 = vector.shape_cast %209 : vector<1x1x64xf32> to vector<64xf32>
    %211 = vector.shape_cast %210 : vector<64xf32> to vector<1x1x64xf32>
    %212 = vector.broadcast %211 : vector<1x1x64xf32> to vector<4x4x64xf32>
    %213 = arith.mulf %208, %212 : vector<4x4x64xf32>
    %214 = arith.addf %207, %213 : vector<4x4x64xf32>
    %215 = vector.extract_strided_slice %12 {offsets = [0, 9, 0], sizes = [10, 4, 64], strides = [1, 1, 1]} : vector<10x16x64xf32> to vector<10x4x64xf32>
    %216 = vector.extract_strided_slice %215 {offsets = [0, 0, 0], sizes = [4, 4, 64], strides = [1, 1, 1]} : vector<10x4x64xf32> to vector<4x4x64xf32>
    %217 = vector.extract_strided_slice %13 {offsets = [0, 4, 0], sizes = [1, 1, 64], strides = [1, 1, 1]} : vector<7x7x64xf32> to vector<1x1x64xf32>
    %218 = vector.shape_cast %217 : vector<1x1x64xf32> to vector<64xf32>
    %219 = vector.shape_cast %218 : vector<64xf32> to vector<1x1x64xf32>
    %220 = vector.broadcast %219 : vector<1x1x64xf32> to vector<4x4x64xf32>
    %221 = arith.mulf %216, %220 : vector<4x4x64xf32>
    %222 = arith.addf %214, %221 : vector<4x4x64xf32>
    %223 = vector.extract_strided_slice %215 {offsets = [1, 0, 0], sizes = [4, 4, 64], strides = [1, 1, 1]} : vector<10x4x64xf32> to vector<4x4x64xf32>
    %224 = vector.extract_strided_slice %13 {offsets = [1, 4, 0], sizes = [1, 1, 64], strides = [1, 1, 1]} : vector<7x7x64xf32> to vector<1x1x64xf32>
    %225 = vector.shape_cast %224 : vector<1x1x64xf32> to vector<64xf32>
    %226 = vector.shape_cast %225 : vector<64xf32> to vector<1x1x64xf32>
    %227 = vector.broadcast %226 : vector<1x1x64xf32> to vector<4x4x64xf32>
    %228 = arith.mulf %223, %227 : vector<4x4x64xf32>
    %229 = arith.addf %222, %228 : vector<4x4x64xf32>
    %230 = vector.extract_strided_slice %215 {offsets = [2, 0, 0], sizes = [4, 4, 64], strides = [1, 1, 1]} : vector<10x4x64xf32> to vector<4x4x64xf32>
    %231 = vector.extract_strided_slice %13 {offsets = [2, 4, 0], sizes = [1, 1, 64], strides = [1, 1, 1]} : vector<7x7x64xf32> to vector<1x1x64xf32>
    %232 = vector.shape_cast %231 : vector<1x1x64xf32> to vector<64xf32>
    %233 = vector.shape_cast %232 : vector<64xf32> to vector<1x1x64xf32>
    %234 = vector.broadcast %233 : vector<1x1x64xf32> to vector<4x4x64xf32>
    %235 = arith.mulf %230, %234 : vector<4x4x64xf32>
    %236 = arith.addf %229, %235 : vector<4x4x64xf32>
    %237 = vector.extract_strided_slice %215 {offsets = [3, 0, 0], sizes = [4, 4, 64], strides = [1, 1, 1]} : vector<10x4x64xf32> to vector<4x4x64xf32>
    %238 = vector.extract_strided_slice %13 {offsets = [3, 4, 0], sizes = [1, 1, 64], strides = [1, 1, 1]} : vector<7x7x64xf32> to vector<1x1x64xf32>
    %239 = vector.shape_cast %238 : vector<1x1x64xf32> to vector<64xf32>
    %240 = vector.shape_cast %239 : vector<64xf32> to vector<1x1x64xf32>
    %241 = vector.broadcast %240 : vector<1x1x64xf32> to vector<4x4x64xf32>
    %242 = arith.mulf %237, %241 : vector<4x4x64xf32>
    %243 = arith.addf %236, %242 : vector<4x4x64xf32>
    %244 = vector.extract_strided_slice %215 {offsets = [4, 0, 0], sizes = [4, 4, 64], strides = [1, 1, 1]} : vector<10x4x64xf32> to vector<4x4x64xf32>
    %245 = vector.extract_strided_slice %13 {offsets = [4, 4, 0], sizes = [1, 1, 64], strides = [1, 1, 1]} : vector<7x7x64xf32> to vector<1x1x64xf32>
    %246 = vector.shape_cast %245 : vector<1x1x64xf32> to vector<64xf32>
    %247 = vector.shape_cast %246 : vector<64xf32> to vector<1x1x64xf32>
    %248 = vector.broadcast %247 : vector<1x1x64xf32> to vector<4x4x64xf32>
    %249 = arith.mulf %244, %248 : vector<4x4x64xf32>
    %250 = arith.addf %243, %249 : vector<4x4x64xf32>
    %251 = vector.extract_strided_slice %215 {offsets = [5, 0, 0], sizes = [4, 4, 64], strides = [1, 1, 1]} : vector<10x4x64xf32> to vector<4x4x64xf32>
    %252 = vector.extract_strided_slice %13 {offsets = [5, 4, 0], sizes = [1, 1, 64], strides = [1, 1, 1]} : vector<7x7x64xf32> to vector<1x1x64xf32>
    %253 = vector.shape_cast %252 : vector<1x1x64xf32> to vector<64xf32>
    %254 = vector.shape_cast %253 : vector<64xf32> to vector<1x1x64xf32>
    %255 = vector.broadcast %254 : vector<1x1x64xf32> to vector<4x4x64xf32>
    %256 = arith.mulf %251, %255 : vector<4x4x64xf32>
    %257 = arith.addf %250, %256 : vector<4x4x64xf32>
    %258 = vector.extract_strided_slice %215 {offsets = [6, 0, 0], sizes = [4, 4, 64], strides = [1, 1, 1]} : vector<10x4x64xf32> to vector<4x4x64xf32>
    %259 = vector.extract_strided_slice %13 {offsets = [6, 4, 0], sizes = [1, 1, 64], strides = [1, 1, 1]} : vector<7x7x64xf32> to vector<1x1x64xf32>
    %260 = vector.shape_cast %259 : vector<1x1x64xf32> to vector<64xf32>
    %261 = vector.shape_cast %260 : vector<64xf32> to vector<1x1x64xf32>
    %262 = vector.broadcast %261 : vector<1x1x64xf32> to vector<4x4x64xf32>
    %263 = arith.mulf %258, %262 : vector<4x4x64xf32>
    %264 = arith.addf %257, %263 : vector<4x4x64xf32>
    %265 = vector.extract_strided_slice %12 {offsets = [0, 10, 0], sizes = [10, 4, 64], strides = [1, 1, 1]} : vector<10x16x64xf32> to vector<10x4x64xf32>
    %266 = vector.extract_strided_slice %265 {offsets = [0, 0, 0], sizes = [4, 4, 64], strides = [1, 1, 1]} : vector<10x4x64xf32> to vector<4x4x64xf32>
    %267 = vector.extract_strided_slice %13 {offsets = [0, 5, 0], sizes = [1, 1, 64], strides = [1, 1, 1]} : vector<7x7x64xf32> to vector<1x1x64xf32>
    %268 = vector.shape_cast %267 : vector<1x1x64xf32> to vector<64xf32>
    %269 = vector.shape_cast %268 : vector<64xf32> to vector<1x1x64xf32>
    %270 = vector.broadcast %269 : vector<1x1x64xf32> to vector<4x4x64xf32>
    %271 = arith.mulf %266, %270 : vector<4x4x64xf32>
    %272 = arith.addf %264, %271 : vector<4x4x64xf32>
    %273 = vector.extract_strided_slice %265 {offsets = [1, 0, 0], sizes = [4, 4, 64], strides = [1, 1, 1]} : vector<10x4x64xf32> to vector<4x4x64xf32>
    %274 = vector.extract_strided_slice %13 {offsets = [1, 5, 0], sizes = [1, 1, 64], strides = [1, 1, 1]} : vector<7x7x64xf32> to vector<1x1x64xf32>
    %275 = vector.shape_cast %274 : vector<1x1x64xf32> to vector<64xf32>
    %276 = vector.shape_cast %275 : vector<64xf32> to vector<1x1x64xf32>
    %277 = vector.broadcast %276 : vector<1x1x64xf32> to vector<4x4x64xf32>
    %278 = arith.mulf %273, %277 : vector<4x4x64xf32>
    %279 = arith.addf %272, %278 : vector<4x4x64xf32>
    %280 = vector.extract_strided_slice %265 {offsets = [2, 0, 0], sizes = [4, 4, 64], strides = [1, 1, 1]} : vector<10x4x64xf32> to vector<4x4x64xf32>
    %281 = vector.extract_strided_slice %13 {offsets = [2, 5, 0], sizes = [1, 1, 64], strides = [1, 1, 1]} : vector<7x7x64xf32> to vector<1x1x64xf32>
    %282 = vector.shape_cast %281 : vector<1x1x64xf32> to vector<64xf32>
    %283 = vector.shape_cast %282 : vector<64xf32> to vector<1x1x64xf32>
    %284 = vector.broadcast %283 : vector<1x1x64xf32> to vector<4x4x64xf32>
    %285 = arith.mulf %280, %284 : vector<4x4x64xf32>
    %286 = arith.addf %279, %285 : vector<4x4x64xf32>
    %287 = vector.extract_strided_slice %265 {offsets = [3, 0, 0], sizes = [4, 4, 64], strides = [1, 1, 1]} : vector<10x4x64xf32> to vector<4x4x64xf32>
    %288 = vector.extract_strided_slice %13 {offsets = [3, 5, 0], sizes = [1, 1, 64], strides = [1, 1, 1]} : vector<7x7x64xf32> to vector<1x1x64xf32>
    %289 = vector.shape_cast %288 : vector<1x1x64xf32> to vector<64xf32>
    %290 = vector.shape_cast %289 : vector<64xf32> to vector<1x1x64xf32>
    %291 = vector.broadcast %290 : vector<1x1x64xf32> to vector<4x4x64xf32>
    %292 = arith.mulf %287, %291 : vector<4x4x64xf32>
    %293 = arith.addf %286, %292 : vector<4x4x64xf32>
    %294 = vector.extract_strided_slice %265 {offsets = [4, 0, 0], sizes = [4, 4, 64], strides = [1, 1, 1]} : vector<10x4x64xf32> to vector<4x4x64xf32>
    %295 = vector.extract_strided_slice %13 {offsets = [4, 5, 0], sizes = [1, 1, 64], strides = [1, 1, 1]} : vector<7x7x64xf32> to vector<1x1x64xf32>
    %296 = vector.shape_cast %295 : vector<1x1x64xf32> to vector<64xf32>
    %297 = vector.shape_cast %296 : vector<64xf32> to vector<1x1x64xf32>
    %298 = vector.broadcast %297 : vector<1x1x64xf32> to vector<4x4x64xf32>
    %299 = arith.mulf %294, %298 : vector<4x4x64xf32>
    %300 = arith.addf %293, %299 : vector<4x4x64xf32>
    %301 = vector.extract_strided_slice %265 {offsets = [5, 0, 0], sizes = [4, 4, 64], strides = [1, 1, 1]} : vector<10x4x64xf32> to vector<4x4x64xf32>
    %302 = vector.extract_strided_slice %13 {offsets = [5, 5, 0], sizes = [1, 1, 64], strides = [1, 1, 1]} : vector<7x7x64xf32> to vector<1x1x64xf32>
    %303 = vector.shape_cast %302 : vector<1x1x64xf32> to vector<64xf32>
    %304 = vector.shape_cast %303 : vector<64xf32> to vector<1x1x64xf32>
    %305 = vector.broadcast %304 : vector<1x1x64xf32> to vector<4x4x64xf32>
    %306 = arith.mulf %301, %305 : vector<4x4x64xf32>
    %307 = arith.addf %300, %306 : vector<4x4x64xf32>
    %308 = vector.extract_strided_slice %265 {offsets = [6, 0, 0], sizes = [4, 4, 64], strides = [1, 1, 1]} : vector<10x4x64xf32> to vector<4x4x64xf32>
    %309 = vector.extract_strided_slice %13 {offsets = [6, 5, 0], sizes = [1, 1, 64], strides = [1, 1, 1]} : vector<7x7x64xf32> to vector<1x1x64xf32>
    %310 = vector.shape_cast %309 : vector<1x1x64xf32> to vector<64xf32>
    %311 = vector.shape_cast %310 : vector<64xf32> to vector<1x1x64xf32>
    %312 = vector.broadcast %311 : vector<1x1x64xf32> to vector<4x4x64xf32>
    %313 = arith.mulf %308, %312 : vector<4x4x64xf32>
    %314 = arith.addf %307, %313 : vector<4x4x64xf32>
    %315 = vector.extract_strided_slice %12 {offsets = [0, 11, 0], sizes = [10, 4, 64], strides = [1, 1, 1]} : vector<10x16x64xf32> to vector<10x4x64xf32>
    %316 = vector.extract_strided_slice %315 {offsets = [0, 0, 0], sizes = [4, 4, 64], strides = [1, 1, 1]} : vector<10x4x64xf32> to vector<4x4x64xf32>
    %317 = vector.extract_strided_slice %13 {offsets = [0, 6, 0], sizes = [1, 1, 64], strides = [1, 1, 1]} : vector<7x7x64xf32> to vector<1x1x64xf32>
    %318 = vector.shape_cast %317 : vector<1x1x64xf32> to vector<64xf32>
    %319 = vector.shape_cast %318 : vector<64xf32> to vector<1x1x64xf32>
    %320 = vector.broadcast %319 : vector<1x1x64xf32> to vector<4x4x64xf32>
    %321 = arith.mulf %316, %320 : vector<4x4x64xf32>
    %322 = arith.addf %314, %321 : vector<4x4x64xf32>
    %323 = vector.extract_strided_slice %315 {offsets = [1, 0, 0], sizes = [4, 4, 64], strides = [1, 1, 1]} : vector<10x4x64xf32> to vector<4x4x64xf32>
    %324 = vector.extract_strided_slice %13 {offsets = [1, 6, 0], sizes = [1, 1, 64], strides = [1, 1, 1]} : vector<7x7x64xf32> to vector<1x1x64xf32>
    %325 = vector.shape_cast %324 : vector<1x1x64xf32> to vector<64xf32>
    %326 = vector.shape_cast %325 : vector<64xf32> to vector<1x1x64xf32>
    %327 = vector.broadcast %326 : vector<1x1x64xf32> to vector<4x4x64xf32>
    %328 = arith.mulf %323, %327 : vector<4x4x64xf32>
    %329 = arith.addf %322, %328 : vector<4x4x64xf32>
    %330 = vector.extract_strided_slice %315 {offsets = [2, 0, 0], sizes = [4, 4, 64], strides = [1, 1, 1]} : vector<10x4x64xf32> to vector<4x4x64xf32>
    %331 = vector.extract_strided_slice %13 {offsets = [2, 6, 0], sizes = [1, 1, 64], strides = [1, 1, 1]} : vector<7x7x64xf32> to vector<1x1x64xf32>
    %332 = vector.shape_cast %331 : vector<1x1x64xf32> to vector<64xf32>
    %333 = vector.shape_cast %332 : vector<64xf32> to vector<1x1x64xf32>
    %334 = vector.broadcast %333 : vector<1x1x64xf32> to vector<4x4x64xf32>
    %335 = arith.mulf %330, %334 : vector<4x4x64xf32>
    %336 = arith.addf %329, %335 : vector<4x4x64xf32>
    %337 = vector.extract_strided_slice %315 {offsets = [3, 0, 0], sizes = [4, 4, 64], strides = [1, 1, 1]} : vector<10x4x64xf32> to vector<4x4x64xf32>
    %338 = vector.extract_strided_slice %13 {offsets = [3, 6, 0], sizes = [1, 1, 64], strides = [1, 1, 1]} : vector<7x7x64xf32> to vector<1x1x64xf32>
    %339 = vector.shape_cast %338 : vector<1x1x64xf32> to vector<64xf32>
    %340 = vector.shape_cast %339 : vector<64xf32> to vector<1x1x64xf32>
    %341 = vector.broadcast %340 : vector<1x1x64xf32> to vector<4x4x64xf32>
    %342 = arith.mulf %337, %341 : vector<4x4x64xf32>
    %343 = arith.addf %336, %342 : vector<4x4x64xf32>
    %344 = vector.extract_strided_slice %315 {offsets = [4, 0, 0], sizes = [4, 4, 64], strides = [1, 1, 1]} : vector<10x4x64xf32> to vector<4x4x64xf32>
    %345 = vector.extract_strided_slice %13 {offsets = [4, 6, 0], sizes = [1, 1, 64], strides = [1, 1, 1]} : vector<7x7x64xf32> to vector<1x1x64xf32>
    %346 = vector.shape_cast %345 : vector<1x1x64xf32> to vector<64xf32>
    %347 = vector.shape_cast %346 : vector<64xf32> to vector<1x1x64xf32>
    %348 = vector.broadcast %347 : vector<1x1x64xf32> to vector<4x4x64xf32>
    %349 = arith.mulf %344, %348 : vector<4x4x64xf32>
    %350 = arith.addf %343, %349 : vector<4x4x64xf32>
    %351 = vector.extract_strided_slice %315 {offsets = [5, 0, 0], sizes = [4, 4, 64], strides = [1, 1, 1]} : vector<10x4x64xf32> to vector<4x4x64xf32>
    %352 = vector.extract_strided_slice %13 {offsets = [5, 6, 0], sizes = [1, 1, 64], strides = [1, 1, 1]} : vector<7x7x64xf32> to vector<1x1x64xf32>
    %353 = vector.shape_cast %352 : vector<1x1x64xf32> to vector<64xf32>
    %354 = vector.shape_cast %353 : vector<64xf32> to vector<1x1x64xf32>
    %355 = vector.broadcast %354 : vector<1x1x64xf32> to vector<4x4x64xf32>
    %356 = arith.mulf %351, %355 : vector<4x4x64xf32>
    %357 = arith.addf %350, %356 : vector<4x4x64xf32>
    %358 = vector.extract_strided_slice %315 {offsets = [6, 0, 0], sizes = [4, 4, 64], strides = [1, 1, 1]} : vector<10x4x64xf32> to vector<4x4x64xf32>
    %359 = vector.extract_strided_slice %13 {offsets = [6, 6, 0], sizes = [1, 1, 64], strides = [1, 1, 1]} : vector<7x7x64xf32> to vector<1x1x64xf32>
    %360 = vector.shape_cast %359 : vector<1x1x64xf32> to vector<64xf32>
    %361 = vector.shape_cast %360 : vector<64xf32> to vector<1x1x64xf32>
    %362 = vector.broadcast %361 : vector<1x1x64xf32> to vector<4x4x64xf32>
    %363 = arith.mulf %358, %362 : vector<4x4x64xf32>
    %364 = arith.addf %357, %363 : vector<4x4x64xf32>
    %365 = vector.shape_cast %364 : vector<4x4x64xf32> to vector<16x64xf32>
    %c0_24 = arith.constant 0 : index
    %c0_25 = arith.constant 0 : index
    %366 = vector.load %arg3[%c0_24, %c0_25] : memref<1x64xf32, #tpu.memory_space<vmem>>, vector<1x64xf32>
    %367 = vector.broadcast %366 : vector<1x64xf32> to vector<16x64xf32>
    %368 = arith.addf %365, %367 : vector<16x64xf32>
    %cst_26 = arith.constant dense<0.000000e+00> : vector<16xf32>
    %369 = vector.multi_reduction <add>, %368, %cst_26 [1] : vector<16x64xf32> to vector<16xf32>
    %370 = vector.shape_cast %369 : vector<16xf32> to vector<16x1xf32>
    %cst_27 = arith.constant 6.400000e+01 : f32
    %371 = vector.broadcast %cst_27 : f32 to vector<16x1xf32>
    %372 = arith.divf %370, %371 : vector<16x1xf32>
    %373 = vector.broadcast %372 : vector<16x1xf32> to vector<16x64xf32>
    %374 = arith.subf %368, %373 : vector<16x64xf32>
    %375 = arith.mulf %374, %374 : vector<16x64xf32>
    %cst_28 = arith.constant dense<0.000000e+00> : vector<16xf32>
    %376 = vector.multi_reduction <add>, %375, %cst_28 [1] : vector<16x64xf32> to vector<16xf32>
    %377 = vector.shape_cast %376 : vector<16xf32> to vector<16x1xf32>
    %cst_29 = arith.constant 6.400000e+01 : f32
    %378 = vector.broadcast %cst_29 : f32 to vector<16x1xf32>
    %379 = arith.divf %377, %378 : vector<16x1xf32>
    %380 = vector.broadcast %372 : vector<16x1xf32> to vector<16x64xf32>
    %381 = arith.subf %368, %380 : vector<16x64xf32>
    %cst_30 = arith.constant 9.99999997E-7 : f32
    %382 = vector.broadcast %cst_30 : f32 to vector<16x1xf32>
    %383 = arith.addf %379, %382 : vector<16x1xf32>
    %384 = math.rsqrt %383 : vector<16x1xf32>
    %385 = vector.broadcast %384 : vector<16x1xf32> to vector<16x64xf32>
    %386 = arith.mulf %381, %385 : vector<16x64xf32>
    %c0_31 = arith.constant 0 : index
    %c0_32 = arith.constant 0 : index
    %387 = vector.load %arg4[%c0_31, %c0_32] : memref<1x64xf32, #tpu.memory_space<vmem>>, vector<1x64xf32>
    %388 = vector.broadcast %387 : vector<1x64xf32> to vector<16x64xf32>
    %389 = arith.mulf %386, %388 : vector<16x64xf32>
    %c0_33 = arith.constant 0 : index
    %c0_34 = arith.constant 0 : index
    %390 = vector.load %arg5[%c0_33, %c0_34] : memref<1x64xf32, #tpu.memory_space<vmem>>, vector<1x64xf32>
    %391 = vector.broadcast %390 : vector<1x64xf32> to vector<16x64xf32>
    %392 = arith.addf %389, %391 : vector<16x64xf32>
    %393 = arith.truncf %392 : vector<16x64xf32> to vector<16x64xbf16>
    %c0_35 = arith.constant 0 : index
    %c0_36 = arith.constant 0 : index
    %394 = vector.load %arg6[%c0_35, %c0_36] : memref<64x256xbf16, #tpu.memory_space<vmem>>, vector<64x256xbf16>
    %cst_37 = arith.constant dense<0.000000e+00> : vector<16x256xf32>
    %395 = tpu.matmul %393, %394, %cst_37 {dimension_numbers = #tpu.dot_dimension_numbers<[1], [0], [0], [1], [0, 0, 1, 1], [], []>} : vector<16x64xbf16>, vector<64x256xbf16>, vector<16x256xf32> -> vector<16x256xf32>
    %c0_38 = arith.constant 0 : index
    %c0_39 = arith.constant 0 : index
    %396 = vector.load %arg7[%c0_38, %c0_39] : memref<1x256xf32, #tpu.memory_space<vmem>>, vector<1x256xf32>
    %397 = vector.broadcast %396 : vector<1x256xf32> to vector<16x256xf32>
    %398 = arith.addf %395, %397 : vector<16x256xf32>
    %399 = arith.mulf %398, %398 : vector<16x256xf32>
    %400 = arith.mulf %398, %399 : vector<16x256xf32>
    %cst_40 = arith.constant 4.471500e-02 : f32
    %401 = vector.broadcast %cst_40 : f32 to vector<16x256xf32>
    %402 = arith.mulf %401, %400 : vector<16x256xf32>
    %403 = arith.addf %398, %402 : vector<16x256xf32>
    %cst_41 = arith.constant 0.797884583 : f32
    %404 = vector.broadcast %cst_41 : f32 to vector<16x256xf32>
    %405 = arith.mulf %404, %403 : vector<16x256xf32>
    %406 = math.tanh %405 : vector<16x256xf32>
    %cst_42 = arith.constant 1.000000e+00 : f32
    %407 = vector.broadcast %cst_42 : f32 to vector<16x256xf32>
    %408 = arith.addf %407, %406 : vector<16x256xf32>
    %cst_43 = arith.constant 5.000000e-01 : f32
    %409 = vector.broadcast %cst_43 : f32 to vector<16x256xf32>
    %410 = arith.mulf %409, %408 : vector<16x256xf32>
    %411 = arith.mulf %398, %410 : vector<16x256xf32>
    %412 = arith.mulf %411, %411 : vector<16x256xf32>
    %cst_44 = arith.constant dense<0.000000e+00> : vector<256xf32>
    %413 = vector.multi_reduction <add>, %412, %cst_44 [0] : vector<16x256xf32> to vector<256xf32>
    %414 = vector.shape_cast %413 : vector<256xf32> to vector<1x256xf32>
    %415 = math.sqrt %414 : vector<1x256xf32>
    %cst_45 = arith.constant dense<0.000000e+00> : vector<1xf32>
    %416 = vector.multi_reduction <add>, %415, %cst_45 [1] : vector<1x256xf32> to vector<1xf32>
    %417 = vector.shape_cast %416 : vector<1xf32> to vector<1x1xf32>
    %cst_46 = arith.constant 2.560000e+02 : f32
    %418 = vector.broadcast %cst_46 : f32 to vector<1x1xf32>
    %419 = arith.divf %417, %418 : vector<1x1xf32>
    %cst_47 = arith.constant 9.99999997E-7 : f32
    %420 = vector.broadcast %cst_47 : f32 to vector<1x1xf32>
    %421 = arith.addf %419, %420 : vector<1x1xf32>
    %422 = vector.broadcast %421 : vector<1x1xf32> to vector<1x256xf32>
    %423 = arith.divf %415, %422 : vector<1x256xf32>
    %c0_48 = arith.constant 0 : index
    %c0_49 = arith.constant 0 : index
    %424 = vector.load %arg8[%c0_48, %c0_49] : memref<1x256xf32, #tpu.memory_space<vmem>>, vector<1x256xf32>
    %425 = vector.broadcast %423 : vector<1x256xf32> to vector<16x256xf32>
    %426 = arith.mulf %411, %425 : vector<16x256xf32>
    %427 = vector.broadcast %424 : vector<1x256xf32> to vector<16x256xf32>
    %428 = arith.mulf %427, %426 : vector<16x256xf32>
    %c0_50 = arith.constant 0 : index
    %c0_51 = arith.constant 0 : index
    %429 = vector.load %arg9[%c0_50, %c0_51] : memref<1x256xf32, #tpu.memory_space<vmem>>, vector<1x256xf32>
    %430 = vector.broadcast %429 : vector<1x256xf32> to vector<16x256xf32>
    %431 = arith.addf %428, %430 : vector<16x256xf32>
    %432 = arith.addf %431, %411 : vector<16x256xf32>
    %433 = arith.truncf %432 : vector<16x256xf32> to vector<16x256xbf16>
    %c0_52 = arith.constant 0 : index
    %c0_53 = arith.constant 0 : index
    %434 = vector.load %arg10[%c0_52, %c0_53] : memref<256x64xbf16, #tpu.memory_space<vmem>>, vector<256x64xbf16>
    %cst_54 = arith.constant dense<0.000000e+00> : vector<16x64xf32>
    %435 = tpu.matmul %433, %434, %cst_54 {dimension_numbers = #tpu.dot_dimension_numbers<[1], [0], [0], [1], [0, 0, 1, 1], [], []>} : vector<16x256xbf16>, vector<256x64xbf16>, vector<16x64xf32> -> vector<16x64xf32>
    %c0_55 = arith.constant 0 : index
    %c0_56 = arith.constant 0 : index
    %436 = vector.load %arg11[%c0_55, %c0_56] : memref<1x64xf32, #tpu.memory_space<vmem>>, vector<1x64xf32>
    %437 = vector.broadcast %436 : vector<1x64xf32> to vector<16x64xf32>
    %438 = arith.addf %435, %437 : vector<16x64xf32>
    %439 = arith.extf %1 : vector<4x4x64xbf16> to vector<4x4x64xf32>
    %440 = vector.shape_cast %439 : vector<4x4x64xf32> to vector<16x64xf32>
    %441 = arith.addf %438, %440 : vector<16x64xf32>
    %442 = vector.shape_cast %441 : vector<16x64xf32> to vector<1x4x4x64xf32>
    %443 = arith.truncf %442 : vector<1x4x4x64xf32> to vector<1x4x4x64xbf16>
    %c0_57 = arith.constant 0 : index
    %c0_58 = arith.constant 0 : index
    %c0_59 = arith.constant 0 : index
    %c0_60 = arith.constant 0 : index
    %444 = vector.load %arg12[%c0_57, %c0_58, %c0_59, %c0_60] : memref<1x4x4x64xbf16, #tpu.memory_space<vmem>>, vector<1x4x4x64xbf16>
    tpu.vector_store %arg12[%c0_57, %c0_58, %c0_59, %c0_60], %443 {strides = array<i32>} : memref<1x4x4x64xbf16, #tpu.memory_space<vmem>>, vector<1x4x4x64xbf16>,
    return
  }
  func.func @transform_0(%arg0: i32) -> (i32, i32, i32, i32) {
    %c0_i32 = arith.constant 0 : i32
    %c0_i32_0 = arith.constant 0 : i32
    %c0_i32_1 = arith.constant 0 : i32
    %c0_i32_2 = arith.constant 0 : i32
    return %arg0, %c0_i32, %c0_i32_0, %c0_i32_1 : i32, i32, i32, i32
  }
  func.func @transform_1(%arg0: i32) -> (i32, i32, i32) {
    %c0_i32 = arith.constant 0 : i32
    %c0_i32_0 = arith.constant 0 : i32
    %c0_i32_1 = arith.constant 0 : i32
    %c0_i32_2 = arith.constant 0 : i32
    return %c0_i32, %c0_i32_0, %c0_i32_1 : i32, i32, i32
  }
  func.func @transform_2(%arg0: i32) -> (i32, i32) {
    %c0_i32 = arith.constant 0 : i32
    %c0_i32_0 = arith.constant 0 : i32
    %c0_i32_1 = arith.constant 0 : i32
    return %c0_i32, %c0_i32_0 : i32, i32
  }
  func.func @transform_3(%arg0: i32) -> (i32, i32) {
    %c0_i32 = arith.constant 0 : i32
    %c0_i32_0 = arith.constant 0 : i32
    %c0_i32_1 = arith.constant 0 : i32
    return %c0_i32, %c0_i32_0 : i32, i32
  }
  func.func @transform_4(%arg0: i32) -> (i32, i32) {
    %c0_i32 = arith.constant 0 : i32
    %c0_i32_0 = arith.constant 0 : i32
    %c0_i32_1 = arith.constant 0 : i32
    return %c0_i32, %c0_i32_0 : i32, i32
  }
  func.func @transform_5(%arg0: i32) -> (i32, i32) {
    %c0_i32 = arith.constant 0 : i32
    %c0_i32_0 = arith.constant 0 : i32
    %c0_i32_1 = arith.constant 0 : i32
    return %c0_i32, %c0_i32_0 : i32, i32
  }
  func.func @transform_6(%arg0: i32) -> (i32, i32) {
    %c0_i32 = arith.constant 0 : i32
    %c0_i32_0 = arith.constant 0 : i32
    %c0_i32_1 = arith.constant 0 : i32
    return %c0_i32, %c0_i32_0 : i32, i32
  }
  func.func @transform_7(%arg0: i32) -> (i32, i32) {
    %c0_i32 = arith.constant 0 : i32
    %c0_i32_0 = arith.constant 0 : i32
    %c0_i32_1 = arith.constant 0 : i32
    return %c0_i32, %c0_i32_0 : i32, i32
  }
  func.func @transform_8(%arg0: i32) -> (i32, i32) {
    %c0_i32 = arith.constant 0 : i32
    %c0_i32_0 = arith.constant 0 : i32
    %c0_i32_1 = arith.constant 0 : i32
    return %c0_i32, %c0_i32_0 : i32, i32
  }
  func.func @transform_9(%arg0: i32) -> (i32, i32) {
    %c0_i32 = arith.constant 0 : i32
    %c0_i32_0 = arith.constant 0 : i32
    %c0_i32_1 = arith.constant 0 : i32
    return %c0_i32, %c0_i32_0 : i32, i32
  }
  func.func @transform_10(%arg0: i32) -> (i32, i32) {
    %c0_i32 = arith.constant 0 : i32
    %c0_i32_0 = arith.constant 0 : i32
    %c0_i32_1 = arith.constant 0 : i32
    return %c0_i32, %c0_i32_0 : i32, i32
  }
  func.func @transform_11(%arg0: i32) -> (i32, i32, i32, i32) {
    %c0_i32 = arith.constant 0 : i32
    %c0_i32_0 = arith.constant 0 : i32
    %c0_i32_1 = arith.constant 0 : i32
    %c0_i32_2 = arith.constant 0 : i32
    return %arg0, %c0_i32, %c0_i32_0, %c0_i32_1 : i32, i32, i32, i32
  }
}

</mosaic_0001>

<bundles_post_ra>
// kernel: convnext_forward.6
= control target key start
LH: loop header
LB: loop body
LE: loop exit
PB: predicated region body
PF: predicated region fallthrough
CT: control target
= control target key end

     0   :  { %vm108_vm0 = vcmask 392192   ;;  %vm230_vm1 = vcmask 261120   ;;  %vm550_vm2 = vcmask 257024   ;;  %s1063_s1 = inlined_call_operand.vmem [shape: bf16[48,32], index: 1, kind: input, shape index: {}]   ;;  %s1064_s0 = inlined_call_operand.vmem [shape: bf16[128,48], index: 0, kind: input, shape index: {}]   ;;  %s1065_s2 = inlined_call_operand.vmem [shape: f32[1,32], index: 2, kind: input, shape index: {}]   ;;  %s1066_s3 = inlined_call_operand.vmem [shape: f32[1,32], index: 3, kind: input, shape index: {}]   ;;  %s1067_s4 = inlined_call_operand.vmem [shape: f32[1,32], index: 4, kind: input, shape index: {}]   ;;  %s1068_s5 = inlined_call_operand.vmem [shape: bf16[128,32], index: 5, kind: output, shape index: {}]  }
   0x1   :  { %v664_v0 = vld [vmem:[%s1063_s1] sm:$0xff]   ;;  %v665_v1 = vld [vmem:[%s1063_s1 + $0x8] sm:$0xff]   ;;  %v666_v2 = vld [vmem:[%s1063_s1 + $0x10] sm:$0xff]  }
   0x2   :  { %636 = vmatprep.subr.bf16.mxu0 %v664_v0  ;;  %658 = vmatprep.subr.bf16.mxu1 %v664_v0  ;;  %v667_v3 = vld [vmem:[%s1064_s0] sm:$0xff]   ;;  %v669_v5 = vld [vmem:[%s1064_s0 + $0x8] sm:$0xff]   ;;  %v671_v7 = vld [vmem:[%s1064_s0 + $0x10] sm:$0xff]  }
   0x3   :  { %637 = vmatpush3.bf16.msra.mxu0 %v664_v0  ;;  %661 = vmatpush3.bf16.msra.mxu1 %v664_v0  ;;  %v668_v4 = vld [vmem:[%s1064_s0 + $0x20] sm:$0xff]   ;;  %v670_v6 = vld [vmem:[%s1064_s0 + $0x28] sm:$0xff]   ;;  %v673_v8 = vld [vmem:[%s1064_s0 + $0x30] sm:$0xff]  }
   0x4   :  { %638 = vmatprep.subr.bf16.mxu0 %v665_v1  ;;  %659 = vmatprep.subr.bf16.mxu1 %v665_v1  ;;  %v672_v9 = vld [vmem:[%s1064_s0 + $0x18] sm:$0xff]   ;;  %v571_v11 = vld [vmem:[%s1065_s2] ss:$0 sm:$0xff] }
   0x5   :  { %642 = vmatprep.mubr.msk.bf16.mxu0 %vm108_vm0, %v667_v3  ;;  %650 = vmatprep.mubr.msk.bf16.mxu1 %vm108_vm0, %v668_v4  ;;  %v674_v10 = vld [vmem:[%s1064_s0 + $0x38] sm:$0xff]  }
   0x7   :  { %639 = vmatpush3.bf16.msra.mxu0 %v665_v1  ;;  %662 = vmatpush3.bf16.msra.mxu1 %v665_v1 }
   0x8   :  { %640 = vmatprep.subr.bf16.mxu0 %v666_v2  ;;  %660 = vmatprep.subr.bf16.mxu1 %v666_v2 }
   0xb   :  { %641 = vmatpush3.bf16.msra.mxu0 %v666_v2  ;;  %663 = vmatpush3.bf16.msra.mxu1 %v666_v2 }
   0xe   :  { %643 = vmatmul.mubr.msk.bf16.vlgmr.msra.gmra.mrb[0].mxu0 %vm108_vm0, %v669_v5  ;;  %651 = vmatmul.mubr.msk.bf16.vlgmr.msra.gmra.mrb[0].mxu1 %vm108_vm0, %v670_v6 }
   0xf   :  { %646 = vmatprep.mubr.msk.bf16.mxu0 %vm108_vm0, %v671_v7  ;;  %654 = vmatprep.mubr.msk.bf16.mxu1 %vm108_vm0, %v673_v8 }
  0x16   :  { %647 = vmatmul.mubr.msk.bf16.gmra.mrb[4].mxu0 %vm108_vm0, %v672_v9  ;;  %655 = vmatmul.mubr.msk.bf16.gmra.mrb[4].mxu1 %vm108_vm0, %v674_v10 }
  0xe1   :  { %v644_v12 = vpop.f32.mrb[0].mxu0  ;;  %v652_v13 = vpop.f32.mrb[0].mxu1 }
  0xe2   :  { %v781_v14 = vadd.f32 %v644_v12, %v571_v11  ;;  %v783_v15 = vadd.f32 %v652_v13, %v571_v11  ;;  %v167_v16 = vpop.f32.mrb[1].mxu0  ;;  %v199_v17 = vpop.f32.mrb[1].mxu1 }
  0xe3   :  { %v645_v18 = vpop.f32.mrb[2].mxu0  ;;  %v653_v19 = vpop.f32.mrb[2].mxu1  ;;  %v785_v20 = vadd.f32 %v571_v11, %v167_v16  ;;  %v793_v26 = vadd.f32 %v571_v11, %v199_v17 }
  0xe4   :  { %v787_v21 = vadd.f32 %v645_v18, %v571_v11  ;;  %v170_v22 = vpop.f32.mrb[3].mxu0  ;;  %v202_v23 = vpop.f32.mrb[3].mxu1  ;;  %v261_v24 = vsel %vm230_vm1, %v783_v15, 0.0  ;;  %v237_v25 = vsel %vm230_vm1, %v781_v14, 0.0  ;;  %v795_v27 = vadd.f32 %v653_v19, %v571_v11 }
  0xe5   :  { %262 = vadd.xlane.f32.xlu0 %v261_v24  ;;  %238 = vadd.xlane.f32.xlu1 %v237_v25  ;;  %v231_v29 = vsel %vm230_vm1, %v785_v20, 0.0  ;;  %v801_v36 = vadd.f32 %v571_v11, %v170_v22  ;;  %v803_v37 = vadd.f32 %v571_v11, %v202_v23  ;;  %v255_v39 = vsel %vm230_vm1, %v793_v26, 0.0 }
  0xe6   :  { %v240_v28 = vsel %vm230_vm1, %v787_v21, 0.0  ;;  %v264_v38 = vsel %vm230_vm1, %v795_v27, 0.0 }
  0xe7   :  { %v258_v44 = vsel %vm230_vm1, %v803_v37, 0.0  ;;  %v234_v45 = vsel %vm230_vm1, %v801_v36, 0.0 }
  0xe9   :  { %241 = vadd.xlane.f32.xlu1 %v240_v28  ;;  %232 = vadd.xlane.f32.xlu0 %v231_v29  ;;  %v648_v30 = vpop.f32.mrb[4].mxu0  ;;  %v656_v31 = vpop.f32.mrb[4].mxu1 }
  0xea   :  { %v183_v32 = vpop.f32.mrb[5].mxu0  ;;  %v215_v33 = vpop.f32.mrb[5].mxu1  ;;  %v809_v42 = vadd.f32 %v648_v30, %v571_v11  ;;  %v837_v56 = vadd.f32 %v656_v31, %v571_v11 }
  0xeb   :  { %v649_v34 = vpop.f32.mrb[6].mxu0  ;;  %v657_v35 = vpop.f32.mrb[6].mxu1  ;;  %v821_v48 = vadd.f32 %v571_v11, %v183_v32  ;;  %v825_v50 = vadd.f32 %v571_v11, %v215_v33 }
  0xec   :  { %v186_v40 = vpop.f32.mrb[7].mxu0  ;;  %v218_v41 = vpop.f32.mrb[7].mxu1  ;;  %v811_v43 = vadd.f32 %v649_v34, %v571_v11  ;;  %v249_v47 = vsel %vm230_vm1, %v809_v42, 0.0  ;;  %v839_v57 = vadd.f32 %v657_v35, %v571_v11  ;;  %v273_v59 = vsel %vm230_vm1, %v837_v56, 0.0 }
  0xed   :  { %265 = vadd.xlane.f32.xlu1 %v264_v38  ;;  %256 = vadd.xlane.f32.xlu0 %v255_v39  ;;  %v823_v49 = vadd.f32 %v571_v11, %v186_v40  ;;  %v827_v51 = vadd.f32 %v571_v11, %v218_v41  ;;  %v243_v53 = vsel %vm230_vm1, %v821_v48, 0.0  ;;  %v267_v55 = vsel %vm230_vm1, %v825_v50, 0.0 }
  0xee   :  { %v252_v46 = vsel %vm230_vm1, %v811_v43, 0.0  ;;  %v276_v58 = vsel %vm230_vm1, %v839_v57, 0.0 }
  0xef   :  { %v246_v52 = vsel %vm230_vm1, %v823_v49, 0.0  ;;  %v270_v54 = vsel %vm230_vm1, %v827_v51, 0.0 }
  0xf1   :  { %259 = vadd.xlane.f32.xlu1 %v258_v44  ;;  %235 = vadd.xlane.f32.xlu0 %v234_v45 }
  0xf5   :  { %253 = vadd.xlane.f32.xlu1 %v252_v46  ;;  %250 = vadd.xlane.f32.xlu0 %v249_v47 }
  0xf9   :  { %247 = vadd.xlane.f32.xlu1 %v246_v52  ;;  %244 = vadd.xlane.f32.xlu0 %v243_v53 }
  0xfd   :  { %271 = vadd.xlane.f32.xlu1 %v270_v54  ;;  %268 = vadd.xlane.f32.xlu0 %v267_v55 }
 0x101   :  { %277 = vadd.xlane.f32.xlu1 %v276_v58  ;;  %274 = vadd.xlane.f32.xlu0 %v273_v59 }
 0x172   :  { %v263_v60 = vpop.xlane.xlu0 %262  ;;  %v239_v61 = vpop.xlane.xlu1 %238 }
 0x173   :  { %v290_v62 = vmul.f32 0.03125, %v263_v60  ;;  %v282_v63 = vmul.f32 0.03125, %v239_v61 }
 0x175   :  { %v846_v0 = vsub.f32 %v783_v15, %v290_v62  ;;  %v849_v1 = vsub.f32 %v781_v14, %v282_v63 }
 0x176   :  { %v242_v2 = vpop.xlane.xlu1 %241  ;;  %v233_v3 = vpop.xlane.xlu0 %232 }
 0x177   :  { %v283_v4 = vmul.f32 0.03125, %v242_v2  ;;  %v280_v5 = vmul.f32 0.03125, %v233_v3  ;;  %v314_v6 = vmul.f32 %v849_v1, %v849_v1  ;;  %v322_v10 = vmul.f32 %v846_v0, %v846_v0 }
 0x179   :  { %v854_v7 = vsub.f32 %v787_v21, %v283_v4  ;;  %v857_v8 = vsub.f32 %v785_v20, %v280_v5  ;;  %v334_v9 = vsel %vm230_vm1, %v314_v6, 0.0  ;;  %v358_v20 = vsel %vm230_vm1, %v322_v10, 0.0 }
 0x17a   :  { %v266_v11 = vpop.xlane.xlu1 %265  ;;  %335 = vadd.xlane.f32.xlu0 %v334_v9  ;;  %v257_v12 = vpop.xlane.xlu0 %256 }
 0x17b   :  { %v291_v13 = vmul.f32 0.03125, %v266_v11  ;;  %v288_v14 = vmul.f32 0.03125, %v257_v12  ;;  %v315_v15 = vmul.f32 %v854_v7, %v854_v7  ;;  %v312_v16 = vmul.f32 %v857_v8, %v857_v8 }
 0x17d   :  { %v867_v17 = vsub.f32 %v795_v27, %v291_v13  ;;  %v870_v18 = vsub.f32 %v793_v26, %v288_v14  ;;  %v337_v19 = vsel %vm230_vm1, %v315_v15, 0.0  ;;  %v328_v28 = vsel %vm230_vm1, %v312_v16, 0.0 }
 0x17e   :  { %v260_v21 = vpop.xlane.xlu1 %259  ;;  %338 = vadd.xlane.f32.xlu1 %v337_v19  ;;  %359 = vadd.xlane.f32.xlu0 %v358_v20  ;;  %v236_v22 = vpop.xlane.xlu0 %235 }
 0x17f   :  { %v289_v23 = vmul.f32 0.03125, %v260_v21  ;;  %v281_v24 = vmul.f32 0.03125, %v236_v22  ;;  %v323_v25 = vmul.f32 %v867_v17, %v867_v17  ;;  %v320_v30 = vmul.f32 %v870_v18, %v870_v18 }
 0x181   :  { %v878_v27 = vsub.f32 %v803_v37, %v289_v23  ;;  %v881_v26 = vsub.f32 %v801_v36, %v281_v24  ;;  %v361_v29 = vsel %vm230_vm1, %v323_v25, 0.0  ;;  %v352_v39 = vsel %vm230_vm1, %v320_v30, 0.0 }
 0x182   :  { %v254_v31 = vpop.xlane.xlu1 %253  ;;  %362 = vadd.xlane.f32.xlu1 %v361_v29  ;;  %329 = vadd.xlane.f32.xlu0 %v328_v28  ;;  %v251_v32 = vpop.xlane.xlu0 %250 }
 0x183   :  { %v287_v33 = vmul.f32 0.03125, %v254_v31  ;;  %v286_v34 = vmul.f32 0.03125, %v251_v32  ;;  %v313_v35 = vmul.f32 %v881_v26, %v881_v26  ;;  %v321_v37 = vmul.f32 %v878_v27, %v878_v27 }
 0x185   :  { %v891_v36 = vsub.f32 %v811_v43, %v287_v33  ;;  %v894_v38 = vsub.f32 %v809_v42, %v286_v34  ;;  %v331_v40 = vsel %vm230_vm1, %v313_v35, 0.0  ;;  %v355_v52 = vsel %vm230_vm1, %v321_v37, 0.0 }
 0x186   :  { %v248_v41 = vpop.xlane.xlu1 %247  ;;  %353 = vadd.xlane.f32.xlu0 %v352_v39  ;;  %332 = vadd.xlane.f32.xlu1 %v331_v40  ;;  %v245_v44 = vpop.xlane.xlu0 %244 }
 0x187   :  { %v285_v45 = vmul.f32 0.03125, %v248_v41  ;;  %v284_v46 = vmul.f32 0.03125, %v245_v44  ;;  %v318_v47 = vmul.f32 %v894_v38, %v894_v38  ;;  %v319_v54 = vmul.f32 %v891_v36, %v891_v36  ;;  %v944_v44 = vld [vmem:[%s1066_s3] ss:$0 sm:$0xff] }
 0x189   :  { %v902_v43 = vsub.f32 %v823_v49, %v285_v45  ;;  %v905_v42 = vsub.f32 %v821_v48, %v284_v46  ;;  %v346_v53 = vsel %vm230_vm1, %v318_v47, 0.0  ;;  %v349_v63 = vsel %vm230_vm1, %v319_v54, 0.0  ;;  %v950_v54 = vld [vmem:[%s1067_s4] ss:$0 sm:$0xff] }
 0x18a   :  { %v272_v55 = vpop.xlane.xlu1 %271  ;;  %356 = vadd.xlane.f32.xlu1 %v355_v52  ;;  %347 = vadd.xlane.f32.xlu0 %v346_v53  ;;  %v269_v58 = vpop.xlane.xlu0 %268 }
 0x18b   :  { %v293_v59 = vmul.f32 0.03125, %v272_v55  ;;  %v292_v60 = vmul.f32 0.03125, %v269_v58  ;;  %v316_v61 = vmul.f32 %v905_v42, %v905_v42  ;;  %v317_v49 = vmul.f32 %v902_v43, %v902_v43 }
 0x18d   :  { %v915_v48 = vsub.f32 %v827_v51, %v293_v59  ;;  %v918_v62 = vsub.f32 %v825_v50, %v292_v60  ;;  %v340_v2 = vsel %vm230_vm1, %v316_v61, 0.0  ;;  %v343_v10 = vsel %vm230_vm1, %v317_v49, 0.0 }
 0x18e   :  { %v278_v3 = vpop.xlane.xlu1 %277  ;;  %350 = vadd.xlane.f32.xlu1 %v349_v63  ;;  %341 = vadd.xlane.f32.xlu0 %v340_v2  ;;  %v275_v4 = vpop.xlane.xlu0 %274 }
 0x18f   :  { %v295_v5 = vmul.f32 0.03125, %v278_v3  ;;  %v294_v6 = vmul.f32 0.03125, %v275_v4  ;;  %v324_v9 = vmul.f32 %v918_v62, %v918_v62  ;;  %v325_v12 = vmul.f32 %v915_v48, %v915_v48 }
 0x191   :  { %v926_v51 = vsub.f32 %v839_v57, %v295_v5  ;;  %v929_v50 = vsub.f32 %v837_v56, %v294_v6  ;;  %v364_v11 = vsel %vm230_vm1, %v324_v9, 0.0  ;;  %v367_v14 = vsel %vm230_vm1, %v325_v12, 0.0 }
 0x192   :  { %344 = vadd.xlane.f32.xlu1 %v343_v10  ;;  %365 = vadd.xlane.f32.xlu0 %v364_v11 }
 0x193   :  { %v326_v13 = vmul.f32 %v929_v50, %v929_v50  ;;  %v327_v57 = vmul.f32 %v926_v51, %v926_v51 }
 0x195   :  { %v370_v15 = vsel %vm230_vm1, %v326_v13, 0.0  ;;  %v373_v56 = vsel %vm230_vm1, %v327_v57, 0.0 }
 0x196   :  { %368 = vadd.xlane.f32.xlu1 %v367_v14  ;;  %371 = vadd.xlane.f32.xlu0 %v370_v15 }
 0x19a   :  { %374 = vadd.xlane.f32.xlu1 %v373_v56 }
 0x207   :  { %v336_v16 = vpop.xlane.xlu0 %335 }
 0x208   :  { %v378_v19 = vmul.f32 0.03125, %v336_v16 }
 0x20a   :  { %v394_v20 = vadd.f32 1e-06, %v378_v19 }
 0x20b   :  { %v339_v21 = vpop.xlane.xlu1 %338  ;;  %v360_v22 = vpop.xlane.xlu0 %359 }
 0x20c   :  { %675 = vrsqrt.f32 %v394_v20  ;;  %v379_v23 = vmul.f32 0.03125, %v339_v21  ;;  %v386_v24 = vmul.f32 0.03125, %v360_v22 }
 0x20e   :  { %v395_v25 = vadd.f32 1e-06, %v379_v23  ;;  %v402_v28 = vadd.f32 1e-06, %v386_v24 }
 0x20f   :  { %v363_v29 = vpop.xlane.xlu1 %362  ;;  %v330_v30 = vpop.xlane.xlu0 %329 }
 0x210   :  { %677 = vrsqrt.f32 %v395_v25  ;;  %v387_v31 = vmul.f32 0.03125, %v363_v29  ;;  %v376_v32 = vmul.f32 0.03125, %v330_v30 }
 0x211   :  { %679 = vrsqrt.f32 %v402_v28 }
 0x212   :  { %v403_v33 = vadd.f32 1e-06, %v387_v31  ;;  %v392_v34 = vadd.f32 1e-06, %v376_v32 }
 0x213   :  { %v333_v35 = vpop.xlane.xlu1 %332  ;;  %v354_v37 = vpop.xlane.xlu0 %353 }
 0x214   :  { %681 = vrsqrt.f32 %v403_v33  ;;  %v377_v39 = vmul.f32 0.03125, %v333_v35  ;;  %v384_v40 = vmul.f32 0.03125, %v354_v37 }
 0x215   :  { %683 = vrsqrt.f32 %v392_v34 }
 0x216   :  { %v676_v41 = vpop.eup %675  ;;  %v393_v45 = vadd.f32 1e-06, %v377_v39  ;;  %v400_v46 = vadd.f32 1e-06, %v384_v40 }
 0x217   :  { %v426_v47 = vmul.f32 %v676_v41, %v849_v1  ;;  %v357_v52 = vpop.xlane.xlu1 %356  ;;  %v348_v53 = vpop.xlane.xlu0 %347 }
 0x218   :  { %685 = vrsqrt.f32 %v393_v45  ;;  %v385_v55 = vmul.f32 0.03125, %v357_v52  ;;  %v382_v58 = vmul.f32 0.03125, %v348_v53 }
 0x219   :  { %v449_v59 = vmul.f32 %v944_v44, %v426_v47  ;;  %687 = vrsqrt.f32 %v400_v46 }
 0x21a   :  { %v678_v60 = vpop.eup %677  ;;  %v401_v61 = vadd.f32 1e-06, %v385_v55  ;;  %v398_v49 = vadd.f32 1e-06, %v382_v58 }
 0x21b   :  { %v680_v63 = vpop.eup %679  ;;  %v472_v1 = vadd.f32 %v950_v54, %v449_v59  ;;  %v427_v2 = vmul.f32 %v678_v60, %v854_v7  ;;  %v351_v3 = vpop.xlane.xlu1 %350 }
 0x21c   :  { %v342_v4 = vpop.xlane.xlu0 %341  ;;  %v434_v5 = vmul.f32 %v680_v63, %v846_v0  ;;  %689 = vrsqrt.f32 %v401_v61  ;;  %v383_v6 = vmul.f32 0.03125, %v351_v3 }
 0x21d   :  { %v380_v9 = vmul.f32 0.03125, %v342_v4  ;;  %v611_v10 = vpack.c.bf16 %v472_v1, %v472_v1  ;;  %v450_v11 = vmul.f32 %v944_v44, %v427_v2  ;;  %691 = vrsqrt.f32 %v398_v49 }
 0x21e   :  { %v682_v12 = vpop.eup %681  ;;  %v457_v13 = vmul.f32 %v944_v44, %v434_v5  ;;  %v399_v14 = vadd.f32 1e-06, %v383_v6 }
 0x21f   :  { %v396_v15 = vadd.f32 1e-06, %v380_v9  ;;  %v684_v57 = vpop.eup %683  ;;  %553 = vst.msk [vmem:[%s1068_s5 + $0x8] sm:$0xf] %vm550_vm2, %v611_v10  ;;  %v473_v0 = vadd.f32 %v950_v54, %v450_v11  ;;  %v435_v7 = vmul.f32 %v682_v12, %v867_v17  ;;  %v345_v56 = vpop.xlane.xlu1 %344 }
 0x220   :  { %v366_v16 = vpop.xlane.xlu0 %365  ;;  %v480_v19 = vadd.f32 %v950_v54, %v457_v13  ;;  %v424_v20 = vmul.f32 %v684_v57, %v857_v8  ;;  %693 = vrsqrt.f32 %v399_v14  ;;  %v381_v21 = vmul.f32 0.03125, %v345_v56 }
 0x221   :  { %v612_v22 = vpack.c.bf16 %v473_v0, %v473_v0  ;;  %v458_v23 = vmul.f32 %v944_v44, %v435_v7  ;;  %695 = vrsqrt.f32 %v396_v15  ;;  %v388_v24 = vmul.f32 0.03125, %v366_v16 }
 0x222   :  { %v686_v25 = vpop.eup %685  ;;  %v619_v28 = vpack.c.bf16 %v480_v19, %v480_v19  ;;  %v447_v29 = vmul.f32 %v944_v44, %v424_v20  ;;  %v397_v30 = vadd.f32 1e-06, %v381_v21 }
 0x223   :  { %v688_v31 = vpop.eup %687  ;;  %554 = vst.msk [vmem:[%s1068_s5 + $0xc] sm:$0xf] %vm550_vm2, %v612_v22  ;;  %v481_v8 = vadd.f32 %v950_v54, %v458_v23  ;;  %v425_v17 = vmul.f32 %v686_v25, %v881_v26  ;;  %v404_v32 = vadd.f32 1e-06, %v388_v24  ;;  %v369_v33 = vpop.xlane.xlu1 %368 }
 0x224   :  { %v372_v34 = vpop.xlane.xlu0 %371  ;;  %561 = vst.msk [vmem:[%s1068_s5 + $0x28] sm:$0xf] %vm550_vm2, %v619_v28  ;;  %v470_v35 = vadd.f32 %v950_v54, %v447_v29  ;;  %v432_v37 = vmul.f32 %v688_v31, %v870_v18  ;;  %697 = vrsqrt.f32 %v397_v30  ;;  %v389_v39 = vmul.f32 0.03125, %v369_v33 }
 0x225   :  { %v620_v40 = vpack.c.bf16 %v481_v8, %v481_v8  ;;  %v448_v41 = vmul.f32 %v944_v44, %v425_v17  ;;  %699 = vrsqrt.f32 %v404_v32  ;;  %v390_v45 = vmul.f32 0.03125, %v372_v34 }
 0x226   :  { %v690_v26 = vpop.eup %689  ;;  %v609_v46 = vpack.c.bf16 %v470_v35, %v470_v35  ;;  %v455_v47 = vmul.f32 %v944_v44, %v432_v37  ;;  %v405_v52 = vadd.f32 1e-06, %v389_v39 }
 0x227   :  { %v692_v53 = vpop.eup %691  ;;  %562 = vst.msk [vmem:[%s1068_s5 + $0x2c] sm:$0xf] %vm550_vm2, %v620_v40  ;;  %v471_v18 = vadd.f32 %v950_v54, %v448_v41  ;;  %v433_v55 = vmul.f32 %v690_v26, %v878_v27  ;;  %v406_v58 = vadd.f32 1e-06, %v390_v45  ;;  %v375_v59 = vpop.xlane.xlu1 %374 }
 0x228   :  { %551 = vst.msk [vmem:[%s1068_s5] sm:$0xf] %vm550_vm2, %v609_v46  ;;  %v478_v60 = vadd.f32 %v950_v54, %v455_v47  ;;  %v430_v61 = vmul.f32 %v692_v53, %v894_v38  ;;  %701 = vrsqrt.f32 %v405_v52  ;;  %v391_v49 = vmul.f32 0.03125, %v375_v59 }
 0x229   :  { %v610_v63 = vpack.c.bf16 %v471_v18, %v471_v18  ;;  %v456_v1 = vmul.f32 %v944_v44, %v433_v55  ;;  %703 = vrsqrt.f32 %v406_v58 }
 0x22a   :  { %v694_v2 = vpop.eup %693  ;;  %v617_v3 = vpack.c.bf16 %v478_v60, %v478_v60  ;;  %v453_v27 = vmul.f32 %v944_v44, %v430_v61  ;;  %v407_v4 = vadd.f32 1e-06, %v391_v49 }
 0x22b   :  { %v696_v5 = vpop.eup %695  ;;  %552 = vst.msk [vmem:[%s1068_s5 + $0x4] sm:$0xf] %vm550_vm2, %v610_v63  ;;  %v479_v6 = vadd.f32 %v950_v54, %v456_v1  ;;  %v431_v38 = vmul.f32 %v694_v2, %v891_v36 }
 0x22c   :  { %559 = vst.msk [vmem:[%s1068_s5 + $0x20] sm:$0xf] %vm550_vm2, %v617_v3  ;;  %v476_v9 = vadd.f32 %v950_v54, %v453_v27  ;;  %v428_v10 = vmul.f32 %v696_v5, %v905_v42  ;;  %705 = vrsqrt.f32 %v407_v4 }
 0x22d   :  { %v618_v11 = vpack.c.bf16 %v479_v6, %v479_v6  ;;  %v454_v12 = vmul.f32 %v944_v44, %v431_v38 }
 0x22e   :  { %v698_v13 = vpop.eup %697  ;;  %v615_v14 = vpack.c.bf16 %v476_v9, %v476_v9  ;;  %v451_v15 = vmul.f32 %v944_v44, %v428_v10 }
 0x22f   :  { %v700_v57 = vpop.eup %699  ;;  %560 = vst.msk [vmem:[%s1068_s5 + $0x24] sm:$0xf] %vm550_vm2, %v618_v11  ;;  %v477_v36 = vadd.f32 %v950_v54, %v454_v12  ;;  %v429_v0 = vmul.f32 %v698_v13, %v902_v43 }
 0x230   :  { %557 = vst.msk [vmem:[%s1068_s5 + $0x18] sm:$0xf] %vm550_vm2, %v615_v14  ;;  %v474_v42 = vadd.f32 %v950_v54, %v451_v15  ;;  %v436_v7 = vmul.f32 %v700_v57, %v918_v62 }
 0x231   :  { %v616_v56 = vpack.c.bf16 %v477_v36, %v477_v36  ;;  %v452_v16 = vmul.f32 %v944_v44, %v429_v0 }
 0x232   :  { %v702_v19 = vpop.eup %701  ;;  %v613_v20 = vpack.c.bf16 %v474_v42, %v474_v42  ;;  %v459_v21 = vmul.f32 %v944_v44, %v436_v7 }
 0x233   :  { %v704_v22 = vpop.eup %703  ;;  %558 = vst.msk [vmem:[%s1068_s5 + $0x1c] sm:$0xf] %vm550_vm2, %v616_v56  ;;  %v475_v43 = vadd.f32 %v950_v54, %v452_v16  ;;  %v437_v23 = vmul.f32 %v702_v19, %v915_v48 }
 0x234   :  { %555 = vst.msk [vmem:[%s1068_s5 + $0x10] sm:$0xf] %vm550_vm2, %v613_v20  ;;  %v482_v62 = vadd.f32 %v950_v54, %v459_v21  ;;  %v438_v24 = vmul.f32 %v704_v22, %v929_v50 }
 0x235   :  { %v614_v25 = vpack.c.bf16 %v475_v43, %v475_v43  ;;  %v460_v28 = vmul.f32 %v944_v44, %v437_v23 }
 0x236   :  { %v706_v29 = vpop.eup %705  ;;  %v621_v30 = vpack.c.bf16 %v482_v62, %v482_v62  ;;  %v461_v31 = vmul.f32 %v944_v44, %v438_v24 }
 0x237   :  { %556 = vst.msk [vmem:[%s1068_s5 + $0x14] sm:$0xf] %vm550_vm2, %v614_v25  ;;  %v483_v48 = vadd.f32 %v950_v54, %v460_v28  ;;  %v439_v8 = vmul.f32 %v706_v29, %v926_v51 }
 0x238   :  { %563 = vst.msk [vmem:[%s1068_s5 + $0x30] sm:$0xf] %vm550_vm2, %v621_v30  ;;  %v484_v50 = vadd.f32 %v950_v54, %v461_v31 }
 0x239   :  { %v622_v17 = vpack.c.bf16 %v483_v48, %v483_v48  ;;  %v462_v32 = vmul.f32 %v944_v44, %v439_v8 }
 0x23a   :  { %v623_v33 = vpack.c.bf16 %v484_v50, %v484_v50 }
 0x23b   :  { %564 = vst.msk [vmem:[%s1068_s5 + $0x34] sm:$0xf] %vm550_vm2, %v622_v17  ;;  %v485_v34 = vadd.f32 %v950_v54, %v462_v32 }
 0x23c   :  { %565 = vst.msk [vmem:[%s1068_s5 + $0x38] sm:$0xf] %vm550_vm2, %v623_v33 }
 0x23d   :  { %v624_v51 = vpack.c.bf16 %v485_v34, %v485_v34 }
 0x23f   :  { %566 = vst.msk [vmem:[%s1068_s5 + $0x3c] sm:$0xf] %vm550_vm2, %v624_v51 }

// kernel: convnext_forward.9
= control target key start
LH: loop header
LB: loop body
LE: loop exit
PB: predicated region body
PF: predicated region fallthrough
CT: control target
= control target key end

     0   :  { %vm38_vm0 = vcmask 261120   ;;  %vm648_vm1 = vcmask 519168   ;;  %s1198_s1 = inlined_call_operand.vmem [shape: bf16[32,32], index: 1, kind: input, shape index: {}]   ;;  %s1199_s2 = inlined_call_operand.vmem [shape: bf16[32,32], index: 2, kind: input, shape index: {}]   ;;  %s1200_s0 = inlined_call_operand.vmem [shape: bf16[32,32], index: 0, kind: input, shape index: {}]   ;;  %s1201_s3 = inlined_call_operand.vmem [shape: bf16[32,32], index: 3, kind: input, shape index: {}]   ;;  %s1202_s6 = inlined_call_operand.vmem [shape: bf16[4,32,64], index: 6, kind: input, shape index: {}]   ;;  %s1203_s4 = inlined_call_operand.vmem [shape: f32[1,32], index: 4, kind: input, shape index: {}]   ;;  %s1204_s5 = inlined_call_operand.vmem [shape: f32[1,32], index: 5, kind: input, shape index: {}]   ;;  %s1205_s7 = inlined_call_operand.vmem [shape: f32[1,64], index: 7, kind: input, shape index: {}]   ;;  %s1206_s8 = inlined_call_operand.vmem [shape: bf16[32,64], index: 8, kind: output, shape index: {}]  }
   0x1   :  { %v880_v0 = vld [vmem:[%s1198_s1] sm:$0xff]   ;;  %v894_v6 = vld [vmem:[%s1198_s1 + $0x8] sm:$0xff]  }
   0x2   :  { %v885_v1 = vld [vmem:[%s1199_s2] sm:$0xff]   ;;  %v706_v2 = vunpack.c.l.bf16 %v880_v0  ;;  %v707_v4 = vunpack.c.h.bf16 %v880_v0  ;;  %v710_v11 = vunpack.c.l.bf16 %v894_v6  ;;  %v711_v12 = vunpack.c.h.bf16 %v894_v6  ;;  %v909_v13 = vld [vmem:[%s1199_s2 + $0x8] sm:$0xff]  }
   0x3   :  { %v714_v3 = vunpack.c.l.bf16 %v885_v1  ;;  %v715_v5 = vunpack.c.h.bf16 %v885_v1  ;;  %v718_v16 = vunpack.c.l.bf16 %v909_v13  ;;  %v719_v17 = vunpack.c.h.bf16 %v909_v13  ;;  %v922_v18 = vld [vmem:[%s1200_s0] sm:$0xff]   ;;  %v948_v28 = vld [vmem:[%s1200_s0 + $0x8] sm:$0xff]  }
   0x4   :  { %v128_v7 = vsel %vm38_vm0, %v706_v2, 0.0  ;;  %v131_v9 = vsel %vm38_vm0, %v707_v4, 0.0  ;;  %v134_v14 = vsel %vm38_vm0, %v710_v11, 0.0  ;;  %v137_v15 = vsel %vm38_vm0, %v711_v12, 0.0  ;;  %v935_v23 = vld [vmem:[%s1201_s3] sm:$0xff]   ;;  %v961_v33 = vld [vmem:[%s1201_s3 + $0x8] sm:$0xff]  }
   0x5   :  { %v337_v8 = vsel %vm38_vm0, %v714_v3, 0.0  ;;  %129 = vadd.xlane.f32.xlu0 %v128_v7  ;;  %v340_v10 = vsel %vm38_vm0, %v715_v5, 0.0  ;;  %v343_v19 = vsel %vm38_vm0, %v718_v16, 0.0  ;;  %v346_v20 = vsel %vm38_vm0, %v719_v17, 0.0 }
   0x6   :  { %338 = vadd.xlane.f32.xlu1 %v337_v8  ;;  %v698_v21 = vunpack.c.l.bf16 %v922_v18  ;;  %v699_v22 = vunpack.c.h.bf16 %v922_v18  ;;  %v722_v26 = vunpack.c.l.bf16 %v935_v23  ;;  %v723_v27 = vunpack.c.h.bf16 %v935_v23 }
   0x7   :  { %v702_v31 = vunpack.c.l.bf16 %v948_v28  ;;  %v703_v32 = vunpack.c.h.bf16 %v948_v28  ;;  %v726_v36 = vunpack.c.l.bf16 %v961_v33  ;;  %v727_v37 = vunpack.c.h.bf16 %v961_v33 }
   0x8   :  { %v39_v24 = vsel %vm38_vm0, %v698_v21, 0.0  ;;  %v42_v25 = vsel %vm38_vm0, %v699_v22, 0.0  ;;  %v483_v29 = vsel %vm38_vm0, %v722_v26, 0.0  ;;  %v486_v30 = vsel %vm38_vm0, %v723_v27, 0.0 }
   0x9   :  { %132 = vadd.xlane.f32.xlu0 %v131_v9  ;;  %v45_v34 = vsel %vm38_vm0, %v702_v31, 0.0  ;;  %v48_v35 = vsel %vm38_vm0, %v703_v32, 0.0  ;;  %v489_v38 = vsel %vm38_vm0, %v726_v36, 0.0  ;;  %v492_v39 = vsel %vm38_vm0, %v727_v37, 0.0 }
   0xa   :  { %341 = vadd.xlane.f32.xlu1 %v340_v10 }
   0xd   :  { %135 = vadd.xlane.f32.xlu0 %v134_v14 }
   0xe   :  { %138 = vadd.xlane.f32.xlu1 %v137_v15 }
  0x11   :  { %344 = vadd.xlane.f32.xlu0 %v343_v19 }
  0x12   :  { %347 = vadd.xlane.f32.xlu1 %v346_v20 }
  0x15   :  { %40 = vadd.xlane.f32.xlu0 %v39_v24 }
  0x16   :  { %43 = vadd.xlane.f32.xlu1 %v42_v25 }
  0x19   :  { %484 = vadd.xlane.f32.xlu0 %v483_v29 }
  0x1a   :  { %487 = vadd.xlane.f32.xlu1 %v486_v30 }
  0x1d   :  { %46 = vadd.xlane.f32.xlu0 %v45_v34 }
  0x1e   :  { %49 = vadd.xlane.f32.xlu1 %v48_v35 }
  0x21   :  { %490 = vadd.xlane.f32.xlu0 %v489_v38 }
  0x22   :  { %493 = vadd.xlane.f32.xlu1 %v492_v39 }
  0x92   :  { %v130_v40 = vpop.xlane.xlu0 %129 }
  0x93   :  { %v339_v41 = vpop.xlane.xlu1 %338  ;;  %v140_v42 = vmul.f32 0.03125, %v130_v40 }
  0x94   :  { %v349_v43 = vmul.f32 0.03125, %v339_v41 }
  0x95   :  { %v977_v44 = vsub.f32 %v706_v2, %v140_v42 }
  0x96   :  { %v979_v45 = vsub.f32 %v714_v3, %v349_v43  ;;  %v133_v46 = vpop.xlane.xlu0 %132 }
  0x97   :  { %v342_v47 = vpop.xlane.xlu1 %341  ;;  %v141_v48 = vmul.f32 0.03125, %v133_v46  ;;  %v148_v50 = vmul.f32 %v977_v44, %v977_v44 }
  0x98   :  { %v350_v49 = vmul.f32 0.03125, %v342_v47  ;;  %v357_v51 = vmul.f32 %v979_v45, %v979_v45 }
  0x99   :  { %v987_v52 = vsub.f32 %v707_v4, %v141_v48  ;;  %v152_v54 = vsel %vm38_vm0, %v148_v50, 0.0 }
  0x9a   :  { %v991_v53 = vsub.f32 %v715_v5, %v350_v49  ;;  %v136_v55 = vpop.xlane.xlu0 %135  ;;  %153 = vadd.xlane.f32.xlu0 %v152_v54  ;;  %v361_v57 = vsel %vm38_vm0, %v357_v51, 0.0 }
  0x9b   :  { %v139_v56 = vpop.xlane.xlu1 %138  ;;  %v142_v58 = vmul.f32 0.03125, %v136_v55  ;;  %v149_v60 = vmul.f32 %v987_v52, %v987_v52 }
  0x9c   :  { %v143_v59 = vmul.f32 0.03125, %v139_v56  ;;  %v358_v61 = vmul.f32 %v991_v53, %v991_v53 }
  0x9d   :  { %v1001_v62 = vsub.f32 %v710_v11, %v142_v58  ;;  %v155_v0 = vsel %vm38_vm0, %v149_v60, 0.0 }
  0x9e   :  { %v1005_v63 = vsub.f32 %v711_v12, %v143_v59  ;;  %v345_v1 = vpop.xlane.xlu0 %344  ;;  %156 = vadd.xlane.f32.xlu1 %v155_v0  ;;  %362 = vadd.xlane.f32.xlu0 %v361_v57  ;;  %v364_v3 = vsel %vm38_vm0, %v358_v61, 0.0  ;;  %v794_v0 = vld [vmem:[%s1202_s6 + $0x20] sm:$0xff]  }
  0x9f   :  { %v348_v2 = vpop.xlane.xlu1 %347  ;;  %v351_v4 = vmul.f32 0.03125, %v345_v1  ;;  %v150_v7 = vmul.f32 %v1001_v62, %v1001_v62  ;;  %764 = vmatprep.subr.bf16.mxu0 %v794_v0  ;;  %v795_v1 = vld [vmem:[%s1202_s6 + $0x28] sm:$0xff]  }
  0xa0   :  { %v352_v5 = vmul.f32 0.03125, %v348_v2  ;;  %v151_v8 = vmul.f32 %v1005_v63, %v1005_v63  ;;  %765 = vmatpush3.bf16.msra.mxu0 %v794_v0  ;;  %v1100_v2 = vld [vmem:[%s1202_s6] sm:$0xff]  }
  0xa1   :  { %v1015_v6 = vsub.f32 %v718_v16, %v351_v4  ;;  %v158_v10 = vsel %vm38_vm0, %v150_v7, 0.0  ;;  %766 = vmatprep.subr.bf16.mxu0 %v795_v1 }
  0xa2   :  { %v1019_v9 = vsub.f32 %v719_v17, %v352_v5  ;;  %365 = vadd.xlane.f32.xlu1 %v364_v3  ;;  %159 = vadd.xlane.f32.xlu0 %v158_v10  ;;  %v41_v11 = vpop.xlane.xlu0 %40  ;;  %v161_v12 = vsel %vm38_vm0, %v151_v8, 0.0  ;;  %v1106_v3 = vld [vmem:[%s1202_s6 + $0x30] sm:$0xff]  }
  0xa3   :  { %v44_v14 = vpop.xlane.xlu1 %43  ;;  %v52_v15 = vmul.f32 0.03125, %v41_v11  ;;  %v359_v20 = vmul.f32 %v1015_v6, %v1015_v6 }
  0xa4   :  { %v53_v19 = vmul.f32 0.03125, %v44_v14  ;;  %v360_v16 = vmul.f32 %v1019_v9, %v1019_v9  ;;  %767 = vmatpush3.bf16.msra.mxu0 %v795_v1 }
  0xa5   :  { %v1029_v13 = vsub.f32 %v698_v21, %v52_v15  ;;  %v367_v24 = vsel %vm38_vm0, %v359_v20, 0.0  ;;  %772 = vmatprep.subr.bf16.mxu0 %v1106_v3 }
  0xa6   :  { %v1033_v17 = vsub.f32 %v699_v22, %v53_v19  ;;  %162 = vadd.xlane.f32.xlu1 %v161_v12  ;;  %368 = vadd.xlane.f32.xlu0 %v367_v24  ;;  %v485_v25 = vpop.xlane.xlu0 %484  ;;  %v370_v29 = vsel %vm38_vm0, %v360_v16, 0.0 }
  0xa7   :  { %v488_v30 = vpop.xlane.xlu1 %487  ;;  %v495_v34 = vmul.f32 0.03125, %v485_v25  ;;  %v60_v38 = vmul.f32 %v1029_v13, %v1029_v13 }
  0xa8   :  { %v496_v35 = vmul.f32 0.03125, %v488_v30  ;;  %v61_v21 = vmul.f32 %v1033_v17, %v1033_v17 }
  0xa9   :  { %v1043_v18 = vsub.f32 %v722_v26, %v495_v34  ;;  %v64_v39 = vsel %vm38_vm0, %v60_v38, 0.0 }
  0xaa   :  { %v1047_v22 = vsub.f32 %v723_v27, %v496_v35  ;;  %371 = vadd.xlane.f32.xlu1 %v370_v29  ;;  %65 = vadd.xlane.f32.xlu0 %v64_v39  ;;  %v47_v40 = vpop.xlane.xlu0 %46  ;;  %v67_v41 = vsel %vm38_vm0, %v61_v21, 0.0 }
  0xab   :  { %v50_v42 = vpop.xlane.xlu1 %49  ;;  %v54_v43 = vmul.f32 0.03125, %v47_v40  ;;  %v503_v47 = vmul.f32 %v1043_v18, %v1043_v18 }
  0xac   :  { %v55_v46 = vmul.f32 0.03125, %v50_v42  ;;  %v504_v26 = vmul.f32 %v1047_v22, %v1047_v22 }
  0xad   :  { %v1057_v23 = vsub.f32 %v702_v31, %v54_v43  ;;  %v507_v48 = vsel %vm38_vm0, %v503_v47, 0.0 }
  0xae   :  { %v1061_v27 = vsub.f32 %v703_v32, %v55_v46  ;;  %68 = vadd.xlane.f32.xlu1 %v67_v41  ;;  %508 = vadd.xlane.f32.xlu0 %v507_v48  ;;  %v491_v49 = vpop.xlane.xlu0 %490  ;;  %v510_v50 = vsel %vm38_vm0, %v504_v26, 0.0  ;;  %v1113_v26 = vld [vmem:[%s1203_s4] ss:$0 sm:$0xff] }
  0xaf   :  { %v494_v51 = vpop.xlane.xlu1 %493  ;;  %v497_v54 = vmul.f32 0.03125, %v491_v49  ;;  %v62_v56 = vmul.f32 %v1057_v23, %v1057_v23 }
  0xb0   :  { %v498_v55 = vmul.f32 0.03125, %v494_v51  ;;  %v63_v31 = vmul.f32 %v1061_v27, %v1061_v27 }
  0xb1   :  { %v1071_v28 = vsub.f32 %v726_v36, %v497_v54  ;;  %v70_v57 = vsel %vm38_vm0, %v62_v56, 0.0  ;;  %v792_v36 = vld [vmem:[%s1202_s6 + $0x10] sm:$0xff]  }
  0xb2   :  { %v1075_v32 = vsub.f32 %v727_v37, %v498_v55  ;;  %511 = vadd.xlane.f32.xlu1 %v510_v50  ;;  %71 = vadd.xlane.f32.xlu0 %v70_v57  ;;  %v73_v58 = vsel %vm38_vm0, %v63_v31, 0.0  ;;  %v793_v37 = vld [vmem:[%s1202_s6 + $0x18] sm:$0xff]  }
  0xb3   :  { %v505_v59 = vmul.f32 %v1071_v28, %v1071_v28  ;;  %748 = vmatprep.subr.bf16.mxu1 %v792_v36 }
  0xb4   :  { %v506_v60 = vmul.f32 %v1075_v32, %v1075_v32  ;;  %749 = vmatpush3.bf16.msra.mxu1 %v792_v36 }
  0xb5   :  { %v513_v61 = vsel %vm38_vm0, %v505_v59, 0.0  ;;  %750 = vmatprep.subr.bf16.mxu1 %v793_v37 }
  0xb6   :  { %74 = vadd.xlane.f32.xlu1 %v73_v58  ;;  %514 = vadd.xlane.f32.xlu0 %v513_v61  ;;  %v516_v33 = vsel %vm38_vm0, %v506_v60, 0.0  ;;  %v1120_v58 = vld [vmem:[%s1204_s5] ss:$0 sm:$0xff] }
  0xb8   :  { %751 = vmatpush3.bf16.msra.mxu1 %v793_v37 }
  0xb9   :  { %756 = vmatprep.subr.bf16.mxu1 %v1100_v2 }
  0xba   :  { %517 = vadd.xlane.f32.xlu1 %v516_v33 }
 0x127   :  { %v154_v4 = vpop.xlane.xlu0 %153 }
 0x128   :  { %v164_v5 = vmul.f32 0.03125, %v154_v4 }
 0x12a   :  { %v168_v7 = vadd.f32 1e-06, %v164_v5 }
 0x12b   :  { %v157_v8 = vpop.xlane.xlu1 %156  ;;  %v363_v10 = vpop.xlane.xlu0 %362 }
 0x12c   :  { %800 = vrsqrt.f32 %v168_v7  ;;  %v165_v11 = vmul.f32 0.03125, %v157_v8  ;;  %v373_v12 = vmul.f32 0.03125, %v363_v10 }
 0x12e   :  { %v169_v14 = vadd.f32 1e-06, %v165_v11  ;;  %v377_v15 = vadd.f32 1e-06, %v373_v12 }
 0x12f   :  { %v366_v19 = vpop.xlane.xlu1 %365  ;;  %v160_v20 = vpop.xlane.xlu0 %159 }
 0x130   :  { %802 = vrsqrt.f32 %v169_v14  ;;  %v374_v16 = vmul.f32 0.03125, %v366_v19  ;;  %v166_v24 = vmul.f32 0.03125, %v160_v20 }
 0x131   :  { %804 = vrsqrt.f32 %v377_v15 }
 0x132   :  { %v378_v25 = vadd.f32 1e-06, %v374_v16  ;;  %v170_v29 = vadd.f32 1e-06, %v166_v24 }
 0x133   :  { %v163_v30 = vpop.xlane.xlu1 %162  ;;  %v369_v34 = vpop.xlane.xlu0 %368 }
 0x134   :  { %806 = vrsqrt.f32 %v378_v25  ;;  %v167_v35 = vmul.f32 0.03125, %v163_v30  ;;  %v375_v38 = vmul.f32 0.03125, %v369_v34 }
 0x135   :  { %808 = vrsqrt.f32 %v170_v29 }
 0x136   :  { %v801_v21 = vpop.eup %800  ;;  %v171_v39 = vadd.f32 1e-06, %v167_v35  ;;  %v379_v40 = vadd.f32 1e-06, %v375_v38 }
 0x137   :  { %v372_v41 = vpop.xlane.xlu1 %371  ;;  %v66_v42 = vpop.xlane.xlu0 %65  ;;  %v176_v43 = vmul.f32 %v801_v21, %v977_v44 }
 0x138   :  { %810 = vrsqrt.f32 %v171_v39  ;;  %v376_v46 = vmul.f32 0.03125, %v372_v41  ;;  %v76_v47 = vmul.f32 0.03125, %v66_v42 }
 0x139   :  { %812 = vrsqrt.f32 %v379_v40  ;;  %v180_v31 = vmul.f32 %v1113_v26, %v176_v43 }
 0x13a   :  { %v803_v48 = vpop.eup %802  ;;  %v380_v49 = vadd.f32 1e-06, %v376_v46  ;;  %v80_v50 = vadd.f32 1e-06, %v76_v47 }
 0x13b   :  { %v805_v51 = vpop.eup %804  ;;  %v69_v54 = vpop.xlane.xlu1 %68  ;;  %v177_v56 = vmul.f32 %v803_v48, %v987_v52  ;;  %v184_v1 = vadd.f32 %v1120_v58, %v180_v31 }
 0x13c   :  { %v509_v55 = vpop.xlane.xlu0 %508  ;;  %814 = vrsqrt.f32 %v380_v49  ;;  %v77_v44 = vmul.f32 0.03125, %v69_v54  ;;  %v385_v59 = vmul.f32 %v805_v51, %v979_v45 }
 0x13d   :  { %v519_v57 = vmul.f32 0.03125, %v509_v55  ;;  %816 = vrsqrt.f32 %v80_v50  ;;  %v181_v60 = vmul.f32 %v1113_v26, %v177_v56 }
 0x13e   :  { %v807_v61 = vpop.eup %806  ;;  %v81_v33 = vadd.f32 1e-06, %v77_v44  ;;  %v389_v7 = vmul.f32 %v1113_v26, %v385_v59 }
 0x13f   :  { %v523_v36 = vadd.f32 1e-06, %v519_v57  ;;  %v809_v37 = vpop.eup %808  ;;  %v512_v52 = vpop.xlane.xlu1 %511  ;;  %v185_v4 = vadd.f32 %v1120_v58, %v181_v60  ;;  %v386_v5 = vmul.f32 %v807_v61, %v991_v53 }
 0x140   :  { %v72_v0 = vpop.xlane.xlu0 %71  ;;  %v178_v8 = vmul.f32 %v809_v37, %v1001_v62  ;;  %818 = vrsqrt.f32 %v81_v33  ;;  %v520_v45 = vmul.f32 0.03125, %v512_v52  ;;  %v393_v25 = vadd.f32 %v1120_v58, %v389_v7 }
 0x141   :  { %v78_v10 = vmul.f32 0.03125, %v72_v0  ;;  %820 = vrsqrt.f32 %v523_v36  ;;  %v188_v11 = vpack.c.bf16 %v185_v4, %v184_v1  ;;  %v390_v12 = vmul.f32 %v1113_v26, %v386_v5 }
 0x142   :  { %v811_v14 = vpop.eup %810  ;;  %v524_v15 = vadd.f32 1e-06, %v520_v45  ;;  %v182_v29 = vmul.f32 %v1113_v26, %v178_v8 }
 0x143   :  { %v82_v19 = vadd.f32 1e-06, %v78_v10  ;;  %v813_v20 = vpop.eup %812  ;;  %v179_v16 = vmul.f32 %v811_v14, %v1005_v63  ;;  %v75_v24 = vpop.xlane.xlu1 %74  ;;  %752 = vmatprep.mubr.msk.bf16.mxu1 %vm38_vm0, %v188_v11  ;;  %v394_v62 = vadd.f32 %v1120_v58, %v390_v12 }
 0x144   :  { %v515_v53 = vpop.xlane.xlu0 %514  ;;  %v387_v30 = vmul.f32 %v813_v20, %v1015_v6  ;;  %822 = vrsqrt.f32 %v524_v15  ;;  %v79_v34 = vmul.f32 0.03125, %v75_v24  ;;  %v186_v46 = vadd.f32 %v1120_v58, %v182_v29 }
 0x145   :  { %v521_v35 = vmul.f32 0.03125, %v515_v53  ;;  %824 = vrsqrt.f32 %v82_v19  ;;  %v397_v38 = vpack.c.bf16 %v394_v62, %v393_v25  ;;  %v183_v21 = vmul.f32 %v1113_v26, %v179_v16 }
 0x146   :  { %v815_v63 = vpop.eup %814  ;;  %v83_v39 = vadd.f32 1e-06, %v79_v34  ;;  %v391_v47 = vmul.f32 %v1113_v26, %v387_v30  ;;  %v687_v34 = vld [vmem:[%s1205_s7] ss:$0 sm:$0xff] }
 0x147   :  { %v525_v40 = vadd.f32 1e-06, %v521_v35  ;;  %v817_v41 = vpop.eup %816  ;;  %v388_v42 = vmul.f32 %v815_v63, %v1019_v9  ;;  %v518_v43 = vpop.xlane.xlu1 %517  ;;  %768 = vmatprep.mubr.msk.bf16.mxu0 %vm38_vm0, %v397_v38  ;;  %v187_v6 = vadd.f32 %v1120_v58, %v183_v21  ;;  %v798_v9 = vld [vmem:[%s1202_s6 + $0x8] sm:$0xff]  }
 0x148   :  { %v88_v48 = vmul.f32 %v817_v41, %v1029_v13  ;;  %826 = vrsqrt.f32 %v83_v39  ;;  %v522_v49 = vmul.f32 0.03125, %v518_v43  ;;  %v395_v44 = vadd.f32 %v1120_v58, %v391_v47 }
 0x149   :  { %828 = vrsqrt.f32 %v525_v40  ;;  %v189_v50 = vpack.c.bf16 %v187_v6, %v186_v46  ;;  %v392_v51 = vmul.f32 %v1113_v26, %v388_v42 }
 0x14a   :  { %v819_v54 = vpop.eup %818  ;;  %v526_v55 = vadd.f32 1e-06, %v522_v49  ;;  %v99_v57 = vmul.f32 %v1113_v26, %v88_v48 }
 0x14b   :  { %v821_v56 = vpop.eup %820  ;;  %v89_v31 = vmul.f32 %v819_v54, %v1033_v17  ;;  %753 = vmatmul.mubr.msk.bf16.vlgmr.msra.gmra.mrb[0].mxu1 %vm38_vm0, %v189_v50  ;;  %v396_v13 = vadd.f32 %v1120_v58, %v392_v51  ;;  %v799_v17 = vld [vmem:[%s1202_s6 + $0x38] sm:$0xff]  }
 0x14c   :  { %v531_v59 = vmul.f32 %v821_v56, %v1043_v18  ;;  %830 = vrsqrt.f32 %v526_v55  ;;  %757 = vmatpush3.bf16.msra.mxu1 %v1100_v2  ;;  %v110_v52 = vadd.f32 %v1120_v58, %v99_v57 }
 0x14d   :  { %v398_v60 = vpack.c.bf16 %v396_v13, %v395_v44  ;;  %v100_v61 = vmul.f32 %v1113_v26, %v89_v31  ;;  %758 = vmatprep.subr.bf16.mxu1 %v798_v9 }
 0x14e   :  { %v823_v33 = vpop.eup %822  ;;  %v535_v2 = vmul.f32 %v1113_v26, %v531_v59 }
 0x14f   :  { %v825_v36 = vpop.eup %824  ;;  %v532_v37 = vmul.f32 %v823_v33, %v1047_v22  ;;  %769 = vmatmul.mubr.msk.bf16.vlgmr.msra.gmra.mrb[0].mxu0 %vm38_vm0, %v398_v60  ;;  %v111_v18 = vadd.f32 %v1120_v58, %v100_v61 }
 0x150   :  { %v90_v0 = vmul.f32 %v825_v36, %v1057_v23  ;;  %773 = vmatpush3.bf16.msra.mxu0 %v1106_v3  ;;  %759 = vmatpush3.bf16.msra.mxu1 %v798_v9  ;;  %v539_v45 = vadd.f32 %v1120_v58, %v535_v2 }
 0x151   :  { %v114_v1 = vpack.c.bf16 %v111_v18, %v110_v52  ;;  %v536_v4 = vmul.f32 %v1113_v26, %v532_v37  ;;  %774 = vmatprep.subr.bf16.mxu0 %v799_v17 }
 0x152   :  { %v827_v5 = vpop.eup %826  ;;  %v101_v22 = vmul.f32 %v1113_v26, %v90_v0 }
 0x153   :  { %v829_v7 = vpop.eup %828  ;;  %v91_v8 = vmul.f32 %v827_v5, %v1061_v27  ;;  %760 = vmatprep.mubr.msk.bf16.mxu1 %vm38_vm0, %v114_v1  ;;  %v540_v10 = vadd.f32 %v1120_v58, %v536_v4 }
 0x154   :  { %v533_v23 = vmul.f32 %v829_v7, %v1071_v28  ;;  %775 = vmatpush3.bf16.msra.mxu0 %v799_v17  ;;  %v112_v27 = vadd.f32 %v1120_v58, %v101_v22 }
 0x155   :  { %v102_v3 = vmul.f32 %v1113_v26, %v91_v8  ;;  %v543_v11 = vpack.c.bf16 %v540_v10, %v539_v45 }
 0x156   :  { %v831_v12 = vpop.eup %830  ;;  %v537_v14 = vmul.f32 %v1113_v26, %v533_v23 }
 0x157   :  { %v534_v15 = vmul.f32 %v831_v12, %v1075_v32  ;;  %776 = vmatprep.mubr.msk.bf16.mxu0 %vm38_vm0, %v543_v11  ;;  %v113_v19 = vadd.f32 %v1120_v58, %v102_v3 }
 0x158   :  { %v541_v28 = vadd.f32 %v1120_v58, %v537_v14 }
 0x159   :  { %v538_v20 = vmul.f32 %v1113_v26, %v534_v15  ;;  %v115_v16 = vpack.c.bf16 %v113_v19, %v112_v27 }
 0x15b   :  { %761 = vmatmul.mubr.msk.bf16.vlgmr.msra.gmra.mrb[0].mxu1 %vm38_vm0, %v115_v16  ;;  %v542_v24 = vadd.f32 %v1120_v58, %v538_v20 }
 0x15d   :  { %v544_v53 = vpack.c.bf16 %v542_v24, %v541_v28 }
 0x15f   :  { %777 = vmatmul.mubr.msk.bf16.vlgmr.msra.gmra.mrb[0].mxu0 %vm38_vm0, %v544_v53 }
 0x22e   :  { %v762_v25 = vpop.f32.mrb[0].mxu1 }
 0x22f   :  { %v314_v32 = vpop.f32.mrb[1].mxu1 }
 0x230   :  { %v763_v62 = vpop.f32.mrb[2].mxu1 }
 0x231   :  { %v317_v29 = vpop.f32.mrb[3].mxu1 }
 0x232   :  { %v778_v30 = vpop.f32.mrb[0].mxu0 }
 0x233   :  { %v780_v26 = vadd.f32 %v778_v30, %v762_v25  ;;  %v602_v35 = vpop.f32.mrb[1].mxu0 }
 0x234   :  { %v781_v38 = vadd.f32 %v602_v35, %v314_v32  ;;  %v779_v21 = vpop.f32.mrb[2].mxu0 }
 0x235   :  { %v630_v63 = vadd.f32 %v780_v26, %v687_v34  ;;  %v782_v39 = vadd.f32 %v779_v21, %v763_v62  ;;  %v605_v40 = vpop.f32.mrb[3].mxu0 }
 0x236   :  { %v628_v58 = vadd.f32 %v781_v38, %v687_v34  ;;  %v783_v41 = vadd.f32 %v605_v40, %v317_v29 }
 0x237   :  { %v694_v42 = vpack.c.bf16 %v630_v63, %v630_v63  ;;  %v631_v43 = vadd.f32 %v782_v39, %v687_v34 }
 0x238   :  { %v692_v46 = vpack.c.bf16 %v628_v58, %v628_v58  ;;  %v629_v6 = vadd.f32 %v783_v41, %v687_v34 }
 0x239   :  { %651 = vst.msk [vmem:[%s1206_s8 + $0x8] sm:$0xf] %vm648_vm1, %v694_v42  ;;  %v695_v47 = vpack.c.bf16 %v631_v43, %v631_v43 }
 0x23a   :  { %649 = vst.msk [vmem:[%s1206_s8] sm:$0xf] %vm648_vm1, %v692_v46  ;;  %v693_v48 = vpack.c.bf16 %v629_v6, %v629_v6 }
 0x23b   :  { %652 = vst.msk [vmem:[%s1206_s8 + $0xc] sm:$0xf] %vm648_vm1, %v695_v47 }
 0x23c   :  { %650 = vst.msk [vmem:[%s1206_s8 + $0x4] sm:$0xf] %vm648_vm1, %v693_v48 }

// kernel: convnext_forward.10
= control target key start
LH: loop header
LB: loop body
LE: loop exit
PB: predicated region body
PF: predicated region fallthrough
CT: control target
= control target key end

     0   :  { %s2950_s17 = smov 0   ;;  %s4243_s0 = inlined_call_operand.vmem [shape: bf16[2,4,4,64], index: 0, kind: input, shape index: {}, may-alias: {0,11}]   ;;  %s4244_s1 = inlined_call_operand.vmem [shape: f32[7,7,64], index: 1, kind: input, shape index: {}]   ;;  %s4245_s2 = inlined_call_operand.vmem [shape: f32[1,64], index: 2, kind: input, shape index: {}]   ;;  %s4246_s3 = inlined_call_operand.vmem [shape: f32[1,64], index: 3, kind: input, shape index: {}]   ;;  %s4247_s4 = inlined_call_operand.vmem [shape: f32[1,64], index: 4, kind: input, shape index: {}]   ;;  %s4248_s5 = inlined_call_operand.vmem [shape: bf16[64,256], index: 5, kind: input, shape index: {}]   ;;  %s4249_s6 = inlined_call_operand.vmem [shape: f32[1,256], index: 6, kind: input, shape index: {}]   ;;  %s4250_s7 = inlined_call_operand.vmem [shape: f32[1,256], index: 7, kind: input, shape index: {}]   ;;  %s4251_s8 = inlined_call_operand.vmem [shape: f32[1,256], index: 8, kind: input, shape index: {}]   ;;  %s4252_s9 = inlined_call_operand.vmem [shape: bf16[256,64], index: 9, kind: input, shape index: {}]   ;;  %s4253_s10 = inlined_call_operand.vmem [shape: f32[1,64], index: 10, kind: input, shape index: {}]   ;;  %s4254_s11 = inlined_call_operand.vmem [shape: bf16[2,4,4,64], index: 11, kind: output, shape index: {}, may-alias: {0,11}]  }
   0x1 LB: > { %s2730_s18 = sadd.s32 4294967295, %s2884_s17   ;;  %p2734_p0 = scmp.ge.s32.totalorder %s2884_s17, 1  ;;  %s2884_s17 = sphi %s2950_s17, %s21_s17  }
   0x2   : > { %p337_p1 = scmp.lt.s32.totalorder %s2884_s17, 3 }
   0x4   : > { %p338_p2 = pnand %p2734_p0, %p337_p1 }
   0x6   : > { %341 = sbr.rel (%p338_p2) target bundleno = 1293 (0x50d), region = 64 }
   0xd   : > { %p2960_p3 = scmp.lt.s32.totalorder %s2730_s18, 1  ;;  %vm392_vm0 = vcmask 523264   ;;  %vm411_vm1 = vcmask 519168   ;;  %v451_v0 = vlaneseq  ;;  %v2886_v1 = vmov 0.0   ;;  %v2984_v2 = vld [vmem:[%s4244_s1] sm:$0x7f] }
   0xe   : > { %393 = vst.msk [vmem:[#allocation2] sm:$0xff] %vm392_vm0, %v2886_v1  ;;  %394 = vst.msk [vmem:[#allocation2 + $0x8] sm:$0xff] %vm392_vm0, %v2886_v1  ;;  %v2998_v3 = vld [vmem:[%s4244_s1 + $0x8] sm:$0x7f]  ;;  %v3003_v4 = vld [vmem:[%s4244_s1 + $0x10] sm:$0x7f] }
   0xf   : > { %395 = vst.msk [vmem:[#allocation2 + $0x10] sm:$0xff] %vm392_vm0, %v2886_v1  ;;  %396 = vst.msk [vmem:[#allocation2 + $0x18] sm:$0xff] %vm392_vm0, %v2886_v1  ;;  %s4473_s18 = smov (!%p2960_p3, %s2730_s18), 1  ;;  %v3005_v5 = vshrl.u32 %v451_v0, 7  ;;  %v3010_v6 = vld [vmem:[%s4244_s1 + $0x18] sm:$0x7f] }
  0x10   : > { %397 = vst.msk [vmem:[#allocation2 + $0x20] sm:$0xff] %vm392_vm0, %v2886_v1  ;;  %398 = vst.msk [vmem:[#allocation2 + $0x28] sm:$0xff] %vm392_vm0, %v2886_v1  ;;  %s2774_s28 = sshll.u32 %s4473_s18, 3  ;;  %v3016_v7 = vld [vmem:[%s4244_s1 + $0x20] sm:$0x7f]  ;;  %vm611_vm2 = vcmask 1046528  }
  0x11   : > { %400 = vst.msk [vmem:[#allocation2 + $0x70] sm:$0xff] %vm392_vm0, %v2886_v1  ;;  %401 = vst.msk [vmem:[#allocation2 + $0x78] sm:$0xff] %vm392_vm0, %v2886_v1  ;;  %v3019_v8 = vsub.s32 0, %v3005_v5  ;;  %s381_s14 = scalar_lea.vmem %s4243_s0, %s2774_s28  ;;  %v3029_v9 = vld [vmem:[%s4244_s1 + $0x28] sm:$0x7f]  ;;  %v3032_v10 = vsub.s32 1, %v3005_v5  ;;  %s386_s19 = scalar_lea.vmem %s4254_s11, %s2774_s28 }
  0x12   : > { %403 = vst.msk [vmem:[#allocation2 + $0x88] sm:$0xff] %vm392_vm0, %v2886_v1  ;;  %407 = vst.msk [vmem:[#allocation2 + $0x30] sm:$0xff] %vm392_vm0, %v2886_v1  ;;  %v3035_v11 = vsub.s32 2, %v3005_v5  ;;  %v3037_v12 = vld [vmem:[%s381_s14] sm:$0x3]  ;;  %v3076_v28 = vsub.s32 3, %v3005_v5 }
  0x13   : > { %408 = vst.msk [vmem:[#allocation2 + $0x40] sm:$0xff] %vm392_vm0, %v2886_v1  ;;  %409 = vst.msk [vmem:[#allocation2 + $0x50] sm:$0xff] %vm392_vm0, %v2886_v1  ;;  %v3039_v13 = vld [vmem:[%s381_s14 + $0x2] sm:$0x3]  ;;  %v3041_v14 = vld [vmem:[%s381_s14 + $0x4] sm:$0x3]  ;;  %v3045_v15 = vrot.slane %v2984_v2, %v3019_v8  ;;  %v3049_v16 = vrot.slane %v2998_v3, %v3019_v8  ;;  %v4257_v18 = vunpack.c.l.bf16 %v3037_v12  ;;  %v3058_v21 = vrot.slane %v3003_v4, %v3019_v8 }
  0x14   : > { %410 = vst.msk [vmem:[#allocation2 + $0x60] sm:$0xff] %vm392_vm0, %v2886_v1  ;;  %402 = vst.msk [vmem:[#allocation2 + $0x80] sm:$0xff] %vm392_vm0, %v2886_v1  ;;  %v3051_v17 = vld [vmem:[%s381_s14 + $0x6] sm:$0x3]  ;;  %v4258_v19 = vunpack.c.l.bf16 %v3039_v13  ;;  %v4255_v20 = vunpack.c.l.bf16 %v3041_v14  ;;  %v3069_v26 = vrot.slane %v3010_v6, %v3019_v8  ;;  %v3073_v27 = vrot.slane %v3016_v7, %v3019_v8  ;;  %v3111_v38 = vld [vmem:[%s4244_s1 + $0x30] sm:$0x7f] }
  0x15   : > { %412 = vst.msk [vmem:[#allocation2 + $0x3c] sm:$0xf] %vm411_vm1, %v2886_v1  ;;  %413 = vst.msk [vmem:[#allocation2 + $0x4c] sm:$0xf] %vm411_vm1, %v2886_v1  ;;  %v4256_v22 = vunpack.c.l.bf16 %v3051_v17  ;;  %v3061_v23 = vld [vmem:[#allocation2] sm:$0xff]  ;;  %v3063_v24 = vld [vmem:[#allocation2 + $0x8] sm:$0xff]  ;;  %v3121_v42 = vrot.slane %v3029_v9, %v3019_v8  ;;  %v3145_v57 = vrot.slane %v3111_v38, %v3019_v8 }
  0x16   : > { %414 = vst.msk [vmem:[#allocation2 + $0x5c] sm:$0xf] %vm411_vm1, %v2886_v1  ;;  %415 = vst.msk [vmem:[#allocation2 + $0x6c] sm:$0xf] %vm411_vm1, %v2886_v1  ;;  %v3065_v25 = vld [vmem:[#allocation2 + $0x10] sm:$0xff]  ;;  %v3087_v29 = vld [vmem:[#allocation2 + $0x18] sm:$0xff]  ;;  %v455_v32 = vmul.f32 %v3045_v15, %v3061_v23  ;;  %v456_v33 = vmul.f32 %v3045_v15, %v3063_v24 }
  0x17   : > { %404 = vst.msk [vmem:[#allocation2 + $0x90] sm:$0xff] %vm392_vm0, %v2886_v1  ;;  %405 = vst.msk [vmem:[#allocation2 + $0x98] sm:$0xff] %vm392_vm0, %v2886_v1  ;;  %v3089_v30 = vld [vmem:[#allocation2 + $0x20] sm:$0xff]  ;;  %v3091_v31 = vld [vmem:[#allocation2 + $0x28] sm:$0xff]  ;;  %v457_v34 = vmul.f32 %v3045_v15, %v3065_v25  ;;  %v475_v35 = vmul.f32 %v3049_v16, %v3065_v25  ;;  %v458_v39 = vmul.f32 %v3045_v15, %v3087_v29  ;;  %vm948_vm3 = vcmask 1045504  }
  0x18   : > { %4347 = vst [vmem:[#allocation3_spill] sm:$0xff] %v3005_v5  ;;  %4348 = vst [vmem:[#allocation4_spill] sm:$0xff] %v3019_v8  ;;  %v476_v40 = vmul.f32 %v3049_v16, %v3087_v29  ;;  %v477_v41 = vmul.f32 %v3049_v16, %v3089_v30  ;;  %v478_v44 = vmul.f32 %v3049_v16, %v3091_v31  ;;  %v3137_v53 = vld [vmem:[#allocation2 + $0x70] sm:$0xff]  ;;  %v3139_v54 = vld [vmem:[#allocation2 + $0x78] sm:$0xff]  ;;  %vm2061_vm4 = vcmask 1042432  }
  0x19   : > { %4349 = vst [vmem:[#allocation5_spill] sm:$0xff] %v3032_v10  ;;  %4350 = vst [vmem:[#allocation6_spill] sm:$0xff] %v3037_v12  ;;  %v3104_v36 = vld [vmem:[#allocation2 + $0x30] sm:$0xff]  ;;  %v483_v45 = vadd.f32 %v475_v35, %v455_v32  ;;  %v495_v46 = vmul.f32 %v3058_v21, %v3089_v30  ;;  %v496_v47 = vmul.f32 %v3058_v21, %v3091_v31  ;;  %vm2062_vm5 = vcmask 1046532  }
  0x1a   : > { %4351 = vst [vmem:[#allocation7_spill] sm:$0xff] %v3039_v13  ;;  %4352 = vst [vmem:[#allocation8_spill] sm:$0xff] %v3041_v14  ;;  %v3106_v37 = vld [vmem:[#allocation2 + $0x40] sm:$0xff]  ;;  %v3123_v43 = vld [vmem:[#allocation2 + $0x50] sm:$0xff]  ;;  %v484_v49 = vadd.f32 %v476_v40, %v456_v33  ;;  %v485_v50 = vadd.f32 %v477_v41, %v457_v34  ;;  %v497_v51 = vmul.f32 %v3058_v21, %v3104_v36  ;;  %vm2670_vm11 = vcmask 517120  }
  0x1b   : > { %4353 = vst [vmem:[#allocation9_spill] sm:$0xff] %v3049_v16  ;;  %4354 = vst [vmem:[#allocation10_spill] sm:$0xff] %v3051_v17  ;;  %v3131_v48 = vld [vmem:[#allocation2 + $0x60] sm:$0xff]  ;;  %v515_v52 = vmul.f32 %v3069_v26, %v3104_v36  ;;  %v503_v55 = vadd.f32 %v495_v46, %v483_v45  ;;  %v517_v56 = vmul.f32 %v3069_v26, %v3106_v37 }
  0x1c   : > { %4355 = vst [vmem:[#allocation11_spill] sm:$0xff] %v3058_v21  ;;  %4356 = vst [vmem:[#allocation12_spill] sm:$0xff] %v3069_v26  ;;  %v486_v58 = vadd.f32 %v478_v44, %v458_v39  ;;  %v505_v59 = vadd.f32 %v497_v51, %v485_v50  ;;  %v504_v60 = vadd.f32 %v496_v47, %v484_v49 }
  0x1d   : > { %4357 = vst [vmem:[#allocation13_spill] sm:$0xff] %v3073_v27  ;;  %420 = vst.msk [vmem:[#allocation2 + $0x38] sm:$0xf] %vm411_vm1, %v4257_v18  ;;  %v523_v61 = vadd.f32 %v515_v52, %v503_v55  ;;  %v535_v62 = vmul.f32 %v3073_v27, %v3106_v37  ;;  %v537_v63 = vmul.f32 %v3073_v27, %v3123_v43 }
  0x1e   : > { %421 = vst.msk [vmem:[#allocation2 + $0x48] sm:$0xf] %vm411_vm1, %v4258_v19  ;;  %422 = vst.msk [vmem:[#allocation2 + $0x58] sm:$0xf] %vm411_vm1, %v4255_v20  ;;  %v525_v33 = vadd.f32 %v517_v56, %v505_v59  ;;  %v555_v34 = vmul.f32 %v3121_v42, %v3123_v43  ;;  %v557_v35 = vmul.f32 %v3121_v42, %v3131_v48 }
  0x1f   : > { %423 = vst.msk [vmem:[#allocation2 + $0x68] sm:$0xf] %vm411_vm1, %v4256_v22  ;;  %4358 = vst [vmem:[#allocation14_spill] sm:$0xff] %v3121_v42  ;;  %v3163_v39 = vrot.slane %v2984_v2, %v3032_v10  ;;  %v575_v46 = vmul.f32 %v3145_v57, %v3131_v48  ;;  %v577_v50 = vmul.f32 %v3145_v57, %v3137_v53 }
  0x20   : > { %4359 = vst [vmem:[#allocation15_spill] sm:$0xff] %v3145_v57  ;;  %v578_v51 = vmul.f32 %v3145_v57, %v3139_v54  ;;  %v543_v56 = vadd.f32 %v535_v62, %v523_v61  ;;  %v545_v59 = vadd.f32 %v537_v63, %v525_v33  ;;  %vm3754_vm6 = vmor %vm2061_vm4, %vm2062_vm5 }
  0x21   : > { %4360 = vst [vmem:[#allocation16_spill] sm:$0xff] %v3163_v39  ;;  %v595_v19 = vmul.f32 %v3163_v39, %v3061_v23  ;;  %v598_v61 = vmul.f32 %v3163_v39, %v3087_v29 }
  0x22   : > { %v563_v12 = vadd.f32 %v555_v34, %v543_v56  ;;  %v565_v13 = vadd.f32 %v557_v35, %v545_v59  ;;  %v3199_v34 = vrot.slane %v2998_v3, %v3032_v10 }
  0x23   : > { %v612_v62 = vrot.slane %v595_v19, 1  ;;  %v3207_v19 = vrot.slane %v3010_v6, %v3032_v10 }
  0x24   : > { %v3151_v0 = vld [vmem:[#allocation2 + $0x38] sm:$0xff]  ;;  %4361 = vst [vmem:[#allocation17_spill] sm:$0xff] %v3199_v34 }
  0x25   : > { %v3153_v1 = vld [vmem:[#allocation2 + $0x48] sm:$0xff]  ;;  %v3155_v32 = vld [vmem:[#allocation2 + $0x58] sm:$0xff]  ;;  %v498_v41 = vmul.f32 %v3058_v21, %v3151_v0  ;;  %v516_v44 = vmul.f32 %v3069_v26, %v3151_v0  ;;  %4363 = vst [vmem:[#allocation19_spill] sm:$0xff] %v3207_v19 }
  0x26   : > { %v3165_v40 = vld [vmem:[#allocation2 + $0x68] sm:$0xff]  ;;  %v518_v45 = vmul.f32 %v3069_v26, %v3153_v1  ;;  %v536_v47 = vmul.f32 %v3073_v27, %v3153_v1  ;;  %v538_v49 = vmul.f32 %v3073_v27, %v3155_v32  ;;  %v556_v20 = vmul.f32 %v3121_v42, %v3155_v32 }
  0x27   : > { %v506_v52 = vadd.f32 %v498_v41, %v486_v58  ;;  %v524_v55 = vadd.f32 %v516_v44, %v504_v60  ;;  %v558_v22 = vmul.f32 %v3121_v42, %v3165_v40  ;;  %v576_v18 = vmul.f32 %v3145_v57, %v3165_v40 }
  0x28   : > { %v596_v58 = vmul.f32 %v3163_v39, %v3063_v24  ;;  %v597_v60 = vmul.f32 %v3163_v39, %v3065_v25  ;;  %v583_v41 = vadd.f32 %v575_v46, %v563_v12  ;;  %v585_v44 = vadd.f32 %v577_v50, %v565_v13 }
  0x29   : > { %v526_v14 = vadd.f32 %v518_v45, %v506_v52  ;;  %v544_v17 = vadd.f32 %v536_v47, %v524_v55  ;;  %v616_v45 = vrot.slane %v598_v61, 1  ;;  %v3203_v52 = vrot.slane %v3003_v4, %v3032_v10 }
  0x2a   : > { %v613_v8 = vrot.slane %v596_v58, 1  ;;  %v615_v16 = vrot.slane %v597_v60, 1  ;;  %v647_v50 = vmul.f32 %v3199_v34, %v3091_v31 }
  0x2b   : > { %v546_v63 = vadd.f32 %v538_v49, %v526_v14  ;;  %v564_v33 = vadd.f32 %v556_v20, %v544_v17  ;;  %4362 = vst [vmem:[#allocation18_spill] sm:$0xff] %v3203_v52  ;;  %v644_v14 = vmul.f32 %v3199_v34, %v3065_v25  ;;  %v645_v17 = vmul.f32 %v3199_v34, %v3087_v29 }
  0x2c   : > { %v614_v12 = vsel %vm611_vm2, %v612_v62, %v613_v8  ;;  %v617_v13 = vsel %vm611_vm2, %v615_v16, %v616_v45  ;;  %v646_v49 = vmul.f32 %v3199_v34, %v3089_v30  ;;  %v692_v16 = vmul.f32 %v3203_v52, %v3089_v30 }
  0x2d   : > { %v566_v35 = vadd.f32 %v558_v22, %v546_v63  ;;  %v584_v47 = vadd.f32 %v576_v18, %v564_v33  ;;  %v632_v18 = vadd.f32 %v614_v12, %v583_v41  ;;  %v634_v46 = vadd.f32 %v617_v13, %v585_v44 }
  0x2e   : > { %v660_v55 = vrot.slane %v644_v14, 1  ;;  %v661_v56 = vrot.slane %v645_v17, 1  ;;  %v693_v58 = vmul.f32 %v3203_v52, %v3091_v31  ;;  %v663_v60 = vrot.slane %v646_v49, 1 }
  0x2f   : > { %v586_v20 = vadd.f32 %v578_v51, %v566_v35  ;;  %v633_v22 = vadd.f32 %v613_v8, %v584_v47  ;;  %v694_v51 = vmul.f32 %v3203_v52, %v3104_v36  ;;  %v664_v61 = vrot.slane %v647_v50, 1 }
  0x30   : > { %v662_v8 = vsel %vm611_vm2, %v660_v55, %v661_v56  ;;  %v3227_v62 = vsub.s32 4, %v3005_v5  ;;  %v695_v33 = vmul.f32 %v3203_v52, %v3151_v0  ;;  %v708_v41 = vrot.slane %v692_v16, 1 }
  0x31   : > { %v635_v59 = vadd.f32 %v616_v45, %v586_v20  ;;  %v681_v63 = vadd.f32 %v661_v56, %v633_v22  ;;  %v709_v44 = vrot.slane %v693_v58, 1  ;;  %v665_v45 = vsel %vm611_vm2, %v663_v60, %v664_v61  ;;  %v3252_v60 = vld [vmem:[#allocation2 + $0x88] sm:$0xff] }
  0x32   : > { %v680_v35 = vadd.f32 %v662_v8, %v632_v18  ;;  %v711_v47 = vrot.slane %v694_v51, 1  ;;  %v740_v12 = vmul.f32 %v3207_v19, %v3104_v36  ;;  %v682_v13 = vadd.f32 %v665_v45, %v634_v46 }
  0x33   : > { %v683_v14 = vadd.f32 %v664_v61, %v635_v59  ;;  %v710_v17 = vsel %vm611_vm2, %v708_v41, %v709_v44  ;;  %v712_v20 = vrot.slane %v695_v33, 1  ;;  %v741_v22 = vmul.f32 %v3207_v19, %v3151_v0 }
  0x34   : > { %v742_v49 = vmul.f32 %v3207_v19, %v3106_v37  ;;  %v743_v50 = vmul.f32 %v3207_v19, %v3153_v1  ;;  %v3242_v18 = vsub.s32 5, %v3005_v5  ;;  %v3246_v55 = vmul.f32 %v3045_v15, %v3091_v31 }
  0x35   : > { %v713_v46 = vsel %vm611_vm2, %v711_v47, %v712_v20  ;;  %v729_v56 = vadd.f32 %v709_v44, %v681_v63  ;;  %v3250_v59 = vsub.s32 6, %v3005_v5  ;;  %v728_v16 = vadd.f32 %v710_v17, %v680_v35 }
  0x36   : > { %v756_v58 = vrot.slane %v740_v12, 1  ;;  %v757_v51 = vrot.slane %v741_v22, 1  ;;  %v759_v8 = vrot.slane %v742_v49, 1  ;;  %v730_v61 = vadd.f32 %v713_v46, %v682_v13 }
  0x37   : > { %v731_v33 = vadd.f32 %v712_v20, %v683_v14  ;;  %v760_v41 = vrot.slane %v743_v50, 1  ;;  %v3256_v45 = vrot.slane %v3016_v7, %v3032_v10  ;;  %v3260_v47 = vmul.f32 %v3121_v42, %v3139_v54 }
  0x38   : > { %v3264_v63 = vmul.f32 %v3145_v57, %v3252_v60  ;;  %v758_v44 = vsel %vm611_vm2, %v756_v58, %v757_v51  ;;  %v3269_v35 = vrot.slane %v3029_v9, %v3032_v10  ;;  %v3273_v12 = vmul.f32 %v3058_v21, %v3153_v1 }
  0x39   : > { %4364 = vst [vmem:[#allocation20_spill] sm:$0xff] %v3256_v45  ;;  %4365 = vst [vmem:[#allocation21_spill] sm:$0xff] %v3260_v47  ;;  %v761_v13 = vsel %vm611_vm2, %v759_v8, %v760_v41  ;;  %v777_v14 = vadd.f32 %v757_v51, %v729_v56  ;;  %v788_v17 = vmul.f32 %v3256_v45, %v3106_v37 }
  0x3a   : > { %4366 = vst [vmem:[#allocation22_spill] sm:$0xff] %v3264_v63  ;;  %v776_v20 = vadd.f32 %v758_v44, %v728_v16  ;;  %v789_v22 = vmul.f32 %v3256_v45, %v3153_v1  ;;  %v790_v49 = vmul.f32 %v3256_v45, %v3123_v43  ;;  %v791_v50 = vmul.f32 %v3256_v45, %v3155_v32 }
  0x3b   : > { %v778_v46 = vadd.f32 %v761_v13, %v730_v61  ;;  %v779_v58 = vadd.f32 %v760_v41, %v731_v33  ;;  %v804_v5 = vrot.slane %v788_v17, 1  ;;  %v836_v8 = vmul.f32 %v3269_v35, %v3123_v43 }
  0x3c   : > { %v805_v56 = vrot.slane %v789_v22, 1  ;;  %v807_v51 = vrot.slane %v790_v49, 1  ;;  %v808_v52 = vrot.slane %v791_v50, 1  ;;  %v837_v16 = vmul.f32 %v3269_v35, %v3155_v32 }
  0x3d   : > { %v3290_v44 = vmul.f32 %v3207_v19, %v3123_v43  ;;  %v838_v34 = vmul.f32 %v3269_v35, %v3131_v48  ;;  %v839_v61 = vmul.f32 %v3269_v35, %v3165_v40  ;;  %v3298_v33 = vrot.slane %v3111_v38, %v3032_v10 }
  0x3e   : > { %v3302_v41 = vmul.f32 %v3069_v26, %v3155_v32  ;;  %v806_v13 = vsel %vm611_vm2, %v804_v5, %v805_v56  ;;  %v809_v17 = vsel %vm611_vm2, %v807_v51, %v808_v52  ;;  %v825_v22 = vadd.f32 %v805_v56, %v777_v14 }
  0x3f   : > { %4367 = vst [vmem:[#allocation23_spill] sm:$0xff] %v3290_v44  ;;  %v3308_v49 = vmul.f32 %v3073_v27, %v3165_v40  ;;  %v824_v50 = vadd.f32 %v806_v13, %v776_v20  ;;  %v826_v39 = vadd.f32 %v809_v17, %v778_v46  ;;  %v827_v57 = vadd.f32 %v808_v52, %v779_v58 }
  0x40   : > { %v852_v42 = vrot.slane %v836_v8, 1  ;;  %v853_v63 = vrot.slane %v837_v16, 1  ;;  %v855_v10 = vrot.slane %v838_v34, 1  ;;  %v856_v47 = vrot.slane %v839_v61, 1 }
  0x41   : > { %4368 = vst [vmem:[#allocation24_spill] sm:$0xff] %v3308_v49  ;;  %v3312_v26 = vmul.f32 %v3207_v19, %v3155_v32  ;;  %v884_v14 = vmul.f32 %v3298_v33, %v3131_v48  ;;  %v885_v56 = vmul.f32 %v3298_v33, %v3165_v40  ;;  %v3321_v52 = vmul.f32 %v3256_v45, %v3131_v48 }
  0x42   : > { %v854_v34 = vsel %vm611_vm2, %v852_v42, %v853_v63  ;;  %v857_v20 = vsel %vm611_vm2, %v855_v10, %v856_v47  ;;  %v873_v46 = vadd.f32 %v853_v63, %v825_v22  ;;  %v875_v8 = vadd.f32 %v856_v47, %v827_v57 }
  0x43   : > { %v872_v58 = vadd.f32 %v854_v34, %v824_v50  ;;  %v886_v51 = vmul.f32 %v3298_v33, %v3137_v53  ;;  %v887_v16 = vmul.f32 %v3298_v33, %v3139_v54  ;;  %v874_v61 = vadd.f32 %v857_v20, %v826_v39 }
  0x44   : > { %v900_v13 = vrot.slane %v884_v14, 1  ;;  %v901_v17 = vrot.slane %v885_v56, 1  ;;  %v3331_v5 = vrot.slane %v2984_v2, %v3035_v11  ;;  %v3335_v42 = vmul.f32 %v3256_v45, %v3165_v40 }
  0x45   : > { %v903_v10 = vrot.slane %v886_v51, 1  ;;  %v904_v63 = vrot.slane %v887_v16, 1  ;;  %v3339_v57 = vrot.slane %v2998_v3, %v3035_v11  ;;  %v3346_v50 = vrot.slane %v3003_v4, %v3035_v11 }
  0x46   : > { %4369 = vst [vmem:[#allocation25_spill] sm:$0xff] %v3331_v5  ;;  %v902_v47 = vsel %vm611_vm2, %v900_v13, %v901_v17  ;;  %v921_v22 = vadd.f32 %v901_v17, %v873_v46  ;;  %v932_v39 = vmul.f32 %v3331_v5, %v3061_v23  ;;  %v933_v20 = vmul.f32 %v3331_v5, %v3063_v24 }
  0x47   : > { %4370 = vst [vmem:[#allocation26_spill] sm:$0xff] %v3339_v57  ;;  %v905_v14 = vsel %vm611_vm2, %v903_v10, %v904_v63  ;;  %v920_v56 = vadd.f32 %v902_v47, %v872_v58  ;;  %v923_v34 = vadd.f32 %v904_v63, %v875_v8  ;;  %v934_v16 = vmul.f32 %v3331_v5, %v3065_v25 }
  0x48   : > { %v922_v51 = vadd.f32 %v905_v14, %v874_v61  ;;  %v935_v46 = vmul.f32 %v3331_v5, %v3087_v29  ;;  %v949_v13 = vrot.slane %v932_v39, 2  ;;  %v950_v23 = vrot.slane %v933_v20, 2 }
  0x49   : > { %v981_v17 = vmul.f32 %v3339_v57, %v3065_v25  ;;  %v982_v10 = vmul.f32 %v3339_v57, %v3087_v29  ;;  %v983_v58 = vmul.f32 %v3339_v57, %v3089_v30  ;;  %v952_v8 = vrot.slane %v934_v16, 2 }
  0x4a   : > { %v953_v63 = vrot.slane %v935_v46, 2  ;;  %v984_v61 = vmul.f32 %v3339_v57, %v3091_v31  ;;  %v1029_v47 = vmul.f32 %v3346_v50, %v3089_v30  ;;  %v951_v39 = vsel %vm948_vm3, %v949_v13, %v950_v23 }
  0x4b   : > { %v970_v14 = vadd.f32 %v950_v23, %v921_v22  ;;  %v997_v20 = vrot.slane %v981_v17, 2  ;;  %v998_v5 = vrot.slane %v982_v10, 2  ;;  %v969_v45 = vadd.f32 %v951_v39, %v920_v56 }
  0x4c   : > { %v954_v25 = vsel %vm948_vm3, %v952_v8, %v953_v63  ;;  %v972_v44 = vadd.f32 %v953_v63, %v923_v34  ;;  %v1000_v19 = vrot.slane %v983_v58, 2  ;;  %v1001_v46 = vrot.slane %v984_v61, 2 }
  0x4d   : > { %v971_v27 = vadd.f32 %v954_v25, %v922_v51  ;;  %v999_v16 = vsel %vm948_vm3, %v997_v20, %v998_v5  ;;  %v1018_v49 = vadd.f32 %v998_v5, %v970_v14  ;;  %v1030_v57 = vmul.f32 %v3346_v50, %v3091_v31 }
  0x4e   : > { %v1017_v21 = vadd.f32 %v999_v16, %v969_v45  ;;  %v1031_v30 = vmul.f32 %v3346_v50, %v3104_v36  ;;  %v1032_v22 = vmul.f32 %v3346_v50, %v3151_v0  ;;  %v1002_v13 = vsel %vm948_vm3, %v1000_v19, %v1001_v46 }
  0x4f   : > { %v1020_v56 = vadd.f32 %v1001_v46, %v972_v44  ;;  %v1045_v34 = vrot.slane %v1029_v47, 2  ;;  %v3377_v51 = vrot.slane %v3010_v6, %v3035_v11  ;;  %v1019_v23 = vadd.f32 %v1002_v13, %v971_v27 }
  0x50   : > { %v1046_v5 = vrot.slane %v1030_v57, 2  ;;  %v1048_v45 = vrot.slane %v1031_v30, 2  ;;  %v1049_v17 = vrot.slane %v1032_v22, 2  ;;  %v3391_v25 = vrot.slane %v3016_v7, %v3035_v11 }
  0x51   : > { %v1077_v10 = vmul.f32 %v3377_v51, %v3104_v36  ;;  %v1078_v58 = vmul.f32 %v3377_v51, %v3151_v0  ;;  %v1079_v8 = vmul.f32 %v3377_v51, %v3106_v37  ;;  %v1080_v19 = vmul.f32 %v3377_v51, %v3153_v1 }
  0x52   : > { %v1047_v44 = vsel %vm948_vm3, %v1045_v34, %v1046_v5  ;;  %v1050_v63 = vsel %vm948_vm3, %v1048_v45, %v1049_v17  ;;  %v1066_v27 = vadd.f32 %v1046_v5, %v1018_v49  ;;  %v1068_v57 = vadd.f32 %v1049_v17, %v1020_v56 }
  0x53   : > { %v1065_v61 = vadd.f32 %v1047_v44, %v1017_v21  ;;  %v1067_v47 = vadd.f32 %v1050_v63, %v1019_v23  ;;  %v1093_v39 = vrot.slane %v1077_v10, 2  ;;  %v1094_v14 = vrot.slane %v1078_v58, 2 }
  0x54   : > { %v1096_v36 = vrot.slane %v1079_v8, 2  ;;  %v1097_v20 = vrot.slane %v1080_v19, 2  ;;  %v3395_v16 = vrot.slane %v3029_v9, %v3035_v11  ;;  %v3400_v49 = vrot.slane %v3111_v38, %v3035_v11 }
  0x55   : > { %v1095_v46 = vsel %vm948_vm3, %v1093_v39, %v1094_v14  ;;  %v1114_v30 = vadd.f32 %v1094_v14, %v1066_v27  ;;  %v3404_v21 = vrot.slane %v2984_v2, %v3076_v28  ;;  %v1125_v34 = vmul.f32 %v3391_v25, %v3106_v37 }
  0x56   : > { %4371 = vst [vmem:[#allocation27_spill] sm:$0xff] %v3395_v16  ;;  %4372 = vst [vmem:[#allocation28_spill] sm:$0xff] %v3400_v49  ;;  %v1098_v22 = vsel %vm948_vm3, %v1096_v36, %v1097_v20  ;;  %v1113_v13 = vadd.f32 %v1095_v46, %v1065_v61  ;;  %v1116_v56 = vadd.f32 %v1097_v20, %v1068_v57 }
  0x57   : > { %4373 = vst [vmem:[#allocation29_spill] sm:$0xff] %v3404_v21  ;;  %v1115_v23 = vadd.f32 %v1098_v22, %v1067_v47  ;;  %v1126_v5 = vmul.f32 %v3391_v25, %v3153_v1  ;;  %v1127_v45 = vmul.f32 %v3391_v25, %v3123_v43  ;;  %v1128_v11 = vmul.f32 %v3391_v25, %v3155_v32 }
  0x58   : > { %v1141_v17 = vrot.slane %v1125_v34, 2  ;;  %v1173_v10 = vmul.f32 %v3395_v16, %v3123_v43  ;;  %v1174_v58 = vmul.f32 %v3395_v16, %v3155_v32  ;;  %v1175_v37 = vmul.f32 %v3395_v16, %v3131_v48 }
  0x59   : > { %v1142_v8 = vrot.slane %v1126_v5, 2  ;;  %v1144_v19 = vrot.slane %v1127_v45, 2  ;;  %v1145_v44 = vrot.slane %v1128_v11, 2  ;;  %v1176_v63 = vmul.f32 %v3395_v16, %v3165_v40 }
  0x5a   : > { %v1189_v27 = vrot.slane %v1173_v10, 2  ;;  %v1190_v57 = vrot.slane %v1174_v58, 2  ;;  %v1192_v61 = vrot.slane %v1175_v37, 2  ;;  %v1221_v47 = vmul.f32 %v3400_v49, %v3131_v48 }
  0x5b   : > { %v1143_v43 = vsel %vm948_vm3, %v1141_v17, %v1142_v8  ;;  %v1146_v39 = vsel %vm948_vm3, %v1144_v19, %v1145_v44  ;;  %v1162_v14 = vadd.f32 %v1142_v8, %v1114_v30  ;;  %v1164_v36 = vadd.f32 %v1145_v44, %v1116_v56 }
  0x5c   : > { %v1161_v20 = vadd.f32 %v1143_v43, %v1113_v13  ;;  %v1163_v46 = vadd.f32 %v1146_v39, %v1115_v23  ;;  %v1191_v22 = vsel %vm948_vm3, %v1189_v27, %v1190_v57  ;;  %v1193_v34 = vrot.slane %v1176_v63, 2 }
  0x5d   : > { %v1210_v5 = vadd.f32 %v1190_v57, %v1162_v14  ;;  %v1222_v45 = vmul.f32 %v3400_v49, %v3165_v40  ;;  %v1223_v11 = vmul.f32 %v3400_v49, %v3137_v53  ;;  %v1224_v48 = vmul.f32 %v3400_v49, %v3139_v54 }
  0x5e   : > { %v1194_v17 = vsel %vm948_vm3, %v1192_v61, %v1193_v34  ;;  %v1209_v10 = vadd.f32 %v1191_v22, %v1161_v20  ;;  %v1212_v30 = vadd.f32 %v1193_v34, %v1164_v36  ;;  %v1237_v56 = vrot.slane %v1221_v47, 2 }
  0x5f   : > { %v1211_v13 = vadd.f32 %v1194_v17, %v1163_v46  ;;  %v1238_v23 = vrot.slane %v1222_v45, 2  ;;  %v1240_v58 = vrot.slane %v1223_v11, 2  ;;  %v1241_v37 = vrot.slane %v1224_v48, 2 }
  0x60   : > { %v3437_v8 = vmul.f32 %v3269_v35, %v3137_v53  ;;  %v1269_v19 = vmul.f32 %v3404_v21, %v3063_v24  ;;  %v1270_v44 = vmul.f32 %v3404_v21, %v3087_v29  ;;  %v3445_v63 = vrot.slane %v2998_v3, %v3076_v28 }
  0x61   : > { %v1239_v27 = vsel %vm948_vm3, %v1237_v56, %v1238_v23  ;;  %v1242_v57 = vsel %vm948_vm3, %v1240_v58, %v1241_v37  ;;  %v1258_v61 = vadd.f32 %v1238_v23, %v1210_v5  ;;  %v1260_v47 = vadd.f32 %v1241_v37, %v1212_v30 }
  0x62   : > { %4374 = vst [vmem:[#allocation30_spill] sm:$0xff] %v3445_v63  ;;  %v1257_v43 = vadd.f32 %v1239_v27, %v1209_v10  ;;  %v1259_v39 = vadd.f32 %v1242_v57, %v1211_v13  ;;  %v1277_v53 = vrot.slane %v1269_v19, 3  ;;  %v1278_v14 = vrot.slane %v1270_v44, 3 }
  0x63   : > { %v3452_v20 = vmul.f32 %v3269_v35, %v3139_v54  ;;  %v1297_v46 = vmul.f32 %v3445_v63, %v3087_v29  ;;  %v1298_v22 = vmul.f32 %v3445_v63, %v3091_v31  ;;  %v3461_v30 = vrot.slane %v3003_v4, %v3076_v28 }
  0x64   : > { %v1285_v34 = vadd.f32 %v1277_v53, %v1257_v43  ;;  %v1286_v45 = vadd.f32 %v1277_v53, %v1258_v61  ;;  %v1287_v5 = vadd.f32 %v1278_v14, %v1259_v39  ;;  %v1288_v11 = vadd.f32 %v1278_v14, %v1260_v47 }
  0x65   : > { %v1305_v17 = vrot.slane %v1297_v46, 3  ;;  %v1306_v10 = vrot.slane %v1298_v22, 3  ;;  %v3467_v23 = vrot.slane %v3010_v6, %v3076_v28  ;;  %v3471_v58 = vrot.slane %v3016_v7, %v3076_v28 }
  0x66   : > { %v1325_v61 = vmul.f32 %v3461_v30, %v3091_v31  ;;  %v1326_v47 = vmul.f32 %v3461_v30, %v3151_v0  ;;  %v3488_v46 = vrot.slane %v3029_v9, %v3076_v28  ;;  %v3492_v22 = vmul.f32 %v3298_v33, %v3252_v60 }
  0x67   : > { %4375 = vst [vmem:[#allocation31_spill] sm:$0xff] %v3471_v58  ;;  %v1313_v19 = vadd.f32 %v1305_v17, %v1285_v34  ;;  %v1314_v44 = vadd.f32 %v1305_v17, %v1286_v45  ;;  %v1315_v27 = vadd.f32 %v1306_v10, %v1287_v5  ;;  %v1316_v57 = vadd.f32 %v1306_v10, %v1288_v11 }
  0x68   : > { %v1353_v43 = vmul.f32 %v3467_v23, %v3151_v0  ;;  %v1354_v39 = vmul.f32 %v3467_v23, %v3153_v1  ;;  %v1381_v53 = vmul.f32 %v3471_v58, %v3153_v1  ;;  %v1382_v14 = vmul.f32 %v3471_v58, %v3155_v32 }
  0x69   : > { %v1333_v34 = vrot.slane %v1325_v61, 3  ;;  %v1334_v45 = vrot.slane %v1326_v47, 3  ;;  %v3496_v11 = vmul.f32 %v3404_v21, %v3091_v31  ;;  %v3500_v13 = vrot.slane %v3111_v38, %v3076_v28 }
  0x6a   : > { %v1361_v5 = vrot.slane %v1353_v43, 3  ;;  %v1362_v17 = vrot.slane %v1354_v39, 3  ;;  %v1389_v10 = vrot.slane %v1381_v53, 3  ;;  %v3504_v58 = vmul.f32 %v3445_v63, %v3151_v0 }
  0x6b   : > { %4376 = vst [vmem:[#allocation32_spill] sm:$0xff] %v3500_v13  ;;  %v1341_v37 = vadd.f32 %v1333_v34, %v1313_v19  ;;  %v1342_v48 = vadd.f32 %v1333_v34, %v1314_v44  ;;  %v1343_v56 = vadd.f32 %v1334_v45, %v1315_v27  ;;  %v1344_v36 = vadd.f32 %v1334_v45, %v1316_v57 }
  0x6c   : > { %4377 = vst [vmem:[#allocation33_spill] sm:$0xff] %v3504_v58  ;;  %v1390_v61 = vrot.slane %v1382_v14, 3  ;;  %v1409_v47 = vmul.f32 %v3488_v46, %v3155_v32  ;;  %v1410_v43 = vmul.f32 %v3488_v46, %v3165_v40  ;;  %v1437_v57 = vmul.f32 %v3500_v13, %v3165_v40 }
  0x6d   : > { %v1369_v39 = vadd.f32 %v1361_v5, %v1341_v37  ;;  %v1370_v53 = vadd.f32 %v1361_v5, %v1342_v48  ;;  %v1371_v21 = vadd.f32 %v1362_v17, %v1343_v56  ;;  %v1372_v28 = vadd.f32 %v1362_v17, %v1344_v36 }
  0x6e   : > { %v1417_v44 = vrot.slane %v1409_v47, 3  ;;  %v1418_v27 = vrot.slane %v1410_v43, 3  ;;  %v1438_v48 = vmul.f32 %v3500_v13, %v3139_v54  ;;  %v1445_v56 = vrot.slane %v1437_v57, 3 }
  0x6f   : > { %v1397_v34 = vadd.f32 %v1389_v10, %v1369_v39  ;;  %v1398_v45 = vadd.f32 %v1389_v10, %v1370_v53  ;;  %v1399_v14 = vadd.f32 %v1390_v61, %v1371_v21  ;;  %v1400_v63 = vadd.f32 %v1390_v61, %v1372_v28 }
  0x70   : > { %v3519_v47 = vmul.f32 %v3461_v30, %v3153_v1  ;;  %v1446_v43 = vrot.slane %v1438_v48, 3  ;;  %v3523_v21 = vrot.slane %v2984_v2, %v3227_v62  ;;  %v3527_v10 = vrot.slane %v2998_v3, %v3227_v62 }
  0x71   : > { %v1425_v36 = vadd.f32 %v1417_v44, %v1397_v34  ;;  %v1426_v37 = vadd.f32 %v1417_v44, %v1398_v45  ;;  %v1427_v5 = vadd.f32 %v1418_v27, %v1399_v14  ;;  %v1428_v17 = vadd.f32 %v1418_v27, %v1400_v63 }
  0x72   : > { %4378 = vst [vmem:[#allocation34_spill] sm:$0xff] %v3523_v21  ;;  %4379 = vst [vmem:[#allocation35_spill] sm:$0xff] %v3527_v10  ;;  %v3531_v53 = vrot.slane %v3003_v4, %v3227_v62  ;;  %v3535_v63 = vrot.slane %v3010_v6, %v3227_v62  ;;  %v1465_v27 = vmul.f32 %v3523_v21, %v3063_v24 }
  0x73   : > { %v1453_v61 = vadd.f32 %v1445_v56, %v1425_v36  ;;  %v1454_v39 = vadd.f32 %v1445_v56, %v1426_v37  ;;  %v1455_v28 = vadd.f32 %v1446_v43, %v1427_v5  ;;  %v1456_v44 = vadd.f32 %v1446_v43, %v1428_v17 }
  0x74   : > { %4380 = vst [vmem:[#allocation36_spill] sm:$0xff] %v3531_v53  ;;  %4381 = vst [vmem:[#allocation37_spill] sm:$0xff] %v3535_v63  ;;  %v1466_v57 = vmul.f32 %v3523_v21, %v3087_v29  ;;  %v1493_v34 = vmul.f32 %v3527_v10, %v3087_v29  ;;  %v1494_v45 = vmul.f32 %v3527_v10, %v3091_v31  ;;  %v1473_v48 = vrot.slane %v1465_v27, 4 }
  0x75   : > { %v1521_v14 = vmul.f32 %v3531_v53, %v3091_v31  ;;  %v1522_v6 = vmul.f32 %v3531_v53, %v3151_v0  ;;  %v1549_v36 = vmul.f32 %v3535_v63, %v3151_v0  ;;  %v1550_v37 = vmul.f32 %v3535_v63, %v3153_v1 }
  0x76   : > { %v1474_v56 = vrot.slane %v1466_v57, 4  ;;  %v1501_v5 = vrot.slane %v1493_v34, 4  ;;  %v1502_v17 = vrot.slane %v1494_v45, 4  ;;  %v1481_v49 = vadd.f32 %v1473_v48, %v1453_v61 }
  0x77   : > { %v1529_v43 = vrot.slane %v1521_v14, 4  ;;  %v1530_v16 = vrot.slane %v1522_v6, 4  ;;  %v1482_v19 = vadd.f32 %v1473_v48, %v1454_v39  ;;  %v1557_v13 = vrot.slane %v1549_v36, 4 }
  0x78   : > { %v1483_v10 = vadd.f32 %v1474_v56, %v1455_v28  ;;  %v1484_v21 = vadd.f32 %v1474_v56, %v1456_v44  ;;  %v1558_v58 = vrot.slane %v1550_v37, 4  ;;  %v3555_v27 = vrot.slane %v3016_v7, %v3227_v62 }
  0x79   : > { %v3559_v57 = vrot.slane %v3029_v9, %v3227_v62  ;;  %v1509_v53 = vadd.f32 %v1501_v5, %v1481_v49  ;;  %v1510_v63 = vadd.f32 %v1501_v5, %v1482_v19  ;;  %v3571_v5 = vrot.slane %v3111_v38, %v3227_v62 }
  0x7a   : > { %v1511_v34 = vadd.f32 %v1502_v17, %v1483_v10  ;;  %v1512_v45 = vadd.f32 %v1502_v17, %v1484_v21  ;;  %v1577_v61 = vmul.f32 %v3555_v27, %v3153_v1  ;;  %v1578_v39 = vmul.f32 %v3555_v27, %v3155_v32 }
  0x7b   : > { %v1605_v28 = vmul.f32 %v3559_v57, %v3155_v32  ;;  %v1606_v7 = vmul.f32 %v3559_v57, %v3165_v40  ;;  %v1537_v44 = vadd.f32 %v1529_v43, %v1509_v53  ;;  %v1538_v14 = vadd.f32 %v1529_v43, %v1510_v63 }
  0x7c   : > { %v1539_v9 = vadd.f32 %v1530_v16, %v1511_v34  ;;  %v1540_v6 = vadd.f32 %v1530_v16, %v1512_v45  ;;  %v1585_v49 = vrot.slane %v1577_v61, 4  ;;  %v1586_v19 = vrot.slane %v1578_v39, 4 }
  0x7d   : > { %v1613_v10 = vrot.slane %v1605_v28, 4  ;;  %v1614_v21 = vrot.slane %v1606_v7, 4  ;;  %v1565_v48 = vadd.f32 %v1557_v13, %v1537_v44  ;;  %v1566_v56 = vadd.f32 %v1557_v13, %v1538_v14 }
  0x7e   : > { %v1567_v36 = vadd.f32 %v1558_v58, %v1539_v9  ;;  %v1568_v37 = vadd.f32 %v1558_v58, %v1540_v6  ;;  %v3575_v17 = vrot.slane %v2984_v2, %v3242_v18  ;;  %v3579_v53 = vrot.slane %v2998_v3, %v3242_v18 }
  0x7f   : > { %v3583_v16 = vrot.slane %v3003_v4, %v3242_v18  ;;  %v1593_v63 = vadd.f32 %v1585_v49, %v1565_v48  ;;  %v1594_v13 = vadd.f32 %v1585_v49, %v1566_v56  ;;  %v1633_v62 = vmul.f32 %v3571_v5, %v3165_v40 }
  0x80   : > { %v1595_v43 = vadd.f32 %v1586_v19, %v1567_v36  ;;  %v1596_v58 = vadd.f32 %v1586_v19, %v1568_v37  ;;  %v1634_v34 = vmul.f32 %v3571_v5, %v3139_v54  ;;  %v1661_v2 = vmul.f32 %v3575_v17, %v3063_v24 }
  0x81   : > { %4382 = vst [vmem:[#allocation38_spill] sm:$0xff] %v3583_v16  ;;  %v1662_v3 = vmul.f32 %v3575_v17, %v3087_v29  ;;  %v1621_v45 = vadd.f32 %v1613_v10, %v1593_v63  ;;  %v1622_v61 = vadd.f32 %v1613_v10, %v1594_v13  ;;  %v1641_v28 = vrot.slane %v1633_v62, 4  ;;  %v2856_v62 = vld [vmem:[%s4244_s1 + $0x18] sm:$0x7f] }
  0x82   : > { %v1623_v4 = vadd.f32 %v1614_v21, %v1595_v43  ;;  %v1624_v39 = vadd.f32 %v1614_v21, %v1596_v58  ;;  %v1642_v7 = vrot.slane %v1634_v34, 4  ;;  %v1669_v44 = vrot.slane %v1661_v2, 5  ;;  %v3610_v34 = vld [vmem:[%s4244_s1 + $0x20] sm:$0x7f] }
  0x83   : > { %v1670_v14 = vrot.slane %v1662_v3, 5  ;;  %v1689_v9 = vmul.f32 %v3579_v53, %v3087_v29  ;;  %v1690_v6 = vmul.f32 %v3579_v53, %v3091_v31  ;;  %v1717_v24 = vmul.f32 %v3583_v16, %v3091_v31  ;;  %v3619_v3 = vld [vmem:[%s4244_s1 + $0x28] sm:$0x7f] }
  0x84   : > { %v1718_v49 = vmul.f32 %v3583_v16, %v3151_v0  ;;  %v1649_v19 = vadd.f32 %v1641_v28, %v1621_v45  ;;  %v1650_v10 = vadd.f32 %v1641_v28, %v1622_v61  ;;  %v1651_v48 = vadd.f32 %v1642_v7, %v1623_v4 }
  0x85   : > { %v1652_v21 = vadd.f32 %v1642_v7, %v1624_v39  ;;  %v1697_v56 = vrot.slane %v1689_v9, 5  ;;  %v1698_v36 = vrot.slane %v1690_v6, 5  ;;  %v1725_v37 = vrot.slane %v1717_v24, 5 }
  0x86   : > { %v1726_v63 = vrot.slane %v1718_v49, 5  ;;  %v1677_v13 = vadd.f32 %v1669_v44, %v1649_v19  ;;  %v1678_v43 = vadd.f32 %v1669_v44, %v1650_v10  ;;  %v1679_v29 = vadd.f32 %v1670_v14, %v1651_v48 }
  0x87   : > { %v1680_v58 = vadd.f32 %v1670_v14, %v1652_v21  ;;  %v3605_v31 = vrot.slane %v2856_v62, %v3242_v18  ;;  %v3614_v2 = vrot.slane %v3610_v34, %v3242_v18  ;;  %v3623_v45 = vrot.slane %v3619_v3, %v3242_v18 }
  0x88   : > { %v3627_v61 = vrot.slane %v3111_v38, %v3242_v18  ;;  %v1705_v4 = vadd.f32 %v1697_v56, %v1677_v13  ;;  %v1706_v39 = vadd.f32 %v1697_v56, %v1678_v43  ;;  %v1707_v28 = vadd.f32 %v1698_v36, %v1679_v29 }
  0x89   : > { %4383 = vst [vmem:[#allocation39_spill] sm:$0xff] %v3605_v31  ;;  %4384 = vst [vmem:[#allocation40_spill] sm:$0xff] %v3614_v2  ;;  %v1708_v7 = vadd.f32 %v1698_v36, %v1680_v58  ;;  %v1745_v44 = vmul.f32 %v3605_v31, %v3151_v0  ;;  %v1746_v14 = vmul.f32 %v3605_v31, %v3153_v1 }
  0x8a   : > { %4385 = vst [vmem:[#allocation41_spill] sm:$0xff] %v3623_v45  ;;  %4386 = vst [vmem:[#allocation42_spill] sm:$0xff] %v3627_v61  ;;  %v1773_v9 = vmul.f32 %v3614_v2, %v3153_v1  ;;  %v1774_v6 = vmul.f32 %v3614_v2, %v3155_v32  ;;  %v1733_v24 = vadd.f32 %v1725_v37, %v1705_v4 }
  0x8b   : > { %v1734_v49 = vadd.f32 %v1725_v37, %v1706_v39  ;;  %v1735_v38 = vadd.f32 %v1726_v63, %v1707_v28  ;;  %v1736_v18 = vadd.f32 %v1726_v63, %v1708_v7  ;;  %v1753_v19 = vrot.slane %v1745_v44, 5 }
  0x8c   : > { %v1754_v10 = vrot.slane %v1746_v14, 5  ;;  %v1781_v48 = vrot.slane %v1773_v9, 5  ;;  %v1782_v21 = vrot.slane %v1774_v6, 5  ;;  %v1801_v56 = vmul.f32 %v3623_v45, %v3155_v32 }
  0x8d   : > { %v1802_v36 = vmul.f32 %v3623_v45, %v3165_v40  ;;  %v1829_v13 = vmul.f32 %v3627_v61, %v3165_v40  ;;  %v1830_v43 = vmul.f32 %v3627_v61, %v3139_v54  ;;  %v1761_v29 = vadd.f32 %v1753_v19, %v1733_v24  ;;  %v2859_v45 = vld [vmem:[%s4244_s1] sm:$0x7f]  ;;  %v2860_v54 = vld [vmem:[%s4244_s1 + $0x8] sm:$0x7f] }
  0x8e   : > { %v1762_v37 = vadd.f32 %v1753_v19, %v1734_v49  ;;  %v1763_v58 = vadd.f32 %v1754_v10, %v1735_v38  ;;  %v1764_v63 = vadd.f32 %v1754_v10, %v1736_v18  ;;  %v1809_v4 = vrot.slane %v1801_v56, 5  ;;  %v2861_v49 = vld [vmem:[%s4244_s1 + $0x10] sm:$0x7f] }
  0x8f   : > { %v1810_v39 = vrot.slane %v1802_v36, 5  ;;  %v1837_v28 = vrot.slane %v1829_v13, 5  ;;  %v1838_v7 = vrot.slane %v1830_v43, 5  ;;  %v1789_v44 = vadd.f32 %v1781_v48, %v1761_v29  ;;  %v2863_v36 = vld [vmem:[#allocation2 + $0x18] sm:$0xff]  ;;  %v3669_v29 = vld [vmem:[#allocation2 + $0x28] sm:$0xff] }
  0x90   : > { %v1790_v14 = vadd.f32 %v1781_v48, %v1762_v37  ;;  %v1791_v9 = vadd.f32 %v1782_v21, %v1763_v58  ;;  %v1792_v6 = vadd.f32 %v1782_v21, %v1764_v63  ;;  %v3649_v40 = vrot.slane %v2859_v45, %v3250_v59  ;;  %v2862_v21 = vld [vmem:[#allocation2 + $0x8] sm:$0xff] }
  0x91   : > { %v3655_v24 = vrot.slane %v2860_v54, %v3250_v59  ;;  %v3661_v38 = vrot.slane %v2861_v49, %v3250_v59  ;;  %v3664_v18 = vrot.slane %v2856_v62, %v3250_v59  ;;  %v1817_v19 = vadd.f32 %v1809_v4, %v1789_v44 }
  0x92   : > { %4387 = vst [vmem:[#allocation43_spill] sm:$0xff] %v3649_v40  ;;  %v1818_v45 = vadd.f32 %v1809_v4, %v1790_v14  ;;  %v1819_v10 = vadd.f32 %v1810_v39, %v1791_v9  ;;  %v1820_v48 = vadd.f32 %v1810_v39, %v1792_v6  ;;  %v1857_v56 = vmul.f32 %v2862_v21, %v3649_v40 }
  0x93   : > { %4388 = vst [vmem:[#allocation44_spill] sm:$0xff] %v3655_v24  ;;  %4389 = vst [vmem:[#allocation45_spill] sm:$0xff] %v3661_v38  ;;  %v1858_v13 = vmul.f32 %v2863_v36, %v3649_v40  ;;  %v1885_v43 = vmul.f32 %v2863_v36, %v3655_v24  ;;  %v1886_v37 = vmul.f32 %v3669_v29, %v3655_v24 }
  0x94   : > { %4390 = vst [vmem:[#allocation46_spill] sm:$0xff] %v3664_v18  ;;  %v1845_v58 = vadd.f32 %v1837_v28, %v1817_v19  ;;  %v1846_v62 = vadd.f32 %v1837_v28, %v1818_v45  ;;  %v1847_v63 = vadd.f32 %v1838_v7, %v1819_v10  ;;  %v1848_v44 = vadd.f32 %v1838_v7, %v1820_v48 }
  0x95   : > { %v1865_v4 = vrot.slane %v1857_v56, 6  ;;  %v1866_v14 = vrot.slane %v1858_v13, 6  ;;  %v1893_v39 = vrot.slane %v1885_v43, 6  ;;  %v1894_v9 = vrot.slane %v1886_v37, 6 }
  0x96   : > { %v1913_v6 = vmul.f32 %v3669_v29, %v3661_v38  ;;  %v1914_v54 = vmul.f32 %v3661_v38, %v3151_v0  ;;  %v1941_v49 = vmul.f32 %v3664_v18, %v3151_v0  ;;  %v1942_v21 = vmul.f32 %v3664_v18, %v3153_v1 }
  0x97   : > { %v1873_v19 = vadd.f32 %v1865_v4, %v1845_v58  ;;  %v1874_v28 = vadd.f32 %v1865_v4, %v1846_v62  ;;  %v1875_v45 = vadd.f32 %v1866_v14, %v1847_v63  ;;  %v1876_v7 = vadd.f32 %v1866_v14, %v1848_v44  ;;  %v2865_v58 = vld [vmem:[%s4244_s1 + $0x30] sm:$0x7f]  ;;  %v3699_v14 = vld [vmem:[#allocation2 + $0x48] sm:$0xff] }
  0x98   : > { %v1921_v10 = vrot.slane %v1913_v6, 6  ;;  %v1922_v48 = vrot.slane %v1914_v54, 6  ;;  %v1949_v56 = vrot.slane %v1941_v49, 6  ;;  %v1950_v36 = vrot.slane %v1942_v21, 6  ;;  %v3709_v6 = vld [vmem:[#allocation2 + $0x68] sm:$0xff] }
  0x99   : > { %v1901_v13 = vadd.f32 %v1893_v39, %v1873_v19  ;;  %v1902_v43 = vadd.f32 %v1893_v39, %v1874_v28  ;;  %v1903_v37 = vadd.f32 %v1894_v9, %v1875_v45  ;;  %v1904_v24 = vadd.f32 %v1894_v9, %v1876_v7  ;;  %v3703_v39 = vld [vmem:[#allocation2 + $0x58] sm:$0xff] }
  0x9a   : > { %v3683_v38 = vmul.f32 %v3467_v23, %v3155_v32  ;;  %v3687_v0 = vrot.slane %v3610_v34, %v3250_v59  ;;  %v3691_v1 = vrot.slane %v3619_v3, %v3250_v59  ;;  %v3697_v62 = vrot.slane %v2865_v58, %v3250_v59 }
  0x9b   : > { %v1929_v63 = vadd.f32 %v1921_v10, %v1901_v13  ;;  %v1930_v44 = vadd.f32 %v1921_v10, %v1902_v43  ;;  %v1931_v4 = vadd.f32 %v1922_v48, %v1903_v37  ;;  %v1932_v32 = vadd.f32 %v1922_v48, %v1904_v24  ;;  %v3716_v24 = vld [vmem:[%s4245_s2] ss:$0 sm:$0xff]  ;;  %v3720_v13 = vld [vmem:[#allocation2 + $0x78] sm:$0xff] }
  0x9c   : > { %4391 = vst [vmem:[#allocation47_spill] sm:$0xff] %v3687_v0  ;;  %4392 = vst [vmem:[#allocation48_spill] sm:$0xff] %v3691_v1  ;;  %v1969_v34 = vmul.f32 %v3699_v14, %v3687_v0  ;;  %v1970_v3 = vmul.f32 %v3703_v39, %v3687_v0  ;;  %v1997_v9 = vmul.f32 %v3703_v39, %v3691_v1 }
  0x9d   : > { %4393 = vst [vmem:[#allocation49_spill] sm:$0xff] %v3697_v62  ;;  %v1998_v59 = vmul.f32 %v3709_v6, %v3691_v1  ;;  %4394 = vst [vmem:[#allocation50_spill] sm:$0xff] %v3716_v24  ;;  %v1957_v54 = vadd.f32 %v1949_v56, %v1929_v63  ;;  %v1958_v49 = vadd.f32 %v1949_v56, %v1930_v44 }
  0x9e   : > { %v1959_v21 = vadd.f32 %v1950_v36, %v1931_v4  ;;  %v1960_v19 = vadd.f32 %v1950_v36, %v1932_v32  ;;  %v1977_v28 = vrot.slane %v1969_v34, 6  ;;  %v1978_v45 = vrot.slane %v1970_v3, 6  ;;  %v3728_v32 = vld [vmem:[#allocation2 + $0x38] sm:$0xff]  ;;  %v4396_v34 = vld [vmem:[#allocation9_spill] sm:$0xff] }
  0x9f   : > { %v2005_v7 = vrot.slane %v1997_v9, 6  ;;  %v2006_v10 = vrot.slane %v1998_v59, 6  ;;  %v2025_v48 = vmul.f32 %v3709_v6, %v3697_v62  ;;  %v2026_v43 = vmul.f32 %v3720_v13, %v3697_v62  ;;  %v3732_v9 = vld [vmem:[#allocation2 + $0x20] sm:$0xff] }
  0xa0   : > { %v3726_v37 = vcombine.high %v3716_v24, %v3716_v24  ;;  %v1985_v56 = vadd.f32 %v1977_v28, %v1957_v54  ;;  %v1986_v58 = vadd.f32 %v1977_v28, %v1958_v49  ;;  %v1987_v36 = vadd.f32 %v1978_v45, %v1959_v21  ;;  %v3737_v49 = vld [vmem:[#allocation2 + $0x30] sm:$0xff] }
  0xa1   : > { %v1988_v63 = vadd.f32 %v1978_v45, %v1960_v19  ;;  %v2033_v44 = vrot.slane %v2025_v48, 6  ;;  %v2034_v4 = vrot.slane %v2026_v43, 6  ;;  %v480_v3 = vmul.f32 %v3728_v32, %v4396_v34 }
  0xa2   : > { %4395 = vst [vmem:[#allocation51_spill] sm:$0xff] %v3726_v37  ;;  %v459_v59 = vmul.f32 %v3732_v9, %v3045_v15  ;;  %v2013_v62 = vadd.f32 %v2005_v7, %v1985_v56  ;;  %v2014_v1 = vadd.f32 %v2005_v7, %v1986_v58  ;;  %v2015_v0 = vadd.f32 %v2006_v10, %v1987_v36 }
  0xa3   : > { %v2016_v18 = vadd.f32 %v2006_v10, %v1988_v63  ;;  %v488_v54 = vadd.f32 %v480_v3, %v3246_v55  ;;  %v461_v21 = vmul.f32 %v3737_v49, %v3045_v15  ;;  %v462_v19 = vmul.f32 %v3728_v32, %v3045_v15  ;;  %v3746_v10 = vld [vmem:[#allocation2 + $0x40] sm:$0xff] }
  0xa4   : > { %v479_v28 = vmul.f32 %v3737_v49, %v4396_v34  ;;  %v2041_v45 = vadd.f32 %v2033_v44, %v2013_v62  ;;  %v2042_v48 = vadd.f32 %v2033_v44, %v2014_v1  ;;  %v2043_v43 = vadd.f32 %v2034_v4, %v2015_v0  ;;  %v4400_v62 = vld [vmem:[#allocation11_spill] sm:$0xff] }
  0xa5   : > { %v2044_v56 = vadd.f32 %v2034_v4, %v2016_v18  ;;  %v508_v7 = vadd.f32 %v3273_v12, %v488_v54  ;;  %v481_v55 = vmul.f32 %v3746_v10, %v4396_v34  ;;  %v482_v58 = vmul.f32 %v3699_v14, %v4396_v34 }
  0xa6   : > { %v487_v36 = vadd.f32 %v479_v28, %v459_v59  ;;  %v2057_v63 = vcombine.high %v2041_v45, %v2041_v45  ;;  %v2058_v15 = vcombine.high %v2043_v43, %v2043_v43  ;;  %v2066_v3 = vrot.slane %v2042_v48, 5  ;;  %v3761_v59 = vld [vmem:[#allocation2 + $0x50] sm:$0xff]  ;;  %v4401_v45 = vld [vmem:[#allocation24_spill] sm:$0xff] }
  0xa7   : > { %v2070_v40 = vrot.slane %v2044_v56, 5  ;;  %v4397_v0 = vmov 0  ;;  %v528_v12 = vadd.f32 %v3302_v41, %v508_v7  ;;  %v489_v18 = vadd.f32 %v481_v55, %v461_v21  ;;  %v4402_v56 = vld [vmem:[#allocation12_spill] sm:$0xff]  ;;  %v3770_v21 = vld [vmem:[#allocation2 + $0x60] sm:$0xff] }
  0xa8   : > { %v4398_v0 = vsel %vm3754_vm6, 4294967295, %v4397_v0  ;;  %v490_v1 = vadd.f32 %v482_v58, %v462_v19  ;;  %v499_v44 = vmul.f32 %v3746_v10, %v4400_v62  ;;  %v2739_v4 = vrot.slane %v2057_v63, 9 }
  0xa9   : > { %4399 = vst [vmem:[#allocation9_spill] sm:$0xff] %v4398_v0  ;;  %v2740_v34 = vrot.slane %v2058_v15, 9  ;;  %v501_v54 = vmul.f32 %v3761_v59, %v4400_v62  ;;  %v502_v28 = vmul.f32 %v3703_v39, %v4400_v62  ;;  %v548_v48 = vadd.f32 %v4401_v45, %v528_v12  ;;  %v4405_v12 = vld [vmem:[#allocation21_spill] sm:$0xff] }
  0xaa   : > { %v507_v43 = vadd.f32 %v499_v44, %v487_v36  ;;  %v519_v41 = vmul.f32 %v3761_v59, %v4402_v56  ;;  %v521_v19 = vmul.f32 %v3770_v21, %v4402_v56  ;;  %v2067_v7 = vsel %vm3754_vm6, %v2739_v4, %v2066_v3  ;;  %v3785_v44 = vld [vmem:[#allocation2 + $0x80] sm:$0xff]  ;;  %v4406_v4 = vld [vmem:[#allocation13_spill] sm:$0xff] }
  0xab   : > { %v2071_v55 = vsel %vm3754_vm6, %v2740_v34, %v2070_v40  ;;  %v509_v58 = vadd.f32 %v501_v54, %v489_v18  ;;  %v510_v63 = vadd.f32 %v502_v28, %v490_v1  ;;  %v3779_v15 = vadd.f32 %v3716_v24, %v2067_v7  ;;  %v3791_v18 = vld [vmem:[#allocation2 + $0x70] sm:$0xff]  ;;  %v4407_v54 = vld [vmem:[#allocation22_spill] sm:$0xff] }
  0xac   : > { %v3782_v36 = vadd.f32 %v3726_v37, %v2071_v55  ;;  %v568_v62 = vadd.f32 %v4405_v12, %v548_v48  ;;  %v522_v45 = vmul.f32 %v3709_v6, %v4402_v56  ;;  %v527_v61 = vadd.f32 %v519_v41, %v507_v43  ;;  %v3798_v48 = vld [vmem:[#allocation2 + $0x90] sm:$0xff]  ;;  %v3800_v7 = vld [vmem:[#allocation2 + $0x98] sm:$0xff] }
  0xad   : > { %4403 = vst [vmem:[#allocation11_spill] sm:$0xff] %v3779_v15  ;;  %v529_v3 = vadd.f32 %v521_v19, %v509_v58  ;;  %v539_v40 = vmul.f32 %v3770_v21, %v4406_v4  ;;  %v541_v1 = vmul.f32 %v3791_v18, %v4406_v4  ;;  %v542_v43 = vmul.f32 %v3720_v13, %v4406_v4  ;;  %v4408_v55 = vld [vmem:[#allocation14_spill] sm:$0xff] }
  0xae   : > { %4404 = vst [vmem:[#allocation24_spill] sm:$0xff] %v3782_v36  ;;  %v2101_v34 = vcombine.low %v3779_v15, %v3782_v36  ;;  %v588_v28 = vadd.f32 %v4407_v54, %v568_v62  ;;  %v530_v56 = vadd.f32 %v522_v45, %v510_v63  ;;  %v559_v58 = vmul.f32 %v3791_v18, %v4408_v55  ;;  %v4409_v54 = vld [vmem:[#allocation15_spill] sm:$0xff] }
  0xaf   : > { %v547_v41 = vadd.f32 %v539_v40, %v527_v61  ;;  %v549_v19 = vadd.f32 %v541_v1, %v529_v3  ;;  %v561_v12 = vmul.f32 %v4408_v55, %v3785_v44  ;;  %v562_v62 = vmul.f32 %v4408_v55, %v3252_v60  ;;  %v4410_v1 = vld [vmem:[#allocation16_spill] sm:$0xff] }
  0xb0   : > { %v2105_v36 = vsel %vm392_vm0, %v2101_v34, 0.0  ;;  %v550_v15 = vadd.f32 %v542_v43, %v530_v56  ;;  %v579_v63 = vmul.f32 %v4409_v54, %v3785_v44  ;;  %v581_v61 = vmul.f32 %v4409_v54, %v3798_v48 }
  0xb1   : > { %2106 = vadd.xlane.f32.xlu0 %v2105_v36  ;;  %v567_v45 = vadd.f32 %v559_v58, %v547_v41  ;;  %v569_v4 = vadd.f32 %v561_v12, %v549_v19  ;;  %v582_v3 = vmul.f32 %v4409_v54, %v3800_v7  ;;  %v599_v34 = vmul.f32 %v3732_v9, %v4410_v1  ;;  %v4411_v19 = vld [vmem:[#allocation17_spill] sm:$0xff] }
  0xb2   : > { %v570_v40 = vadd.f32 %v562_v62, %v550_v15  ;;  %v600_v56 = vmul.f32 %v3669_v29, %v4410_v1  ;;  %v601_v60 = vmul.f32 %v3737_v49, %v4410_v1  ;;  %v602_v41 = vmul.f32 %v3728_v32, %v4410_v1  ;;  %v4412_v1 = vld [vmem:[#allocation18_spill] sm:$0xff] }
  0xb3   : > { %v587_v43 = vadd.f32 %v579_v63, %v567_v45  ;;  %v589_v36 = vadd.f32 %v581_v61, %v569_v4  ;;  %v648_v55 = vmul.f32 %v3737_v49, %v4411_v19  ;;  %v618_v12 = vrot.slane %v599_v34, 1 }
  0xb4   : > { %v590_v58 = vadd.f32 %v582_v3, %v570_v40  ;;  %v619_v15 = vrot.slane %v600_v56, 1  ;;  %v621_v62 = vrot.slane %v601_v60, 1  ;;  %v622_v54 = vrot.slane %v602_v41, 1 }
  0xb5   : > { %v649_v37 = vmul.f32 %v3728_v32, %v4411_v19  ;;  %v650_v24 = vmul.f32 %v3746_v10, %v4411_v19  ;;  %v651_v63 = vmul.f32 %v3699_v14, %v4411_v19  ;;  %v666_v61 = vrot.slane %v648_v55, 1 }
  0xb6   : > { %v620_v45 = vsel %vm611_vm2, %v618_v12, %v619_v15  ;;  %v637_v4 = vadd.f32 %v619_v15, %v588_v28  ;;  %v696_v3 = vmul.f32 %v3746_v10, %v4412_v1  ;;  %v623_v40 = vsel %vm611_vm2, %v621_v62, %v622_v54 }
  0xb7   : > { %v636_v34 = vadd.f32 %v620_v45, %v587_v43  ;;  %v639_v56 = vadd.f32 %v622_v54, %v590_v58  ;;  %v667_v60 = vrot.slane %v649_v37, 1  ;;  %v638_v41 = vadd.f32 %v623_v40, %v589_v36  ;;  %v4413_v54 = vld [vmem:[#allocation19_spill] sm:$0xff] }
  0xb8   : > { %v669_v0 = vrot.slane %v650_v24, 1  ;;  %v670_v2 = vrot.slane %v651_v63, 1  ;;  %v697_v31 = vmul.f32 %v3699_v14, %v4412_v1  ;;  %v698_v28 = vmul.f32 %v3761_v59, %v4412_v1 }
  0xb9   : > { %v668_v19 = vsel %vm611_vm2, %v666_v61, %v667_v60  ;;  %v685_v16 = vadd.f32 %v667_v60, %v637_v4  ;;  %v699_v55 = vmul.f32 %v3703_v39, %v4412_v1  ;;  %v714_v37 = vrot.slane %v696_v3, 1  ;;  %v4415_v61 = vld [vmem:[#allocation23_spill] sm:$0xff] }
  0xba   : > { %v671_v12 = vsel %vm611_vm2, %v669_v0, %v670_v2  ;;  %v684_v43 = vadd.f32 %v668_v19, %v636_v34  ;;  %v687_v58 = vadd.f32 %v670_v2, %v639_v56  ;;  %v715_v24 = vrot.slane %v697_v31, 1  ;;  %v4417_v0 = vld [vmem:[#allocation20_spill] sm:$0xff] }
  0xbb   : > { %v686_v36 = vadd.f32 %v671_v12, %v638_v41  ;;  %v717_v15 = vrot.slane %v698_v28, 1  ;;  %v718_v62 = vrot.slane %v699_v55, 1  ;;  %v746_v63 = vmul.f32 %v3770_v21, %v4413_v54 }
  0xbc   : > { %v747_v45 = vmul.f32 %v3709_v6, %v4413_v54  ;;  %v4414_v4 = vrot.slane %v3312_v26, 1  ;;  %v4416_v40 = vrot.slane %v4415_v61, 1  ;;  %v794_v2 = vmul.f32 %v3791_v18, %v4417_v0 }
  0xbd   : > { %v716_v3 = vsel %vm611_vm2, %v714_v37, %v715_v24  ;;  %v719_v31 = vsel %vm611_vm2, %v717_v15, %v718_v62  ;;  %v733_v34 = vadd.f32 %v715_v24, %v685_v16  ;;  %v735_v56 = vadd.f32 %v718_v62, %v687_v58 }
  0xbe   : > { %v764_v1 = vsel %vm611_vm2, %v4416_v40, %v4414_v4  ;;  %v732_v60 = vadd.f32 %v716_v3, %v684_v43  ;;  %v734_v41 = vadd.f32 %v719_v31, %v686_v36  ;;  %v765_v19 = vrot.slane %v746_v63, 1  ;;  %v3872_v63 = vld [vmem:[#allocation2 + $0x88] sm:$0xff] }
  0xbf   : > { %v766_v28 = vrot.slane %v747_v45, 1  ;;  %v4418_v55 = vmov %v4414_v4  ;;  %v795_v54 = vmul.f32 %v3720_v13, %v4417_v0  ;;  %v4419_v4 = vrot.slane %v3335_v42, 1 }
  0xc0   : > { %v781_v12 = vadd.f32 %v4418_v55, %v733_v34  ;;  %v4420_v61 = vrot.slane %v3321_v52, 1  ;;  %v813_v40 = vrot.slane %v794_v2, 1  ;;  %v780_v58 = vadd.f32 %v764_v1, %v732_v60 }
  0xc1   : > { %v767_v16 = vsel %vm611_vm2, %v765_v19, %v766_v28  ;;  %v783_v43 = vadd.f32 %v766_v28, %v735_v56  ;;  %v842_v36 = vmul.f32 %v3269_v35, %v3785_v44  ;;  %v814_v26 = vrot.slane %v795_v54, 1 }
  0xc2   : > { %v812_v37 = vsel %vm611_vm2, %v4420_v61, %v4419_v4  ;;  %v782_v24 = vadd.f32 %v767_v16, %v734_v41  ;;  %v4421_v15 = vmov %v4419_v4  ;;  %v843_v52 = vmul.f32 %v3872_v63, %v3269_v35 }
  0xc3   : > { %v829_v62 = vadd.f32 %v4421_v15, %v781_v12  ;;  %v828_v45 = vadd.f32 %v812_v37, %v780_v58  ;;  %v4422_v0 = vrot.slane %v3452_v20, 1  ;;  %v4423_v2 = vrot.slane %v3437_v8, 1  ;;  %v4426_v20 = vld [vmem:[#allocation25_spill] sm:$0xff] }
  0xc4   : > { %v861_v3 = vrot.slane %v842_v36, 1  ;;  %v888_v31 = vmul.f32 %v3298_v33, %v3785_v44  ;;  %v815_v34 = vsel %vm611_vm2, %v813_v40, %v814_v26  ;;  %v831_v42 = vadd.f32 %v814_v26, %v783_v43 }
  0xc5   : > { %v860_v1 = vsel %vm611_vm2, %v4423_v2, %v4422_v0  ;;  %v862_v56 = vrot.slane %v843_v52, 1  ;;  %v4424_v60 = vmov %v4422_v0  ;;  %v830_v19 = vadd.f32 %v815_v34, %v782_v24 }
  0xc6   : > { %v877_v41 = vadd.f32 %v4424_v60, %v829_v62  ;;  %v876_v35 = vadd.f32 %v860_v1, %v828_v45  ;;  %v890_v28 = vmul.f32 %v3298_v33, %v3798_v48  ;;  %v891_v8 = vmul.f32 %v3298_v33, %v3800_v7  ;;  %v4428_v1 = vld [vmem:[#allocation26_spill] sm:$0xff] }
  0xc7   : > { %v863_v55 = vsel %vm611_vm2, %v861_v3, %v862_v56  ;;  %v879_v12 = vadd.f32 %v862_v56, %v831_v42  ;;  %v906_v54 = vrot.slane %v888_v31, 1  ;;  %v4425_v4 = vrot.slane %v3492_v22, 1 }
  0xc8   : > { %v878_v37 = vadd.f32 %v863_v55, %v830_v19  ;;  %v909_v40 = vrot.slane %v890_v28, 1  ;;  %v910_v16 = vrot.slane %v891_v8, 1  ;;  %v936_v58 = vmul.f32 %v3732_v9, %v4426_v20 }
  0xc9   : > { %v925_v61 = vadd.f32 %v4425_v4, %v877_v41  ;;  %v4427_v43 = vmov %v4425_v4  ;;  %v937_v33 = vmul.f32 %v3669_v29, %v4426_v20  ;;  %v938_v24 = vmul.f32 %v3737_v49, %v4426_v20 }
  0xca   : > { %v908_v36 = vsel %vm611_vm2, %v906_v54, %v4427_v43  ;;  %v939_v26 = vmul.f32 %v3728_v32, %v4426_v20  ;;  %v911_v15 = vsel %vm611_vm2, %v909_v40, %v910_v16  ;;  %v927_v52 = vadd.f32 %v910_v16, %v879_v12 }
  0xcb   : > { %v924_v62 = vadd.f32 %v908_v36, %v876_v35  ;;  %v955_v45 = vrot.slane %v936_v58, 2  ;;  %v926_v0 = vadd.f32 %v911_v15, %v878_v37  ;;  %v956_v9 = vrot.slane %v937_v33, 2 }
  0xcc   : > { %v958_v2 = vrot.slane %v938_v24, 2  ;;  %v959_v22 = vrot.slane %v939_v26, 2  ;;  %v985_v3 = vmul.f32 %v3737_v49, %v4428_v1  ;;  %v986_v31 = vmul.f32 %v3728_v32, %v4428_v1 }
  0xcd   : > { %v987_v34 = vmul.f32 %v3746_v10, %v4428_v1  ;;  %v988_v42 = vmul.f32 %v3699_v14, %v4428_v1  ;;  %v957_v56 = vsel %vm948_vm3, %v955_v45, %v956_v9  ;;  %v974_v41 = vadd.f32 %v956_v9, %v925_v61 }
  0xce   : > { %v960_v60 = vsel %vm948_vm3, %v958_v2, %v959_v22  ;;  %v976_v19 = vadd.f32 %v959_v22, %v927_v52  ;;  %v973_v35 = vadd.f32 %v957_v56, %v924_v62  ;;  %v1003_v8 = vrot.slane %v985_v3, 2 }
  0xcf   : > { %v975_v28 = vadd.f32 %v960_v60, %v926_v0  ;;  %v1004_v55 = vrot.slane %v986_v31, 2  ;;  %v1006_v49 = vrot.slane %v987_v34, 2  ;;  %v1007_v12 = vrot.slane %v988_v42, 2 }
  0xd0   : > { %v1033_v54 = vmul.f32 %v3746_v10, %v3346_v50  ;;  %v1034_v4 = vmul.f32 %v3699_v14, %v3346_v50  ;;  %v1035_v16 = vmul.f32 %v3761_v59, %v3346_v50  ;;  %v1036_v61 = vmul.f32 %v3703_v39, %v3346_v50 }
  0xd1   : > { %v1005_v37 = vsel %vm948_vm3, %v1003_v8, %v1004_v55  ;;  %v1022_v40 = vadd.f32 %v1004_v55, %v974_v41  ;;  %v1008_v20 = vsel %vm948_vm3, %v1006_v49, %v1007_v12  ;;  %v1024_v43 = vadd.f32 %v1007_v12, %v976_v19 }
  0xd2   : > { %v1021_v58 = vadd.f32 %v1005_v37, %v973_v35  ;;  %v1051_v36 = vrot.slane %v1033_v54, 2  ;;  %v1023_v33 = vadd.f32 %v1008_v20, %v975_v28  ;;  %v1052_v24 = vrot.slane %v1034_v4, 2  ;;  %v4429_v4 = vld [vmem:[#allocation27_spill] sm:$0xff] }
  0xd3   : > { %v1054_v10 = vrot.slane %v1035_v16, 2  ;;  %v1055_v26 = vrot.slane %v1036_v61, 2  ;;  %v1081_v15 = vmul.f32 %v3761_v59, %v3377_v51  ;;  %v1082_v62 = vmul.f32 %v3703_v39, %v3377_v51 }
  0xd4   : > { %v1083_v52 = vmul.f32 %v3770_v21, %v3377_v51  ;;  %v1084_v50 = vmul.f32 %v3709_v6, %v3377_v51  ;;  %v1053_v45 = vsel %vm948_vm3, %v1051_v36, %v1052_v24  ;;  %v1070_v9 = vadd.f32 %v1052_v24, %v1022_v40 }
  0xd5   : > { %v1056_v0 = vsel %vm948_vm3, %v1054_v10, %v1055_v26  ;;  %v1072_v2 = vadd.f32 %v1055_v26, %v1024_v43  ;;  %v1069_v22 = vadd.f32 %v1053_v45, %v1021_v58  ;;  %v1099_v3 = vrot.slane %v1081_v15, 2  ;;  %v4430_v15 = vld [vmem:[#allocation28_spill] sm:$0xff] }
  0xd6   : > { %v1071_v1 = vadd.f32 %v1056_v0, %v1023_v33  ;;  %v1100_v31 = vrot.slane %v1082_v62, 2  ;;  %v1102_v59 = vrot.slane %v1083_v52, 2  ;;  %v1103_v34 = vrot.slane %v1084_v50, 2 }
  0xd7   : > { %v1129_v42 = vmul.f32 %v3770_v21, %v3391_v25  ;;  %v1130_v56 = vmul.f32 %v3709_v6, %v3391_v25  ;;  %v1131_v41 = vmul.f32 %v3791_v18, %v3391_v25  ;;  %v1132_v19 = vmul.f32 %v3720_v13, %v3391_v25 }
  0xd8   : > { %v1101_v51 = vsel %vm948_vm3, %v1099_v3, %v1100_v31  ;;  %v1118_v60 = vadd.f32 %v1100_v31, %v1070_v9  ;;  %v1104_v35 = vsel %vm948_vm3, %v1102_v59, %v1103_v34  ;;  %v1120_v8 = vadd.f32 %v1103_v34, %v1072_v2 }
  0xd9   : > { %v1117_v28 = vadd.f32 %v1101_v51, %v1069_v22  ;;  %v1147_v55 = vrot.slane %v1129_v42, 2  ;;  %v1119_v49 = vadd.f32 %v1104_v35, %v1071_v1  ;;  %v1148_v12 = vrot.slane %v1130_v56, 2  ;;  %v4431_v42 = vld [vmem:[#allocation29_spill] sm:$0xff]  ;;  %v4432_v51 = vld [vmem:[#allocation30_spill] sm:$0xff] }
  0xda   : > { %v1150_v21 = vrot.slane %v1131_v41, 2  ;;  %v1151_v54 = vrot.slane %v1132_v19, 2  ;;  %v1177_v37 = vmul.f32 %v3791_v18, %v4429_v4  ;;  %v1178_v40 = vmul.f32 %v3720_v13, %v4429_v4 }
  0xdb   : > { %v1179_v16 = vmul.f32 %v4429_v4, %v3785_v44  ;;  %v1180_v25 = vmul.f32 %v3872_v63, %v4429_v4  ;;  %v1149_v61 = vsel %vm948_vm3, %v1147_v55, %v1148_v12  ;;  %v1166_v58 = vadd.f32 %v1148_v12, %v1118_v60  ;;  %v4433_v4 = vld [vmem:[#allocation31_spill] sm:$0xff] }
  0xdc   : > { %v1152_v20 = vsel %vm948_vm3, %v1150_v21, %v1151_v54  ;;  %v1168_v43 = vadd.f32 %v1151_v54, %v1120_v8  ;;  %v1165_v36 = vadd.f32 %v1149_v61, %v1117_v28  ;;  %v1195_v24 = vrot.slane %v1177_v37, 2 }
  0xdd   : > { %v1167_v33 = vadd.f32 %v1152_v20, %v1119_v49  ;;  %v1196_v10 = vrot.slane %v1178_v40, 2  ;;  %v1198_v18 = vrot.slane %v1179_v16, 2  ;;  %v1199_v26 = vrot.slane %v1180_v25, 2 }
  0xde   : > { %v1225_v62 = vmul.f32 %v4430_v15, %v3785_v44  ;;  %v1226_v52 = vmul.f32 %v3872_v63, %v4430_v15  ;;  %v1227_v0 = vmul.f32 %v4430_v15, %v3798_v48  ;;  %v1228_v9 = vmul.f32 %v4430_v15, %v3800_v7 }
  0xdf   : > { %v1197_v50 = vsel %vm948_vm3, %v1195_v24, %v1196_v10  ;;  %v1214_v45 = vadd.f32 %v1196_v10, %v1166_v58  ;;  %v1200_v2 = vsel %vm948_vm3, %v1198_v18, %v1199_v26  ;;  %v1216_v1 = vadd.f32 %v1199_v26, %v1168_v43 }
  0xe0   : > { %v1213_v22 = vadd.f32 %v1197_v50, %v1165_v36  ;;  %v1243_v3 = vrot.slane %v1225_v62, 2  ;;  %v1215_v31 = vadd.f32 %v1200_v2, %v1167_v33  ;;  %v1244_v59 = vrot.slane %v1226_v52, 2  ;;  %v4436_v36 = vld [vmem:[#allocation33_spill] sm:$0xff]  ;;  %v4439_v50 = vld [vmem:[#allocation32_spill] sm:$0xff] }
  0xe1   : > { %v1246_v44 = vrot.slane %v1227_v0, 2  ;;  %v1247_v34 = vrot.slane %v1228_v9, 2  ;;  %v1272_v56 = vmul.f32 %v3728_v32, %v4431_v42  ;;  %v1300_v60 = vmul.f32 %v3699_v14, %v4432_v51 }
  0xe2   : > { %v1328_v48 = vmul.f32 %v3703_v39, %v3461_v30  ;;  %v1356_v41 = vmul.f32 %v3709_v6, %v3467_v23  ;;  %v1245_v19 = vsel %vm948_vm3, %v1243_v3, %v1244_v59  ;;  %v1262_v28 = vadd.f32 %v1244_v59, %v1214_v45  ;;  %v4440_v59 = vld [vmem:[#allocation34_spill] sm:$0xff] }
  0xe3   : > { %v1248_v35 = vsel %vm948_vm3, %v1246_v44, %v1247_v34  ;;  %v1264_v8 = vadd.f32 %v1247_v34, %v1216_v1  ;;  %v1261_v55 = vadd.f32 %v1245_v19, %v1213_v22  ;;  %v1280_v12 = vrot.slane %v1272_v56, 3 }
  0xe4   : > { %v1263_v49 = vadd.f32 %v1248_v35, %v1215_v31  ;;  %v1308_v21 = vrot.slane %v1300_v60, 3  ;;  %v1335_v54 = vrot.slane %v3519_v47, 3  ;;  %v1383_v37 = vmul.f32 %v3709_v6, %v4433_v4 }
  0xe5   : > { %v4434_v30 = vrot.slane %v3496_v11, 3  ;;  %v1384_v23 = vmul.f32 %v3720_v13, %v4433_v4  ;;  %v1292_v20 = vadd.f32 %v1280_v12, %v1264_v8  ;;  %v1336_v58 = vrot.slane %v1328_v48, 3 }
  0xe6   : > { %v1291_v61 = vadd.f32 %v1280_v12, %v1263_v49  ;;  %v1363_v43 = vrot.slane %v3683_v38, 3  ;;  %v1411_v47 = vmul.f32 %v3720_v13, %v3488_v46  ;;  %v4437_v33 = vrot.slane %v4436_v36, 3 }
  0xe7   : > { %v1290_v40 = vadd.f32 %v4434_v30, %v1262_v28  ;;  %v4435_v16 = vmov %v4434_v30  ;;  %v1412_v10 = vmul.f32 %v3872_v63, %v3488_v46  ;;  %v1320_v11 = vadd.f32 %v1308_v21, %v1292_v20 }
  0xe8   : > { %v1289_v25 = vadd.f32 %v4435_v16, %v1261_v55  ;;  %v4438_v18 = vmov %v4437_v33  ;;  %v1319_v15 = vadd.f32 %v1308_v21, %v1291_v61  ;;  %v1364_v62 = vrot.slane %v1356_v41, 3  ;;  %v4441_v41 = vld [vmem:[#allocation35_spill] sm:$0xff] }
  0xe9   : > { %v1318_v24 = vadd.f32 %v4437_v33, %v1290_v40  ;;  %v1391_v52 = vrot.slane %v1383_v37, 3  ;;  %v1439_v45 = vmul.f32 %v3872_v63, %v4439_v50  ;;  %v1392_v0 = vrot.slane %v1384_v23, 3 }
  0xea   : > { %v1317_v26 = vadd.f32 %v4438_v18, %v1289_v25  ;;  %v1347_v2 = vadd.f32 %v1336_v58, %v1319_v15  ;;  %v1348_v22 = vadd.f32 %v1336_v58, %v1320_v11  ;;  %v1440_v1 = vmul.f32 %v4439_v50, %v3800_v7  ;;  %v4443_v58 = vld [vmem:[#allocation37_spill] sm:$0xff] }
  0xeb   : > { %v1346_v38 = vadd.f32 %v1335_v54, %v1318_v24  ;;  %v1419_v3 = vrot.slane %v1411_v47, 3  ;;  %v1420_v31 = vrot.slane %v1412_v10, 3  ;;  %v1467_v44 = vmul.f32 %v3669_v29, %v4440_v59 }
  0xec   : > { %v1345_v9 = vadd.f32 %v1335_v54, %v1317_v26  ;;  %v1375_v42 = vadd.f32 %v1364_v62, %v1347_v2  ;;  %v1376_v56 = vadd.f32 %v1364_v62, %v1348_v22  ;;  %v1468_v51 = vmul.f32 %v3728_v32, %v4440_v59  ;;  %v4442_v54 = vld [vmem:[#allocation36_spill] sm:$0xff] }
  0xed   : > { %v1374_v46 = vadd.f32 %v1363_v43, %v1346_v38  ;;  %v1447_v60 = vrot.slane %v1439_v45, 3  ;;  %v1495_v19 = vmul.f32 %v3728_v32, %v4441_v41  ;;  %v1496_v35 = vmul.f32 %v3699_v14, %v4441_v41 }
  0xee   : > { %v1373_v34 = vadd.f32 %v1363_v43, %v1345_v9  ;;  %v1403_v8 = vadd.f32 %v1392_v0, %v1375_v42  ;;  %v1404_v55 = vadd.f32 %v1392_v0, %v1376_v56  ;;  %v1448_v49 = vrot.slane %v1440_v1, 3 }
  0xef   : > { %v1402_v48 = vadd.f32 %v1391_v52, %v1374_v46  ;;  %v1475_v21 = vrot.slane %v1467_v44, 4  ;;  %v1523_v4 = vmul.f32 %v3699_v14, %v4442_v54  ;;  %v1524_v37 = vmul.f32 %v3703_v39, %v4442_v54 }
  0xf0   : > { %v1401_v28 = vadd.f32 %v1391_v52, %v1373_v34  ;;  %v1431_v40 = vadd.f32 %v1420_v31, %v1403_v8  ;;  %v1432_v23 = vadd.f32 %v1420_v31, %v1404_v55  ;;  %v1476_v16 = vrot.slane %v1468_v51, 4 }
  0xf1   : > { %v1430_v12 = vadd.f32 %v1419_v3, %v1402_v48  ;;  %v1503_v61 = vrot.slane %v1495_v19, 4  ;;  %v1504_v20 = vrot.slane %v1496_v35, 4  ;;  %v1551_v43 = vmul.f32 %v3703_v39, %v4443_v58 }
  0xf2   : > { %v1429_v30 = vadd.f32 %v1419_v3, %v1401_v28  ;;  %v1459_v36 = vadd.f32 %v1448_v49, %v1431_v40  ;;  %v1460_v33 = vadd.f32 %v1448_v49, %v1432_v23  ;;  %v1552_v24 = vmul.f32 %v3709_v6, %v4443_v58  ;;  %v4444_v40 = vld [vmem:[#allocation38_spill] sm:$0xff] }
  0xf3   : > { %v1458_v25 = vadd.f32 %v1447_v60, %v1430_v12  ;;  %v1531_v18 = vrot.slane %v1523_v4, 4  ;;  %v1532_v26 = vrot.slane %v1524_v37, 4  ;;  %v1579_v15 = vmul.f32 %v3709_v6, %v3555_v27 }
  0xf4   : > { %v1457_v47 = vadd.f32 %v1447_v60, %v1429_v30  ;;  %v1487_v62 = vadd.f32 %v1476_v16, %v1459_v36  ;;  %v1488_v52 = vadd.f32 %v1476_v16, %v1460_v33  ;;  %v1580_v50 = vmul.f32 %v3720_v13, %v3555_v27 }
  0xf5   : > { %v1486_v10 = vadd.f32 %v1475_v21, %v1458_v25  ;;  %v1559_v38 = vrot.slane %v1551_v43, 4  ;;  %v1607_v0 = vmul.f32 %v3720_v13, %v3559_v57  ;;  %v1608_v9 = vmul.f32 %v3872_v63, %v3559_v57 }
  0xf6   : > { %v1485_v11 = vadd.f32 %v1475_v21, %v1457_v47  ;;  %v1515_v22 = vadd.f32 %v1504_v20, %v1487_v62  ;;  %v1516_v1 = vadd.f32 %v1504_v20, %v1488_v52  ;;  %v1560_v3 = vrot.slane %v1552_v24, 4  ;;  %v4445_v47 = vld [vmem:[#allocation39_spill] sm:$0xff]  ;;  %v4446_v62 = vld [vmem:[#allocation40_spill] sm:$0xff] }
  0xf7   : > { %v1514_v45 = vadd.f32 %v1503_v61, %v1486_v10  ;;  %v1587_v31 = vrot.slane %v1579_v15, 4  ;;  %v1635_v59 = vmul.f32 %v3872_v63, %v3571_v5  ;;  %v1636_v27 = vmul.f32 %v3571_v5, %v3800_v7 }
  0xf8   : > { %v1513_v2 = vadd.f32 %v1503_v61, %v1485_v11  ;;  %v1543_v34 = vadd.f32 %v1532_v26, %v1515_v22  ;;  %v1544_v42 = vadd.f32 %v1532_v26, %v1516_v1  ;;  %v1588_v56 = vrot.slane %v1580_v50, 4  ;;  %v4447_v1 = vld [vmem:[#allocation41_spill] sm:$0xff] }
  0xf9   : > { %v1542_v46 = vadd.f32 %v1531_v18, %v1514_v45  ;;  %v1615_v60 = vrot.slane %v1607_v0, 4  ;;  %v1616_v48 = vrot.slane %v1608_v9, 4  ;;  %v1663_v57 = vmul.f32 %v3669_v29, %v3575_v17 }
  0xfa   : > { %v1541_v44 = vadd.f32 %v1531_v18, %v1513_v2  ;;  %v1571_v19 = vadd.f32 %v1560_v3, %v1543_v34  ;;  %v1572_v35 = vadd.f32 %v1560_v3, %v1544_v42  ;;  %v1664_v28 = vmul.f32 %v3728_v32, %v3575_v17  ;;  %v4448_v42 = vld [vmem:[#allocation42_spill] sm:$0xff] }
  0xfb   : > { %v1570_v51 = vadd.f32 %v1559_v38, %v1542_v46  ;;  %v1643_v55 = vrot.slane %v1635_v59, 4  ;;  %v1644_v49 = vrot.slane %v1636_v27, 4  ;;  %v1691_v5 = vmul.f32 %v3728_v32, %v3579_v53 }
  0xfc   : > { %v1569_v41 = vadd.f32 %v1559_v38, %v1541_v44  ;;  %v1599_v21 = vadd.f32 %v1588_v56, %v1571_v19  ;;  %v1600_v54 = vadd.f32 %v1588_v56, %v1572_v35  ;;  %v1692_v4 = vmul.f32 %v3699_v14, %v3579_v53 }
  0xfd   : > { %v1598_v8 = vadd.f32 %v1587_v31, %v1570_v51  ;;  %v1671_v30 = vrot.slane %v1663_v57, 5  ;;  %v1719_v23 = vmul.f32 %v3699_v14, %v4444_v40  ;;  %v1720_v17 = vmul.f32 %v3703_v39, %v4444_v40 }
  0xfe   : > { %v1597_v12 = vadd.f32 %v1587_v31, %v1569_v41  ;;  %v1627_v25 = vadd.f32 %v1616_v48, %v1599_v21  ;;  %v1628_v61 = vadd.f32 %v1616_v48, %v1600_v54  ;;  %v1672_v20 = vrot.slane %v1664_v28, 5  ;;  %v4449_v28 = vld [vmem:[#allocation43_spill] sm:$0xff] }
  0xff   : > { %v1626_v37 = vadd.f32 %v1615_v60, %v1598_v8  ;;  %v1699_v43 = vrot.slane %v1691_v5, 5  ;;  %v1747_v36 = vmul.f32 %v3703_v39, %v4445_v47  ;;  %v1748_v53 = vmul.f32 %v3709_v6, %v4445_v47 }
 0x100   : > { %v1625_v16 = vadd.f32 %v1615_v60, %v1597_v12  ;;  %v1655_v24 = vadd.f32 %v1644_v49, %v1627_v25  ;;  %v1656_v10 = vadd.f32 %v1644_v49, %v1628_v61  ;;  %v1700_v18 = vrot.slane %v1692_v4, 5 }
 0x101   : > { %v1654_v58 = vadd.f32 %v1643_v55, %v1626_v37  ;;  %v1727_v15 = vrot.slane %v1719_v23, 5  ;;  %v1728_v11 = vrot.slane %v1720_v17, 5  ;;  %v1775_v52 = vmul.f32 %v3709_v6, %v4446_v62 }
 0x102   : > { %v1653_v33 = vadd.f32 %v1643_v55, %v1625_v16  ;;  %v1683_v45 = vadd.f32 %v1672_v20, %v1655_v24  ;;  %v1684_v38 = vadd.f32 %v1672_v20, %v1656_v10  ;;  %v1776_v0 = vmul.f32 %v3720_v13, %v4446_v62  ;;  %v4452_v10 = vld [vmem:[#allocation46_spill] sm:$0xff] }
 0x103   : > { %v1682_v26 = vadd.f32 %v1671_v30, %v1654_v58  ;;  %v1755_v2 = vrot.slane %v1747_v36, 5  ;;  %v1756_v22 = vrot.slane %v1748_v53, 5  ;;  %v1803_v3 = vmul.f32 %v3720_v13, %v4447_v1  ;;  %v4451_v58 = vld [vmem:[#allocation45_spill] sm:$0xff] }
 0x104   : > { %v1681_v50 = vadd.f32 %v1671_v30, %v1653_v33  ;;  %v1711_v31 = vadd.f32 %v1700_v18, %v1683_v45  ;;  %v1712_v59 = vadd.f32 %v1700_v18, %v1684_v38  ;;  %v1804_v27 = vmul.f32 %v3872_v63, %v4447_v1  ;;  %v4450_v30 = vld [vmem:[#allocation44_spill] sm:$0xff]  ;;  %v4453_v45 = vld [vmem:[#allocation47_spill] sm:$0xff] }
 0x105   : > { %v1710_v9 = vadd.f32 %v1699_v43, %v1682_v26  ;;  %v1783_v34 = vrot.slane %v1775_v52, 5  ;;  %v1831_v56 = vmul.f32 %v3872_v63, %v4448_v42  ;;  %v1832_v51 = vmul.f32 %v4448_v42, %v3800_v7 }
 0x106   : > { %v1709_v46 = vadd.f32 %v1699_v43, %v1681_v50  ;;  %v1739_v48 = vadd.f32 %v1728_v11, %v1711_v31  ;;  %v1740_v57 = vadd.f32 %v1728_v11, %v1712_v59  ;;  %v1784_v41 = vrot.slane %v1776_v0, 5  ;;  %v4454_v31 = vld [vmem:[#allocation48_spill] sm:$0xff] }
 0x107   : > { %v1738_v44 = vadd.f32 %v1727_v15, %v1710_v9  ;;  %v1811_v35 = vrot.slane %v1803_v3, 5  ;;  %v1859_v8 = vmul.f32 %v3669_v29, %v4449_v28  ;;  %v1860_v55 = vmul.f32 %v3728_v32, %v4449_v28 }
 0x108   : > { %v1737_v60 = vadd.f32 %v1727_v15, %v1709_v46  ;;  %v1767_v5 = vadd.f32 %v1756_v22, %v1739_v48  ;;  %v1768_v12 = vadd.f32 %v1756_v22, %v1740_v57  ;;  %v1812_v21 = vrot.slane %v1804_v27, 5 }
 0x109   : > { %v1766_v19 = vadd.f32 %v1755_v2, %v1738_v44  ;;  %v1839_v4 = vrot.slane %v1831_v56, 5  ;;  %v1840_v37 = vrot.slane %v1832_v51, 5  ;;  %v1887_v40 = vmul.f32 %v3728_v32, %v4450_v30 }
 0x10a   : > { %v1765_v49 = vadd.f32 %v1755_v2, %v1737_v60  ;;  %v1795_v17 = vadd.f32 %v1784_v41, %v1767_v5  ;;  %v1796_v16 = vadd.f32 %v1784_v41, %v1768_v12  ;;  %v1888_v25 = vmul.f32 %v3699_v14, %v4450_v30  ;;  %v4455_v60 = vld [vmem:[#allocation49_spill] sm:$0xff] }
 0x10b   : > { %v1794_v54 = vadd.f32 %v1783_v34, %v1766_v19  ;;  %v1867_v61 = vrot.slane %v1859_v8, 6  ;;  %v1868_v20 = vrot.slane %v1860_v55, 6  ;;  %v1915_v43 = vmul.f32 %v3699_v14, %v4451_v58 }
 0x10c   : > { %v1793_v23 = vadd.f32 %v1783_v34, %v1765_v49  ;;  %v1823_v36 = vadd.f32 %v1812_v21, %v1795_v17  ;;  %v1824_v53 = vadd.f32 %v1812_v21, %v1796_v16  ;;  %v1916_v33 = vmul.f32 %v3703_v39, %v4451_v58 }
 0x10d   : > { %v1822_v29 = vadd.f32 %v1811_v35, %v1794_v54  ;;  %v1895_v32 = vrot.slane %v1887_v40, 6  ;;  %v1943_v18 = vmul.f32 %v3703_v39, %v4452_v10  ;;  %v1944_v26 = vmul.f32 %v3709_v6, %v4452_v10 }
 0x10e   : > { %v1821_v47 = vadd.f32 %v1811_v35, %v1793_v23  ;;  %v1851_v11 = vadd.f32 %v1840_v37, %v1823_v36  ;;  %v1852_v62 = vadd.f32 %v1840_v37, %v1824_v53  ;;  %v1896_v52 = vrot.slane %v1888_v25, 6 }
 0x10f   : > { %v1850_v24 = vadd.f32 %v1839_v4, %v1822_v29  ;;  %v1923_v14 = vrot.slane %v1915_v43, 6  ;;  %v1971_v38 = vmul.f32 %v3709_v6, %v4453_v45  ;;  %v1972_v0 = vmul.f32 %v3720_v13, %v4453_v45 }
 0x110   : > { %v1849_v15 = vadd.f32 %v1839_v4, %v1821_v47  ;;  %v1879_v2 = vadd.f32 %v1868_v20, %v1851_v11  ;;  %v1880_v22 = vadd.f32 %v1868_v20, %v1852_v62  ;;  %v1924_v1 = vrot.slane %v1916_v33, 6 }
 0x111   : > { %v1878_v50 = vadd.f32 %v1867_v61, %v1850_v24  ;;  %v1951_v3 = vrot.slane %v1943_v18, 6  ;;  %v1952_v46 = vrot.slane %v1944_v26, 6  ;;  %v1999_v59 = vmul.f32 %v3720_v13, %v4454_v31  ;;  %v4458_v18 = vld [vmem:[#allocation51_spill] sm:$0xff] }
 0x112   : > { %v1877_v9 = vadd.f32 %v1867_v61, %v1849_v15  ;;  %v1907_v44 = vadd.f32 %v1896_v52, %v1879_v2  ;;  %v1908_v34 = vadd.f32 %v1896_v52, %v1880_v22  ;;  %v2000_v42 = vmul.f32 %v3872_v63, %v4454_v31 }
 0x113   : > { %v1906_v39 = vadd.f32 %v1895_v32, %v1878_v50  ;;  %v1979_v56 = vrot.slane %v1971_v38, 6  ;;  %v1980_v51 = vrot.slane %v1972_v0, 6  ;;  %v2027_v48 = vmul.f32 %v3872_v63, %v4455_v60  ;;  %v4459_v0 = vld [vmem:[#allocation3_spill] sm:$0xff] }
 0x114   : > { %v1905_v27 = vadd.f32 %v1895_v32, %v1877_v9  ;;  %v1935_v41 = vadd.f32 %v1924_v1, %v1907_v44  ;;  %v1936_v19 = vadd.f32 %v1924_v1, %v1908_v34  ;;  %v2028_v35 = vmul.f32 %v4455_v60, %v3800_v7  ;;  %v4457_v32 = vld [vmem:[#allocation50_spill] sm:$0xff] }
 0x115   : > { %v1934_v6 = vadd.f32 %v1923_v14, %v1906_v39  ;;  %v2007_v13 = vrot.slane %v1999_v59, 6  ;;  %v2008_v5 = vrot.slane %v2000_v42, 6  ;;  %v2035_v21 = vrot.slane %v2027_v48, 6  ;;  %v4461_v59 = vld [vmem:[#allocation24_spill] sm:$0xff] }
 0x116   : > { %v1933_v57 = vadd.f32 %v1923_v14, %v1905_v27  ;;  %v1963_v55 = vadd.f32 %v1952_v46, %v1935_v41  ;;  %v1964_v49 = vadd.f32 %v1952_v46, %v1936_v19  ;;  %v2036_v30 = vrot.slane %v2028_v35, 6  ;;  %v4460_v46 = vld [vmem:[#allocation11_spill] sm:$0xff] }
 0x117   : > { %v1962_v28 = vadd.f32 %v1951_v3, %v1934_v6  ;;  %v2887_v62 = vmov 839922192   ;;  %v2888_v50 = vmov 1985246804  }
 0x118   : > { %v1961_v8 = vadd.f32 %v1951_v3, %v1933_v57  ;;  %v1991_v4 = vadd.f32 %v1980_v51, %v1963_v55  ;;  %v1992_v37 = vadd.f32 %v1980_v51, %v1964_v49  ;;  %v2117_v52 = vunpack.c.l.s4 %v2887_v62  ;;  %v2812_v55 = vld [vmem:[%s4248_s5] ss:$8 sps:$4 sm:$0xff]   ;;  %v2813_v49 = vld [vmem:[%s4248_s5 + $0x14] ss:$8 sps:$4 sm:$0xff]  }
 0x119   : > { %v1990_v12 = vadd.f32 %v1979_v56, %v1962_v28  ;;  %v2124_v14 = vunpack.c.l.s4 %v2888_v50 }
 0x11a   : > { %v1989_v54 = vadd.f32 %v1979_v56, %v1961_v8  ;;  %v2019_v23 = vadd.f32 %v2008_v5, %v1991_v4  ;;  %v2020_v17 = vadd.f32 %v2008_v5, %v1992_v37  ;;  %v2118_v45 = vunpack.c.0.s8 %v2117_v52  ;;  %v2810_v8 = vld [vmem:[%s4248_s5 + $0x4] ss:$8 sps:$4 sm:$0xff]   ;;  %v2815_v5 = vld [vmem:[%s4248_s5 + $0x10] ss:$8 sps:$4 sm:$0xff]  }
 0x11b   : > { %v2018_v40 = vadd.f32 %v2007_v13, %v1990_v12  ;;  %v2125_v38 = vunpack.c.0.s8 %v2124_v14  ;;  %2312 = vmatprep.subr.bf16.mxu0 %v2810_v8  ;;  %v2816_v12 = vld [vmem:[%s4248_s5 + $0x24] ss:$8 sps:$4 sm:$0xff]   ;;  %v2889_v4 = vmov 0   ;;  %v2821_v37 = vld [vmem:[%s4248_s5 + $0x30] ss:$8 sps:$4 sm:$0xff]  }
 0x11c   : > { %v2017_v63 = vadd.f32 %v2007_v13, %v1989_v54  ;;  %v2047_v29 = vadd.f32 %v2036_v30, %v2019_v23  ;;  %v2048_v7 = vadd.f32 %v2036_v30, %v2020_v17  ;;  %v4089_v9 = vsub.s32 %v2118_v45, %v4459_v0  ;;  %2313 = vmatpush1.bf16.msra.mxu0 %v2812_v55  ;;  %v2819_v54 = vld [vmem:[%s4248_s5 + $0x34] ss:$8 sps:$4 sm:$0xff]  }
 0x11d   : > { %v2046_v16 = vadd.f32 %v2035_v21, %v2018_v40  ;;  %v4092_v2 = vsub.s32 %v2125_v38, %v4459_v0  ;;  %2314 = vmatprep.subr.bf16.mxu0 %v2813_v49  ;;  %2344 = vmatprep.mubr.bf16.mxu0 %v2889_v4 }
 0x11e   : > { %v2045_v25 = vadd.f32 %v2035_v21, %v2017_v63  ;;  %v2060_v20 = vcombine.high %v2047_v29, %v2047_v29  ;;  %v2078_v43 = vrot.slane %v2048_v7, 5  ;;  %v2818_v21 = vld [vmem:[%s4248_s5 + $0x20] ss:$8 sps:$4 sm:$0xff]  }
 0x11f   : > { %v2074_v58 = vrot.slane %v2046_v16, 5 }
 0x120   : > { %v2059_v61 = vcombine.high %v2045_v25, %v2045_v25  ;;  %v2742_v36 = vrot.slane %v2060_v20, 9  ;;  %2315 = vmatpush1.bf16.msra.mxu0 %v2815_v5 }
 0x121   : > { %2316 = vmatprep.subr.bf16.mxu0 %v2816_v12 }
 0x122   : > { %v2741_v47 = vrot.slane %v2059_v61, 9  ;;  %v2079_v24 = vsel %vm3754_vm6, %v2742_v36, %v2078_v43  ;;  %v2744_v61 = vld [vmem:[%s4246_s3] ss:$0 sm:$0xff] }
 0x123   : > { %v2096_v26 = vadd.f32 %v4458_v18, %v2079_v24  ;;  %v2221_v43 = vcombine.high %v2744_v61, %v2744_v61 }
 0x124   : > { %v2075_v33 = vsel %vm3754_vm6, %v2741_v47, %v2074_v58  ;;  %2317 = vmatpush1.bf16.msra.mxu0 %v2818_v21  ;;  %v2745_v47 = vld [vmem:[%s4247_s4] ss:$0 sm:$0xff] }
 0x125   : > { %v2095_v10 = vadd.f32 %v4457_v32, %v2075_v33  ;;  %2318 = vmatprep.subr.bf16.mxu0 %v2819_v54  ;;  %v2234_v53 = vcombine.high %v2745_v47, %v2745_v47 }
 0x127   : > { %v2102_v15 = vcombine.low %v2095_v10, %v2096_v26 }
 0x128   : > { %2319 = vmatpush1.bf16.msra.mxu0 %v2821_v37 }
 0x129   : > { %v2108_v11 = vsel %vm392_vm0, %v2102_v15, 0.0 }
 0x12a   : > { %2109 = vadd.xlane.f32.xlu0 %v2108_v11 }
 0x13e   : > { %v2107_v22 = vpop.xlane.xlu0 %2106 }
 0x13f   : > { %v2112_v1 = vmul.f32 0.015625, %v2107_v22  ;;  %v2257_v22 = vld [vmem:[%s4249_s6] sm:$0x3] }
 0x141   : > { %v2122_v39 = vrot.slane %v2112_v1, %v4089_v9  ;;  %v2129_v3 = vrot.slane %v2112_v1, %v4092_v2  ;;  %v4462_v1 = vld [vmem:[#allocation4_spill] sm:$0xff] }
 0x143   : > { %v2148_v31 = vsub.f32 %v4460_v46, %v2122_v39  ;;  %v2149_v27 = vsub.f32 %v4461_v59, %v2129_v3  ;;  %v2262_v39 = vrot.slane %v2257_v22, %v4462_v1  ;;  %v4463_v3 = vld [vmem:[#allocation5_spill] sm:$0xff] }
 0x144   : > { %v2266_v46 = vrot.slane %v2257_v22, %v4463_v3 }
 0x145   : > { %v2152_v44 = vmul.f32 %v2148_v31, %v2148_v31  ;;  %v2153_v34 = vmul.f32 %v2149_v27, %v2149_v27 }
 0x147   : > { %v2160_v42 = vcombine.low %v2152_v44, %v2153_v34 }
 0x149   : > { %v2164_v6 = vsel %vm392_vm0, %v2160_v42, 0.0 }
 0x14a   : > { %2165 = vadd.xlane.f32.xlu1 %v2164_v6 }
 0x1b7   : > { %v2110_v56 = vpop.xlane.xlu0 %2109 }
 0x1b8   : > { %v2113_v51 = vmul.f32 0.015625, %v2110_v56 }
 0x1ba   : > { %v2136_v60 = vrot.slane %v2113_v51, %v4089_v9  ;;  %v2143_v48 = vrot.slane %v2113_v51, %v4092_v2 }
 0x1bc   : > { %v2150_v57 = vsub.f32 %v2095_v10, %v2136_v60  ;;  %v2151_v41 = vsub.f32 %v2096_v26, %v2143_v48 }
 0x1be   : > { %v2154_v19 = vmul.f32 %v2150_v57, %v2150_v57  ;;  %v2155_v35 = vmul.f32 %v2151_v41, %v2151_v41 }
 0x1c0   : > { %v2161_v28 = vcombine.low %v2154_v19, %v2155_v35 }
 0x1c2   : > { %v2167_v13 = vsel %vm392_vm0, %v2161_v28, 0.0 }
 0x1c3   : > { %2168 = vadd.xlane.f32.xlu1 %v2167_v13 }
 0x1d7   : > { %v2166_v30 = vpop.xlane.xlu1 %2165 }
 0x1d8   : > { %v2170_v40 = vmul.f32 0.015625, %v2166_v30 }
 0x1da   : > { %v2172_v63 = vadd.f32 1e-06, %v2170_v40 }
 0x1dc   : > { %2838 = vrsqrt.f32 %v2172_v63 }
 0x1e6   : > { %v2839_v25 = vpop.eup %2838 }
 0x1e7   : > { %v2184_v29 = vrot.slane %v2839_v25, %v4089_v9  ;;  %v2191_v7 = vrot.slane %v2839_v25, %v4092_v2 }
 0x1e9   : > { %v2210_v20 = vmul.f32 %v2184_v29, %v2148_v31  ;;  %v2211_v58 = vmul.f32 %v2191_v7, %v2149_v27 }
 0x1eb   : > { %v2223_v32 = vmul.f32 %v2744_v61, %v2210_v20  ;;  %v2224_v10 = vmul.f32 %v2221_v43, %v2211_v58 }
 0x1ed   : > { %v2236_v62 = vadd.f32 %v2745_v47, %v2223_v32  ;;  %v2237_v52 = vadd.f32 %v2234_v53, %v2224_v10 }
 0x1ef   : > { %v2244_v45 = vcombine.low %v2236_v62, %v2237_v52 }
 0x250   : > { %v2169_v23 = vpop.xlane.xlu1 %2168 }
 0x251   : > { %v2171_v17 = vmul.f32 0.015625, %v2169_v23 }
 0x253   : > { %v2173_v16 = vadd.f32 1e-06, %v2171_v17 }
 0x255   : > { %2840 = vrsqrt.f32 %v2173_v16 }
 0x25f   : > { %v2841_v36 = vpop.eup %2840 }
 0x260   : > { %v2198_v33 = vrot.slane %v2841_v36, %v4089_v9  ;;  %v2205_v24 = vrot.slane %v2841_v36, %v4092_v2  ;;  %v2822_v9 = vld [vmem:[%s4252_s9 + $0x40] sm:$0xff]  }
 0x261   : > { %v2823_v2 = vld [vmem:[%s4252_s9] sm:$0xff]   ;;  %2776 = vmatprep.subr.bf16.mxu1 %v2822_v9 }
 0x262   : > { %v2212_v18 = vmul.f32 %v2198_v33, %v2150_v57  ;;  %v2213_v26 = vmul.f32 %v2205_v24, %v2151_v41  ;;  %2777 = vmatpush3.bf16.msra.mxu1 %v2823_v2 }
 0x264   : > { %v2225_v15 = vmul.f32 %v2744_v61, %v2212_v18  ;;  %v2226_v11 = vmul.f32 %v2221_v43, %v2213_v26 }
 0x266   : > { %v2238_v50 = vadd.f32 %v2745_v47, %v2225_v15  ;;  %v2239_v14 = vadd.f32 %v2234_v53, %v2226_v11 }
 0x268   : > { %v2245_v38 = vcombine.low %v2238_v50, %v2239_v14 }
 0x26a   : > { %v2248_v0 = vpack.c.bf16 %v2245_v38, %v2244_v45 }
 0x26c   : > { %2754 = vmatmul.mubr.msk.bf16.vlgmr.msra.gmra.mrb[0].mxu0 %vm392_vm0, %v2248_v0 }
 0x33f   : > { %v2346_v31 = vpop.f32.mrb[0].mxu0 }
 0x340   : > { %v2347_v59 = vadd.f32 %v2346_v31, %v2262_v39  ;;  %v2348_v27 = vpop.f32.mrb[1].mxu0 }
 0x341   : > { %v2349_v44 = vadd.f32 %v2348_v27, %v2266_v46  ;;  %v2350_v34 = vpop.f32.mrb[2].mxu0 }
 0x342   : > { %v2355_v42 = vmul.f32 %v2347_v59, %v2347_v59  ;;  %v2351_v6 = vadd.f32 %v2350_v34, %v2262_v39  ;;  %v2352_v56 = vpop.f32.mrb[3].mxu0 }
 0x343   : > { %v2356_v51 = vmul.f32 %v2349_v44, %v2349_v44  ;;  %v2353_v60 = vadd.f32 %v2352_v56, %v2266_v46 }
 0x344   : > { %v2359_v48 = vmul.f32 %v2355_v42, %v2347_v59  ;;  %v2357_v57 = vmul.f32 %v2351_v6, %v2351_v6 }
 0x345   : > { %v2360_v41 = vmul.f32 %v2356_v51, %v2349_v44  ;;  %v2358_v19 = vmul.f32 %v2353_v60, %v2353_v60 }
 0x346   : > { %v2363_v35 = vmul.f32 0.044715, %v2359_v48  ;;  %v2361_v28 = vmul.f32 %v2357_v57, %v2351_v6  ;;  %v2824_v57 = vld [vmem:[%s4252_s9 + $0x48] sm:$0xff]  }
 0x347   : > { %v2364_v13 = vmul.f32 0.044715, %v2360_v41  ;;  %v2362_v8 = vmul.f32 %v2358_v19, %v2353_v60  ;;  %v2825_v41 = vld [vmem:[%s4252_s9 + $0x8] sm:$0xff]   ;;  %2778 = vmatprep.subr.bf16.mxu1 %v2824_v57  ;;  %v2826_v19 = vld [vmem:[%s4252_s9 + $0x50] sm:$0xff]  }
 0x348   : > { %v2367_v55 = vadd.f32 %v2363_v35, %v2347_v59  ;;  %v2365_v49 = vmul.f32 0.044715, %v2361_v28  ;;  %2779 = vmatpush3.bf16.msra.mxu1 %v2825_v41  ;;  %v2827_v35 = vld [vmem:[%s4252_s9 + $0x10] sm:$0xff]   ;;  %v2828_v28 = vld [vmem:[%s4252_s9 + $0x58] sm:$0xff]  }
 0x349   : > { %v2368_v5 = vadd.f32 %v2364_v13, %v2349_v44  ;;  %v2366_v12 = vmul.f32 0.044715, %v2362_v8  ;;  %2780 = vmatprep.subr.bf16.mxu1 %v2826_v19  ;;  %v2829_v13 = vld [vmem:[%s4252_s9 + $0x18] sm:$0xff]   ;;  %v2830_v8 = vld [vmem:[%s4252_s9 + $0x60] sm:$0xff]  }
 0x34a   : > { %v2371_v21 = vmul.f32 0.7978846, %v2367_v55  ;;  %v2369_v54 = vadd.f32 %v2365_v49, %v2351_v6  ;;  %v2831_v55 = vld [vmem:[%s4252_s9 + $0x20] sm:$0xff]   ;;  %v2832_v49 = vld [vmem:[%s4252_s9 + $0x68] sm:$0xff]  }
 0x34b   : > { %v2372_v4 = vmul.f32 0.7978846, %v2368_v5  ;;  %v2370_v37 = vadd.f32 %v2366_v12, %v2353_v60  ;;  %v2833_v5 = vld [vmem:[%s4252_s9 + $0x28] sm:$0xff]   ;;  %v2834_v12 = vld [vmem:[%s4252_s9 + $0x70] sm:$0xff]  }
 0x34c   : > { %2842 = vtanh.f32 %v2371_v21  ;;  %v2373_v30 = vmul.f32 0.7978846, %v2369_v54  ;;  %2781 = vmatpush3.bf16.msra.mxu1 %v2827_v35  ;;  %v2835_v21 = vld [vmem:[%s4252_s9 + $0x30] sm:$0xff]   ;;  %v2836_v54 = vld [vmem:[%s4252_s9 + $0x78] sm:$0xff]  }
 0x34d   : > { %2844 = vtanh.f32 %v2372_v4  ;;  %v2374_v40 = vmul.f32 0.7978846, %v2370_v37  ;;  %2782 = vmatprep.subr.bf16.mxu1 %v2828_v28  ;;  %v2837_v4 = vld [vmem:[%s4252_s9 + $0x38] sm:$0xff]  }
 0x34e   : > { %2846 = vtanh.f32 %v2373_v30 }
 0x34f   : > { %2848 = vtanh.f32 %v2374_v40 }
 0x350   : > { %2783 = vmatpush3.bf16.msra.mxu1 %v2829_v13 }
 0x351   : > { %2784 = vmatprep.subr.bf16.mxu1 %v2830_v8 }
 0x354   : > { %2785 = vmatpush3.bf16.msra.mxu1 %v2831_v55 }
 0x355   : > { %2786 = vmatprep.subr.bf16.mxu1 %v2832_v49 }
 0x356   : > { %v2843_v63 = vpop.eup %2842 }
 0x357   : > { %v2845_v23 = vpop.eup %2844  ;;  %v2379_v17 = vadd.f32 1.0, %v2843_v63  ;;  %v2432_v63 = vld [vmem:[%s4250_s7] sm:$0x3] }
 0x358   : > { %v2847_v16 = vpop.eup %2846  ;;  %v2380_v25 = vadd.f32 1.0, %v2845_v23  ;;  %2787 = vmatpush3.bf16.msra.mxu1 %v2833_v5  ;;  %v2452_v23 = vld [vmem:[%s4251_s8] sm:$0x3] }
 0x359   : > { %v2849_v29 = vpop.eup %2848  ;;  %v2383_v7 = vmul.f32 0.5, %v2379_v17  ;;  %v2381_v61 = vadd.f32 1.0, %v2847_v16  ;;  %2788 = vmatprep.subr.bf16.mxu1 %v2834_v12 }
 0x35a   : > { %v2384_v20 = vmul.f32 0.5, %v2380_v25  ;;  %v2382_v58 = vadd.f32 1.0, %v2849_v29  ;;  %v2441_v29 = vrot.slane %v2432_v63, %v4462_v1 }
 0x35b   : > { %v4148_v43 = vmul.f32 %v2383_v7, %v2347_v59  ;;  %v2385_v47 = vmul.f32 0.5, %v2381_v61  ;;  %v2445_v7 = vrot.slane %v2432_v63, %v4463_v3  ;;  %v2457_v61 = vrot.slane %v2452_v23, %v4462_v1 }
 0x35c   : > { %v4150_v36 = vmul.f32 %v2384_v20, %v2349_v44  ;;  %v2386_v53 = vmul.f32 0.5, %v2382_v58  ;;  %2789 = vmatpush3.bf16.msra.mxu1 %v2835_v21  ;;  %v2461_v20 = vrot.slane %v2452_v23, %v4463_v3 }
 0x35d   : > { %v4152_v33 = vmul.f32 %v2385_v47, %v2351_v6  ;;  %v2391_v32 = vmul.f32 %v4148_v43, %v4148_v43  ;;  %2790 = vmatprep.subr.bf16.mxu1 %v2836_v54 }
 0x35e   : > { %v4154_v24 = vmul.f32 %v2386_v53, %v2353_v60  ;;  %v2392_v18 = vmul.f32 %v4150_v36, %v4150_v36 }
 0x35f   : > { %v2393_v10 = vmul.f32 %v4152_v33, %v4152_v33 }
 0x360   : > { %v2394_v26 = vmul.f32 %v4154_v24, %v4154_v24  ;;  %2791 = vmatpush3.bf16.msra.mxu1 %v2837_v4 }
 0x361   : > { %v2395_v15 = vadd.f32 %v2393_v10, %v2391_v32 }
 0x362   : > { %v2402_v11 = vadd.f32 %v2394_v26, %v2392_v18 }
 0x363   : > { %v2396_v62 = vrot.slane %v2395_v15, 4 }
 0x364   : > { %v2403_v52 = vrot.slane %v2402_v11, 4 }
 0x365   : > { %v2397_v50 = vadd.f32 %v2396_v62, %v2395_v15 }
 0x366   : > { %v2404_v14 = vadd.f32 %v2403_v52, %v2402_v11 }
 0x367   : > { %v2398_v45 = vrot.slane %v2397_v50, 2 }
 0x368   : > { %v2405_v38 = vrot.slane %v2404_v14, 2 }
 0x369   : > { %v2399_v0 = vadd.f32 %v2398_v45, %v2397_v50 }
 0x36a   : > { %v2406_v9 = vadd.f32 %v2405_v38, %v2404_v14 }
 0x36b   : > { %v2400_v2 = vrot.slane %v2399_v0, 1 }
 0x36c   : > { %v2407_v22 = vrot.slane %v2406_v9, 1 }
 0x36d   : > { %v2401_v39 = vadd.f32 %v2400_v2, %v2399_v0  ;;  %v2755_v2 = vld [vmem:[%s4253_s10] ss:$0 sm:$0xff] }
 0x36e   : > { %v2408_v46 = vadd.f32 %v2407_v22, %v2406_v9 }
 0x36f   : > { %2850 = vrsqrt.f32 %v2401_v39  ;;  %vm2411_vm7 = vcmp.eq.f32.partialorder %v2401_v39, inf  ;;  %v2414_v44 = vand.u32 2147483648, %v2401_v39  ;;  %vm2413_vm8 = vcmp.eq.f32.partialorder %v2401_v39, 0.0 }
 0x370   : > { %2852 = vrsqrt.f32 %v2408_v46  ;;  %vm2418_vm9 = vcmp.eq.f32.partialorder %v2408_v46, inf  ;;  %v2421_v6 = vand.u32 2147483648, %v2408_v46  ;;  %vm2420_vm10 = vcmp.eq.f32.partialorder %v2408_v46, 0.0 }
 0x379   : > { %v2851_v31 = vpop.eup %2850 }
 0x37a   : > { %v2853_v59 = vpop.eup %2852  ;;  %v2410_v27 = vmul.f32 %v2851_v31, %v2401_v39  ;;  %v4466_v31 = vld [vmem:[#allocation6_spill] sm:$0xff] }
 0x37b   : > { %v2417_v34 = vmul.f32 %v2853_v59, %v2408_v46 }
 0x37c   : > { %v2412_v42 = vsel %vm2411_vm7, %v2401_v39, %v2410_v27 }
 0x37d   : > { %v2415_v56 = vsel %vm2413_vm8, %v2414_v44, %v2412_v42  ;;  %v2419_v51 = vsel %vm2418_vm9, %v2408_v46, %v2417_v34  ;;  %v4464_v46 = vld [vmem:[#allocation7_spill] sm:$0xff]  ;;  %v4468_v34 = vld [vmem:[#allocation10_spill] sm:$0xff] }
 0x37e   : > { %v2422_v60 = vsel %vm2420_vm10, %v2421_v6, %v2419_v51  ;;  %v4469_v42 = vunpack.c.l.bf16 %v4468_v34  ;;  %v4470_v6 = vld [vmem:[#allocation8_spill] sm:$0xff] }
 0x37f   : > { %v2423_v48 = vadd.f32 %v2422_v60, %v2415_v56 }
 0x381   : > { %2424 = vadd.xlane.f32.xlu0 %v2423_v48 }
 0x40e   : > { %v2425_v37 = vpop.xlane.xlu0 %2424 }
 0x40f   : > { %v2427_v30 = vmul.f32 0.00390625, %v2425_v37 }
 0x411   : > { %v2428_v40 = vadd.f32 1e-06, %v2427_v30 }
 0x413   : > { %2854 = vrcp.f32 %v2428_v40 }
 0x41d   : > { %v2855_v17 = vpop.eup %2854 }
 0x41e   : > { %v2430_v16 = vmul.f32 %v2855_v17, %v2415_v56  ;;  %v2431_v25 = vmul.f32 %v2855_v17, %v2422_v60  ;;  %v4471_v56 = vunpack.c.l.bf16 %v4470_v6 }
 0x420   : > { %v2434_v58 = vmul.f32 %v2431_v25, %v4150_v36  ;;  %v2436_v47 = vmul.f32 %v2431_v25, %v4154_v24  ;;  %v2433_v53 = vmul.f32 %v2430_v16, %v4148_v43  ;;  %v2435_v32 = vmul.f32 %v2430_v16, %v4152_v33 }
 0x421   : > { %v2655_v51 = vcombine.low %v4471_v56, %v4469_v42 }
 0x422   : > { %v2449_v10 = vmul.f32 %v2445_v7, %v2434_v58  ;;  %v2451_v18 = vmul.f32 %v2445_v7, %v2436_v47  ;;  %v2448_v26 = vmul.f32 %v2441_v29, %v2433_v53  ;;  %v2450_v15 = vmul.f32 %v2441_v29, %v2435_v32 }
 0x424   : > { %v2465_v11 = vadd.f32 %v2461_v20, %v2449_v10  ;;  %v2467_v62 = vadd.f32 %v2461_v20, %v2451_v18  ;;  %v2464_v52 = vadd.f32 %v2457_v61, %v2448_v26  ;;  %v2466_v50 = vadd.f32 %v2457_v61, %v2450_v15 }
 0x426   : > { %v2469_v1 = vadd.f32 %v2465_v11, %v4150_v36  ;;  %v2471_v3 = vadd.f32 %v2467_v62, %v4154_v24  ;;  %v2468_v14 = vadd.f32 %v2464_v52, %v4148_v43  ;;  %v2470_v45 = vadd.f32 %v2466_v50, %v4152_v33 }
 0x427   : > { %v4465_v36 = vunpack.c.l.bf16 %v4464_v46  ;;  %v4467_v24 = vunpack.c.l.bf16 %v4466_v31 }
 0x428   : > { %v2473_v38 = vpack.c.bf16 %v2471_v3, %v2469_v1  ;;  %v2472_v0 = vpack.c.bf16 %v2470_v45, %v2468_v14 }
 0x429   : > { %v2654_v59 = vcombine.low %v4467_v24, %v4465_v36 }
 0x42a   : > { %2641 = vmatprep.mubr.bf16.mxu1 %v2473_v38 }
 0x42b   : > { %2642 = vmatmul.mubr.bf16.vlgmr.msra.gmra.mrb[0].mxu1 %v2472_v0 }
 0x4fe   : > { %v2792_v9 = vpop.f32.mrb[0].mxu1 }
 0x4ff   : > { %v2793_v22 = vpop.f32.mrb[1].mxu1 }
 0x500   : > { %v2794_v39 = vadd.f32 %v2793_v22, %v2792_v9  ;;  %v2795_v43 = vpop.f32.mrb[2].mxu1 }
 0x501   : > { %v2796_v27 = vpop.f32.mrb[3].mxu1 }
 0x502   : > { %v2644_v33 = vadd.f32 %v2794_v39, %v2755_v2  ;;  %v2797_v44 = vadd.f32 %v2796_v27, %v2795_v43 }
 0x504   : > { %v2658_v60 = vadd.f32 %v2654_v59, %v2644_v33  ;;  %v2647_v48 = vadd.f32 %v2797_v44, %v2755_v2 }
 0x506   : > { %v2662_v57 = vcombine.high %v2658_v60, %v2658_v60  ;;  %v2666_v41 = vpack.c.bf16 %v2658_v60, %v2658_v60  ;;  %v2659_v19 = vadd.f32 %v2655_v51, %v2647_v48 }
 0x508   : > { %v2667_v35 = vpack.c.bf16 %v2662_v57, %v2662_v57  ;;  %2671 = vst.msk [vmem:[%s386_s19] sm:$0x3] %vm2670_vm11, %v2666_v41  ;;  %v2663_v28 = vcombine.high %v2659_v19, %v2659_v19  ;;  %v2668_v13 = vpack.c.bf16 %v2659_v19, %v2659_v19 }
 0x50a   : > { %2672 = vst.msk [vmem:[%s386_s19 + $0x2] sm:$0x3] %vm2670_vm11, %v2667_v35  ;;  %v2669_v8 = vpack.c.bf16 %v2663_v28, %v2663_v28  ;;  %2673 = vst.msk [vmem:[%s386_s19 + $0x4] sm:$0x3] %vm2670_vm11, %v2668_v13 }
 0x50c   : > { %2674 = vst.msk [vmem:[%s386_s19 + $0x6] sm:$0x3] %vm2670_vm11, %v2669_v8 }
 0x50d PF: > { %s21_s17 = sadd.s32 1, %s2884_s17  }
 0x50e   : > { %p18_p4 = scmp.ge.s32.totalorder %s21_s17, 4  }
 0x510   :  { %20 = sbr.rel (!%p18_p4) target bundleno = 1 (0x1), region = 96 }

// kernel: convnext_forward.7
= control target key start
LH: loop header
LB: loop body
LE: loop exit
PB: predicated region body
PF: predicated region fallthrough
CT: control target
= control target key end

     0   :  { %s5317_s17 = smov 0   ;;  %s9127_s0 = inlined_call_operand.vmem [shape: bf16[2,8,8,32], index: 0, kind: input, shape index: {}, may-alias: {0,11}]   ;;  %s9128_s1 = inlined_call_operand.vmem [shape: f32[7,7,32], index: 1, kind: input, shape index: {}]   ;;  %s9129_s2 = inlined_call_operand.vmem [shape: f32[1,32], index: 2, kind: input, shape index: {}]   ;;  %s9130_s3 = inlined_call_operand.vmem [shape: f32[1,32], index: 3, kind: input, shape index: {}]   ;;  %s9131_s4 = inlined_call_operand.vmem [shape: f32[1,32], index: 4, kind: input, shape index: {}]   ;;  %s9132_s5 = inlined_call_operand.vmem [shape: bf16[32,128], index: 5, kind: input, shape index: {}]   ;;  %s9133_s6 = inlined_call_operand.vmem [shape: f32[1,128], index: 6, kind: input, shape index: {}]   ;;  %s9134_s7 = inlined_call_operand.vmem [shape: f32[1,128], index: 7, kind: input, shape index: {}]   ;;  %s9135_s8 = inlined_call_operand.vmem [shape: f32[1,128], index: 8, kind: input, shape index: {}]   ;;  %s9136_s9 = inlined_call_operand.vmem [shape: bf16[128,32], index: 9, kind: input, shape index: {}]   ;;  %s9137_s10 = inlined_call_operand.vmem [shape: f32[1,32], index: 10, kind: input, shape index: {}]   ;;  %s9138_s11 = inlined_call_operand.vmem [shape: bf16[2,8,8,32], index: 11, kind: output, shape index: {}, may-alias: {0,11}]  }
   0x1 LB: > { %s5014_s18 = sadd.s32 4294967295, %s5254_s17   ;;  %p5018_p0 = scmp.ge.s32.totalorder %s5254_s17, 1  ;;  %s5254_s17 = sphi %s5317_s17, %s21_s17  }
   0x2   : > { %p337_p1 = scmp.lt.s32.totalorder %s5254_s17, 3 }
   0x4   : > { %p338_p2 = pnand %p5018_p0, %p337_p1 }
   0x6   : > { %341 = sbr.rel (%p338_p2) target bundleno = 1704 (0x6a8), region = 64 }
   0xd   : > { %p5327_p3 = scmp.lt.s32.totalorder %s5014_s18, 1  ;;  %vm396_vm0 = vcmask 261120   ;;  %v498_v0 = vlaneseq  ;;  %v5256_v1 = vmov 0.0   ;;  %v5374_v2 = vld [vmem:[%s9128_s1] sm:$0x7f]  ;;  %vm786_vm1 = vcmask 1046528  }
   0xe   : > { %397 = vst.msk [vmem:[#allocation2] sm:$0xff] %vm396_vm0, %v5256_v1  ;;  %398 = vst.msk [vmem:[#allocation2 + $0x8] sm:$0xff] %vm396_vm0, %v5256_v1  ;;  %v5379_v3 = vld [vmem:[%s9128_s1 + $0x8] sm:$0x7f]  ;;  %v5384_v5 = vld [vmem:[%s9128_s1 + $0x10] sm:$0x7f] }
   0xf   : > { %399 = vst.msk [vmem:[#allocation2 + $0x10] sm:$0xff] %vm396_vm0, %v5256_v1  ;;  %400 = vst.msk [vmem:[#allocation2 + $0x18] sm:$0xff] %vm396_vm0, %v5256_v1  ;;  %s10207_s18 = smov (!%p5327_p3, %s5014_s18), 1  ;;  %v499_v4 = vshrl.u32 %v498_v0, 7  ;;  %v5389_v6 = vld [vmem:[%s9128_s1 + $0x18] sm:$0x7f] }
  0x10   : > { %401 = vst.msk [vmem:[#allocation2 + $0x20] sm:$0xff] %vm396_vm0, %v5256_v1  ;;  %402 = vst.msk [vmem:[#allocation2 + $0x28] sm:$0xff] %vm396_vm0, %v5256_v1  ;;  %v5394_v7 = vld [vmem:[%s9128_s1 + $0x20] sm:$0x7f]  ;;  %s5046_s30 = sshll.u32 %s10207_s18, 5  ;;  %vm1431_vm2 = vcmask 1045504  }
  0x11   : > { %403 = vst.msk [vmem:[#allocation2 + $0x30] sm:$0xff] %vm396_vm0, %v5256_v1  ;;  %404 = vst.msk [vmem:[#allocation2 + $0x38] sm:$0xff] %vm396_vm0, %v5256_v1  ;;  %v5400_v8 = vld [vmem:[%s9128_s1 + $0x28] sm:$0x7f]  ;;  %v500_v9 = vsub.s32 0, %v499_v4  ;;  %v5402_v10 = vsub.s32 1, %v499_v4  ;;  %s5411_s16 = scalar_lea.vmem %s9127_s0, %s5046_s30  ;;  %s9092_s13 = scalar_lea.vmem %s9138_s11, %s5046_s30 }
  0x12   : > { %405 = vst.msk [vmem:[#allocation2 + $0x40] sm:$0xff] %vm396_vm0, %v5256_v1  ;;  %417 = vst.msk [vmem:[#allocation2 + $0x48] sm:$0xff] %vm396_vm0, %v5256_v1  ;;  %v5404_v11 = vsub.s32 2, %v499_v4  ;;  %v5416_v12 = vld [vmem:[%s9128_s1 + $0x30] sm:$0x7f]  ;;  %v5418_v13 = vsub.s32 3, %v499_v4 }
  0x13   : > { %418 = vst.msk [vmem:[#allocation2 + $0x60] sm:$0xff] %vm396_vm0, %v5256_v1  ;;  %419 = vst.msk [vmem:[#allocation2 + $0x78] sm:$0xff] %vm396_vm0, %v5256_v1  ;;  %v5420_v14 = vsub.s32 4, %v499_v4  ;;  %v5422_v15 = vsub.s32 5, %v499_v4  ;;  %v5424_v16 = vsub.s32 6, %v499_v4  ;;  %v5427_v17 = vld [vmem:[%s5411_s16] sm:$0xff]   ;;  %v5436_v20 = vrot.slane %v5374_v2, %v500_v9 }
  0x14   : > { %420 = vst.msk [vmem:[#allocation2 + $0x90] sm:$0xff] %vm396_vm0, %v5256_v1  ;;  %421 = vst.msk [vmem:[#allocation2 + $0xa8] sm:$0xff] %vm396_vm0, %v5256_v1  ;;  %v5430_v18 = vld [vmem:[%s5411_s16 + $0x8] sm:$0xff]   ;;  %v5433_v19 = vld [vmem:[%s5411_s16 + $0x10] sm:$0xff]   ;;  %v5439_v21 = vrot.slane %v5379_v3, %v500_v9  ;;  %v5442_v22 = vrot.slane %v5384_v5, %v500_v9  ;;  %v5445_v23 = vrot.slane %v5389_v6, %v500_v9  ;;  %v9143_v24 = vunpack.c.l.bf16 %v5427_v17 }
  0x15   : > { %425 = vst.msk [vmem:[#allocation2 + $0x58] sm:$0xff] %vm396_vm0, %v5256_v1  ;;  %426 = vst.msk [vmem:[#allocation2 + $0x70] sm:$0xff] %vm396_vm0, %v5256_v1  ;;  %v9141_v25 = vunpack.c.h.bf16 %v5427_v17  ;;  %v9144_v26 = vunpack.c.l.bf16 %v5430_v18  ;;  %v9142_v27 = vunpack.c.h.bf16 %v5430_v18  ;;  %v9140_v28 = vunpack.c.l.bf16 %v5433_v19  ;;  %v5453_v30 = vld [vmem:[#allocation2] sm:$0xff]  ;;  %v5455_v31 = vld [vmem:[#allocation2 + $0x8] sm:$0xff] }
  0x16   : > { %427 = vst.msk [vmem:[#allocation2 + $0x88] sm:$0xff] %vm396_vm0, %v5256_v1  ;;  %428 = vst.msk [vmem:[#allocation2 + $0xa0] sm:$0xff] %vm396_vm0, %v5256_v1  ;;  %v9139_v29 = vunpack.c.h.bf16 %v5433_v19  ;;  %v5458_v32 = vrot.slane %v5394_v7, %v500_v9  ;;  %v5461_v33 = vrot.slane %v5400_v8, %v500_v9  ;;  %v5475_v34 = vld [vmem:[#allocation2 + $0x18] sm:$0xff]  ;;  %v502_v36 = vmul.f32 %v5436_v20, %v5453_v30 }
  0x17   : > { %407 = vst.msk [vmem:[#allocation2 + $0x108] sm:$0xff] %vm396_vm0, %v5256_v1  ;;  %408 = vst.msk [vmem:[#allocation2 + $0x110] sm:$0xff] %vm396_vm0, %v5256_v1  ;;  %v5477_v35 = vld [vmem:[#allocation2 + $0x20] sm:$0xff]  ;;  %v503_v37 = vmul.f32 %v5436_v20, %v5455_v31  ;;  %v5484_v38 = vrot.slane %v5416_v12, %v500_v9  ;;  %v5488_v39 = vrot.slane %v5374_v2, %v5402_v10  ;;  %vm2440_vm3 = vcmask 1043456  }
  0x18   : > { %409 = vst.msk [vmem:[#allocation2 + $0x118] sm:$0xff] %vm396_vm0, %v5256_v1  ;;  %410 = vst.msk [vmem:[#allocation2 + $0x120] sm:$0xff] %vm396_vm0, %v5256_v1  ;;  %v5496_v40 = vld [vmem:[#allocation2 + $0x30] sm:$0xff]  ;;  %v5498_v41 = vld [vmem:[#allocation2 + $0x38] sm:$0xff]  ;;  %v504_v42 = vmul.f32 %v5436_v20, %v5475_v34  ;;  %v505_v43 = vmul.f32 %v5436_v20, %v5477_v35  ;;  %v538_v44 = vmul.f32 %v5439_v21, %v5475_v34  ;;  %vm3085_vm4 = vcmask 1042432  }
  0x19   : > { %411 = vst.msk [vmem:[#allocation2 + $0x128] sm:$0xff] %vm396_vm0, %v5256_v1  ;;  %412 = vst.msk [vmem:[#allocation2 + $0x130] sm:$0xff] %vm396_vm0, %v5256_v1  ;;  %v539_v45 = vmul.f32 %v5439_v21, %v5477_v35  ;;  %v5508_v46 = vld [vmem:[#allocation2 + $0x48] sm:$0xff]  ;;  %v5514_v48 = vmul.f32 %v5436_v20, %v5496_v40  ;;  %v540_v49 = vmul.f32 %v5439_v21, %v5496_v40  ;;  %vm3730_vm5 = vcmask 1041408  }
  0x1a   : > { %413 = vst.msk [vmem:[#allocation2 + $0x138] sm:$0xff] %vm396_vm0, %v5256_v1  ;;  %414 = vst.msk [vmem:[#allocation2 + $0x140] sm:$0xff] %vm396_vm0, %v5256_v1  ;;  %v5510_v47 = vld [vmem:[#allocation2 + $0x60] sm:$0xff]  ;;  %v541_v50 = vmul.f32 %v5439_v21, %v5498_v41  ;;  %v574_v51 = vmul.f32 %v5442_v22, %v5496_v40  ;;  %v5522_v52 = vld [vmem:[#allocation2 + $0x78] sm:$0xff]  ;;  %v554_v53 = vadd.f32 %v538_v44, %v502_v36  ;;  %vm4950_vm8 = vcmask 257024  }
  0x1b   : > { %415 = vst.msk [vmem:[#allocation2 + $0x148] sm:$0xff] %vm396_vm0, %v5256_v1  ;;  %422 = vst.msk [vmem:[#allocation2 + $0xc0] sm:$0xff] %vm396_vm0, %v5256_v1  ;;  %v555_v54 = vadd.f32 %v539_v45, %v503_v37  ;;  %v575_v55 = vmul.f32 %v5442_v22, %v5498_v41  ;;  %v576_v56 = vmul.f32 %v5442_v22, %v5508_v46  ;;  %v5528_v57 = vld [vmem:[#allocation2 + $0x90] sm:$0xff]  ;;  %v5536_v62 = vld [vmem:[#allocation2 + $0xa8] sm:$0xff] }
  0x1c   : > { %423 = vst.msk [vmem:[#allocation2 + $0xd8] sm:$0xff] %vm396_vm0, %v5256_v1  ;;  %424 = vst.msk [vmem:[#allocation2 + $0xf0] sm:$0xff] %vm396_vm0, %v5256_v1  ;;  %v556_v58 = vadd.f32 %v540_v49, %v504_v42  ;;  %v5530_v59 = vadd.f32 %v541_v50, %v505_v43  ;;  %v610_v60 = vmul.f32 %v5445_v23, %v5508_v46 }
  0x1d   : > { %429 = vst.msk [vmem:[#allocation2 + $0xb8] sm:$0xff] %vm396_vm0, %v5256_v1  ;;  %430 = vst.msk [vmem:[#allocation2 + $0xd0] sm:$0xff] %vm396_vm0, %v5256_v1  ;;  %v612_v61 = vmul.f32 %v5445_v23, %v5510_v47  ;;  %v590_v63 = vadd.f32 %v574_v51, %v554_v53  ;;  %v591_v0 = vadd.f32 %v575_v55, %v555_v54 }
  0x1e   : > { %431 = vst.msk [vmem:[#allocation2 + $0xe8] sm:$0xff] %vm396_vm0, %v5256_v1  ;;  %432 = vst.msk [vmem:[#allocation2 + $0x100] sm:$0xff] %vm396_vm0, %v5256_v1  ;;  %v646_v1 = vmul.f32 %v5458_v32, %v5510_v47  ;;  %v648_v4 = vmul.f32 %v5458_v32, %v5522_v52  ;;  %v592_v9 = vadd.f32 %v576_v56, %v556_v58 }
  0x1f   : > { %9570 = vst [vmem:[#allocation3_spill] sm:$0xff] %v5427_v17  ;;  %9571 = vst [vmem:[#allocation4_spill] sm:$0xff] %v5430_v18  ;;  %v682_v36 = vmul.f32 %v5461_v33, %v5522_v52  ;;  %v684_v37 = vmul.f32 %v5461_v33, %v5528_v57  ;;  %v718_v42 = vmul.f32 %v5484_v38, %v5528_v57 }
  0x20   : > { %9572 = vst [vmem:[#allocation5_spill] sm:$0xff] %v5433_v19  ;;  %9573 = vst [vmem:[#allocation6_spill] sm:$0xff] %v5436_v20  ;;  %v626_v49 = vadd.f32 %v610_v60, %v590_v63  ;;  %v720_v50 = vmul.f32 %v5484_v38, %v5536_v62  ;;  %v754_v51 = vmul.f32 %v5488_v39, %v5453_v30 }
  0x21   : > { %9574 = vst [vmem:[#allocation7_spill] sm:$0xff] %v5439_v21  ;;  %9575 = vst [vmem:[#allocation8_spill] sm:$0xff] %v5442_v22  ;;  %v755_v53 = vmul.f32 %v5488_v39, %v5455_v31  ;;  %v628_v60 = vadd.f32 %v612_v61, %v592_v9 }
  0x22   : > { %9576 = vst [vmem:[#allocation9_spill] sm:$0xff] %v5445_v23  ;;  %9577 = vst [vmem:[#allocation10_spill] sm:$0xff] %v5458_v32  ;;  %v787_v17 = vrot.slane %v754_v51, 1 }
  0x23   : > { %9578 = vst [vmem:[#allocation11_spill] sm:$0xff] %v5461_v33  ;;  %441 = vst.msk [vmem:[#allocation2 + $0x50] sm:$0xff] %vm396_vm0, %v9143_v24 }
  0x24   : > { %442 = vst.msk [vmem:[#allocation2 + $0x68] sm:$0xff] %vm396_vm0, %v9141_v25  ;;  %443 = vst.msk [vmem:[#allocation2 + $0x80] sm:$0xff] %vm396_vm0, %v9144_v26  ;;  %v664_v26 = vadd.f32 %v648_v4, %v628_v60  ;;  %v5596_v4 = vrot.slane %v5379_v3, %v5402_v10 }
  0x25   : > { %444 = vst.msk [vmem:[#allocation2 + $0x98] sm:$0xff] %vm396_vm0, %v9142_v27  ;;  %9579 = vst [vmem:[#allocation12_spill] sm:$0xff] %v5484_v38 }
  0x26   : > { %9580 = vst [vmem:[#allocation13_spill] sm:$0xff] %v5488_v39  ;;  %445 = vst.msk [vmem:[#allocation2 + $0xb0] sm:$0xff] %vm396_vm0, %v9140_v28  ;;  %v662_v28 = vadd.f32 %v646_v1, %v626_v49  ;;  %v756_v1 = vmul.f32 %v5488_v39, %v5475_v34  ;;  %v5592_v49 = vmul.f32 %v5488_v39, %v5477_v35 }
  0x27   : > { %446 = vst.msk [vmem:[#allocation2 + $0xc8] sm:$0xff] %vm396_vm0, %v9139_v29  ;;  %9581 = vst [vmem:[#allocation14_spill] sm:$0xff] %v5496_v40 }
  0x28   : > { %9582 = vst [vmem:[#allocation15_spill] sm:$0xff] %v5514_v48  ;;  %v698_v19 = vadd.f32 %v682_v36, %v662_v28  ;;  %9586 = vst [vmem:[#allocation19_spill] sm:$0xff] %v5592_v49  ;;  %v790_v60 = vrot.slane %v756_v1, 1  ;;  %v5601_v28 = vrot.slane %v5384_v5, %v5402_v10 }
  0x29   : > { %9587 = vst [vmem:[#allocation20_spill] sm:$0xff] %v5596_v4 }
  0x2a   : > { %v5548_v43 = vld [vmem:[#allocation2 + $0x50] sm:$0xff] }
  0x2b   : > { %v5550_v44 = vld [vmem:[#allocation2 + $0x68] sm:$0xff]  ;;  %v5552_v45 = vld [vmem:[#allocation2 + $0x80] sm:$0xff]  ;;  %v611_v56 = vmul.f32 %v5445_v23, %v5548_v43 }
  0x2c   : > { %v5560_v54 = vld [vmem:[#allocation2 + $0x98] sm:$0xff]  ;;  %v5568_v58 = vmul.f32 %v5445_v23, %v5550_v44  ;;  %v647_v63 = vmul.f32 %v5458_v32, %v5550_v44  ;;  %v5574_v29 = vmul.f32 %v5458_v32, %v5552_v45  ;;  %v683_v25 = vmul.f32 %v5461_v33, %v5552_v45 }
  0x2d   : > { %v5562_v55 = vld [vmem:[#allocation2 + $0xb0] sm:$0xff]  ;;  %v5580_v27 = vmul.f32 %v5461_v33, %v5560_v54  ;;  %v627_v24 = vadd.f32 %v611_v56, %v591_v0  ;;  %v719_v61 = vmul.f32 %v5484_v38, %v5560_v54  ;;  %v700_v33 = vadd.f32 %v684_v37, %v664_v26 }
  0x2e   : > { %9583 = vst [vmem:[#allocation16_spill] sm:$0xff] %v5562_v55  ;;  %v5586_v9 = vmul.f32 %v5484_v38, %v5562_v55  ;;  %v788_v0 = vrot.slane %v755_v53, 1  ;;  %v734_v56 = vadd.f32 %v718_v42, %v698_v19  ;;  %v9159_v38 = vrot.slane %v5592_v49, 1 }
  0x2f   : > { %9584 = vst [vmem:[#allocation17_spill] sm:$0xff] %v5580_v27  ;;  %v663_v18 = vadd.f32 %v647_v63, %v627_v24  ;;  %v736_v32 = vadd.f32 %v720_v50, %v700_v33  ;;  %v847_v24 = vmul.f32 %v5596_v4, %v5475_v34  ;;  %v848_v19 = vmul.f32 %v5596_v4, %v5477_v35 }
  0x30   : > { %9585 = vst [vmem:[#allocation18_spill] sm:$0xff] %v5586_v9  ;;  %v789_v39 = vsel %vm786_vm1, %v787_v17, %v788_v0  ;;  %v792_v26 = vsel %vm786_vm1, %v790_v60, %v9159_v38  ;;  %v849_v42 = vmul.f32 %v5596_v4, %v5496_v40  ;;  %v939_v50 = vmul.f32 %v5601_v28, %v5496_v40 }
  0x31   : > { %v699_v36 = vadd.f32 %v683_v25, %v663_v18  ;;  %v827_v37 = vadd.f32 %v789_v39, %v734_v56  ;;  %v829_v53 = vadd.f32 %v792_v26, %v736_v32  ;;  %v5615_v18 = vmul.f32 %v5596_v4, %v5498_v41 }
  0x32   : > { %v879_v17 = vrot.slane %v847_v24, 1  ;;  %v880_v25 = vrot.slane %v848_v19, 1  ;;  %v882_v33 = vrot.slane %v849_v42, 1  ;;  %v940_v39 = vmul.f32 %v5601_v28, %v5498_v41 }
  0x33   : > { %v735_v51 = vadd.f32 %v719_v61, %v699_v36  ;;  %9588 = vst [vmem:[#allocation21_spill] sm:$0xff] %v5615_v18  ;;  %v9164_v1 = vrot.slane %v5615_v18, 1  ;;  %v5624_v61 = vmul.f32 %v5601_v28, %v5548_v43  ;;  %v5628_v32 = vrot.slane %v5389_v6, %v5402_v10 }
  0x34   : > { %v881_v56 = vsel %vm786_vm1, %v879_v17, %v880_v25  ;;  %v971_v60 = vrot.slane %v939_v50, 1  ;;  %v972_v36 = vrot.slane %v940_v39, 1  ;;  %v5633_v24 = vrot.slane %v5394_v7, %v5402_v10 }
  0x35   : > { %v828_v63 = vadd.f32 %v788_v0, %v735_v51  ;;  %v884_v0 = vsel %vm786_vm1, %v882_v33, %v9164_v1  ;;  %v919_v26 = vadd.f32 %v881_v56, %v827_v37  ;;  %v1031_v17 = vmul.f32 %v5628_v32, %v5508_v46 }
  0x36   : > { %v5639_v51 = vadd.f32 %v884_v0, %v829_v53  ;;  %v973_v38 = vsel %vm786_vm1, %v971_v60, %v972_v36  ;;  %v1032_v50 = vmul.f32 %v5628_v32, %v5548_v43  ;;  %v5648_v23 = vmul.f32 %v5628_v32, %v5550_v44 }
  0x37   : > { %v920_v19 = vadd.f32 %v880_v25, %v828_v63  ;;  %v1011_v39 = vadd.f32 %v973_v38, %v919_v26  ;;  %v1123_v37 = vmul.f32 %v5633_v24, %v5510_v47  ;;  %v1063_v25 = vrot.slane %v1031_v17, 1 }
  0x38   : > { %v1064_v53 = vrot.slane %v1032_v50, 1  ;;  %v1124_v33 = vmul.f32 %v5633_v24, %v5550_v44  ;;  %v5656_v63 = vmul.f32 %v5633_v24, %v5552_v45  ;;  %v5661_v60 = vrot.slane %v5400_v8, %v5402_v10 }
  0x39   : > { %v1012_v4 = vadd.f32 %v972_v36, %v920_v19  ;;  %v1155_v38 = vrot.slane %v1123_v37, 1  ;;  %v5665_v36 = vrot.slane %v5416_v12, %v5402_v10  ;;  %v5954_v27 = vrot.slane %v5374_v2, %v5422_v15 }
  0x3a   : > { %9589 = vst [vmem:[#allocation22_spill] sm:$0xff] %v5661_v60  ;;  %v1065_v0 = vsel %vm786_vm1, %v1063_v25, %v1064_v53  ;;  %v1156_v19 = vrot.slane %v1124_v33, 1  ;;  %v1215_v1 = vmul.f32 %v5661_v60, %v5522_v52  ;;  %v1216_v37 = vmul.f32 %v5661_v60, %v5552_v45 }
  0x3b   : > { %9590 = vst [vmem:[#allocation23_spill] sm:$0xff] %v5665_v36  ;;  %v1104_v26 = vadd.f32 %v1064_v53, %v1012_v4  ;;  %v1103_v50 = vadd.f32 %v1065_v0, %v1011_v39  ;;  %v5675_v56 = vmul.f32 %v5661_v60, %v5560_v54  ;;  %v1307_v4 = vmul.f32 %v5665_v36, %v5528_v57 }
  0x3c   : > { %v1157_v10 = vsel %vm786_vm1, %v1155_v38, %v1156_v19  ;;  %v1308_v25 = vmul.f32 %v5665_v36, %v5560_v54  ;;  %v1247_v53 = vrot.slane %v1215_v1, 1  ;;  %v1248_v33 = vrot.slane %v1216_v37, 1  ;;  %9631 = vst [vmem:[#allocation64_spill] sm:$0xff] %v5954_v27 }
  0x3d   : > { %9591 = vst [vmem:[#allocation24_spill] sm:$0xff] %v5675_v56  ;;  %v1196_v42 = vadd.f32 %v1156_v19, %v1104_v26  ;;  %v1195_v39 = vadd.f32 %v1157_v10, %v1103_v50  ;;  %v5685_v17 = vmul.f32 %v5665_v36, %v5562_v55  ;;  %v1339_v48 = vrot.slane %v1307_v4, 1 }
  0x3e   : > { %v1340_v21 = vrot.slane %v1308_v25, 1  ;;  %v5689_v38 = vrot.slane %v5374_v2, %v5404_v11  ;;  %v1249_v26 = vsel %vm786_vm1, %v1247_v53, %v1248_v33  ;;  %v5694_v50 = vrot.slane %v5379_v3, %v5404_v11 }
  0x3f   : > { %9592 = vst [vmem:[#allocation25_spill] sm:$0xff] %v5685_v17  ;;  %v1288_v19 = vadd.f32 %v1248_v33, %v1196_v42  ;;  %v5698_v1 = vrot.slane %v5384_v5, %v5404_v11  ;;  %v1287_v37 = vadd.f32 %v1249_v26, %v1195_v39  ;;  %v5738_v56 = vrot.slane %v5389_v6, %v5404_v11 }
  0x40   : > { %9593 = vst [vmem:[#allocation26_spill] sm:$0xff] %v5689_v38  ;;  %9594 = vst [vmem:[#allocation27_spill] sm:$0xff] %v5694_v50  ;;  %v1341_v10 = vsel %vm786_vm1, %v1339_v48, %v1340_v21  ;;  %v1399_v25 = vmul.f32 %v5689_v38, %v5453_v30  ;;  %v1400_v42 = vmul.f32 %v5689_v38, %v5455_v31 }
  0x41   : > { %9595 = vst [vmem:[#allocation28_spill] sm:$0xff] %v5698_v1  ;;  %v1380_v0 = vadd.f32 %v1340_v21, %v1288_v19  ;;  %v5708_v53 = vmul.f32 %v5689_v38, %v5475_v34  ;;  %v5712_v33 = vmul.f32 %v5689_v38, %v5477_v35  ;;  %v1379_v39 = vadd.f32 %v1341_v10, %v1287_v37 }
  0x42   : > { %v1432_v26 = vrot.slane %v1399_v25, 2  ;;  %v1492_v48 = vmul.f32 %v5694_v50, %v5475_v34  ;;  %v1493_v30 = vmul.f32 %v5694_v50, %v5477_v35  ;;  %v1433_v21 = vrot.slane %v1400_v42, 2  ;;  %9600 = vst [vmem:[#allocation33_spill] sm:$0xff] %v5738_v56 }
  0x43   : > { %9596 = vst [vmem:[#allocation29_spill] sm:$0xff] %v5708_v53  ;;  %9597 = vst [vmem:[#allocation30_spill] sm:$0xff] %v5712_v33  ;;  %v5722_v20 = vmul.f32 %v5694_v50, %v5498_v41  ;;  %v1584_v37 = vmul.f32 %v5698_v1, %v5496_v40  ;;  %v1585_v34 = vmul.f32 %v5698_v1, %v5498_v41  ;;  %v5906_v40 = vld [vmem:[#allocation2 + $0x58] sm:$0xff] }
  0x44   : > { %v1524_v18 = vrot.slane %v1492_v48, 2  ;;  %v1525_v38 = vrot.slane %v1493_v30, 2  ;;  %v1434_v10 = vsel %vm1431_vm2, %v1432_v26, %v1433_v21  ;;  %v1473_v25 = vadd.f32 %v1433_v21, %v1380_v0 }
  0x45   : > { %9598 = vst [vmem:[#allocation31_spill] sm:$0xff] %v5722_v20  ;;  %v5732_v19 = vmul.f32 %v5698_v1, %v5548_v43  ;;  %v1472_v4 = vadd.f32 %v1434_v10, %v1379_v39  ;;  %v1616_v48 = vrot.slane %v1584_v37, 2  ;;  %v1617_v30 = vrot.slane %v1585_v34, 2 }
  0x46   : > { %v1526_v49 = vsel %vm1431_vm2, %v1524_v18, %v1525_v38  ;;  %v1565_v9 = vadd.f32 %v1525_v38, %v1473_v25  ;;  %v5742_v0 = vrot.slane %v5394_v7, %v5404_v11  ;;  %v5747_v39 = vrot.slane %v5400_v8, %v5404_v11 }
  0x47   : > { %9599 = vst [vmem:[#allocation32_spill] sm:$0xff] %v5732_v19  ;;  %v1564_v26 = vadd.f32 %v1526_v49, %v1472_v4  ;;  %v1618_v21 = vsel %vm1431_vm2, %v1616_v48, %v1617_v30  ;;  %v5751_v18 = vrot.slane %v5416_v12, %v5404_v11  ;;  %v1676_v37 = vmul.f32 %v5738_v56, %v5508_v46 }
  0x48   : > { %9601 = vst [vmem:[#allocation34_spill] sm:$0xff] %v5742_v0  ;;  %9602 = vst [vmem:[#allocation35_spill] sm:$0xff] %v5747_v39  ;;  %v1657_v38 = vadd.f32 %v1617_v30, %v1565_v9  ;;  %v1677_v34 = vmul.f32 %v5738_v56, %v5548_v43  ;;  %v5759_v49 = vmul.f32 %v5738_v56, %v5550_v44 }
  0x49   : > { %9603 = vst [vmem:[#allocation36_spill] sm:$0xff] %v5751_v18  ;;  %v1656_v4 = vadd.f32 %v1618_v21, %v1564_v26  ;;  %v1768_v10 = vmul.f32 %v5742_v0, %v5510_v47  ;;  %v1769_v25 = vmul.f32 %v5742_v0, %v5550_v44  ;;  %v5767_v11 = vmul.f32 %v5742_v0, %v5552_v45 }
  0x4a   : > { %9604 = vst [vmem:[#allocation37_spill] sm:$0xff] %v5759_v49  ;;  %v1708_v9 = vrot.slane %v1676_v37, 2  ;;  %v1709_v48 = vrot.slane %v1677_v34, 2  ;;  %v1860_v17 = vmul.f32 %v5747_v39, %v5522_v52  ;;  %v1861_v21 = vmul.f32 %v5747_v39, %v5552_v45 }
  0x4b   : > { %9605 = vst [vmem:[#allocation38_spill] sm:$0xff] %v5767_v11  ;;  %v1800_v42 = vrot.slane %v1768_v10, 2  ;;  %v1801_v19 = vrot.slane %v1769_v25, 2  ;;  %v5778_v0 = vmul.f32 %v5747_v39, %v5560_v54  ;;  %v1952_v10 = vmul.f32 %v5751_v18, %v5528_v57 }
  0x4c   : > { %v1710_v20 = vsel %vm1431_vm2, %v1708_v9, %v1709_v48  ;;  %v1749_v56 = vadd.f32 %v1709_v48, %v1657_v38  ;;  %v1892_v37 = vrot.slane %v1860_v17, 2  ;;  %v1893_v49 = vrot.slane %v1861_v21, 2 }
  0x4d   : > { %9606 = vst [vmem:[#allocation39_spill] sm:$0xff] %v5778_v0  ;;  %v1748_v34 = vadd.f32 %v1710_v20, %v1656_v4  ;;  %v1802_v30 = vsel %vm1431_vm2, %v1800_v42, %v1801_v19  ;;  %v1953_v11 = vmul.f32 %v5751_v18, %v5560_v54  ;;  %v5788_v38 = vmul.f32 %v5751_v18, %v5562_v55 }
  0x4e   : > { %v1841_v25 = vadd.f32 %v1801_v19, %v1749_v56  ;;  %v1894_v17 = vsel %vm1431_vm2, %v1892_v37, %v1893_v49  ;;  %v1984_v20 = vrot.slane %v1952_v10, 2  ;;  %v5793_v42 = vrot.slane %v5374_v2, %v5418_v13 }
  0x4f   : > { %9607 = vst [vmem:[#allocation40_spill] sm:$0xff] %v5788_v38  ;;  %v1840_v9 = vadd.f32 %v1802_v30, %v1748_v34  ;;  %v1985_v48 = vrot.slane %v1953_v11, 2  ;;  %v5798_v19 = vrot.slane %v5379_v3, %v5418_v13  ;;  %v5808_v37 = vrot.slane %v5384_v5, %v5418_v13 }
  0x50   : > { %9608 = vst [vmem:[#allocation41_spill] sm:$0xff] %v5793_v42  ;;  %v1933_v4 = vadd.f32 %v1893_v49, %v1841_v25  ;;  %v2044_v26 = vmul.f32 %v5793_v42, %v5455_v31  ;;  %v5804_v30 = vmul.f32 %v5793_v42, %v5477_v35 }
  0x51   : > { %9609 = vst [vmem:[#allocation42_spill] sm:$0xff] %v5798_v19  ;;  %v1932_v21 = vadd.f32 %v1894_v17, %v1840_v9  ;;  %9611 = vst [vmem:[#allocation44_spill] sm:$0xff] %v5808_v37  ;;  %v1986_v49 = vsel %vm1431_vm2, %v1984_v20, %v1985_v48  ;;  %v2096_v34 = vmul.f32 %v5798_v19, %v5477_v35 }
  0x52   : > { %9610 = vst [vmem:[#allocation43_spill] sm:$0xff] %v5804_v30  ;;  %v2025_v11 = vadd.f32 %v1985_v48, %v1933_v4  ;;  %v5815_v10 = vmul.f32 %v5798_v19, %v5498_v41  ;;  %v2060_v9 = vrot.slane %v2044_v26, 3  ;;  %v2148_v56 = vmul.f32 %v5808_v37, %v5498_v41 }
  0x53   : > { %v2024_v25 = vadd.f32 %v1986_v49, %v1932_v21  ;;  %v2112_v42 = vrot.slane %v2096_v34, 3  ;;  %v5823_v20 = vmul.f32 %v5808_v37, %v5548_v43  ;;  %v5827_v4 = vrot.slane %v5389_v6, %v5418_v13 }
  0x54   : > { %9612 = vst [vmem:[#allocation45_spill] sm:$0xff] %v5815_v10  ;;  %v2077_v19 = vadd.f32 %v2060_v9, %v2025_v11  ;;  %v2164_v21 = vrot.slane %v2148_v56, 3  ;;  %v5831_v26 = vrot.slane %v5394_v7, %v5418_v13  ;;  %v5842_v17 = vrot.slane %v5400_v8, %v5418_v13  ;;  %v5857_v10 = vld [vmem:[#allocation2 + $0x10] sm:$0xff] }
  0x55   : > { %9613 = vst [vmem:[#allocation46_spill] sm:$0xff] %v5823_v20  ;;  %9614 = vst [vmem:[#allocation47_spill] sm:$0xff] %v5827_v4  ;;  %v2076_v48 = vadd.f32 %v2060_v9, %v2024_v25  ;;  %v2200_v34 = vmul.f32 %v5827_v4, %v5548_v43  ;;  %v5838_v38 = vmul.f32 %v5827_v4, %v5550_v44 }
  0x56   : > { %9615 = vst [vmem:[#allocation48_spill] sm:$0xff] %v5831_v26  ;;  %9617 = vst [vmem:[#allocation50_spill] sm:$0xff] %v5842_v17  ;;  %v2129_v56 = vadd.f32 %v2112_v42, %v2077_v19  ;;  %v2252_v25 = vmul.f32 %v5831_v26, %v5550_v44  ;;  %v5848_v9 = vmul.f32 %v5831_v26, %v5552_v45 }
  0x57   : > { %9616 = vst [vmem:[#allocation49_spill] sm:$0xff] %v5838_v38  ;;  %v2128_v11 = vadd.f32 %v2112_v42, %v2076_v48  ;;  %v2216_v49 = vrot.slane %v2200_v34, 3  ;;  %v2304_v4 = vmul.f32 %v5842_v17, %v5552_v45  ;;  %v5855_v20 = vmul.f32 %v5842_v17, %v5560_v54 }
  0x58   : > { %9618 = vst [vmem:[#allocation51_spill] sm:$0xff] %v5848_v9  ;;  %v2181_v19 = vadd.f32 %v2164_v21, %v2129_v56  ;;  %v2268_v48 = vrot.slane %v2252_v25, 3  ;;  %v5863_v34 = vrot.slane %v5416_v12, %v5418_v13  ;;  %v5867_v37 = vrot.slane %v5374_v2, %v5420_v14 }
  0x59   : > { %9619 = vst [vmem:[#allocation52_spill] sm:$0xff] %v5855_v20  ;;  %v2180_v42 = vadd.f32 %v2164_v21, %v2128_v11  ;;  %v2320_v0 = vrot.slane %v2304_v4, 3  ;;  %v5871_v11 = vrot.slane %v5379_v3, %v5420_v14  ;;  %v5875_v21 = vrot.slane %v5384_v5, %v5420_v14  ;;  %v5877_v4 = vld [vmem:[#allocation2 + $0x28] sm:$0xff]  ;;  %v5895_v20 = vld [vmem:[#allocation2 + $0x40] sm:$0xff] }
  0x5a   : > { %9620 = vst [vmem:[#allocation53_spill] sm:$0xff] %v5863_v34  ;;  %9621 = vst [vmem:[#allocation54_spill] sm:$0xff] %v5867_v37  ;;  %v2233_v38 = vadd.f32 %v2216_v49, %v2181_v19  ;;  %v2356_v13 = vmul.f32 %v5863_v34, %v5560_v54  ;;  %v5883_v56 = vmul.f32 %v5863_v34, %v5562_v55 }
  0x5b   : > { %v2232_v17 = vadd.f32 %v2216_v49, %v2180_v42  ;;  %9622 = vst [vmem:[#allocation55_spill] sm:$0xff] %v5871_v11  ;;  %9623 = vst [vmem:[#allocation56_spill] sm:$0xff] %v5875_v21  ;;  %v2408_v49 = vmul.f32 %v5867_v37, %v5455_v31  ;;  %v2409_v25 = vmul.f32 %v5867_v37, %v5857_v10 }
  0x5c   : > { %9624 = vst [vmem:[#allocation57_spill] sm:$0xff] %v5883_v56  ;;  %v2285_v19 = vadd.f32 %v2268_v48, %v2233_v38  ;;  %v5891_v26 = vmul.f32 %v5867_v37, %v5477_v35  ;;  %v2411_v30 = vmul.f32 %v5867_v37, %v5877_v4  ;;  %v2372_v9 = vrot.slane %v2356_v13, 3  ;;  %v5919_v56 = vld [vmem:[#allocation2 + $0x70] sm:$0xff] }
  0x5d   : > { %v2284_v42 = vadd.f32 %v2268_v48, %v2232_v17  ;;  %v2441_v55 = vrot.slane %v2408_v49, 4  ;;  %v2442_v18 = vrot.slane %v2409_v25, 4  ;;  %v2501_v48 = vmul.f32 %v5871_v11, %v5477_v35 }
  0x5e   : > { %9625 = vst [vmem:[#allocation58_spill] sm:$0xff] %v5891_v26  ;;  %v2337_v1 = vadd.f32 %v2320_v0, %v2285_v19  ;;  %v9235_v50 = vrot.slane %v5891_v26, 4  ;;  %v2445_v17 = vrot.slane %v2411_v30, 4  ;;  %v2502_v37 = vmul.f32 %v5871_v11, %v5877_v4 }
  0x5f   : > { %v2336_v39 = vadd.f32 %v2320_v0, %v2284_v42  ;;  %v2443_v38 = vsel %vm2440_vm3, %v2441_v55, %v2442_v18  ;;  %v2593_v13 = vmul.f32 %v5875_v21, %v5498_v41  ;;  %v2594_v18 = vmul.f32 %v5875_v21, %v5895_v20 }
  0x60   : > { %v2389_v25 = vadd.f32 %v2372_v9, %v2337_v1  ;;  %v5911_v0 = vsel %vm2440_vm3, %v9235_v50, %v2445_v17  ;;  %v2533_v30 = vrot.slane %v2501_v48, 4  ;;  %v2534_v42 = vrot.slane %v2502_v37, 4  ;;  %v5925_v17 = vld [vmem:[#allocation2 + $0x88] sm:$0xff] }
  0x61   : > { %v2388_v49 = vadd.f32 %v2372_v9, %v2336_v39  ;;  %9626 = vst [vmem:[#allocation59_spill] sm:$0xff] %v5911_v0  ;;  %v2625_v19 = vrot.slane %v2593_v13, 4  ;;  %v5917_v34 = vrot.slane %v5389_v6, %v5420_v14  ;;  %v2626_v1 = vrot.slane %v2594_v18, 4 }
  0x62   : > { %v2482_v39 = vadd.f32 %v2443_v38, %v2389_v25  ;;  %v5923_v9 = vrot.slane %v5394_v7, %v5420_v14  ;;  %v2535_v50 = vsel %vm2440_vm3, %v2533_v30, %v2534_v42  ;;  %v5934_v13 = vrot.slane %v5400_v8, %v5420_v14 }
  0x63   : > { %9627 = vst [vmem:[#allocation60_spill] sm:$0xff] %v5917_v34  ;;  %v2481_v11 = vadd.f32 %v2441_v55, %v2388_v49  ;;  %v2685_v37 = vmul.f32 %v5917_v34, %v5548_v43  ;;  %v2686_v48 = vmul.f32 %v5917_v34, %v5906_v40  ;;  %v2627_v49 = vsel %vm2440_vm3, %v2625_v19, %v2626_v1  ;;  %v5943_v34 = vld [vmem:[#allocation2 + $0xa0] sm:$0xff] }
  0x64   : > { %9628 = vst [vmem:[#allocation61_spill] sm:$0xff] %v5923_v9  ;;  %9629 = vst [vmem:[#allocation62_spill] sm:$0xff] %v5934_v13  ;;  %v2574_v38 = vadd.f32 %v2535_v50, %v2482_v39  ;;  %v2777_v25 = vmul.f32 %v5923_v9, %v5550_v44  ;;  %v2778_v0 = vmul.f32 %v5923_v9, %v5919_v56 }
  0x65   : > { %v2573_v55 = vadd.f32 %v2533_v30, %v2481_v11  ;;  %v2717_v18 = vrot.slane %v2685_v37, 4  ;;  %v2718_v42 = vrot.slane %v2686_v48, 4  ;;  %v2869_v26 = vmul.f32 %v5934_v13, %v5552_v45 }
  0x66   : > { %v2666_v53 = vadd.f32 %v2627_v49, %v2574_v38  ;;  %v2809_v11 = vrot.slane %v2777_v25, 4  ;;  %v2870_v50 = vmul.f32 %v5934_v13, %v5925_v17  ;;  %v2810_v39 = vrot.slane %v2778_v0, 4 }
  0x67   : > { %v2665_v21 = vadd.f32 %v2625_v19, %v2573_v55  ;;  %v2719_v30 = vsel %vm2440_vm3, %v2717_v18, %v2718_v42  ;;  %v2901_v1 = vrot.slane %v2869_v26, 4  ;;  %v5950_v37 = vrot.slane %v5416_v12, %v5420_v14 }
  0x68   : > { %v2758_v9 = vadd.f32 %v2719_v30, %v2666_v53  ;;  %v2902_v33 = vrot.slane %v2870_v50, 4  ;;  %v2811_v19 = vsel %vm2440_vm3, %v2809_v11, %v2810_v39  ;;  %v5963_v26 = vrot.slane %v5379_v3, %v5422_v15 }
  0x69   : > { %9630 = vst [vmem:[#allocation63_spill] sm:$0xff] %v5950_v37  ;;  %v2757_v48 = vadd.f32 %v2717_v18, %v2665_v21  ;;  %v2961_v55 = vmul.f32 %v5950_v37, %v5560_v54  ;;  %v2962_v0 = vmul.f32 %v5950_v37, %v5943_v34  ;;  %v3053_v38 = vmul.f32 %v5954_v27, %v5455_v31 }
  0x6a   : > { %9632 = vst [vmem:[#allocation65_spill] sm:$0xff] %v5963_v26  ;;  %v2850_v21 = vadd.f32 %v2811_v19, %v2758_v9  ;;  %v2903_v53 = vsel %vm2440_vm3, %v2901_v1, %v2902_v33  ;;  %v3054_v18 = vmul.f32 %v5954_v27, %v5857_v10  ;;  %v3146_v42 = vmul.f32 %v5963_v26, %v5477_v35 }
  0x6b   : > { %v2849_v14 = vadd.f32 %v2809_v11, %v2757_v48  ;;  %v2993_v49 = vrot.slane %v2961_v55, 4  ;;  %v2994_v25 = vrot.slane %v2962_v0, 4  ;;  %v3086_v39 = vrot.slane %v3053_v38, 5 }
  0x6c   : > { %v2942_v30 = vadd.f32 %v2903_v53, %v2850_v21  ;;  %v3147_v11 = vmul.f32 %v5963_v26, %v5877_v4  ;;  %v3087_v33 = vrot.slane %v3054_v18, 5  ;;  %v3178_v48 = vrot.slane %v3146_v42, 5 }
  0x6d   : > { %v2941_v50 = vadd.f32 %v2901_v1, %v2849_v14  ;;  %v2995_v9 = vsel %vm2440_vm3, %v2993_v49, %v2994_v25  ;;  %v5977_v19 = vrot.slane %v5384_v5, %v5422_v15  ;;  %v5981_v37 = vrot.slane %v5389_v6, %v5422_v15 }
  0x6e   : > { %v3034_v0 = vadd.f32 %v2995_v9, %v2942_v30  ;;  %v3179_v27 = vrot.slane %v3147_v11, 5  ;;  %v3088_v1 = vsel %vm3085_vm4, %v3086_v39, %v3087_v33  ;;  %v5990_v53 = vrot.slane %v5394_v7, %v5422_v15 }
  0x6f   : > { %9633 = vst [vmem:[#allocation66_spill] sm:$0xff] %v5977_v19  ;;  %v3033_v55 = vadd.f32 %v2993_v49, %v2941_v50  ;;  %9634 = vst [vmem:[#allocation67_spill] sm:$0xff] %v5981_v37  ;;  %v3238_v14 = vmul.f32 %v5977_v19, %v5498_v41  ;;  %v3239_v21 = vmul.f32 %v5977_v19, %v5895_v20 }
  0x70   : > { %9635 = vst [vmem:[#allocation68_spill] sm:$0xff] %v5990_v53  ;;  %v3127_v49 = vadd.f32 %v3088_v1, %v3034_v0  ;;  %v3180_v25 = vsel %vm3085_vm4, %v3178_v48, %v3179_v27  ;;  %v3330_v18 = vmul.f32 %v5981_v37, %v5548_v43  ;;  %v3331_v30 = vmul.f32 %v5981_v37, %v5906_v40 }
  0x71   : > { %v3126_v38 = vadd.f32 %v3086_v39, %v3033_v55  ;;  %v3270_v42 = vrot.slane %v3238_v14, 5  ;;  %v3271_v50 = vrot.slane %v3239_v21, 5  ;;  %v3422_v11 = vmul.f32 %v5990_v53, %v5550_v44 }
  0x72   : > { %v3219_v33 = vadd.f32 %v3180_v25, %v3127_v49  ;;  %v3362_v19 = vrot.slane %v3330_v18, 5  ;;  %v3423_v39 = vmul.f32 %v5990_v53, %v5919_v56  ;;  %v3363_v55 = vrot.slane %v3331_v30, 5 }
  0x73   : > { %v3218_v9 = vadd.f32 %v3178_v48, %v3126_v38  ;;  %v3272_v27 = vsel %vm3085_vm4, %v3270_v42, %v3271_v50  ;;  %v3454_v0 = vrot.slane %v3422_v11, 5  ;;  %v6004_v1 = vrot.slane %v5400_v8, %v5422_v15 }
  0x74   : > { %v3311_v21 = vadd.f32 %v3272_v27, %v3219_v33  ;;  %v3455_v37 = vrot.slane %v3423_v39, 5  ;;  %v6008_v26 = vrot.slane %v5416_v12, %v5422_v15  ;;  %v3364_v48 = vsel %vm3085_vm4, %v3362_v19, %v3363_v55 }
  0x75   : > { %9636 = vst [vmem:[#allocation69_spill] sm:$0xff] %v6004_v1  ;;  %v3310_v14 = vadd.f32 %v3270_v42, %v3218_v9  ;;  %v3514_v38 = vmul.f32 %v6004_v1, %v5552_v45  ;;  %v3515_v49 = vmul.f32 %v6004_v1, %v5925_v17  ;;  %v6017_v25 = vrot.slane %v5374_v2, %v5424_v16 }
  0x76   : > { %9637 = vst [vmem:[#allocation70_spill] sm:$0xff] %v6008_v26  ;;  %v3403_v42 = vadd.f32 %v3364_v48, %v3311_v21  ;;  %v3456_v50 = vsel %vm3085_vm4, %v3454_v0, %v3455_v37  ;;  %v3606_v15 = vmul.f32 %v6008_v26, %v5560_v54  ;;  %v3607_v9 = vmul.f32 %v6008_v26, %v5943_v34 }
  0x77   : > { %9638 = vst [vmem:[#allocation71_spill] sm:$0xff] %v6017_v25  ;;  %v3402_v18 = vadd.f32 %v3362_v19, %v3310_v14  ;;  %v3546_v30 = vrot.slane %v3514_v38, 5  ;;  %v3547_v11 = vrot.slane %v3515_v49, 5  ;;  %v3698_v33 = vmul.f32 %v6017_v25, %v5455_v31 }
  0x78   : > { %v3495_v27 = vadd.f32 %v3456_v50, %v3403_v42  ;;  %v3638_v55 = vrot.slane %v3606_v15, 5  ;;  %v3699_v2 = vmul.f32 %v6017_v25, %v5857_v10  ;;  %v3639_v37 = vrot.slane %v3607_v9, 5 }
  0x79   : > { %v3494_v39 = vadd.f32 %v3454_v0, %v3402_v18  ;;  %v3548_v19 = vsel %vm3085_vm4, %v3546_v30, %v3547_v11  ;;  %v3731_v14 = vrot.slane %v3698_v33, 6  ;;  %v6031_v21 = vrot.slane %v5379_v3, %v5424_v16 }
  0x7a   : > { %v3587_v38 = vadd.f32 %v3548_v19, %v3495_v27  ;;  %v3732_v49 = vrot.slane %v3699_v2, 6  ;;  %v6035_v31 = vrot.slane %v5384_v5, %v5424_v16  ;;  %v3640_v0 = vsel %vm3085_vm4, %v3638_v55, %v3639_v37 }
  0x7b   : > { %9639 = vst [vmem:[#allocation72_spill] sm:$0xff] %v6031_v21  ;;  %v3586_v48 = vadd.f32 %v3546_v30, %v3494_v39  ;;  %v3791_v10 = vmul.f32 %v6031_v21, %v5477_v35  ;;  %v3792_v18 = vmul.f32 %v6031_v21, %v5877_v4  ;;  %v6044_v42 = vrot.slane %v5389_v6, %v5424_v16 }
  0x7c   : > { %9640 = vst [vmem:[#allocation73_spill] sm:$0xff] %v6035_v31  ;;  %v3679_v50 = vadd.f32 %v3640_v0, %v3587_v38  ;;  %v3733_v15 = vsel %vm3730_vm5, %v3731_v14, %v3732_v49  ;;  %v3883_v5 = vmul.f32 %v6035_v31, %v5498_v41  ;;  %v3884_v9 = vmul.f32 %v6035_v31, %v5895_v20 }
  0x7d   : > { %9641 = vst [vmem:[#allocation74_spill] sm:$0xff] %v6044_v42  ;;  %v3678_v3 = vadd.f32 %v3638_v55, %v3586_v48  ;;  %v3823_v30 = vrot.slane %v3791_v10, 6  ;;  %v3824_v11 = vrot.slane %v3792_v18, 6  ;;  %v3975_v35 = vmul.f32 %v6044_v42, %v5548_v43 }
  0x7e   : > { %v3772_v39 = vadd.f32 %v3733_v15, %v3679_v50  ;;  %v3915_v27 = vrot.slane %v3883_v5, 6  ;;  %v3976_v6 = vmul.f32 %v6044_v42, %v5906_v40  ;;  %v3916_v2 = vrot.slane %v3884_v9, 6 }
  0x7f   : > { %v3771_v33 = vadd.f32 %v3731_v14, %v3678_v3  ;;  %v3825_v55 = vsel %vm3730_vm5, %v3823_v30, %v3824_v11  ;;  %v4007_v19 = vrot.slane %v3975_v35, 6  ;;  %v6058_v37 = vrot.slane %v5394_v7, %v5424_v16 }
  0x80   : > { %v3864_v38 = vadd.f32 %v3825_v55, %v3772_v39  ;;  %v4008_v49 = vrot.slane %v3976_v6, 6  ;;  %v6062_v0 = vrot.slane %v5400_v8, %v5424_v16  ;;  %v3917_v14 = vsel %vm3730_vm5, %v3915_v27, %v3916_v2 }
  0x81   : > { %9642 = vst [vmem:[#allocation75_spill] sm:$0xff] %v6058_v37  ;;  %v3863_v48 = vadd.f32 %v3823_v30, %v3771_v33  ;;  %v4067_v10 = vmul.f32 %v6058_v37, %v5550_v44  ;;  %v4068_v18 = vmul.f32 %v6058_v37, %v5919_v56  ;;  %v6071_v3 = vrot.slane %v5416_v12, %v5424_v16 }
  0x82   : > { %9643 = vst [vmem:[#allocation76_spill] sm:$0xff] %v6062_v0  ;;  %v3956_v50 = vadd.f32 %v3917_v14, %v3864_v38  ;;  %v4009_v15 = vsel %vm3730_vm5, %v4007_v19, %v4008_v49  ;;  %v4159_v8 = vmul.f32 %v6062_v0, %v5552_v45  ;;  %v4160_v11 = vmul.f32 %v6062_v0, %v5925_v17 }
  0x83   : > { %9644 = vst [vmem:[#allocation77_spill] sm:$0xff] %v6071_v3  ;;  %v3955_v7 = vadd.f32 %v3915_v27, %v3863_v48  ;;  %v4099_v5 = vrot.slane %v4067_v10, 6  ;;  %v4100_v30 = vrot.slane %v4068_v18, 6  ;;  %v4251_v9 = vmul.f32 %v6071_v3, %v5560_v54 }
  0x84   : > { %v4048_v33 = vadd.f32 %v4009_v15, %v3956_v50  ;;  %v4191_v39 = vrot.slane %v4159_v8, 6  ;;  %v4252_v12 = vmul.f32 %v6071_v3, %v5943_v34  ;;  %v4192_v27 = vrot.slane %v4160_v11, 6 }
  0x85   : > { %v4047_v35 = vadd.f32 %v4007_v19, %v3955_v7  ;;  %v4101_v16 = vsel %vm3730_vm5, %v4099_v5, %v4100_v30  ;;  %v4283_v6 = vrot.slane %v4251_v9, 6  ;;  %v577_v55 = vmul.f32 %v5442_v22, %v5548_v43 }
  0x86   : > { %v4140_v48 = vadd.f32 %v4101_v16, %v4048_v33  ;;  %v4284_v38 = vrot.slane %v4252_v12, 6  ;;  %v941_v49 = vmul.f32 %v5601_v28, %v5508_v46  ;;  %v4193_v19 = vsel %vm3730_vm5, %v4191_v39, %v4192_v27 }
  0x87   : > { %v4139_v2 = vadd.f32 %v4099_v5, %v4047_v35  ;;  %v593_v14 = vadd.f32 %v577_v55, %v5530_v59  ;;  %v1033_v10 = vmul.f32 %v5628_v32, %v5510_v47  ;;  %v1125_v18 = vmul.f32 %v5633_v24, %v5522_v52 }
  0x88   : > { %v4232_v50 = vadd.f32 %v4193_v19, %v4140_v48  ;;  %v4285_v15 = vsel %vm3730_vm5, %v4283_v6, %v4284_v38  ;;  %v974_v8 = vrot.slane %v941_v49, 1  ;;  %v1217_v9 = vmul.f32 %v5661_v60, %v5528_v57  ;;  %v6113_v49 = vld [vmem:[%s9129_s2] ss:$0 sm:$0xff] }
  0x89   : > { %v4231_v7 = vadd.f32 %v4191_v39, %v4139_v2  ;;  %v629_v5 = vadd.f32 %v5568_v58, %v593_v14  ;;  %v1066_v30 = vrot.slane %v1033_v10, 1  ;;  %v1158_v11 = vrot.slane %v1125_v18, 1  ;;  %9648 = vst [vmem:[#allocation78_spill] sm:$0xff] %v6113_v49  ;;  %v9650_v18 = vld [vmem:[#allocation30_spill] sm:$0xff] }
  0x8a   : > { %v4324_v59 = vadd.f32 %v4285_v15, %v4232_v50  ;;  %v9645_v33 = vrot.slane %v5624_v61, 1  ;;  %v1309_v39 = vmul.f32 %v5665_v36, %v5536_v62  ;;  %v9646_v58 = vrot.slane %v5648_v23, 1  ;;  %v9652_v50 = vld [vmem:[#allocation29_spill] sm:$0xff] }
  0x8b   : > { %v4323_v35 = vadd.f32 %v4283_v6, %v4231_v7  ;;  %v665_v16 = vadd.f32 %v5574_v29, %v629_v5  ;;  %v9647_v2 = vrot.slane %v5656_v63, 1  ;;  %v1250_v19 = vrot.slane %v1217_v9, 1  ;;  %v9649_v29 = vld [vmem:[#allocation17_spill] sm:$0xff]  ;;  %v9654_v5 = vld [vmem:[#allocation14_spill] sm:$0xff] }
  0x8c   : > { %v976_v12 = vsel %vm786_vm1, %v974_v8, %v9645_v33  ;;  %v1068_v55 = vsel %vm786_vm1, %v1066_v30, %v9646_v58  ;;  %v4356_v38 = vrot.slane %v4324_v59, 5  ;;  %v1342_v14 = vrot.slane %v1309_v39, 1  ;;  %v9655_v30 = vld [vmem:[#allocation27_spill] sm:$0xff]  ;;  %v9656_v59 = vld [vmem:[#allocation24_spill] sm:$0xff]  ;;  %v9658_v9 = vld [vmem:[#allocation25_spill] sm:$0xff] }
  0x8d   : > { %v1013_v27 = vadd.f32 %v976_v12, %v5639_v51  ;;  %v1160_v6 = vsel %vm786_vm1, %v1158_v11, %v9647_v2  ;;  %v4355_v48 = vrot.slane %v4323_v35, 5  ;;  %v701_v10 = vadd.f32 %v9649_v29, %v665_v16  ;;  %v9662_v2 = vld [vmem:[#allocation18_spill] sm:$0xff] }
  0x8e   : > { %v9651_v7 = vrot.slane %v9650_v18, 2  ;;  %v9653_v15 = vrot.slane %v9652_v50, 2  ;;  %v1494_v11 = vmul.f32 %v9655_v30, %v9654_v5  ;;  %v9657_v33 = vrot.slane %v9656_v59, 1  ;;  %v6289_v30 = vld [vmem:[#allocation2 + $0x68] sm:$0xff] }
  0x8f   : > { %v1105_v51 = vadd.f32 %v1068_v55, %v1013_v27  ;;  %v4357_v35 = vsel %vm3085_vm4, %v4355_v48, %v4356_v38  ;;  %v9659_v39 = vrot.slane %v9658_v9, 1  ;;  %v9660_v27 = vld [vmem:[#allocation28_spill] sm:$0xff]  ;;  %v737_v29 = vadd.f32 %v9662_v2, %v701_v10  ;;  %v9663_v48 = vld [vmem:[#allocation33_spill] sm:$0xff]  ;;  %v9668_v10 = vld [vmem:[#allocation31_spill] sm:$0xff] }
  0x90   : > { %v1437_v8 = vsel %vm1431_vm2, %v9653_v15, %v9651_v7  ;;  %v1252_v12 = vsel %vm786_vm1, %v1250_v19, %v9657_v33  ;;  %v1586_v58 = vmul.f32 %v9660_v27, %v5508_v46  ;;  %v6133_v55 = vadd.f32 %v6113_v49, %v4357_v35  ;;  %v9664_v19 = vld [vmem:[#allocation34_spill] sm:$0xff]  ;;  %v9665_v33 = vld [vmem:[#allocation35_spill] sm:$0xff] }
  0x91   : > { %v1344_v16 = vsel %vm786_vm1, %v1342_v14, %v9659_v39  ;;  %v1197_v7 = vadd.f32 %v1160_v6, %v1105_v51  ;;  %v1527_v50 = vrot.slane %v1494_v11, 2  ;;  %v1678_v38 = vmul.f32 %v9663_v48, %v5510_v47  ;;  %v9666_v39 = vld [vmem:[#allocation19_spill] sm:$0xff]  ;;  %v9670_v11 = vld [vmem:[#allocation32_spill] sm:$0xff] }
  0x92   : > { %9661 = vst [vmem:[#allocation17_spill] sm:$0xff] %v6133_v55  ;;  %v1619_v15 = vrot.slane %v1586_v58, 2  ;;  %v1770_v5 = vmul.f32 %v9664_v19, %v5522_v52  ;;  %v1862_v14 = vmul.f32 %v9665_v33, %v5528_v57  ;;  %v4402_v46 = vsel %vm396_vm0, %v6133_v55, 0.0  ;;  %v9672_v57 = vld [vmem:[#allocation21_spill] sm:$0xff] }
  0x93   : > { %v9667_v35 = vrot.slane %v9666_v39, 1  ;;  %v1289_v27 = vadd.f32 %v1252_v12, %v1197_v7  ;;  %v9669_v6 = vrot.slane %v9668_v10, 2  ;;  %4403 = vadd.xlane.f32.xlu0 %v4402_v46  ;;  %v9671_v47 = vrot.slane %v9670_v11, 2  ;;  %v9674_v39 = vld [vmem:[#allocation36_spill] sm:$0xff]  ;;  %v9675_v12 = vld [vmem:[#allocation55_spill] sm:$0xff] }
  0x94   : > { %v1711_v52 = vrot.slane %v1678_v38, 2  ;;  %v1803_v2 = vrot.slane %v1770_v5, 2  ;;  %v1895_v19 = vrot.slane %v1862_v14, 2  ;;  %v9673_v33 = vrot.slane %v9672_v57, 1  ;;  %v9680_v5 = vld [vmem:[#allocation39_spill] sm:$0xff] }
  0x95   : > { %v830_v49 = vadd.f32 %v9667_v35, %v737_v29  ;;  %v1529_v51 = vsel %vm1431_vm2, %v1527_v50, %v9669_v6  ;;  %v1621_v58 = vsel %vm1431_vm2, %v1619_v15, %v9671_v47  ;;  %v1381_v55 = vadd.f32 %v1344_v16, %v1289_v27  ;;  %v9676_v50 = vld [vmem:[#allocation37_spill] sm:$0xff]  ;;  %v9678_v6 = vld [vmem:[#allocation38_spill] sm:$0xff] }
  0x96   : > { %v1954_v29 = vmul.f32 %v9674_v39, %v5536_v62  ;;  %v6158_v7 = vmul.f32 %v9675_v12, %v5498_v41  ;;  %v9677_v46 = vrot.slane %v9676_v50, 2  ;;  %v9679_v15 = vrot.slane %v9678_v6, 2 }
  0x97   : > { %v922_v48 = vadd.f32 %v9673_v33, %v830_v49  ;;  %v9681_v14 = vrot.slane %v9680_v5, 2  ;;  %v2504_v16 = vmul.f32 %v9675_v12, %v5895_v20  ;;  %v9682_v62 = vrot.slane %v5624_v61, 1 }
  0x98   : > { %v1713_v35 = vsel %vm1431_vm2, %v1711_v52, %v9677_v46  ;;  %v1805_v38 = vsel %vm1431_vm2, %v1803_v2, %v9679_v15  ;;  %v1474_v41 = vadd.f32 %v1437_v8, %v1381_v55  ;;  %v1987_v33 = vrot.slane %v1954_v29, 2  ;;  %v9683_v52 = vld [vmem:[#allocation56_spill] sm:$0xff] }
  0x99   : > { %v1897_v49 = vsel %vm1431_vm2, %v1895_v19, %v9681_v14  ;;  %v1014_v27 = vadd.f32 %v9682_v62, %v922_v48  ;;  %v9260_v47 = vrot.slane %v6158_v7, 4  ;;  %v2537_v57 = vrot.slane %v2504_v16, 4  ;;  %v9684_v19 = vld [vmem:[#allocation60_spill] sm:$0xff] }
  0x9a   : > { %v6176_v46 = vmul.f32 %v9683_v52, %v5548_v43  ;;  %v2596_v2 = vmul.f32 %v9683_v52, %v5906_v40  ;;  %v6182_v15 = vmul.f32 %v9684_v19, %v5550_v44  ;;  %v9685_v14 = vrot.slane %v5648_v23, 1  ;;  %v9686_v8 = vld [vmem:[#allocation40_spill] sm:$0xff] }
  0x9b   : > { %v1566_v48 = vadd.f32 %v1529_v51, %v1474_v41  ;;  %v9687_v55 = vrot.slane %v9686_v8, 2  ;;  %v2688_v16 = vmul.f32 %v9684_v19, %v5919_v56  ;;  %v6194_v43 = vsel %vm2440_vm3, %v9260_v47, %v2537_v57  ;;  %v9692_v47 = vld [vmem:[#allocation16_spill] sm:$0xff] }
  0x9c   : > { %v1106_v61 = vadd.f32 %v9685_v14, %v1014_v27  ;;  %v9259_v62 = vrot.slane %v6176_v46, 4  ;;  %v2629_v44 = vrot.slane %v2596_v2, 4  ;;  %v9264_v52 = vrot.slane %v6182_v15, 4 }
  0x9d   : > { %v1989_v29 = vsel %vm1431_vm2, %v1987_v33, %v9687_v55  ;;  %v9688_v23 = vrot.slane %v5656_v63, 1  ;;  %v1658_v27 = vadd.f32 %v1621_v58, %v1566_v48  ;;  %v2721_v41 = vrot.slane %v2688_v16, 4  ;;  %v9689_v33 = vld [vmem:[#allocation61_spill] sm:$0xff] }
  0x9e   : > { %v6202_v14 = vmul.f32 %v9689_v33, %v5552_v45  ;;  %v6207_v55 = vsel %vm2440_vm3, %v9259_v62, %v2629_v44  ;;  %v2780_v57 = vmul.f32 %v9689_v33, %v5925_v17  ;;  %v6213_v2 = vmul.f32 %v5934_v13, %v5560_v54  ;;  %v6225_v44 = vld [vmem:[#allocation2 + $0xb8] sm:$0xff]  ;;  %v9693_v33 = vld [vmem:[#allocation63_spill] sm:$0xff] }
  0x9f   : > { %v1198_v51 = vadd.f32 %v9688_v23, %v1106_v61  ;;  %v2872_v63 = vmul.f32 %v5934_v13, %v5943_v34  ;;  %v9690_v58 = vrot.slane %v9656_v59, 1  ;;  %v1750_v45 = vadd.f32 %v1713_v35, %v1658_v27  ;;  %9691 = vst [vmem:[#allocation30_spill] sm:$0xff] %v6225_v44 }
  0xa0   : > { %v6222_v48 = vsel %vm2440_vm3, %v9264_v52, %v2721_v41  ;;  %v9267_v16 = vrot.slane %v6202_v14, 4  ;;  %v2813_v23 = vrot.slane %v2780_v57, 4  ;;  %v9269_v54 = vrot.slane %v6213_v2, 4  ;;  %v5176_v41 = vld [vmem:[#allocation2 + $0x20] sm:$0xff] }
  0xa1   : > { %v1290_v61 = vadd.f32 %v9690_v58, %v1198_v51  ;;  %v2905_v62 = vrot.slane %v2872_v63, 4  ;;  %v6230_v13 = vmul.f32 %v9693_v33, %v9692_v47  ;;  %v9694_v59 = vrot.slane %v9658_v9, 1  ;;  %v9695_v58 = vld [vmem:[#allocation64_spill] sm:$0xff]  ;;  %v9699_v9 = vld [vmem:[#allocation66_spill] sm:$0xff] }
  0xa2   : > { %v1842_v51 = vadd.f32 %v1805_v38, %v1750_v45  ;;  %v2964_v27 = vmul.f32 %v9693_v33, %v6225_v44  ;;  %v6237_v52 = vmul.f32 %v5176_v41, %v9695_v58  ;;  %v6242_v57 = vsel %vm2440_vm3, %v9267_v16, %v2813_v23  ;;  %v6255_v23 = vld [vmem:[#allocation2 + $0x38] sm:$0xff]  ;;  %v9698_v16 = vld [vmem:[#allocation65_spill] sm:$0xff] }
  0xa3   : > { %v1382_v35 = vadd.f32 %v9694_v59, %v1290_v61  ;;  %v6247_v47 = vsel %vm2440_vm3, %v9269_v54, %v2905_v62  ;;  %v3056_v38 = vmul.f32 %v9695_v58, %v5877_v4  ;;  %v9697_v63 = vrot.slane %v9650_v18, 2  ;;  %v6263_v54 = vld [vmem:[#allocation2 + $0x50] sm:$0xff] }
  0xa4   : > { %9696 = vst [vmem:[#allocation29_spill] sm:$0xff] %v6247_v47  ;;  %v1934_v45 = vadd.f32 %v1897_v49, %v1842_v51  ;;  %v2997_v59 = vrot.slane %v2964_v27, 4  ;;  %v9275_v33 = vrot.slane %v6237_v52, 5  ;;  %v6259_v12 = vmul.f32 %v6255_v23, %v9698_v16 }
  0xa5   : > { %v1475_v61 = vadd.f32 %v9697_v63, %v1382_v35  ;;  %v3090_v19 = vrot.slane %v3056_v38, 5  ;;  %v3149_v62 = vmul.f32 %v9698_v16, %v5895_v20  ;;  %v6267_v18 = vmul.f32 %v6263_v54, %v9699_v9 }
  0xa6   : > { %v9700_v49 = vrot.slane %v9668_v10, 2  ;;  %v2026_v51 = vadd.f32 %v1989_v29, %v1934_v45  ;;  %v9701_v27 = vrot.slane %v6230_v13, 4  ;;  %v3241_v63 = vmul.f32 %v9699_v9, %v5906_v40  ;;  %v9705_v45 = vld [vmem:[#allocation43_spill] sm:$0xff] }
  0xa7   : > { %v6281_v16 = vsel %vm3085_vm4, %v9275_v33, %v3090_v19  ;;  %v9276_v58 = vrot.slane %v6259_v12, 5  ;;  %v3182_v39 = vrot.slane %v3149_v62, 5  ;;  %v9704_v29 = vrot.slane %v9670_v11, 2  ;;  %v9707_v9 = vld [vmem:[#allocation67_spill] sm:$0xff]  ;;  %v6302_v11 = vld [vmem:[#allocation2 + $0x80] sm:$0xff] }
  0xa8   : > { %v1567_v35 = vadd.f32 %v9700_v49, %v1475_v61  ;;  %v6274_v38 = vsel %vm2440_vm3, %v9701_v27, %v2997_v59  ;;  %9703 = vst [vmem:[#allocation24_spill] sm:$0xff] %v6281_v16  ;;  %v9706_v49 = vrot.slane %v9705_v45, 3  ;;  %v3274_v27 = vrot.slane %v3241_v63, 5 }
  0xa9   : > { %9702 = vst [vmem:[#allocation14_spill] sm:$0xff] %v6274_v38  ;;  %v6293_v36 = vmul.f32 %v6289_v30, %v9707_v9  ;;  %v6298_v19 = vsel %vm3085_vm4, %v9276_v58, %v3182_v39  ;;  %v3333_v62 = vmul.f32 %v9707_v9, %v5919_v56  ;;  %v9710_v63 = vrot.slane %v9676_v50, 2  ;;  %v6321_v38 = vld [vmem:[#allocation2 + $0x98] sm:$0xff] }
  0xaa   : > { %v1659_v61 = vadd.f32 %v9704_v29, %v1567_v35  ;;  %v2078_v59 = vadd.f32 %v9706_v49, %v2026_v51  ;;  %9709 = vst [vmem:[#allocation18_spill] sm:$0xff] %v6298_v19  ;;  %v6306_v35 = vmul.f32 %v6302_v11, %v5990_v53  ;;  %v3425_v51 = vmul.f32 %v5990_v53, %v5925_v17  ;;  %v9711_v49 = vld [vmem:[#allocation45_spill] sm:$0xff] }
  0xab   : > { %9708 = vst [vmem:[#allocation25_spill] sm:$0xff] %v6293_v36  ;;  %v9712_v33 = vrot.slane %v9711_v49, 3  ;;  %v9713_v39 = vrot.slane %v6267_v18, 5  ;;  %v9285_v9 = vrot.slane %v6293_v36, 5  ;;  %v3366_v19 = vrot.slane %v3333_v62, 5 }
  0xac   : > { %v1751_v29 = vadd.f32 %v9710_v63, %v1659_v61  ;;  %v9286_v16 = vrot.slane %v6306_v35, 5  ;;  %v3458_v60 = vrot.slane %v3425_v51, 5  ;;  %v6325_v50 = vmul.f32 %v6321_v38, %v6004_v1 }
  0xad   : > { %v2130_v10 = vadd.f32 %v9712_v33, %v2078_v59  ;;  %v6317_v58 = vsel %vm3085_vm4, %v9713_v39, %v3274_v27  ;;  %v9715_v61 = vrot.slane %v9678_v6, 2  ;;  %v9716_v59 = vld [vmem:[#allocation46_spill] sm:$0xff]  ;;  %v3517_v27 = vmul.f32 %v6004_v1, %v5943_v34  ;;  %v6333_v39 = vld [vmem:[#allocation2 + $0xb0] sm:$0xff]  ;;  %v9720_v1 = vld [vmem:[#allocation49_spill] sm:$0xff] }
  0xae   : > { %9714 = vst [vmem:[#allocation19_spill] sm:$0xff] %v6317_v58  ;;  %v9717_v63 = vrot.slane %v9716_v59, 3  ;;  %v6337_v62 = vmul.f32 %v6333_v39, %v6008_v26  ;;  %v6342_v51 = vsel %vm3085_vm4, %v9285_v9, %v3366_v19  ;;  %v6347_v6 = vsel %vm3085_vm4, %v9286_v16, %v3458_v60 }
  0xaf   : > { %v1843_v33 = vadd.f32 %v9715_v61, %v1751_v29  ;;  %9718 = vst [vmem:[#allocation31_spill] sm:$0xff] %v6342_v51  ;;  %v3609_v29 = vmul.f32 %v6008_v26, %v6225_v44  ;;  %v9719_v61 = vrot.slane %v9680_v5, 2  ;;  %v9721_v58 = vrot.slane %v9720_v1, 3 }
  0xb0   : > { %v2182_v53 = vadd.f32 %v9717_v63, %v2130_v10  ;;  %v3550_v36 = vrot.slane %v3517_v27, 5  ;;  %v9289_v19 = vrot.slane %v6337_v62, 5  ;;  %v6358_v51 = vmul.f32 %v5176_v41, %v6017_v25 }
  0xb1   : > { %v1935_v63 = vadd.f32 %v9719_v61, %v1843_v33  ;;  %v3642_v9 = vrot.slane %v3609_v29, 5  ;;  %v3701_v60 = vmul.f32 %v6017_v25, %v5877_v4  ;;  %v6364_v16 = vmul.f32 %v6255_v23, %v6031_v21  ;;  %v9723_v61 = vld [vmem:[#allocation51_spill] sm:$0xff] }
  0xb2   : > { %v2234_v47 = vadd.f32 %v9721_v58, %v2182_v53  ;;  %v9722_v5 = vrot.slane %v9686_v8, 2  ;;  %v9724_v10 = vrot.slane %v9723_v61, 3  ;;  %v9725_v58 = vrot.slane %v6325_v50, 5 }
  0xb3   : > { %v3794_v41 = vmul.f32 %v6031_v21, %v5895_v20  ;;  %v6380_v4 = vsel %vm3085_vm4, %v9289_v19, %v3642_v9  ;;  %v9290_v29 = vrot.slane %v6358_v51, 6  ;;  %v3735_v8 = vrot.slane %v3701_v60, 6 }
  0xb4   : > { %v2027_v33 = vadd.f32 %v9722_v5, %v1935_v63  ;;  %v2286_v53 = vadd.f32 %v9724_v10, %v2234_v47  ;;  %v6373_v27 = vsel %vm3085_vm4, %v9725_v58, %v3550_v36  ;;  %v9295_v63 = vrot.slane %v6364_v16, 6  ;;  %v9727_v5 = vld [vmem:[#allocation52_spill] sm:$0xff] }
  0xb5   : > { %v9726_v47 = vrot.slane %v9705_v45, 3  ;;  %v9728_v25 = vrot.slane %v9727_v5, 3  ;;  %v3827_v58 = vrot.slane %v3794_v41, 6  ;;  %v6390_v20 = vmul.f32 %v6263_v54, %v6035_v31  ;;  %v9730_v41 = vld [vmem:[#allocation57_spill] sm:$0xff] }
  0xb6   : > { %v6395_v9 = vsel %vm3730_vm5, %v9290_v29, %v3735_v8  ;;  %v3886_v60 = vmul.f32 %v6035_v31, %v5906_v40  ;;  %v6401_v45 = vmul.f32 %v6289_v30, %v6044_v42 }
  0xb7   : > { %v2079_v10 = vadd.f32 %v9726_v47, %v2027_v33  ;;  %v2338_v36 = vadd.f32 %v9728_v25, %v2286_v53  ;;  %v3978_v25 = vmul.f32 %v6044_v42, %v5919_v56  ;;  %v9729_v33 = vrot.slane %v9711_v49, 3  ;;  %v6503_v42 = vld [vmem:[#allocation2 + $0xc0] sm:$0xff] }
  0xb8   : > { %v9731_v47 = vrot.slane %v9730_v41, 3  ;;  %v6412_v8 = vsel %vm3730_vm5, %v9295_v63, %v3827_v58  ;;  %v9296_v40 = vrot.slane %v6390_v20, 6  ;;  %v3919_v29 = vrot.slane %v3886_v60, 6 }
  0xb9   : > { %v2131_v53 = vadd.f32 %v9729_v33, %v2079_v10  ;;  %v9299_v31 = vrot.slane %v6401_v45, 6  ;;  %v4011_v21 = vrot.slane %v3978_v25, 6  ;;  %v6418_v56 = vmul.f32 %v6302_v11, %v6058_v37  ;;  %v9733_v33 = vld [vmem:[#allocation58_spill] sm:$0xff] }
  0xba   : > { %v2390_v19 = vadd.f32 %v9731_v47, %v2338_v36  ;;  %v9732_v49 = vrot.slane %v9716_v59, 3  ;;  %v9734_v36 = vrot.slane %v9733_v33, 4  ;;  %v4070_v58 = vmul.f32 %v6058_v37, %v5925_v17 }
  0xbb   : > { %v6428_v63 = vmul.f32 %v6321_v38, %v6062_v0  ;;  %v6433_v60 = vsel %vm3730_vm5, %v9296_v40, %v3919_v29  ;;  %v6438_v59 = vsel %vm3730_vm5, %v9299_v31, %v4011_v21  ;;  %v9300_v25 = vrot.slane %v6418_v56, 6  ;;  %v9739_v31 = vld [vmem:[#allocation6_spill] sm:$0xff] }
  0xbc   : > { %v2183_v10 = vadd.f32 %v9732_v49, %v2131_v53  ;;  %v2483_v47 = vadd.f32 %v9734_v36, %v2390_v19  ;;  %9735 = vst [vmem:[#allocation32_spill] sm:$0xff] %v6433_v60  ;;  %9736 = vst [vmem:[#allocation21_spill] sm:$0xff] %v6438_v59  ;;  %v4162_v19 = vmul.f32 %v6062_v0, %v5943_v34  ;;  %v9737_v17 = vrot.slane %v9720_v1, 3  ;;  %v6482_v0 = vld [vmem:[#allocation2 + $0x60] sm:$0xff] }
  0xbd   : > { %v9738_v49 = vrot.slane %v6158_v7, 4  ;;  %v4103_v36 = vrot.slane %v4070_v58, 6  ;;  %v9305_v29 = vrot.slane %v6428_v63, 6  ;;  %v6450_v37 = vmul.f32 %v6333_v39, %v6071_v3 }
  0xbe   : > { %v2235_v53 = vadd.f32 %v9737_v17, %v2183_v10  ;;  %v4195_v40 = vrot.slane %v4162_v19, 6  ;;  %v4254_v21 = vmul.f32 %v6071_v3, %v6225_v44  ;;  %v507_v34 = vmul.f32 %v6255_v23, %v9739_v31  ;;  %v6465_v19 = vld [vmem:[#allocation2 + $0x48] sm:$0xff]  ;;  %v9743_v17 = vld [vmem:[#allocation7_spill] sm:$0xff] }
  0xbf   : > { %v2575_v33 = vadd.f32 %v9738_v49, %v2483_v47  ;;  %v9740_v1 = vrot.slane %v9723_v61, 3  ;;  %v9741_v7 = vrot.slane %v6176_v46, 4  ;;  %v6463_v58 = vsel %vm3730_vm5, %v9300_v25, %v4103_v36  ;;  %v9747_v25 = vld [vmem:[#allocation15_spill] sm:$0xff] }
  0xc0   : > { %9742 = vst [vmem:[#allocation37_spill] sm:$0xff] %v6463_v58  ;;  %v542_v49 = vmul.f32 %v6465_v19, %v9743_v17  ;;  %v6472_v31 = vsel %vm3730_vm5, %v9305_v29, %v4195_v40  ;;  %v9309_v61 = vrot.slane %v6450_v37, 6  ;;  %v543_v46 = vmul.f32 %v6263_v54, %v9743_v17  ;;  %v9757_v58 = vld [vmem:[#allocation13_spill] sm:$0xff] }
  0xc1   : > { %v2287_v10 = vadd.f32 %v9740_v1, %v2235_v53  ;;  %v2667_v47 = vadd.f32 %v9741_v7, %v2575_v33  ;;  %9744 = vst [vmem:[#allocation38_spill] sm:$0xff] %v6472_v31  ;;  %v4287_v53 = vrot.slane %v4254_v21, 6  ;;  %v9745_v33 = vrot.slane %v9727_v5, 3  ;;  %v6526_v31 = vld [vmem:[#allocation2 + $0x30] sm:$0xff] }
  0xc2   : > { %v9746_v1 = vrot.slane %v6182_v15, 4  ;;  %v558_v3 = vadd.f32 %v542_v49, %v9747_v25  ;;  %v578_v40 = vmul.f32 %v6482_v0, %v5442_v22  ;;  %v559_v29 = vadd.f32 %v543_v46, %v507_v34  ;;  %v9749_v15 = vld [vmem:[#allocation9_spill] sm:$0xff]  ;;  %v6497_v25 = vld [vmem:[#allocation2 + $0xc8] sm:$0xff] }
  0xc3   : > { %v2339_v36 = vadd.f32 %v9745_v33, %v2287_v10  ;;  %v6489_v21 = vsel %vm3730_vm5, %v9309_v61, %v4287_v53  ;;  %v579_v5 = vmul.f32 %v6289_v30, %v5442_v22  ;;  %v6493_v10 = vld [vmem:[#allocation2 + $0x78] sm:$0xff]  ;;  %v9750_v49 = vrot.slane %v9730_v41, 3  ;;  %v6507_v61 = vld [vmem:[#allocation2 + $0x90] sm:$0xff]  ;;  %v9752_v22 = vld [vmem:[#allocation10_spill] sm:$0xff] }
  0xc4   : > { %v2759_v7 = vadd.f32 %v9746_v1, %v2667_v47  ;;  %9748 = vst [vmem:[#allocation39_spill] sm:$0xff] %v6489_v21  ;;  %v614_v47 = vmul.f32 %v6493_v10, %v9749_v15  ;;  %v9751_v1 = vrot.slane %v6202_v14, 4  ;;  %v594_v53 = vadd.f32 %v578_v40, %v558_v3  ;;  %v6513_v41 = vld [vmem:[#allocation2 + $0xa8] sm:$0xff] }
  0xc5   : > { %v2391_v33 = vadd.f32 %v9750_v49, %v2339_v36  ;;  %v615_v34 = vmul.f32 %v6302_v11, %v9749_v15  ;;  %v595_v46 = vadd.f32 %v579_v5, %v559_v29  ;;  %v650_v26 = vmul.f32 %v6507_v61, %v9752_v22  ;;  %v9753_v36 = vld [vmem:[#allocation11_spill] sm:$0xff]  ;;  %v9756_v15 = vld [vmem:[#allocation12_spill] sm:$0xff] }
  0xc6   : > { %v2851_v17 = vadd.f32 %v9751_v1, %v2759_v7  ;;  %v651_v44 = vmul.f32 %v6321_v38, %v9752_v22  ;;  %v686_v14 = vmul.f32 %v6513_v41, %v9753_v36  ;;  %v9754_v7 = vld [vmem:[#allocation59_spill] sm:$0xff]  ;;  %v9755_v3 = vrot.slane %v6213_v2, 4 }
  0xc7   : > { %v2484_v49 = vadd.f32 %v9754_v7, %v2391_v33  ;;  %v630_v1 = vadd.f32 %v614_v47, %v594_v53  ;;  %v687_v29 = vmul.f32 %v6333_v39, %v9753_v36  ;;  %v631_v5 = vadd.f32 %v615_v34, %v595_v46  ;;  %v9759_v7 = vld [vmem:[#allocation20_spill] sm:$0xff] }
  0xc8   : > { %v2943_v40 = vadd.f32 %v9755_v3, %v2851_v17  ;;  %v722_v21 = vmul.f32 %v9756_v15, %v6503_v42  ;;  %v723_v22 = vmul.f32 %v9756_v15, %v6497_v25  ;;  %v758_v59 = vmul.f32 %v6526_v31, %v9757_v58 }
  0xc9   : > { %v2576_v33 = vadd.f32 %v6194_v43, %v2484_v49  ;;  %v9758_v2 = vrot.slane %v6230_v13, 4  ;;  %v666_v47 = vadd.f32 %v650_v26, %v630_v1  ;;  %v759_v53 = vmul.f32 %v6255_v23, %v9757_v58 }
  0xca   : > { %v667_v34 = vadd.f32 %v651_v44, %v631_v5  ;;  %v793_v46 = vrot.slane %v758_v59, 1  ;;  %v851_v3 = vmul.f32 %v6465_v19, %v9759_v7  ;;  %v852_v15 = vmul.f32 %v6263_v54, %v9759_v7 }
  0xcb   : > { %v3035_v17 = vadd.f32 %v9758_v2, %v2943_v40  ;;  %v2668_v36 = vadd.f32 %v6207_v55, %v2576_v33  ;;  %v9760_v60 = vrot.slane %v6237_v52, 5  ;;  %v702_v49 = vadd.f32 %v686_v14, %v666_v47  ;;  %v9763_v47 = vld [vmem:[#allocation29_spill] sm:$0xff] }
  0xcc   : > { %v794_v13 = vrot.slane %v759_v53, 1  ;;  %v703_v40 = vadd.f32 %v687_v29, %v667_v34  ;;  %v885_v26 = vrot.slane %v851_v3, 1  ;;  %v886_v1 = vrot.slane %v852_v15, 1  ;;  %v9764_v34 = vld [vmem:[#allocation25_spill] sm:$0xff] }
  0xcd   : > { %v3128_v43 = vadd.f32 %v9760_v60, %v3035_v17  ;;  %v943_v44 = vmul.f32 %v6482_v0, %v5601_v28  ;;  %v2760_v59 = vadd.f32 %v6222_v48, %v2668_v36  ;;  %v9761_v5 = vrot.slane %v6259_v12, 5 }
  0xce   : > { %v738_v58 = vadd.f32 %v722_v21, %v702_v49  ;;  %v795_v7 = vsel %vm786_vm1, %v793_v46, %v794_v13  ;;  %v739_v55 = vadd.f32 %v723_v22, %v703_v40  ;;  %v887_v52 = vsel %vm786_vm1, %v885_v26, %v886_v1 }
  0xcf   : > { %v3220_v2 = vadd.f32 %v9761_v5, %v3128_v43  ;;  %v944_v60 = vmul.f32 %v6289_v30, %v5601_v28  ;;  %v977_v14 = vrot.slane %v943_v44, 1  ;;  %v2852_v15 = vadd.f32 %v6242_v57, %v2760_v59 }
  0xd0   : > { %v9762_v29 = vrot.slane %v6267_v18, 5  ;;  %v831_v17 = vadd.f32 %v795_v7, %v738_v58  ;;  %v1035_v12 = vmul.f32 %v6493_v10, %v5628_v32  ;;  %v832_v48 = vadd.f32 %v794_v13, %v739_v55  ;;  %v9766_v13 = vld [vmem:[#allocation14_spill] sm:$0xff] }
  0xd1   : > { %v978_v21 = vrot.slane %v944_v60, 1  ;;  %v1036_v22 = vmul.f32 %v6302_v11, %v5628_v32  ;;  %v1127_v36 = vmul.f32 %v6507_v61, %v5633_v24  ;;  %v2944_v53 = vadd.f32 %v9763_v47, %v2852_v15  ;;  %v9769_v15 = vld [vmem:[#allocation24_spill] sm:$0xff]  ;;  %v9772_v47 = vld [vmem:[#allocation18_spill] sm:$0xff] }
  0xd2   : > { %v3312_v33 = vadd.f32 %v9762_v29, %v3220_v2  ;;  %v9765_v46 = vrot.slane %v9764_v34, 5  ;;  %v923_v3 = vadd.f32 %v887_v52, %v831_v17  ;;  %v1069_v18 = vrot.slane %v1035_v12, 1  ;;  %v9768_v52 = vld [vmem:[#allocation22_spill] sm:$0xff] }
  0xd3   : > { %v924_v43 = vadd.f32 %v886_v1, %v832_v48  ;;  %v979_v58 = vsel %vm786_vm1, %v977_v14, %v978_v21  ;;  %v1070_v7 = vrot.slane %v1036_v22, 1  ;;  %v1128_v49 = vmul.f32 %v6321_v38, %v5633_v24 }
  0xd4   : > { %v3404_v57 = vadd.f32 %v9765_v46, %v3312_v33  ;;  %v3036_v40 = vadd.f32 %v9766_v13, %v2944_v53  ;;  %v9767_v26 = vrot.slane %v6306_v35, 5  ;;  %v1015_v59 = vadd.f32 %v979_v58, %v923_v3  ;;  %v9774_v58 = vld [vmem:[#allocation26_spill] sm:$0xff] }
  0xd5   : > { %v1161_v5 = vrot.slane %v1127_v36, 1  ;;  %v1016_v2 = vadd.f32 %v978_v21, %v924_v43  ;;  %v1071_v55 = vsel %vm786_vm1, %v1069_v18, %v1070_v7  ;;  %v1162_v60 = vrot.slane %v1128_v49, 1  ;;  %v9771_v21 = vld [vmem:[#allocation23_spill] sm:$0xff] }
  0xd6   : > { %v3496_v44 = vadd.f32 %v9767_v26, %v3404_v57  ;;  %v1219_v1 = vmul.f32 %v6513_v41, %v9768_v52  ;;  %v3129_v14 = vadd.f32 %v9769_v15, %v3036_v40  ;;  %v9770_v29 = vrot.slane %v6325_v50, 5  ;;  %v9775_v49 = vld [vmem:[#allocation19_spill] sm:$0xff] }
  0xd7   : > { %v1107_v17 = vadd.f32 %v1071_v55, %v1015_v59  ;;  %v1220_v12 = vmul.f32 %v6333_v39, %v9768_v52  ;;  %v1108_v35 = vadd.f32 %v1070_v7, %v1016_v2  ;;  %v1163_v48 = vsel %vm786_vm1, %v1161_v5, %v1162_v60 }
  0xd8   : > { %v3588_v33 = vadd.f32 %v9770_v29, %v3496_v44  ;;  %v1253_v22 = vrot.slane %v1219_v1, 1  ;;  %v1311_v36 = vmul.f32 %v9771_v21, %v6503_v42  ;;  %v3221_v53 = vadd.f32 %v9772_v47, %v3129_v14  ;;  %v9779_v29 = vld [vmem:[#allocation27_spill] sm:$0xff] }
  0xd9   : > { %v9773_v34 = vrot.slane %v6337_v62, 5  ;;  %v1199_v57 = vadd.f32 %v1163_v48, %v1107_v17  ;;  %v1254_v3 = vrot.slane %v1220_v12, 1  ;;  %v1200_v50 = vadd.f32 %v1162_v60, %v1108_v35  ;;  %v9777_v60 = vld [vmem:[#allocation31_spill] sm:$0xff]  ;;  %v9780_v35 = vld [vmem:[#allocation28_spill] sm:$0xff] }
  0xda   : > { %v1312_v18 = vmul.f32 %v9771_v21, %v6497_v25  ;;  %v1345_v43 = vrot.slane %v1311_v36, 1  ;;  %v1403_v7 = vmul.f32 %v6526_v31, %v9774_v58  ;;  %v3313_v13 = vadd.f32 %v9775_v49, %v3221_v53 }
  0xdb   : > { %v3680_v46 = vadd.f32 %v9773_v34, %v3588_v33  ;;  %v9776_v40 = vrot.slane %v6358_v51, 6  ;;  %v1255_v44 = vsel %vm786_vm1, %v1253_v22, %v1254_v3  ;;  %v1404_v62 = vmul.f32 %v6255_v23, %v9774_v58 }
  0xdc   : > { %v1291_v59 = vadd.f32 %v1255_v44, %v1199_v57  ;;  %v1292_v5 = vadd.f32 %v1254_v3, %v1200_v50  ;;  %v1346_v2 = vrot.slane %v1312_v18, 1  ;;  %v1438_v55 = vrot.slane %v1403_v7, 2 }
  0xdd   : > { %v3773_v26 = vadd.f32 %v9776_v40, %v3680_v46  ;;  %v3405_v1 = vadd.f32 %v9777_v60, %v3313_v13  ;;  %v9778_v15 = vrot.slane %v6364_v16, 6  ;;  %v1439_v31 = vrot.slane %v1404_v62, 2  ;;  %v9783_v13 = vld [vmem:[#allocation33_spill] sm:$0xff] }
  0xde   : > { %v1496_v33 = vmul.f32 %v6465_v19, %v9779_v29  ;;  %v1347_v51 = vsel %vm786_vm1, %v1345_v43, %v1346_v2  ;;  %v1384_v17 = vadd.f32 %v1346_v2, %v1292_v5  ;;  %v1497_v12 = vmul.f32 %v6263_v54, %v9779_v29 }
  0xdf   : > { %v3865_v14 = vadd.f32 %v9778_v15, %v3773_v26  ;;  %v1588_v48 = vmul.f32 %v6482_v0, %v9780_v35  ;;  %v3497_v22 = vadd.f32 %v6347_v6, %v3405_v1  ;;  %v9781_v36 = vrot.slane %v6390_v20, 6 }
  0xe0   : > { %v1383_v16 = vadd.f32 %v1347_v51, %v1291_v59  ;;  %v1440_v53 = vsel %vm1431_vm2, %v1438_v55, %v1439_v31  ;;  %v1477_v34 = vadd.f32 %v1439_v31, %v1384_v17  ;;  %v1530_v46 = vrot.slane %v1496_v33, 2  ;;  %v9785_v55 = vld [vmem:[#allocation34_spill] sm:$0xff]  ;;  %v9787_v51 = vld [vmem:[#allocation35_spill] sm:$0xff] }
  0xe1   : > { %v3957_v47 = vadd.f32 %v9781_v36, %v3865_v14  ;;  %v1531_v19 = vrot.slane %v1497_v12, 2  ;;  %v1589_v57 = vmul.f32 %v6289_v30, %v9780_v35  ;;  %v3589_v3 = vadd.f32 %v6373_v27, %v3497_v22 }
  0xe2   : > { %v9782_v50 = vrot.slane %v6401_v45, 6  ;;  %v1476_v43 = vadd.f32 %v1440_v53, %v1383_v16  ;;  %v1622_v7 = vrot.slane %v1588_v48, 2  ;;  %v1680_v40 = vmul.f32 %v6493_v10, %v9783_v13 }
  0xe3   : > { %v1532_v6 = vsel %vm1431_vm2, %v1530_v46, %v1531_v19  ;;  %v1569_v20 = vadd.f32 %v1531_v19, %v1477_v34  ;;  %v1623_v49 = vrot.slane %v1589_v57, 2  ;;  %v3681_v26 = vadd.f32 %v6380_v4, %v3589_v3  ;;  %v9789_v46 = vld [vmem:[#allocation32_spill] sm:$0xff] }
  0xe4   : > { %v4049_v18 = vadd.f32 %v9782_v50, %v3957_v47  ;;  %v9784_v44 = vrot.slane %v6418_v56, 6  ;;  %v1568_v59 = vadd.f32 %v1532_v6, %v1476_v43  ;;  %v1681_v27 = vmul.f32 %v6302_v11, %v9783_v13  ;;  %v9790_v3 = vld [vmem:[#allocation36_spill] sm:$0xff] }
  0xe5   : > { %v1624_v45 = vsel %vm1431_vm2, %v1622_v7, %v1623_v49  ;;  %v1661_v5 = vadd.f32 %v1623_v49, %v1569_v20  ;;  %v1714_v2 = vrot.slane %v1680_v40, 2  ;;  %v1772_v60 = vmul.f32 %v6507_v61, %v9785_v55  ;;  %v9791_v7 = vld [vmem:[#allocation41_spill] sm:$0xff] }
  0xe6   : > { %v4141_v62 = vadd.f32 %v9784_v44, %v4049_v18  ;;  %v3774_v1 = vadd.f32 %v6395_v9, %v3681_v26  ;;  %v9786_v15 = vrot.slane %v6428_v63, 6  ;;  %v1660_v4 = vadd.f32 %v1624_v45, %v1568_v59  ;;  %v9792_v20 = vld [vmem:[#allocation21_spill] sm:$0xff] }
  0xe7   : > { %v1715_v31 = vrot.slane %v1681_v27, 2  ;;  %v1773_v56 = vmul.f32 %v6321_v38, %v9785_v55  ;;  %v1806_v33 = vrot.slane %v1772_v60, 2  ;;  %v1864_v17 = vmul.f32 %v6513_v41, %v9787_v51  ;;  %v9793_v27 = vld [vmem:[#allocation42_spill] sm:$0xff]  ;;  %v9795_v60 = vld [vmem:[#allocation37_spill] sm:$0xff] }
  0xe8   : > { %v4233_v14 = vadd.f32 %v9786_v15, %v4141_v62  ;;  %v1865_v12 = vmul.f32 %v6333_v39, %v9787_v51  ;;  %v3866_v48 = vadd.f32 %v6412_v8, %v3774_v1  ;;  %v9788_v22 = vrot.slane %v6450_v37, 6 }
  0xe9   : > { %v1716_v63 = vsel %vm1431_vm2, %v1714_v2, %v1715_v31  ;;  %v1753_v36 = vadd.f32 %v1715_v31, %v1661_v5  ;;  %v1807_v16 = vrot.slane %v1773_v56, 2  ;;  %v1898_v53 = vrot.slane %v1864_v17, 2  ;;  %v9794_v5 = vld [vmem:[#allocation44_spill] sm:$0xff] }
  0xea   : > { %v4325_v9 = vadd.f32 %v9788_v22, %v4233_v14  ;;  %v1752_v47 = vadd.f32 %v1716_v63, %v1660_v4  ;;  %v1899_v34 = vrot.slane %v1865_v12, 2  ;;  %v3958_v19 = vadd.f32 %v9789_v46, %v3866_v48  ;;  %v9796_v4 = vld [vmem:[#allocation47_spill] sm:$0xff]  ;;  %v9797_v12 = vld [vmem:[#allocation48_spill] sm:$0xff]  ;;  %v9798_v22 = vld [vmem:[#allocation38_spill] sm:$0xff] }
  0xeb   : > { %v1956_v50 = vmul.f32 %v9790_v3, %v6503_v42  ;;  %v1957_v18 = vmul.f32 %v9790_v3, %v6497_v25  ;;  %v1808_v8 = vsel %vm1431_vm2, %v1806_v33, %v1807_v16  ;;  %v1845_v37 = vadd.f32 %v1807_v16, %v1753_v36  ;;  %v9800_v46 = vld [vmem:[#allocation53_spill] sm:$0xff] }
  0xec   : > { %v4358_v57 = vrot.slane %v4325_v9, 5  ;;  %v1900_v43 = vsel %vm1431_vm2, %v1898_v53, %v1899_v34  ;;  %v2046_v6 = vmul.f32 %v6255_v23, %v9791_v7  ;;  %v4050_v49 = vadd.f32 %v9792_v20, %v3958_v19  ;;  %v6666_v20 = vld [vmem:[#allocation2 + $0x40] sm:$0xff] }
  0xed   : > { %v1844_v40 = vadd.f32 %v1808_v8, %v1752_v47  ;;  %v1990_v26 = vrot.slane %v1956_v50, 2  ;;  %v1991_v44 = vrot.slane %v1957_v18, 2  ;;  %v1937_v62 = vadd.f32 %v1899_v34, %v1845_v37  ;;  %v9799_v47 = vld [vmem:[#allocation50_spill] sm:$0xff]  ;;  %v9802_v8 = vld [vmem:[#allocation39_spill] sm:$0xff] }
  0xee   : > { %v2062_v59 = vrot.slane %v2046_v6, 3  ;;  %v2098_v45 = vmul.f32 %v6263_v54, %v9793_v27  ;;  %v2150_v2 = vmul.f32 %v6289_v30, %v9794_v5  ;;  %v4142_v1 = vadd.f32 %v9795_v60, %v4050_v49  ;;  %v9801_v50 = vld [vmem:[#allocation54_spill] sm:$0xff] }
  0xef   : > { %v1936_v15 = vadd.f32 %v1900_v43, %v1844_v40  ;;  %v1992_v14 = vsel %vm1431_vm2, %v1990_v26, %v1991_v44  ;;  %v2202_v31 = vmul.f32 %v6302_v11, %v9796_v4  ;;  %v2029_v56 = vadd.f32 %v1991_v44, %v1937_v62  ;;  %v9803_v62 = vld [vmem:[#allocation55_spill] sm:$0xff]  ;;  %v9816_v4 = vld [vmem:[#allocation64_spill] sm:$0xff] }
  0xf0   : > { %v2114_v33 = vrot.slane %v2098_v45, 3  ;;  %v2166_v17 = vrot.slane %v2150_v2, 3  ;;  %v2254_v48 = vmul.f32 %v6321_v38, %v9797_v12  ;;  %v4234_v9 = vadd.f32 %v9798_v22, %v4142_v1  ;;  %v6684_v22 = vld [vmem:[#allocation2 + $0x70] sm:$0xff] }
  0xf1   : > { %v2028_v63 = vadd.f32 %v1992_v14, %v1936_v15  ;;  %v2218_v36 = vrot.slane %v2202_v31, 3  ;;  %v2306_v16 = vmul.f32 %v6333_v39, %v9799_v47  ;;  %v2081_v53 = vadd.f32 %v2062_v59, %v2029_v56  ;;  %v6675_v15 = vld [vmem:[#allocation2 + $0x58] sm:$0xff]  ;;  %9805 = vst [vmem:[#allocation40_spill] sm:$0xff] %v6684_v22 }
  0xf2   : > { %v2270_v34 = vrot.slane %v2254_v48, 3  ;;  %v2358_v19 = vmul.f32 %v9800_v46, %v6497_v25  ;;  %v6663_v18 = vmul.f32 %v6255_v23, %v9801_v50  ;;  %v4326_v37 = vadd.f32 %v9802_v8, %v4234_v9  ;;  %v9804_v56 = vld [vmem:[#allocation56_spill] sm:$0xff] }
  0xf3   : > { %v2080_v43 = vadd.f32 %v2062_v59, %v2028_v63  ;;  %v2322_v6 = vrot.slane %v2306_v16, 3  ;;  %v2413_v49 = vmul.f32 %v6666_v20, %v9801_v50  ;;  %v2133_v40 = vadd.f32 %v2114_v33, %v2081_v53 }
  0xf4   : > { %v2374_v26 = vrot.slane %v2358_v19, 3  ;;  %v2447_v44 = vrot.slane %v6663_v18, 4  ;;  %v6673_v45 = vmul.f32 %v6263_v54, %v9803_v62  ;;  %v4359_v2 = vrot.slane %v4326_v37, 5  ;;  %v9806_v19 = vld [vmem:[#allocation78_spill] sm:$0xff] }
  0xf5   : > { %v2132_v60 = vadd.f32 %v2114_v33, %v2080_v43  ;;  %v2448_v1 = vrot.slane %v2413_v49, 4  ;;  %v2506_v59 = vmul.f32 %v6675_v15, %v9803_v62  ;;  %v2185_v14 = vadd.f32 %v2166_v17, %v2133_v40 }
  0xf6   : > { %v2539_v31 = vrot.slane %v6673_v45, 4  ;;  %v6682_v48 = vmul.f32 %v6289_v30, %v9804_v56  ;;  %v2598_v9 = vmul.f32 %v6684_v22, %v9804_v56  ;;  %v4360_v33 = vsel %vm3085_vm4, %v4358_v57, %v4359_v2  ;;  %v9808_v45 = vld [vmem:[#allocation60_spill] sm:$0xff]  ;;  %v6697_v56 = vld [vmem:[#allocation2 + $0x88] sm:$0xff] }
  0xf7   : > { %v2184_v63 = vadd.f32 %v2166_v17, %v2132_v60  ;;  %v2449_v16 = vsel %vm2440_vm3, %v2447_v44, %v2448_v1  ;;  %v2540_v53 = vrot.slane %v2506_v59, 4  ;;  %v6691_v18 = vadd.f32 %v9806_v19, %v4360_v33  ;;  %9809 = vst [vmem:[#allocation43_spill] sm:$0xff] %v6697_v56  ;;  %v9810_v1 = vld [vmem:[#allocation61_spill] sm:$0xff] }
  0xf8   : > { %v2237_v8 = vadd.f32 %v2218_v36, %v2185_v14  ;;  %v2631_v37 = vrot.slane %v6682_v48, 4  ;;  %v2632_v43 = vrot.slane %v2598_v9, 4  ;;  %v2689_v62 = vmul.f32 %v6302_v11, %v9808_v45  ;;  %v6708_v33 = vld [vmem:[#allocation2 + $0xa0] sm:$0xff] }
  0xf9   : > { %9807 = vst [vmem:[#allocation16_spill] sm:$0xff] %v6691_v18  ;;  %v2236_v49 = vadd.f32 %v2218_v36, %v2184_v63  ;;  %v2541_v40 = vsel %vm2440_vm3, %v2539_v31, %v2540_v53  ;;  %v2690_v57 = vmul.f32 %v6697_v56, %v9808_v45  ;;  %v4405_v17 = vsel %vm396_vm0, %v6691_v18, 0.0  ;;  %v6706_v36 = vld [vmem:[#allocation2 + $0xd0] sm:$0xff]  ;;  %9812 = vst [vmem:[#allocation46_spill] sm:$0xff] %v6708_v33  ;;  %v9813_v18 = vld [vmem:[#allocation62_spill] sm:$0xff] }
  0xfa   : > { %v2289_v2 = vadd.f32 %v2270_v34, %v2237_v8  ;;  %v2633_v60 = vsel %vm2440_vm3, %v2631_v37, %v2632_v43  ;;  %v2781_v59 = vmul.f32 %v6321_v38, %v9810_v1  ;;  %4406 = vadd.xlane.f32.xlu0 %v4405_v17  ;;  %9811 = vst [vmem:[#allocation45_spill] sm:$0xff] %v6706_v36  ;;  %v2723_v48 = vrot.slane %v2689_v62, 4  ;;  %v9814_v43 = vld [vmem:[#allocation30_spill] sm:$0xff] }
  0xfb   : > { %v2288_v14 = vadd.f32 %v2270_v34, %v2236_v49  ;;  %v2724_v9 = vrot.slane %v2690_v57, 4  ;;  %v2782_v63 = vmul.f32 %v6708_v33, %v9810_v1  ;;  %v2873_v8 = vmul.f32 %v6333_v39, %v9813_v18  ;;  %v9815_v34 = vld [vmem:[#allocation63_spill] sm:$0xff] }
  0xfc   : > { %v2341_v53 = vadd.f32 %v2322_v6, %v2289_v2  ;;  %v2815_v19 = vrot.slane %v2781_v59, 4  ;;  %v2874_v45 = vmul.f32 %v9813_v18, %v9814_v43  ;;  %v2965_v62 = vmul.f32 %v9815_v34, %v6497_v25 }
  0xfd   : > { %v2340_v50 = vadd.f32 %v2322_v6, %v2288_v14  ;;  %v2725_v17 = vsel %vm2440_vm3, %v2723_v48, %v2724_v9  ;;  %v2816_v46 = vrot.slane %v2782_v63, 4  ;;  %v2907_v57 = vrot.slane %v2873_v8, 4 }
  0xfe   : > { %v2393_v49 = vadd.f32 %v2374_v26, %v2341_v53  ;;  %v2908_v47 = vrot.slane %v2874_v45, 4  ;;  %v2966_v2 = vmul.f32 %v9815_v34, %v6706_v36  ;;  %v2999_v12 = vrot.slane %v2965_v62, 4  ;;  %v9817_v45 = vld [vmem:[#allocation65_spill] sm:$0xff] }
  0xff   : > { %v2392_v59 = vadd.f32 %v2374_v26, %v2340_v50  ;;  %v2817_v1 = vsel %vm2440_vm3, %v2815_v19, %v2816_v46  ;;  %v3057_v18 = vmul.f32 %v6255_v23, %v9816_v4  ;;  %v3058_v63 = vmul.f32 %v6666_v20, %v9816_v4 }
 0x100   : > { %v2486_v6 = vadd.f32 %v2449_v16, %v2393_v49  ;;  %v2909_v14 = vsel %vm2440_vm3, %v2907_v57, %v2908_v47  ;;  %v3000_v9 = vrot.slane %v2966_v2, 4  ;;  %v6729_v5 = vmul.f32 %v6263_v54, %v9817_v45  ;;  %v9818_v16 = vld [vmem:[#allocation66_spill] sm:$0xff] }
 0x101   : > { %v2485_v53 = vadd.f32 %v2447_v44, %v2392_v59  ;;  %v3092_v8 = vrot.slane %v3057_v18, 5  ;;  %v3151_v46 = vmul.f32 %v6675_v15, %v9817_v45  ;;  %v3093_v62 = vrot.slane %v3058_v63, 5 }
 0x102   : > { %v2578_v50 = vadd.f32 %v2541_v40, %v2486_v6  ;;  %v3001_v26 = vsel %vm2440_vm3, %v2999_v12, %v3000_v9  ;;  %v6736_v47 = vmul.f32 %v6289_v30, %v9818_v16  ;;  %v3184_v2 = vrot.slane %v6729_v5, 5  ;;  %v9819_v40 = vld [vmem:[#allocation67_spill] sm:$0xff] }
 0x103   : > { %v2577_v49 = vadd.f32 %v2539_v31, %v2485_v53  ;;  %v3185_v44 = vrot.slane %v3151_v46, 5  ;;  %v3243_v18 = vmul.f32 %v6684_v22, %v9818_v16  ;;  %v3094_v4 = vsel %vm3085_vm4, %v3092_v8, %v3093_v62  ;;  %v9820_v46 = vld [vmem:[#allocation68_spill] sm:$0xff] }
 0x104   : > { %v2670_v59 = vadd.f32 %v2633_v60, %v2578_v50  ;;  %v3276_v45 = vrot.slane %v6736_v47, 5  ;;  %v6745_v6 = vmul.f32 %v6302_v11, %v9819_v40  ;;  %v3335_v5 = vmul.f32 %v6697_v56, %v9819_v40 }
 0x105   : > { %v2669_v9 = vadd.f32 %v2631_v37, %v2577_v49  ;;  %v3186_v63 = vsel %vm3085_vm4, %v3184_v2, %v3185_v44  ;;  %v3277_v34 = vrot.slane %v3243_v18, 5  ;;  %v6753_v60 = vmul.f32 %v6321_v38, %v9820_v46  ;;  %v9821_v49 = vld [vmem:[#allocation69_spill] sm:$0xff] }
 0x106   : > { %v2762_v31 = vadd.f32 %v2725_v17, %v2670_v59  ;;  %v3368_v53 = vrot.slane %v6745_v6, 5  ;;  %v3427_v50 = vmul.f32 %v6708_v33, %v9820_v46  ;;  %v3369_v37 = vrot.slane %v3335_v5, 5 }
 0x107   : > { %v2761_v62 = vadd.f32 %v2723_v48, %v2669_v9  ;;  %v3278_v47 = vsel %vm3085_vm4, %v3276_v45, %v3277_v34  ;;  %v6760_v44 = vmul.f32 %v6333_v39, %v9821_v49  ;;  %v3460_v17 = vrot.slane %v6753_v60, 5  ;;  %v9822_v48 = vld [vmem:[#allocation70_spill] sm:$0xff] }
 0x108   : > { %v2854_v18 = vadd.f32 %v2817_v1, %v2762_v31  ;;  %v3461_v59 = vrot.slane %v3427_v50, 5  ;;  %v3519_v6 = vmul.f32 %v9821_v49, %v9814_v43  ;;  %v3370_v16 = vsel %vm3085_vm4, %v3368_v53, %v3369_v37  ;;  %v9823_v50 = vld [vmem:[#allocation71_spill] sm:$0xff] }
 0x109   : > { %v2853_v40 = vadd.f32 %v2815_v19, %v2761_v62  ;;  %v9337_v46 = vrot.slane %v6760_v44, 5  ;;  %v6769_v34 = vmul.f32 %v9822_v48, %v6497_v25  ;;  %v3611_v1 = vmul.f32 %v9822_v48, %v6706_v36 }
 0x10a   : > { %v2946_v9 = vadd.f32 %v2909_v14, %v2854_v18  ;;  %v3462_v5 = vsel %vm3085_vm4, %v3460_v17, %v3461_v59  ;;  %v3553_v27 = vrot.slane %v3519_v6, 5  ;;  %v6777_v19 = vmul.f32 %v6255_v23, %v9823_v50  ;;  %v9824_v59 = vld [vmem:[#allocation72_spill] sm:$0xff] }
 0x10b   : > { %v2945_v31 = vadd.f32 %v2907_v57, %v2853_v40  ;;  %v3703_v62 = vmul.f32 %v6666_v20, %v9823_v50  ;;  %v3645_v18 = vrot.slane %v3611_v1, 5  ;;  %v6786_v6 = vmul.f32 %v6263_v54, %v9824_v59 }
 0x10c   : > { %v3038_v37 = vadd.f32 %v3001_v26, %v2946_v9  ;;  %v3554_v14 = vsel %vm3085_vm4, %v9337_v46, %v3553_v27  ;;  %v9336_v40 = vrot.slane %v6777_v19, 6  ;;  %v3796_v23 = vmul.f32 %v6675_v15, %v9824_v59  ;;  %v9826_v27 = vld [vmem:[#allocation73_spill] sm:$0xff] }
 0x10d   : > { %v3037_v57 = vadd.f32 %v2999_v12, %v2945_v31  ;;  %v3738_v60 = vrot.slane %v3703_v62, 6  ;;  %v9825_v20 = vrot.slane %v6769_v34, 5  ;;  %v9340_v9 = vrot.slane %v6786_v6, 6 }
 0x10e   : > { %v3131_v48 = vadd.f32 %v3094_v4, %v3038_v37  ;;  %v6797_v1 = vmul.f32 %v6289_v30, %v9826_v27  ;;  %v3830_v31 = vrot.slane %v3796_v23, 6  ;;  %v3888_v15 = vmul.f32 %v6684_v22, %v9826_v27  ;;  %v9827_v37 = vld [vmem:[#allocation74_spill] sm:$0xff]  ;;  %v9828_v23 = vld [vmem:[#allocation75_spill] sm:$0xff] }
 0x10f   : > { %v3646_v26 = vsel %vm3085_vm4, %v9825_v20, %v3645_v18  ;;  %v3130_v54 = vadd.f32 %v3092_v8, %v3037_v57  ;;  %v3739_v12 = vsel %vm3730_vm5, %v9336_v40, %v3738_v60  ;;  %v6807_v18 = vmul.f32 %v6302_v11, %v9827_v37 }
 0x110   : > { %v3223_v4 = vadd.f32 %v3186_v63, %v3131_v48  ;;  %v3980_v20 = vmul.f32 %v6697_v56, %v9827_v37  ;;  %v3831_v60 = vsel %vm3730_vm5, %v9340_v9, %v3830_v31  ;;  %v3922_v57 = vrot.slane %v3888_v15, 6  ;;  %v9830_v31 = vld [vmem:[#allocation76_spill] sm:$0xff] }
 0x111   : > { %v3222_v8 = vadd.f32 %v3184_v2, %v3130_v54  ;;  %v6816_v40 = vmul.f32 %v6321_v38, %v9828_v23  ;;  %v9343_v48 = vrot.slane %v6807_v18, 6  ;;  %v4072_v62 = vmul.f32 %v6708_v33, %v9828_v23  ;;  %v6830_v9 = vld [vmem:[%s5411_s16 + $0x18] sm:$0xff]  }
 0x112   : > { %v3315_v63 = vadd.f32 %v3278_v47, %v3223_v4  ;;  %v4014_v46 = vrot.slane %v3980_v20, 6  ;;  %v9829_v37 = vrot.slane %v6797_v1, 6  ;;  %v6827_v15 = vmul.f32 %v6333_v39, %v9830_v31  ;;  %9831 = vst [vmem:[#allocation49_spill] sm:$0xff] %v6830_v9 }
 0x113   : > { %v3314_v27 = vadd.f32 %v3276_v45, %v3222_v8  ;;  %v4106_v20 = vrot.slane %v4072_v62, 6  ;;  %v4164_v45 = vmul.f32 %v9830_v31, %v9814_v43  ;;  %v9347_v62 = vunpack.c.l.bf16 %v6830_v9 }
 0x114   : > { %v3923_v2 = vsel %vm3730_vm5, %v9829_v37, %v3922_v57  ;;  %v3407_v47 = vadd.f32 %v3370_v16, %v3315_v63  ;;  %v4015_v4 = vsel %vm3730_vm5, %v9343_v48, %v4014_v46  ;;  %v9832_v57 = vld [vmem:[#allocation77_spill] sm:$0xff]  ;;  %v9833_v16 = vrot.slane %v6816_v40, 6 }
 0x115   : > { %v3406_v8 = vadd.f32 %v3368_v53, %v3314_v27  ;;  %v6840_v54 = vmul.f32 %v9832_v57, %v6497_v25  ;;  %v4256_v23 = vmul.f32 %v9832_v57, %v6706_v36  ;;  %v4198_v46 = vrot.slane %v4164_v45, 6  ;;  %447 = vst.msk [vmem:[#allocation2 + $0xe0] sm:$0xff] %vm396_vm0, %v9347_v62 }
 0x116   : > { %v3499_v59 = vadd.f32 %v3462_v5, %v3407_v47  ;;  %v4107_v63 = vsel %vm3730_vm5, %v9833_v16, %v4106_v20  ;;  %v9346_v27 = vunpack.c.h.bf16 %v6830_v9  ;;  %v9834_v31 = vrot.slane %v6827_v15, 6  ;;  %v9835_v5 = vld [vmem:[#allocation6_spill] sm:$0xff] }
 0x117   : > { %v3498_v48 = vadd.f32 %v3460_v17, %v3406_v8  ;;  %v9348_v43 = vrot.slane %v6840_v54, 6  ;;  %v4290_v53 = vrot.slane %v4256_v23, 6  ;;  %v510_v47 = vmul.f32 %v6482_v0, %v9835_v5 }
 0x118   : > { %v3591_v37 = vadd.f32 %v3554_v14, %v3499_v59  ;;  %v4199_v50 = vsel %vm3730_vm5, %v9834_v31, %v4198_v46  ;;  %v511_v17 = vmul.f32 %v6289_v30, %v9835_v5  ;;  %v9836_v20 = vrot.slane %v6760_v44, 5  ;;  %448 = vst.msk [vmem:[#allocation2 + $0xf8] sm:$0xff] %vm396_vm0, %v9346_v27  ;;  %v6870_v59 = vld [vmem:[#allocation2 + $0xd8] sm:$0xff]  ;;  %v9837_v31 = vld [vmem:[#allocation7_spill] sm:$0xff] }
 0x119   : > { %v6865_v14 = vsel %vm3730_vm5, %v9348_v43, %v4290_v53  ;;  %v546_v45 = vmul.f32 %v6493_v10, %v9837_v31  ;;  %v547_v8 = vmul.f32 %v6302_v11, %v9837_v31  ;;  %v6876_v44 = vld [vmem:[#allocation2 + $0xf0] sm:$0xff]  ;;  %v9840_v62 = vrot.slane %v6769_v34, 5 }
 0x11a   : > { %v3590_v23 = vadd.f32 %v9836_v20, %v3498_v48  ;;  %v3683_v16 = vadd.f32 %v3646_v26, %v3591_v37  ;;  %v9838_v48 = vld [vmem:[#allocation8_spill] sm:$0xff]  ;;  %v9839_v20 = vld [vmem:[#allocation9_spill] sm:$0xff]  ;;  %v9841_v37 = vld [vmem:[#allocation10_spill] sm:$0xff]  ;;  %v9843_v33 = vrot.slane %v6777_v19, 6 }
 0x11b   : > { %v582_v46 = vmul.f32 %v6507_v61, %v9838_v48  ;;  %v583_v53 = vmul.f32 %v6321_v38, %v9838_v48  ;;  %v618_v27 = vmul.f32 %v6513_v41, %v9839_v20  ;;  %v562_v9 = vadd.f32 %v546_v45, %v510_v47  ;;  %v9842_v48 = vld [vmem:[#allocation11_spill] sm:$0xff]  ;;  %v9844_v47 = vld [vmem:[#allocation12_spill] sm:$0xff]  ;;  %v9845_v45 = vld [vmem:[#allocation13_spill] sm:$0xff] }
 0x11c   : > { %v3682_v43 = vadd.f32 %v9840_v62, %v3590_v23  ;;  %v563_v5 = vadd.f32 %v547_v8, %v511_v17  ;;  %v619_v31 = vmul.f32 %v6333_v39, %v9839_v20  ;;  %v3776_v26 = vadd.f32 %v3739_v12, %v3683_v16  ;;  %v9846_v16 = vld [vmem:[#allocation20_spill] sm:$0xff]  ;;  %v6906_v19 = vld [vmem:[#allocation2 + $0xe0] sm:$0xff] }
 0x11d   : > { %v654_v57 = vmul.f32 %v9841_v37, %v6503_v42  ;;  %v655_v49 = vmul.f32 %v9841_v37, %v6497_v25  ;;  %v690_v36 = vmul.f32 %v9842_v48, %v6870_v59  ;;  %v598_v34 = vadd.f32 %v582_v46, %v562_v9 }
 0x11e   : > { %v3775_v56 = vadd.f32 %v9843_v33, %v3682_v43  ;;  %v599_v62 = vadd.f32 %v583_v53, %v563_v5  ;;  %v726_v17 = vmul.f32 %v9844_v47, %v6876_v44  ;;  %v3868_v23 = vadd.f32 %v3831_v60, %v3776_v26 }
 0x11f   : > { %v762_v12 = vmul.f32 %v6482_v0, %v9845_v45  ;;  %v763_v8 = vmul.f32 %v6289_v30, %v9845_v45  ;;  %v855_v37 = vmul.f32 %v6493_v10, %v9846_v16  ;;  %v9847_v20 = vrot.slane %v6786_v6, 6  ;;  %v6910_v5 = vld [vmem:[#allocation2 + $0xf8] sm:$0xff] }
 0x120   : > { %v634_v33 = vadd.f32 %v618_v27, %v598_v34  ;;  %v635_v9 = vadd.f32 %v619_v31, %v599_v62  ;;  %v856_v43 = vmul.f32 %v6302_v11, %v9846_v16  ;;  %v3960_v60 = vadd.f32 %v3923_v2, %v3868_v23 }
 0x121   : > { %v3867_v22 = vadd.f32 %v9847_v20, %v3775_v56  ;;  %v691_v46 = vmul.f32 %v9842_v48, %v6906_v19  ;;  %v799_v53 = vrot.slane %v762_v12, 1  ;;  %v800_v26 = vrot.slane %v763_v8, 1 }
 0x122   : > { %v9848_v45 = vrot.slane %v6797_v1, 6  ;;  %v670_v6 = vadd.f32 %v654_v57, %v634_v33  ;;  %v671_v56 = vadd.f32 %v655_v49, %v635_v9  ;;  %v727_v27 = vmul.f32 %v9844_v47, %v6910_v5 }
 0x123   : > { %v4052_v31 = vadd.f32 %v4015_v4, %v3960_v60  ;;  %v801_v20 = vsel %vm786_vm1, %v799_v53, %v800_v26  ;;  %v891_v11 = vrot.slane %v855_v37, 1  ;;  %v892_v2 = vrot.slane %v856_v43, 1 }
 0x124   : > { %v3959_v7 = vadd.f32 %v9848_v45, %v3867_v22  ;;  %v9849_v34 = vrot.slane %v6807_v18, 6  ;;  %v706_v23 = vadd.f32 %v690_v36, %v670_v6  ;;  %v707_v16 = vadd.f32 %v691_v46, %v671_v56 }
 0x125   : > { %v947_v12 = vmul.f32 %v6507_v61, %v5601_v28  ;;  %v4144_v1 = vadd.f32 %v4107_v63, %v4052_v31  ;;  %v893_v22 = vsel %vm786_vm1, %v891_v11, %v892_v2  ;;  %v948_v49 = vmul.f32 %v6321_v38, %v5601_v28 }
 0x126   : > { %v4051_v62 = vadd.f32 %v9849_v34, %v3959_v7  ;;  %v1039_v4 = vmul.f32 %v6513_v41, %v5628_v32  ;;  %v9850_v57 = vrot.slane %v6816_v40, 6  ;;  %v742_v45 = vadd.f32 %v726_v17, %v706_v23 }
 0x127   : > { %v743_v18 = vadd.f32 %v727_v27, %v707_v16  ;;  %v983_v7 = vrot.slane %v947_v12, 1  ;;  %v4236_v36 = vadd.f32 %v4199_v50, %v4144_v1  ;;  %v984_v8 = vrot.slane %v948_v49, 1 }
 0x128   : > { %v4143_v37 = vadd.f32 %v9850_v57, %v4051_v62  ;;  %v1040_v33 = vmul.f32 %v6333_v39, %v5628_v32  ;;  %v1075_v63 = vrot.slane %v1039_v4, 1  ;;  %v9851_v9 = vrot.slane %v6827_v15, 6 }
 0x129   : > { %v835_v60 = vadd.f32 %v801_v20, %v742_v45  ;;  %v836_v46 = vadd.f32 %v800_v26, %v743_v18  ;;  %v1131_v53 = vmul.f32 %v5633_v24, %v6503_v42  ;;  %v4328_v40 = vadd.f32 %v6865_v14, %v4236_v36  ;;  %v6956_v45 = vld [vmem:[%s9129_s2] ss:$0 sm:$0xff] }
 0x12a   : > { %v4235_v43 = vadd.f32 %v9851_v9, %v4143_v37  ;;  %v985_v17 = vsel %vm786_vm1, %v983_v7, %v984_v8  ;;  %v1076_v16 = vrot.slane %v1040_v33, 1  ;;  %v1132_v50 = vmul.f32 %v5633_v24, %v6497_v25  ;;  %9853 = vst [vmem:[#allocation51_spill] sm:$0xff] %v6956_v45 }
 0x12b   : > { %v9852_v6 = vrot.slane %v6840_v54, 6  ;;  %v927_v27 = vadd.f32 %v893_v22, %v835_v60  ;;  %v928_v31 = vadd.f32 %v892_v2, %v836_v46  ;;  %v1167_v15 = vrot.slane %v1131_v53, 1 }
 0x12c   : > { %v4362_v11 = vrot.slane %v4328_v40, 5  ;;  %v1077_v26 = vsel %vm786_vm1, %v1075_v63, %v1076_v16  ;;  %v1168_v20 = vrot.slane %v1132_v50, 1  ;;  %v1223_v34 = vmul.f32 %v9768_v52, %v6870_v59  ;;  %v6971_v50 = vld [vmem:[#allocation2 + $0x80] sm:$0xff] }
 0x12d   : > { %v4327_v56 = vadd.f32 %v9852_v6, %v4235_v43  ;;  %v1019_v62 = vadd.f32 %v985_v17, %v927_v27  ;;  %v1020_v23 = vadd.f32 %v984_v8, %v928_v31  ;;  %v1224_v12 = vmul.f32 %v9768_v52, %v6906_v19 }
 0x12e   : > { %v1169_v1 = vsel %vm786_vm1, %v1167_v15, %v1168_v20  ;;  %v1259_v54 = vrot.slane %v1223_v34, 1  ;;  %v1315_v2 = vmul.f32 %v9771_v21, %v6876_v44  ;;  %v1316_v22 = vmul.f32 %v9771_v21, %v6910_v5 }
 0x12f   : > { %v4361_v14 = vrot.slane %v4327_v56, 5  ;;  %v1111_v4 = vadd.f32 %v1077_v26, %v1019_v62  ;;  %v1112_v57 = vadd.f32 %v1076_v16, %v1020_v23  ;;  %v1260_v37 = vrot.slane %v1224_v12, 1 }
 0x130   : > { %v1351_v7 = vrot.slane %v1315_v2, 1  ;;  %v1352_v36 = vrot.slane %v1316_v22, 1  ;;  %v1407_v8 = vmul.f32 %v6482_v0, %v9774_v58  ;;  %v1408_v43 = vmul.f32 %v6289_v30, %v9774_v58 }
 0x131   : > { %v4363_v49 = vsel %vm3085_vm4, %v4361_v14, %v4362_v11  ;;  %v1203_v33 = vadd.f32 %v1169_v1, %v1111_v4  ;;  %v1204_v63 = vadd.f32 %v1168_v20, %v1112_v57  ;;  %v1261_v9 = vsel %vm786_vm1, %v1259_v54, %v1260_v37 }
 0x132   : > { %v6959_v18 = vadd.f32 %v6956_v45, %v4363_v49  ;;  %v1353_v46 = vsel %vm786_vm1, %v1351_v7, %v1352_v36  ;;  %v1444_v53 = vrot.slane %v1407_v8, 2  ;;  %v1500_v40 = vmul.f32 %v6493_v10, %v9779_v29 }
 0x133   : > { %v1295_v17 = vadd.f32 %v1261_v9, %v1203_v33  ;;  %v1296_v16 = vadd.f32 %v1260_v37, %v1204_v63  ;;  %v1445_v0 = vrot.slane %v1408_v43, 2  ;;  %v1501_v6 = vmul.f32 %v6971_v50, %v9779_v29 }
 0x134   : > { %9854 = vst [vmem:[#allocation52_spill] sm:$0xff] %v6959_v18  ;;  %v4408_v60 = vsel %vm396_vm0, %v6959_v18, 0.0  ;;  %v1536_v56 = vrot.slane %v1500_v40, 2  ;;  %v1592_v30 = vmul.f32 %v6507_v61, %v9780_v35  ;;  %v1593_v27 = vmul.f32 %v6321_v38, %v9780_v35  ;;  %v9857_v40 = vld [vmem:[#allocation42_spill] sm:$0xff]  ;;  %v9872_v18 = vld [vmem:[#allocation61_spill] sm:$0xff] }
 0x135   : > { %4409 = vadd.xlane.f32.xlu1 %v4408_v60  ;;  %v1684_v31 = vmul.f32 %v6513_v41, %v9783_v13  ;;  %v1387_v10 = vadd.f32 %v1353_v46, %v1295_v17  ;;  %v1388_v15 = vadd.f32 %v1352_v36, %v1296_v16  ;;  %v1446_v11 = vsel %vm1431_vm2, %v1444_v53, %v1445_v0  ;;  %v7000_v60 = vld [vmem:[#allocation2 + $0x68] sm:$0xff]  ;;  %v9856_v46 = vld [vmem:[#allocation41_spill] sm:$0xff] }
 0x136   : > { %v1537_v26 = vrot.slane %v1501_v6, 2  ;;  %v1628_v20 = vrot.slane %v1592_v30, 2  ;;  %v1629_v34 = vrot.slane %v1593_v27, 2  ;;  %v1685_v14 = vmul.f32 %v6333_v39, %v9783_v13  ;;  %9855 = vst [vmem:[#allocation57_spill] sm:$0xff] %v7000_v60  ;;  %v7007_v27 = vld [vmem:[#allocation2 + $0x98] sm:$0xff]  ;;  %v9914_v13 = vld [vmem:[#allocation10_spill] sm:$0xff] }
 0x137   : > { %v1720_v62 = vrot.slane %v1684_v31, 2  ;;  %v1480_v23 = vadd.f32 %v1446_v11, %v1387_v10  ;;  %v1481_v12 = vadd.f32 %v1445_v0, %v1388_v15  ;;  %v1776_v38 = vmul.f32 %v9785_v55, %v6503_v42  ;;  %v9858_v31 = vld [vmem:[#allocation44_spill] sm:$0xff]  ;;  %v7011_v15 = vld [vmem:[#allocation2 + $0xb0] sm:$0xff] }
 0x138   : > { %v1538_v61 = vsel %vm1431_vm2, %v1536_v56, %v1537_v26  ;;  %v1630_v41 = vsel %vm1431_vm2, %v1628_v20, %v1629_v34  ;;  %v1721_v1 = vrot.slane %v1685_v14, 2  ;;  %v1777_v54 = vmul.f32 %v9785_v55, %v6497_v25  ;;  %v9859_v11 = vld [vmem:[#allocation47_spill] sm:$0xff] }
 0x139   : > { %v1868_v2 = vmul.f32 %v9787_v51, %v6870_v59  ;;  %v1572_v22 = vadd.f32 %v1538_v61, %v1480_v23  ;;  %v1573_v49 = vadd.f32 %v1537_v26, %v1481_v12  ;;  %v1812_v39 = vrot.slane %v1776_v38, 2  ;;  %v9861_v38 = vld [vmem:[#allocation50_spill] sm:$0xff] }
 0x13a   : > { %v1869_v4 = vmul.f32 %v9787_v51, %v6906_v19  ;;  %v1722_v57 = vsel %vm1431_vm2, %v1720_v62, %v1721_v1  ;;  %v1813_v37 = vrot.slane %v1777_v54, 2  ;;  %v1960_v42 = vmul.f32 %v9790_v3, %v6876_v44  ;;  %v9860_v62 = vld [vmem:[#allocation48_spill] sm:$0xff] }
 0x13b   : > { %v1904_v7 = vrot.slane %v1868_v2, 2  ;;  %v1664_v36 = vadd.f32 %v1630_v41, %v1572_v22  ;;  %v1665_v8 = vadd.f32 %v1629_v34, %v1573_v49  ;;  %v1961_v63 = vmul.f32 %v9790_v3, %v6910_v5 }
 0x13c   : > { %v1905_v33 = vrot.slane %v1869_v4, 2  ;;  %v1814_v9 = vsel %vm1431_vm2, %v1812_v39, %v1813_v37  ;;  %v1996_v43 = vrot.slane %v1960_v42, 2  ;;  %v2048_v53 = vmul.f32 %v7000_v60, %v9856_v46  ;;  %v9863_v39 = vld [vmem:[#allocation54_spill] sm:$0xff]  ;;  %v9865_v42 = vld [vmem:[#allocation55_spill] sm:$0xff] }
 0x13d   : > { %v2100_v17 = vmul.f32 %v6971_v50, %v9857_v40  ;;  %v1756_v16 = vadd.f32 %v1722_v57, %v1664_v36  ;;  %v1757_v0 = vadd.f32 %v1721_v1, %v1665_v8  ;;  %v1997_v6 = vrot.slane %v1961_v63, 2  ;;  %v9862_v1 = vld [vmem:[#allocation53_spill] sm:$0xff] }
 0x13e   : > { %v1906_v44 = vsel %vm1431_vm2, %v1904_v7, %v1905_v33  ;;  %v2064_v56 = vrot.slane %v2048_v53, 3  ;;  %v2152_v10 = vmul.f32 %v7007_v27, %v9858_v31  ;;  %v2204_v26 = vmul.f32 %v7011_v15, %v9859_v11 }
 0x13f   : > { %v2116_v30 = vrot.slane %v2100_v17, 3  ;;  %v1848_v20 = vadd.f32 %v1814_v9, %v1756_v16  ;;  %v1849_v34 = vadd.f32 %v1813_v37, %v1757_v0  ;;  %v1998_v14 = vsel %vm1431_vm2, %v1996_v43, %v1997_v6  ;;  %v9864_v37 = vld [vmem:[#allocation40_spill] sm:$0xff]  ;;  %v9866_v9 = vld [vmem:[#allocation43_spill] sm:$0xff] }
 0x140   : > { %v2256_v23 = vmul.f32 %v9860_v62, %v6497_v25  ;;  %v2168_v12 = vrot.slane %v2152_v10, 3  ;;  %v2220_v61 = vrot.slane %v2204_v26, 3  ;;  %v7020_v41 = vmul.f32 %v9861_v38, %v6906_v19  ;;  %v9867_v16 = vld [vmem:[#allocation56_spill] sm:$0xff]  ;;  %v9874_v25 = vld [vmem:[#allocation62_spill] sm:$0xff] }
 0x141   : > { %v7024_v54 = vmul.f32 %v9862_v1, %v6910_v5  ;;  %v1940_v2 = vadd.f32 %v1906_v44, %v1848_v20  ;;  %v1941_v22 = vadd.f32 %v1905_v33, %v1849_v34  ;;  %v7028_v4 = vmul.f32 %v7000_v60, %v9863_v39  ;;  %v9868_v44 = vld [vmem:[#allocation46_spill] sm:$0xff] }
 0x142   : > { %v2272_v49 = vrot.slane %v2256_v23, 3  ;;  %v2324_v57 = vrot.slane %v7020_v41, 3  ;;  %v2417_v7 = vmul.f32 %v9864_v37, %v9863_v39  ;;  %v7036_v36 = vmul.f32 %v6971_v50, %v9865_v42  ;;  %v7052_v23 = vld [vmem:[#allocation2 + $0xe8] sm:$0xff] }
 0x143   : > { %v2032_v8 = vadd.f32 %v1998_v14, %v1940_v2  ;;  %v2033_v63 = vadd.f32 %v1997_v6, %v1941_v22  ;;  %v9368_v33 = vrot.slane %v7028_v4, 4  ;;  %v2510_v43 = vmul.f32 %v9866_v9, %v9865_v42  ;;  %v9869_v14 = vld [vmem:[#allocation60_spill] sm:$0xff]  ;;  %9870 = vst [vmem:[#allocation58_spill] sm:$0xff] %v7052_v23 }
 0x144   : > { %v2454_v53 = vrot.slane %v2417_v7, 4  ;;  %v9371_v17 = vrot.slane %v7036_v36, 4  ;;  %v7044_v0 = vmul.f32 %v7007_v27, %v9867_v16  ;;  %v2602_v10 = vmul.f32 %v9868_v44, %v9867_v16  ;;  %v7058_v7 = vld [vmem:[#allocation2 + $0xb8] sm:$0xff] }
 0x145   : > { %v2084_v26 = vadd.f32 %v2064_v56, %v2032_v8  ;;  %v2085_v20 = vadd.f32 %v2064_v56, %v2033_v63  ;;  %v2546_v34 = vrot.slane %v2510_v43, 4  ;;  %v7050_v6 = vmul.f32 %v7011_v15, %v9869_v14  ;;  %9871 = vst [vmem:[#allocation15_spill] sm:$0xff] %v7058_v7 }
 0x146   : > { %v2455_v41 = vsel %vm2440_vm3, %v9368_v33, %v2454_v53  ;;  %v9373_v2 = vrot.slane %v7044_v0, 4  ;;  %v2638_v22 = vrot.slane %v2602_v10, 4  ;;  %v2694_v8 = vmul.f32 %v7058_v7, %v9869_v14  ;;  %v7071_v10 = vld [vmem:[#allocation2 + $0xc8] sm:$0xff] }
 0x147   : > { %v2136_v56 = vadd.f32 %v2116_v30, %v2084_v26  ;;  %v2137_v63 = vadd.f32 %v2116_v30, %v2085_v20  ;;  %v2547_v43 = vsel %vm2440_vm3, %v9371_v17, %v2546_v34  ;;  %v7075_v16 = vmul.f32 %v7071_v10, %v9872_v18  ;;  %v9873_v26 = vld [vmem:[#allocation45_spill] sm:$0xff] }
 0x148   : > { %v7069_v53 = vsel %vm2440_vm3, %v9373_v2, %v2638_v22  ;;  %v2730_v33 = vrot.slane %v2694_v8, 4  ;;  %v2786_v30 = vmul.f32 %v9872_v18, %v9873_v26  ;;  %v7079_v20 = vld [vmem:[#allocation2 + $0x100] sm:$0xff]  ;;  %v7083_v14 = vmul.f32 %v9874_v25, %v6906_v19  ;;  %v9876_v18 = vld [vmem:[#allocation63_spill] sm:$0xff] }
 0x149   : > { %v2188_v34 = vadd.f32 %v2168_v12, %v2136_v56  ;;  %v2189_v17 = vadd.f32 %v2168_v12, %v2137_v63  ;;  %v2878_v22 = vmul.f32 %v9874_v25, %v7052_v23  ;;  %v9875_v8 = vrot.slane %v7050_v6, 4 }
 0x14a   : > { %v9378_v42 = vrot.slane %v7075_v16, 4  ;;  %v2822_v39 = vrot.slane %v2786_v30, 4  ;;  %v7093_v1 = vmul.f32 %v9876_v18, %v6910_v5  ;;  %v9380_v63 = vrot.slane %v7083_v14, 4 }
 0x14b   : > { %v2731_v2 = vsel %vm2440_vm3, %v9875_v8, %v2730_v33  ;;  %v2240_v56 = vadd.f32 %v2220_v61, %v2188_v34  ;;  %v2241_v12 = vadd.f32 %v2220_v61, %v2189_v17  ;;  %v2914_v38 = vrot.slane %v2878_v22, 4  ;;  %v9877_v8 = vld [vmem:[#allocation64_spill] sm:$0xff]  ;;  %v9878_v22 = vld [vmem:[#allocation65_spill] sm:$0xff] }
 0x14c   : > { %v2823_v25 = vsel %vm2440_vm3, %v9378_v42, %v2822_v39  ;;  %v2970_v62 = vmul.f32 %v9876_v18, %v7079_v20  ;;  %v7104_v30 = vmul.f32 %v7000_v60, %v9877_v8  ;;  %v3062_v17 = vmul.f32 %v9864_v37, %v9877_v8  ;;  %v9879_v18 = vld [vmem:[#allocation66_spill] sm:$0xff] }
 0x14d   : > { %v2292_v11 = vadd.f32 %v2272_v49, %v2240_v56  ;;  %v2293_v31 = vadd.f32 %v2272_v49, %v2241_v12  ;;  %v7109_v61 = vsel %vm2440_vm3, %v9380_v63, %v2914_v38  ;;  %v7116_v42 = vmul.f32 %v6971_v50, %v9878_v22 }
 0x14e   : > { %v3006_v39 = vrot.slane %v2970_v62, 4  ;;  %v3155_v33 = vmul.f32 %v9866_v9, %v9878_v22  ;;  %v3099_v12 = vrot.slane %v3062_v17, 5  ;;  %v7122_v38 = vmul.f32 %v7007_v27, %v9879_v18 }
 0x14f   : > { %v2344_v56 = vadd.f32 %v2324_v57, %v2292_v11  ;;  %v2345_v49 = vadd.f32 %v2324_v57, %v2293_v31  ;;  %v9880_v63 = vrot.slane %v7093_v1, 4  ;;  %v9385_v34 = vrot.slane %v7116_v42, 5 }
 0x150   : > { %v3191_v8 = vrot.slane %v3155_v33, 5  ;;  %v3247_v40 = vmul.f32 %v9868_v44, %v9879_v18  ;;  %v9881_v46 = vrot.slane %v7024_v54, 3  ;;  %v9883_v57 = vrot.slane %v7104_v30, 5 }
 0x151   : > { %v3007_v62 = vsel %vm2440_vm3, %v9880_v63, %v3006_v39  ;;  %v9389_v3 = vrot.slane %v7122_v38, 5  ;;  %v9884_v39 = vld [vmem:[#allocation67_spill] sm:$0xff]  ;;  %v9885_v54 = vrot.slane %v7028_v4, 4 }
 0x152   : > { %v2396_v22 = vadd.f32 %v9881_v46, %v2344_v56  ;;  %v9882_v31 = vmov %v9881_v46  ;;  %v7137_v17 = vsel %vm3085_vm4, %v9883_v57, %v3099_v12  ;;  %v7143_v63 = vsel %vm3085_vm4, %v9385_v34, %v3191_v8  ;;  %v9886_v12 = vld [vmem:[#allocation68_spill] sm:$0xff] }
 0x153   : > { %v2397_v11 = vadd.f32 %v9882_v31, %v2345_v49  ;;  %v3283_v33 = vrot.slane %v3247_v40, 5  ;;  %v7147_v18 = vmul.f32 %v7011_v15, %v9884_v39  ;;  %v3339_v46 = vmul.f32 %v7058_v7, %v9884_v39  ;;  %v9887_v39 = vld [vmem:[#allocation69_spill] sm:$0xff] }
 0x154   : > { %v2489_v56 = vadd.f32 %v9885_v54, %v2396_v22  ;;  %v7155_v31 = vmul.f32 %v7071_v10, %v9886_v12  ;;  %v3431_v8 = vmul.f32 %v9886_v12, %v9873_v26  ;;  %v7167_v4 = vmul.f32 %v9887_v39, %v6906_v19 }
 0x155   : > { %v2490_v49 = vadd.f32 %v2455_v41, %v2397_v11  ;;  %v7162_v40 = vsel %vm3085_vm4, %v9389_v3, %v3283_v33  ;;  %v9391_v57 = vrot.slane %v7147_v18, 5  ;;  %v3375_v34 = vrot.slane %v3339_v46, 5  ;;  %v9889_v3 = vld [vmem:[#allocation70_spill] sm:$0xff] }
 0x156   : > { %v9888_v41 = vrot.slane %v7036_v36, 4  ;;  %v9392_v54 = vrot.slane %v7155_v31, 5  ;;  %v3467_v51 = vrot.slane %v3431_v8, 5  ;;  %v3523_v33 = vmul.f32 %v9887_v39, %v7052_v23 }
 0x157   : > { %v2582_v11 = vadd.f32 %v2547_v43, %v2490_v49  ;;  %v7175_v12 = vsel %vm3085_vm4, %v9391_v57, %v3375_v34  ;;  %v7182_v55 = vmul.f32 %v9889_v3, %v6910_v5  ;;  %v9890_v36 = vrot.slane %v7044_v0, 4  ;;  %v9891_v57 = vld [vmem:[#allocation71_spill] sm:$0xff] }
 0x158   : > { %v2581_v22 = vadd.f32 %v9888_v41, %v2489_v56  ;;  %v7190_v49 = vsel %vm3085_vm4, %v9392_v54, %v3467_v51  ;;  %v3615_v34 = vmul.f32 %v9889_v3, %v7079_v20  ;;  %v3559_v8 = vrot.slane %v3523_v33, 5  ;;  %v9893_v51 = vld [vmem:[#allocation72_spill] sm:$0xff] }
 0x159   : > { %v2674_v56 = vadd.f32 %v7069_v53, %v2582_v11  ;;  %v7197_v46 = vmul.f32 %v7000_v60, %v9891_v57  ;;  %v3707_v0 = vmul.f32 %v9864_v37, %v9891_v57  ;;  %v9892_v53 = vrot.slane %v7050_v6, 4  ;;  %v7330_v57 = vld [vmem:[#allocation2 + $0x90] sm:$0xff] }
 0x15a   : > { %v2673_v43 = vadd.f32 %v9890_v36, %v2581_v22  ;;  %v3651_v36 = vrot.slane %v3615_v34, 5  ;;  %v7205_v54 = vmul.f32 %v6971_v50, %v9893_v51  ;;  %v9894_v33 = vrot.slane %v7167_v4, 5 }
 0x15b   : > { %v2766_v11 = vadd.f32 %v2731_v2, %v2674_v56  ;;  %v9395_v3 = vrot.slane %v7197_v46, 6  ;;  %v3744_v39 = vrot.slane %v3707_v0, 6  ;;  %v3800_v37 = vmul.f32 %v9866_v9, %v9893_v51 }
 0x15c   : > { %v2765_v22 = vadd.f32 %v9892_v53, %v2673_v43  ;;  %v7210_v41 = vsel %vm3085_vm4, %v9894_v33, %v3559_v8  ;;  %v9895_v6 = vrot.slane %v7075_v16, 4  ;;  %v9896_v56 = vrot.slane %v7182_v55, 5  ;;  %v9897_v33 = vld [vmem:[#allocation73_spill] sm:$0xff] }
 0x15d   : > { %v2858_v2 = vadd.f32 %v2823_v25, %v2766_v11  ;;  %v9398_v53 = vrot.slane %v7205_v54, 6  ;;  %v7226_v8 = vsel %vm3730_vm5, %v9395_v3, %v3744_v39  ;;  %v3836_v0 = vrot.slane %v3800_v37, 6  ;;  %v9900_v3 = vld [vmem:[#allocation75_spill] sm:$0xff] }
 0x15e   : > { %v2857_v43 = vadd.f32 %v9895_v6, %v2765_v22  ;;  %v7220_v34 = vsel %vm3085_vm4, %v9896_v56, %v3651_v36  ;;  %v7230_v9 = vmul.f32 %v7007_v27, %v9897_v33  ;;  %v3892_v25 = vmul.f32 %v9868_v44, %v9897_v33  ;;  %v9899_v36 = vld [vmem:[#allocation74_spill] sm:$0xff] }
 0x15f   : > { %v9898_v16 = vrot.slane %v7083_v14, 4  ;;  %v2950_v11 = vadd.f32 %v7109_v61, %v2858_v2  ;;  %v7239_v6 = vmul.f32 %v7011_v15, %v9899_v36  ;;  %v3984_v39 = vmul.f32 %v7058_v7, %v9899_v36  ;;  %v7336_v7 = vld [vmem:[#allocation2 + $0xa8] sm:$0xff] }
 0x160   : > { %v7246_v37 = vsel %vm3730_vm5, %v9398_v53, %v3836_v0  ;;  %v9400_v56 = vrot.slane %v7230_v9, 6  ;;  %v3928_v44 = vrot.slane %v3892_v25, 6  ;;  %v7251_v14 = vmul.f32 %v7071_v10, %v9900_v3  ;;  %v9902_v53 = vld [vmem:[#allocation76_spill] sm:$0xff] }
 0x161   : > { %v2949_v22 = vadd.f32 %v9898_v16, %v2857_v43  ;;  %v9901_v61 = vrot.slane %v7093_v1, 4  ;;  %v3042_v2 = vadd.f32 %v3007_v62, %v2950_v11  ;;  %v9401_v16 = vrot.slane %v7239_v6, 6 }
 0x162   : > { %v4020_v33 = vrot.slane %v3984_v39, 6  ;;  %v7259_v36 = vsel %vm3730_vm5, %v9400_v56, %v3928_v44  ;;  %v4076_v0 = vmul.f32 %v9900_v3, %v9873_v26  ;;  %v9403_v25 = vrot.slane %v7251_v14, 6 }
 0x163   : > { %v3041_v43 = vadd.f32 %v9901_v61, %v2949_v22  ;;  %v7266_v51 = vmul.f32 %v9902_v53, %v6906_v19  ;;  %v9903_v1 = vrot.slane %v7104_v30, 5  ;;  %v3135_v22 = vadd.f32 %v7137_v17, %v3042_v2  ;;  %v9904_v61 = vld [vmem:[#allocation77_spill] sm:$0xff] }
 0x164   : > { %v7274_v11 = vsel %vm3730_vm5, %v9401_v16, %v4020_v33  ;;  %v4168_v39 = vmul.f32 %v9902_v53, %v7052_v23  ;;  %v4112_v26 = vrot.slane %v4076_v0, 6  ;;  %v7281_v56 = vmul.f32 %v9904_v61, %v6910_v5  ;;  %v9906_v16 = vld [vmem:[#allocation6_spill] sm:$0xff] }
 0x165   : > { %v3134_v62 = vadd.f32 %v9903_v1, %v3041_v43  ;;  %v4260_v30 = vmul.f32 %v9904_v61, %v7079_v20  ;;  %v9905_v17 = vrot.slane %v7116_v42, 5  ;;  %v3227_v2 = vadd.f32 %v7143_v63, %v3135_v22  ;;  %v7288_v1 = vld [vmem:[#allocation2 + $0x48] sm:$0xff]  ;;  %v7298_v20 = vld [vmem:[#allocation2 + $0x50] sm:$0xff] }
 0x166   : > { %v4204_v33 = vrot.slane %v4168_v39, 6  ;;  %v508_v0 = vmul.f32 %v7288_v1, %v9906_v16  ;;  %v7295_v44 = vsel %vm3730_vm5, %v9403_v25, %v4112_v26  ;;  %v9408_v5 = vrot.slane %v7281_v56, 6  ;;  %v7310_v26 = vld [vmem:[#allocation2 + $0x60] sm:$0xff]  ;;  %v9910_v25 = vld [vmem:[#allocation7_spill] sm:$0xff] }
 0x167   : > { %v3226_v43 = vadd.f32 %v9905_v17, %v3134_v62  ;;  %v4296_v53 = vrot.slane %v4260_v30, 6  ;;  %v509_v42 = vmul.f32 %v7298_v20, %v9906_v16  ;;  %v9907_v63 = vrot.slane %v7122_v38, 5  ;;  %9909 = vst [vmem:[#allocation59_spill] sm:$0xff] %v7310_v26 }
 0x168   : > { %v3319_v22 = vadd.f32 %v7162_v40, %v3227_v2  ;;  %v9908_v39 = vrot.slane %v7266_v51, 6  ;;  %v544_v30 = vmul.f32 %v7310_v26, %v9910_v25  ;;  %v545_v38 = vmul.f32 %v7000_v60, %v9910_v25  ;;  %v9911_v40 = vld [vmem:[#allocation8_spill] sm:$0xff] }
 0x169   : > { %v3318_v62 = vadd.f32 %v9907_v63, %v3226_v43  ;;  %v7317_v61 = vsel %vm3730_vm5, %v9408_v5, %v4296_v53  ;;  %v7321_v43 = vld [vmem:[#allocation2 + $0x78] sm:$0xff]  ;;  %v9912_v63 = vrot.slane %v7147_v18, 5  ;;  %v9913_v53 = vld [vmem:[#allocation9_spill] sm:$0xff]  ;;  %v653_v18 = vmul.f32 %v7011_v15, %v9914_v13 }
 0x16a   : > { %v7308_v17 = vsel %vm3730_vm5, %v9908_v39, %v4204_v33  ;;  %v580_v2 = vmul.f32 %v7321_v43, %v9911_v40  ;;  %v581_v33 = vmul.f32 %v6971_v50, %v9911_v40  ;;  %v3411_v16 = vadd.f32 %v7175_v12, %v3319_v22 }
 0x16b   : > { %v3410_v39 = vadd.f32 %v9912_v63, %v3318_v62  ;;  %v560_v3 = vadd.f32 %v544_v30, %v508_v0  ;;  %v616_v5 = vmul.f32 %v7330_v57, %v9913_v53  ;;  %v561_v25 = vadd.f32 %v545_v38, %v509_v42  ;;  %v7345_v30 = vld [vmem:[#allocation2 + $0xc0] sm:$0xff] }
 0x16c   : > { %v617_v23 = vmul.f32 %v7007_v27, %v9913_v53  ;;  %v652_v40 = vmul.f32 %v7336_v7, %v9914_v13  ;;  %v9915_v12 = vrot.slane %v7155_v31, 5  ;;  %v3503_v62 = vadd.f32 %v7190_v49, %v3411_v16  ;;  %v9917_v16 = vld [vmem:[#allocation13_spill] sm:$0xff] }
 0x16d   : > { %v596_v22 = vadd.f32 %v580_v2, %v560_v3  ;;  %v688_v42 = vmul.f32 %v7345_v30, %v9842_v48  ;;  %v597_v38 = vadd.f32 %v581_v33, %v561_v25  ;;  %v689_v63 = vmul.f32 %v7071_v10, %v9842_v48  ;;  %v9918_v33 = vld [vmem:[#allocation20_spill] sm:$0xff] }
 0x16e   : > { %v3502_v0 = vadd.f32 %v9915_v12, %v3410_v39  ;;  %v724_v53 = vmul.f32 %v9844_v47, %v6870_v59  ;;  %v725_v13 = vmul.f32 %v9844_v47, %v6906_v19  ;;  %v9916_v31 = vrot.slane %v7167_v4, 5 }
 0x16f   : > { %v3595_v3 = vadd.f32 %v7210_v41, %v3503_v62  ;;  %v632_v49 = vadd.f32 %v616_v5, %v596_v22  ;;  %v760_v2 = vmul.f32 %v7288_v1, %v9917_v16  ;;  %v633_v12 = vadd.f32 %v617_v23, %v597_v38 }
 0x170   : > { %v3594_v39 = vadd.f32 %v9916_v31, %v3502_v0  ;;  %v761_v25 = vmul.f32 %v7298_v20, %v9917_v16  ;;  %v853_v48 = vmul.f32 %v7310_v26, %v9918_v33  ;;  %v854_v45 = vmul.f32 %v7000_v60, %v9918_v33 }
 0x171   : > { %v9919_v47 = vrot.slane %v7182_v55, 5  ;;  %v3687_v0 = vadd.f32 %v7220_v34, %v3595_v3  ;;  %v668_v41 = vadd.f32 %v652_v40, %v632_v49  ;;  %v796_v5 = vrot.slane %v760_v2, 1 }
 0x172   : > { %v669_v62 = vadd.f32 %v653_v18, %v633_v12  ;;  %v797_v22 = vrot.slane %v761_v25, 1  ;;  %v888_v31 = vrot.slane %v853_v48, 1  ;;  %v889_v23 = vrot.slane %v854_v45, 1 }
 0x173   : > { %v3686_v4 = vadd.f32 %v9919_v47, %v3594_v39  ;;  %v9920_v38 = vrot.slane %v7197_v46, 6  ;;  %v3780_v35 = vadd.f32 %v7226_v8, %v3687_v0  ;;  %v704_v26 = vadd.f32 %v688_v42, %v668_v41 }
 0x174   : > { %v945_v33 = vmul.f32 %v7321_v43, %v5601_v28  ;;  %v705_v60 = vadd.f32 %v689_v63, %v669_v62  ;;  %v798_v55 = vsel %vm786_vm1, %v796_v5, %v797_v22  ;;  %v890_v47 = vsel %vm786_vm1, %v888_v31, %v889_v23 }
 0x175   : > { %v3779_v16 = vadd.f32 %v9920_v38, %v3686_v4  ;;  %v946_v34 = vmul.f32 %v6971_v50, %v5601_v28  ;;  %v9921_v48 = vrot.slane %v7205_v54, 6  ;;  %v3872_v46 = vadd.f32 %v7246_v37, %v3780_v35 }
 0x176   : > { %v740_v40 = vadd.f32 %v724_v53, %v704_v26  ;;  %v980_v18 = vrot.slane %v945_v33, 1  ;;  %v741_v8 = vadd.f32 %v725_v13, %v705_v60  ;;  %v1037_v39 = vmul.f32 %v7330_v57, %v5628_v32 }
 0x177   : > { %v3871_v45 = vadd.f32 %v9921_v48, %v3779_v16  ;;  %v981_v42 = vrot.slane %v946_v34, 1  ;;  %v1038_v63 = vmul.f32 %v7007_v27, %v5628_v32  ;;  %v9922_v3 = vrot.slane %v7230_v9, 6 }
 0x178   : > { %v3964_v2 = vadd.f32 %v7259_v36, %v3872_v46  ;;  %v833_v12 = vadd.f32 %v798_v55, %v740_v40  ;;  %v1129_v54 = vmul.f32 %v7336_v7, %v5633_v24  ;;  %v834_v35 = vadd.f32 %v797_v22, %v741_v8 }
 0x179   : > { %v3963_v49 = vadd.f32 %v9922_v3, %v3871_v45  ;;  %v982_v37 = vsel %vm786_vm1, %v980_v18, %v981_v42  ;;  %v1072_v13 = vrot.slane %v1037_v39, 1  ;;  %v1073_v60 = vrot.slane %v1038_v63, 1 }
 0x17a   : > { %v9923_v26 = vrot.slane %v7239_v6, 6  ;;  %v4056_v16 = vadd.f32 %v7274_v11, %v3964_v2  ;;  %v925_v25 = vadd.f32 %v890_v47, %v833_v12  ;;  %v1130_v9 = vmul.f32 %v7011_v15, %v5633_v24 }
 0x17b   : > { %v926_v33 = vadd.f32 %v889_v23, %v834_v35  ;;  %v1074_v36 = vsel %vm786_vm1, %v1072_v13, %v1073_v60  ;;  %v1164_v4 = vrot.slane %v1129_v54, 1  ;;  %v1221_v0 = vmul.f32 %v7345_v30, %v9768_v52 }
 0x17c   : > { %v4055_v53 = vadd.f32 %v9923_v26, %v3963_v49  ;;  %v9924_v41 = vrot.slane %v7251_v14, 6  ;;  %v4148_v62 = vadd.f32 %v7295_v44, %v4056_v16  ;;  %v1017_v6 = vadd.f32 %v982_v37, %v925_v25  ;;  %v9929_v25 = vld [vmem:[#allocation28_spill] sm:$0xff] }
 0x17d   : > { %v1165_v22 = vrot.slane %v1130_v9, 1  ;;  %v1018_v31 = vadd.f32 %v981_v42, %v926_v33  ;;  %v1222_v11 = vmul.f32 %v7071_v10, %v9768_v52  ;;  %v1256_v38 = vrot.slane %v1221_v0, 1  ;;  %v9930_v33 = vld [vmem:[#allocation51_spill] sm:$0xff] }
 0x17e   : > { %v4147_v5 = vadd.f32 %v9924_v41, %v4055_v53  ;;  %v1313_v23 = vmul.f32 %v9771_v21, %v6870_v59  ;;  %v9925_v55 = vrot.slane %v7266_v51, 6  ;;  %v4240_v34 = vadd.f32 %v7308_v17, %v4148_v62  ;;  %v9928_v53 = vld [vmem:[#allocation57_spill] sm:$0xff] }
 0x17f   : > { %v1109_v48 = vadd.f32 %v1074_v36, %v1017_v6  ;;  %v1166_v14 = vsel %vm786_vm1, %v1164_v4, %v1165_v22  ;;  %v1110_v45 = vadd.f32 %v1073_v60, %v1018_v31  ;;  %v1257_v44 = vrot.slane %v1222_v11, 1 }
 0x180   : > { %v4239_v47 = vadd.f32 %v9925_v55, %v4147_v5  ;;  %v1314_v46 = vmul.f32 %v9771_v21, %v6906_v19  ;;  %v1348_v40 = vrot.slane %v1313_v23, 1  ;;  %v9926_v18 = vrot.slane %v7281_v56, 6 }
 0x181   : > { %v4332_v42 = vadd.f32 %v7317_v61, %v4240_v34  ;;  %v1201_v39 = vadd.f32 %v1166_v14, %v1109_v48  ;;  %v1405_v51 = vmul.f32 %v7288_v1, %v9774_v58  ;;  %v1202_v63 = vadd.f32 %v1165_v22, %v1110_v45  ;;  %v9927_v61 = vld [vmem:[#allocation59_spill] sm:$0xff]  ;;  %v9933_v34 = vld [vmem:[#allocation34_spill] sm:$0xff] }
 0x182   : > { %v4331_v8 = vadd.f32 %v9926_v18, %v4239_v47  ;;  %v1258_v17 = vsel %vm786_vm1, %v1256_v38, %v1257_v44  ;;  %v1349_v3 = vrot.slane %v1314_v46, 1  ;;  %v1406_v49 = vmul.f32 %v7298_v20, %v9774_v58  ;;  %v9932_v38 = vld [vmem:[#allocation33_spill] sm:$0xff] }
 0x183   : > { %v4368_v12 = vrot.slane %v4332_v42, 5  ;;  %v1293_v54 = vadd.f32 %v1258_v17, %v1201_v39  ;;  %v1441_v35 = vrot.slane %v1405_v51, 2  ;;  %v1294_v37 = vadd.f32 %v1257_v44, %v1202_v63  ;;  %v9934_v39 = vld [vmem:[#allocation35_spill] sm:$0xff] }
 0x184   : > { %v4367_v2 = vrot.slane %v4331_v8, 5  ;;  %v1350_v56 = vsel %vm786_vm1, %v1348_v40, %v1349_v3  ;;  %v1442_v13 = vrot.slane %v1406_v49, 2  ;;  %v1498_v60 = vmul.f32 %v9927_v61, %v9779_v29 }
 0x185   : > { %v1385_v26 = vadd.f32 %v1350_v56, %v1293_v54  ;;  %v1499_v16 = vmul.f32 %v9928_v53, %v9779_v29  ;;  %v1590_v9 = vmul.f32 %v7321_v43, %v9929_v25  ;;  %v1386_v4 = vadd.f32 %v1349_v3, %v1294_v37  ;;  %v9935_v54 = vld [vmem:[#allocation36_spill] sm:$0xff] }
 0x186   : > { %v4369_v1 = vsel %vm3085_vm4, %v4367_v2, %v4368_v12  ;;  %v1443_v0 = vsel %vm1431_vm2, %v1441_v35, %v1442_v13  ;;  %v1533_v41 = vrot.slane %v1498_v60, 2  ;;  %v1591_v6 = vmul.f32 %v6971_v50, %v9929_v25  ;;  %v9936_v60 = vld [vmem:[#allocation41_spill] sm:$0xff] }
 0x187   : > { %v7429_v36 = vadd.f32 %v9930_v33, %v4369_v1  ;;  %v1478_v5 = vadd.f32 %v1443_v0, %v1385_v26  ;;  %v1534_v62 = vrot.slane %v1499_v16, 2  ;;  %v1625_v22 = vrot.slane %v1590_v9, 2  ;;  %v9937_v9 = vld [vmem:[#allocation42_spill] sm:$0xff] }
 0x188   : > { %v1479_v11 = vadd.f32 %v1442_v13, %v1386_v4  ;;  %v1682_v43 = vmul.f32 %v7330_v57, %v9932_v38  ;;  %v1683_v23 = vmul.f32 %v7007_v27, %v9932_v38  ;;  %v1626_v47 = vrot.slane %v1591_v6, 2  ;;  %v9938_v4 = vld [vmem:[#allocation44_spill] sm:$0xff] }
 0x189   : > { %9931 = vst [vmem:[#allocation29_spill] sm:$0xff] %v7429_v36  ;;  %v4414_v31 = vsel %vm396_vm0, %v7429_v36, 0.0  ;;  %v1535_v55 = vsel %vm1431_vm2, %v1533_v41, %v1534_v62  ;;  %v1774_v48 = vmul.f32 %v7336_v7, %v9933_v34  ;;  %v1775_v14 = vmul.f32 %v7011_v15, %v9933_v34  ;;  %v9954_v36 = vld [vmem:[#allocation58_spill] sm:$0xff] }
 0x18a   : > { %4415 = vadd.xlane.f32.xlu0 %v4414_v31  ;;  %v1570_v45 = vadd.f32 %v1535_v55, %v1478_v5  ;;  %v1571_v44 = vadd.f32 %v1534_v62, %v1479_v11  ;;  %v1717_v46 = vrot.slane %v1682_v43, 2  ;;  %v1718_v40 = vrot.slane %v1683_v23, 2  ;;  %v9939_v11 = vld [vmem:[#allocation47_spill] sm:$0xff] }
 0x18b   : > { %v1627_v18 = vsel %vm1431_vm2, %v1625_v22, %v1626_v47  ;;  %v1809_v8 = vrot.slane %v1774_v48, 2  ;;  %v1810_v42 = vrot.slane %v1775_v14, 2  ;;  %v1866_v51 = vmul.f32 %v7345_v30, %v9934_v39  ;;  %v9941_v14 = vld [vmem:[#allocation50_spill] sm:$0xff] }
 0x18c   : > { %v1662_v63 = vadd.f32 %v1627_v18, %v1570_v45  ;;  %v1663_v17 = vadd.f32 %v1626_v47, %v1571_v44  ;;  %v1719_v3 = vsel %vm1431_vm2, %v1717_v46, %v1718_v40  ;;  %v1867_v49 = vmul.f32 %v7071_v10, %v9934_v39  ;;  %v9940_v47 = vld [vmem:[#allocation48_spill] sm:$0xff]  ;;  %v9942_v46 = vld [vmem:[#allocation53_spill] sm:$0xff]  ;;  %v9943_v18 = vld [vmem:[#allocation54_spill] sm:$0xff] }
 0x18d   : > { %v1811_v2 = vsel %vm1431_vm2, %v1809_v8, %v1810_v42  ;;  %v1901_v12 = vrot.slane %v1866_v51, 2  ;;  %v1958_v35 = vmul.f32 %v9935_v54, %v6870_v59  ;;  %v1959_v37 = vmul.f32 %v9935_v54, %v6906_v19 }
 0x18e   : > { %v1754_v56 = vadd.f32 %v1719_v3, %v1662_v63  ;;  %v1755_v13 = vadd.f32 %v1718_v40, %v1663_v17  ;;  %v1902_v61 = vrot.slane %v1867_v49, 2  ;;  %v2047_v1 = vmul.f32 %v7298_v20, %v9936_v60 }
 0x18f   : > { %v1993_v26 = vrot.slane %v1958_v35, 2  ;;  %v1994_v16 = vrot.slane %v1959_v37, 2  ;;  %v2099_v33 = vmul.f32 %v9928_v53, %v9937_v9  ;;  %v2151_v0 = vmul.f32 %v6971_v50, %v9938_v4  ;;  %v9944_v37 = vld [vmem:[#allocation55_spill] sm:$0xff] }
 0x190   : > { %v1846_v41 = vadd.f32 %v1811_v2, %v1754_v56  ;;  %v1847_v5 = vadd.f32 %v1810_v42, %v1755_v13  ;;  %v1903_v59 = vsel %vm1431_vm2, %v1901_v12, %v1902_v61  ;;  %v2063_v62 = vrot.slane %v2047_v1, 3  ;;  %v7478_v42 = vld [vmem:[#allocation2 + $0x58] sm:$0xff]  ;;  %v7488_v1 = vld [vmem:[#allocation2 + $0x70] sm:$0xff] }
 0x191   : > { %v1995_v6 = vsel %vm1431_vm2, %v1993_v26, %v1994_v16  ;;  %v2115_v22 = vrot.slane %v2099_v33, 3  ;;  %v2167_v31 = vrot.slane %v2151_v0, 3  ;;  %v2203_v43 = vmul.f32 %v7007_v27, %v9939_v11  ;;  %v9945_v33 = vld [vmem:[#allocation56_spill] sm:$0xff] }
 0x192   : > { %v1938_v23 = vadd.f32 %v1903_v59, %v1846_v41  ;;  %v1939_v55 = vadd.f32 %v1902_v61, %v1847_v5  ;;  %v2255_v48 = vmul.f32 %v7011_v15, %v9940_v47  ;;  %v2307_v45 = vmul.f32 %v7071_v10, %v9941_v14  ;;  %v7500_v5 = vld [vmem:[#allocation2 + $0x88] sm:$0xff] }
 0x193   : > { %v2219_v44 = vrot.slane %v2203_v43, 3  ;;  %v7472_v40 = vmul.f32 %v9942_v46, %v6906_v19  ;;  %v7476_v8 = vmul.f32 %v7298_v20, %v9943_v18  ;;  %v2415_v51 = vmul.f32 %v7478_v42, %v9943_v18 }
 0x194   : > { %v2030_v63 = vadd.f32 %v1995_v6, %v1938_v23  ;;  %v2031_v17 = vadd.f32 %v1994_v16, %v1939_v55  ;;  %v2271_v3 = vrot.slane %v2255_v48, 3  ;;  %v2323_v49 = vrot.slane %v2307_v45, 3 }
 0x195   : > { %v2375_v2 = vrot.slane %v7472_v40, 3  ;;  %v9427_v12 = vrot.slane %v7476_v8, 4  ;;  %v2451_v35 = vrot.slane %v2415_v51, 4  ;;  %v7486_v56 = vmul.f32 %v9928_v53, %v9944_v37  ;;  %v7509_v40 = vld [vmem:[#allocation2 + $0xa0] sm:$0xff] }
 0x196   : > { %v2082_v13 = vadd.f32 %v2063_v62, %v2030_v63  ;;  %v2083_v61 = vadd.f32 %v2063_v62, %v2031_v17  ;;  %v2508_v26 = vmul.f32 %v7488_v1, %v9944_v37  ;;  %v7494_v16 = vmul.f32 %v6971_v50, %v9945_v33  ;;  %v9946_v62 = vld [vmem:[#allocation60_spill] sm:$0xff]  ;;  %9947 = vst [vmem:[#allocation25_spill] sm:$0xff] %v7509_v40  ;;  %v9948_v17 = vld [vmem:[#allocation61_spill] sm:$0xff] }
 0x197   : > { %v2452_v0 = vsel %vm2440_vm3, %v9427_v12, %v2451_v35  ;;  %v2542_v41 = vrot.slane %v7486_v56, 4  ;;  %v2600_v59 = vmul.f32 %v7500_v5, %v9945_v33  ;;  %v7506_v6 = vmul.f32 %v7007_v27, %v9946_v62 }
 0x198   : > { %v2134_v43 = vadd.f32 %v2115_v22, %v2082_v13  ;;  %v2135_v23 = vadd.f32 %v2115_v22, %v2083_v61  ;;  %v2543_v55 = vrot.slane %v2508_v26, 4  ;;  %v9433_v48 = vrot.slane %v7494_v16, 4  ;;  %v9949_v22 = vld [vmem:[#allocation15_spill] sm:$0xff] }
 0x199   : > { %v2635_v45 = vrot.slane %v2600_v59, 4  ;;  %v2692_v51 = vmul.f32 %v7509_v40, %v9946_v62  ;;  %v7516_v35 = vmul.f32 %v7011_v15, %v9948_v17  ;;  %v2784_v61 = vmul.f32 %v9949_v22, %v9948_v17  ;;  %v9950_v62 = vld [vmem:[#allocation62_spill] sm:$0xff] }
 0x19a   : > { %v2186_v56 = vadd.f32 %v2167_v31, %v2134_v43  ;;  %v2187_v12 = vadd.f32 %v2167_v31, %v2135_v23  ;;  %v2544_v13 = vsel %vm2440_vm3, %v2542_v41, %v2543_v55  ;;  %v7527_v63 = vmul.f32 %v7071_v10, %v9950_v62  ;;  %v7529_v31 = vld [vmem:[#allocation2 + $0xd0] sm:$0xff] }
 0x19b   : > { %v2636_v26 = vsel %vm2440_vm3, %v9433_v48, %v2635_v45  ;;  %v2727_v59 = vrot.slane %v2692_v51, 4  ;;  %v2819_v43 = vrot.slane %v2784_v61, 4  ;;  %9951 = vst [vmem:[#allocation14_spill] sm:$0xff] %v7529_v31  ;;  %v2876_v23 = vmul.f32 %v7529_v31, %v9950_v62  ;;  %v9953_v51 = vld [vmem:[#allocation63_spill] sm:$0xff] }
 0x19c   : > { %v2238_v33 = vadd.f32 %v2219_v44, %v2186_v56  ;;  %v2239_v37 = vadd.f32 %v2219_v44, %v2187_v12  ;;  %v9952_v55 = vrot.slane %v7506_v6, 4  ;;  %v7539_v48 = vmul.f32 %v9953_v51, %v6906_v19 }
 0x19d   : > { %v2968_v56 = vmul.f32 %v9953_v51, %v9954_v36  ;;  %v9955_v61 = vrot.slane %v7516_v35, 4  ;;  %v2911_v62 = vrot.slane %v2876_v23, 4  ;;  %v9959_v51 = vld [vmem:[#allocation66_spill] sm:$0xff] }
 0x19e   : > { %v2728_v17 = vsel %vm2440_vm3, %v9952_v55, %v2727_v59  ;;  %v2290_v44 = vadd.f32 %v2271_v3, %v2238_v33  ;;  %v2291_v12 = vadd.f32 %v2271_v3, %v2239_v37  ;;  %v9438_v46 = vrot.slane %v7539_v48, 4  ;;  %v9956_v59 = vld [vmem:[#allocation64_spill] sm:$0xff]  ;;  %v9958_v37 = vld [vmem:[#allocation65_spill] sm:$0xff] }
 0x19f   : > { %v2820_v18 = vsel %vm2440_vm3, %v9955_v61, %v2819_v43  ;;  %v3003_v14 = vrot.slane %v2968_v56, 4  ;;  %v7549_v55 = vmul.f32 %v7298_v20, %v9956_v59  ;;  %v3060_v19 = vmul.f32 %v7478_v42, %v9956_v59 }
 0x1a0   : > { %v2342_v45 = vadd.f32 %v2323_v49, %v2290_v44  ;;  %v2343_v47 = vadd.f32 %v2323_v49, %v2291_v12  ;;  %v9957_v33 = vrot.slane %v7527_v63, 4  ;;  %v7558_v43 = vmul.f32 %v9928_v53, %v9958_v37 }
 0x1a1   : > { %v3004_v23 = vsel %vm2440_vm3, %v9438_v46, %v3003_v14  ;;  %v9440_v56 = vrot.slane %v7549_v55, 5  ;;  %v3096_v61 = vrot.slane %v3060_v19, 5  ;;  %v3153_v59 = vmul.f32 %v7488_v1, %v9958_v37  ;;  %v9960_v19 = vld [vmem:[#allocation67_spill] sm:$0xff] }
 0x1a2   : > { %v2912_v3 = vsel %vm2440_vm3, %v9957_v33, %v2911_v62  ;;  %v2394_v44 = vadd.f32 %v2375_v2, %v2342_v45  ;;  %v2395_v49 = vadd.f32 %v2375_v2, %v2343_v47  ;;  %v7569_v62 = vmul.f32 %v6971_v50, %v9959_v51 }
 0x1a3   : > { %v3097_v33 = vsel %vm3085_vm4, %v9440_v56, %v3096_v61  ;;  %v3188_v11 = vrot.slane %v3153_v59, 5  ;;  %v3245_v14 = vmul.f32 %v7500_v5, %v9959_v51  ;;  %v7578_v46 = vmul.f32 %v7007_v27, %v9960_v19  ;;  %v9963_v51 = vld [vmem:[#allocation68_spill] sm:$0xff] }
 0x1a4   : > { %v9961_v47 = vrot.slane %v7476_v8, 4  ;;  %v2488_v45 = vadd.f32 %v2452_v0, %v2395_v49  ;;  %v9442_v12 = vrot.slane %v7569_v62, 5  ;;  %v3337_v37 = vmul.f32 %v7509_v40, %v9960_v19 }
 0x1a5   : > { %v9962_v4 = vrot.slane %v7558_v43, 5  ;;  %v3280_v61 = vrot.slane %v3245_v14, 5  ;;  %v9445_v56 = vrot.slane %v7578_v46, 5  ;;  %v7591_v9 = vmul.f32 %v7011_v15, %v9963_v51 }
 0x1a6   : > { %v2487_v2 = vadd.f32 %v9961_v47, %v2394_v44  ;;  %v2580_v8 = vadd.f32 %v2544_v13, %v2488_v45  ;;  %v3372_v44 = vrot.slane %v3337_v37, 5  ;;  %v3429_v0 = vmul.f32 %v9949_v22, %v9963_v51  ;;  %v7613_v47 = vld [vmem:[#allocation2 + $0xe0] sm:$0xff]  ;;  %v9966_v51 = vld [vmem:[#allocation70_spill] sm:$0xff] }
 0x1a7   : > { %v3189_v59 = vsel %vm3085_vm4, %v9962_v4, %v3188_v11  ;;  %v3281_v49 = vsel %vm3085_vm4, %v9442_v12, %v3280_v61  ;;  %v9964_v4 = vld [vmem:[#allocation69_spill] sm:$0xff]  ;;  %v7617_v19 = vmul.f32 %v7613_v47, %v9966_v51 }
 0x1a8   : > { %v2579_v60 = vadd.f32 %v2542_v41, %v2487_v2  ;;  %v7601_v11 = vmul.f32 %v7071_v10, %v9964_v4  ;;  %v3521_v14 = vmul.f32 %v7529_v31, %v9964_v4  ;;  %v9965_v41 = vrot.slane %v7494_v16, 4 }
 0x1a9   : > { %v2672_v37 = vadd.f32 %v2636_v26, %v2580_v8  ;;  %v7610_v2 = vsel %vm3085_vm4, %v9445_v56, %v3372_v44  ;;  %v3464_v45 = vrot.slane %v3429_v0, 5  ;;  %v3613_v16 = vmul.f32 %v9966_v51, %v9954_v36 }
 0x1aa   : > { %v2671_v13 = vadd.f32 %v9965_v41, %v2579_v60  ;;  %v9451_v61 = vrot.slane %v7601_v11, 5  ;;  %v3556_v12 = vrot.slane %v3521_v14, 5  ;;  %v9967_v60 = vrot.slane %v7506_v6, 4  ;;  %v9969_v41 = vld [vmem:[#allocation71_spill] sm:$0xff] }
 0x1ab   : > { %v2764_v8 = vadd.f32 %v2728_v17, %v2672_v37  ;;  %v9968_v44 = vrot.slane %v7591_v9, 5  ;;  %v7630_v14 = vmul.f32 %v7298_v20, %v9969_v41  ;;  %v9448_v51 = vrot.slane %v7617_v19, 5 }
 0x1ac   : > { %v2763_v26 = vadd.f32 %v9967_v60, %v2671_v13  ;;  %v7635_v56 = vsel %vm3085_vm4, %v9451_v61, %v3556_v12  ;;  %v3648_v4 = vrot.slane %v3613_v16, 5  ;;  %v3705_v6 = vmul.f32 %v7478_v42, %v9969_v41  ;;  %v9971_v60 = vld [vmem:[#allocation72_spill] sm:$0xff]  ;;  %v9972_v42 = vld [vmem:[#allocation73_spill] sm:$0xff] }
 0x1ad   : > { %v7626_v0 = vsel %vm3085_vm4, %v9968_v44, %v3464_v45  ;;  %v9970_v17 = vrot.slane %v7516_v35, 4  ;;  %v2856_v37 = vadd.f32 %v2820_v18, %v2764_v8  ;;  %v9449_v45 = vrot.slane %v7630_v14, 6  ;;  %v9978_v61 = vld [vmem:[#allocation76_spill] sm:$0xff] }
 0x1ae   : > { %v7645_v20 = vmul.f32 %v9928_v53, %v9971_v60  ;;  %v7650_v12 = vsel %vm3085_vm4, %v9448_v51, %v3648_v4  ;;  %v3741_v44 = vrot.slane %v3705_v6, 6  ;;  %v3798_v16 = vmul.f32 %v7488_v1, %v9971_v60  ;;  %v9974_v51 = vld [vmem:[#allocation74_spill] sm:$0xff] }
 0x1af   : > { %v2855_v13 = vadd.f32 %v9970_v17, %v2763_v26  ;;  %v7656_v35 = vmul.f32 %v6971_v50, %v9972_v42  ;;  %v9973_v18 = vrot.slane %v7527_v63, 4  ;;  %v2948_v8 = vadd.f32 %v2912_v3, %v2856_v37  ;;  %v9990_v60 = vld [vmem:[#allocation10_spill] sm:$0xff] }
 0x1b0   : > { %v9450_v53 = vrot.slane %v7645_v20, 6  ;;  %v3890_v17 = vmul.f32 %v7500_v5, %v9972_v42  ;;  %v7666_v4 = vsel %vm3730_vm5, %v9449_v45, %v3741_v44  ;;  %v3833_v6 = vrot.slane %v3798_v16, 6  ;;  %v7761_v42 = vld [vmem:[#allocation2 + $0x120] sm:$0xff] }
 0x1b1   : > { %v2947_v26 = vadd.f32 %v9973_v18, %v2855_v13  ;;  %v9452_v1 = vrot.slane %v7656_v35, 6  ;;  %v7671_v50 = vmul.f32 %v7007_v27, %v9974_v51  ;;  %v9975_v63 = vrot.slane %v7539_v48, 4  ;;  %v9976_v18 = vld [vmem:[#allocation75_spill] sm:$0xff] }
 0x1b2   : > { %v3040_v13 = vadd.f32 %v3004_v23, %v2948_v8  ;;  %v3925_v37 = vrot.slane %v3890_v17, 6  ;;  %v3982_v5 = vmul.f32 %v7509_v40, %v9974_v51  ;;  %v7680_v44 = vsel %vm3730_vm5, %v9450_v53, %v3833_v6 }
 0x1b3   : > { %v3039_v3 = vadd.f32 %v9975_v63, %v2947_v26  ;;  %v7685_v45 = vmul.f32 %v7011_v15, %v9976_v18  ;;  %v4074_v48 = vmul.f32 %v9949_v22, %v9976_v18  ;;  %v9977_v23 = vrot.slane %v7549_v55, 5  ;;  %v9984_v18 = vld [vmem:[#allocation7_spill] sm:$0xff] }
 0x1b4   : > { %v3133_v8 = vadd.f32 %v3097_v33, %v3040_v13  ;;  %v7694_v17 = vsel %vm3730_vm5, %v9452_v1, %v3925_v37  ;;  %v4017_v6 = vrot.slane %v3982_v5, 6  ;;  %v7699_v16 = vmul.f32 %v7071_v10, %v9978_v61  ;;  %v9981_v5 = vld [vmem:[#allocation77_spill] sm:$0xff] }
 0x1b5   : > { %v3132_v26 = vadd.f32 %v9977_v23, %v3039_v3  ;;  %v9454_v63 = vrot.slane %v7685_v45, 6  ;;  %v4109_v53 = vrot.slane %v4074_v48, 6  ;;  %v4166_v22 = vmul.f32 %v7529_v31, %v9978_v61  ;;  %v7771_v31 = vld [vmem:[#allocation2 + $0xf8] sm:$0xff] }
 0x1b6   : > { %v9979_v55 = vrot.slane %v7558_v43, 5  ;;  %v3225_v33 = vadd.f32 %v3189_v59, %v3133_v8  ;;  %v9980_v13 = vrot.slane %v7671_v50, 6  ;;  %v7712_v23 = vmul.f32 %v7613_v47, %v9981_v5 }
 0x1b7   : > { %v7717_v48 = vsel %vm3730_vm5, %v9454_v63, %v4109_v53  ;;  %v9456_v1 = vrot.slane %v7699_v16, 6  ;;  %v4201_v61 = vrot.slane %v4166_v22, 6  ;;  %v4258_v43 = vmul.f32 %v9981_v5, %v9954_v36 }
 0x1b8   : > { %v3224_v3 = vadd.f32 %v9979_v55, %v3132_v26  ;;  %v7708_v37 = vsel %vm3730_vm5, %v9980_v13, %v4017_v6  ;;  %v9982_v59 = vrot.slane %v7569_v62, 5  ;;  %v3317_v8 = vadd.f32 %v3281_v49, %v3225_v33  ;;  %v9983_v55 = vld [vmem:[#allocation6_spill] sm:$0xff]  ;;  %v9986_v6 = vld [vmem:[#allocation8_spill] sm:$0xff] }
 0x1b9   : > { %v514_v13 = vmul.f32 %v7330_v57, %v9983_v55  ;;  %v7730_v53 = vsel %vm3730_vm5, %v9456_v1, %v4201_v61  ;;  %v4293_v63 = vrot.slane %v4258_v43, 6  ;;  %v515_v22 = vmul.f32 %v7007_v27, %v9983_v55  ;;  %v7739_v33 = vld [vmem:[#allocation2 + $0x108] sm:$0xff]  ;;  %v7750_v55 = vld [vmem:[#allocation2 + $0x110] sm:$0xff] }
 0x1ba   : > { %v3316_v26 = vadd.f32 %v9982_v59, %v3224_v3  ;;  %v550_v36 = vmul.f32 %v7336_v7, %v9984_v18  ;;  %v9985_v62 = vrot.slane %v7578_v46, 5  ;;  %v3409_v3 = vadd.f32 %v7610_v2, %v3317_v8  ;;  %v7754_v2 = vld [vmem:[#allocation2 + $0xd8] sm:$0xff] }
 0x1bb   : > { %v551_v59 = vmul.f32 %v7011_v15, %v9984_v18  ;;  %v586_v61 = vmul.f32 %v7345_v30, %v9986_v6  ;;  %v9987_v43 = vrot.slane %v7712_v23, 6  ;;  %v587_v46 = vmul.f32 %v7071_v10, %v9986_v6  ;;  %v7767_v6 = vld [vmem:[#allocation2 + $0xf0] sm:$0xff] }
 0x1bc   : > { %v3408_v49 = vadd.f32 %v9985_v62, %v3316_v26  ;;  %v566_v5 = vadd.f32 %v550_v36, %v514_v13  ;;  %v9988_v26 = vld [vmem:[#allocation9_spill] sm:$0xff]  ;;  %v9989_v62 = vrot.slane %v7591_v9, 5  ;;  %v3501_v51 = vadd.f32 %v7626_v0, %v3409_v3  ;;  %v9991_v0 = vld [vmem:[#allocation11_spill] sm:$0xff] }
 0x1bd   : > { %v7748_v1 = vsel %vm3730_vm5, %v9987_v43, %v4293_v63  ;;  %v622_v8 = vmul.f32 %v7754_v2, %v9988_v26  ;;  %v7763_v63 = vld [vmem:[#allocation2 + $0x128] sm:$0xff]  ;;  %v567_v43 = vadd.f32 %v551_v59, %v515_v22  ;;  %v623_v13 = vmul.f32 %v7613_v47, %v9988_v26  ;;  %v9993_v26 = vld [vmem:[#allocation12_spill] sm:$0xff] }
 0x1be   : > { %v3500_v18 = vadd.f32 %v9989_v62, %v3408_v49  ;;  %v602_v36 = vadd.f32 %v586_v61, %v566_v5  ;;  %v658_v41 = vmul.f32 %v7767_v6, %v9990_v60  ;;  %v659_v9 = vmul.f32 %v7771_v31, %v9990_v60  ;;  %v9994_v60 = vld [vmem:[#allocation13_spill] sm:$0xff] }
 0x1bf   : > { %v694_v49 = vmul.f32 %v9991_v0, %v7739_v33  ;;  %v9992_v3 = vrot.slane %v7601_v11, 5  ;;  %v3593_v59 = vadd.f32 %v7635_v56, %v3501_v51  ;;  %v603_v62 = vadd.f32 %v587_v46, %v567_v43  ;;  %v9996_v43 = vld [vmem:[#allocation20_spill] sm:$0xff] }
 0x1c0   : > { %v695_v5 = vmul.f32 %v9991_v0, %v7750_v55  ;;  %v638_v61 = vadd.f32 %v622_v8, %v602_v36  ;;  %v730_v40 = vmul.f32 %v9993_v26, %v7761_v42  ;;  %v731_v54 = vmul.f32 %v9993_v26, %v7763_v63 }
 0x1c1   : > { %v3592_v22 = vadd.f32 %v9992_v3, %v3500_v18  ;;  %v766_v39 = vmul.f32 %v7330_v57, %v9994_v60  ;;  %v9995_v34 = vrot.slane %v7617_v19, 5  ;;  %v3685_v18 = vadd.f32 %v7650_v12, %v3593_v59 }
 0x1c2   : > { %v639_v51 = vadd.f32 %v623_v13, %v603_v62  ;;  %v767_v56 = vmul.f32 %v7007_v27, %v9994_v60  ;;  %v674_v46 = vadd.f32 %v658_v41, %v638_v61  ;;  %v859_v36 = vmul.f32 %v7336_v7, %v9996_v43 }
 0x1c3   : > { %v3684_v11 = vadd.f32 %v9995_v34, %v3592_v22  ;;  %v805_v8 = vrot.slane %v766_v39, 1  ;;  %v860_v3 = vmul.f32 %v7011_v15, %v9996_v43  ;;  %v9997_v26 = vrot.slane %v7630_v14, 6 }
 0x1c4   : > { %v3778_v19 = vadd.f32 %v7666_v4, %v3685_v18  ;;  %v675_v34 = vadd.f32 %v659_v9, %v639_v51  ;;  %v806_v22 = vrot.slane %v767_v56, 1  ;;  %v710_v12 = vadd.f32 %v694_v49, %v674_v46 }
 0x1c5   : > { %v3777_v0 = vadd.f32 %v9997_v26, %v3684_v11  ;;  %v897_v13 = vrot.slane %v859_v36, 1  ;;  %v898_v59 = vrot.slane %v860_v3, 1  ;;  %v951_v27 = vmul.f32 %v7345_v30, %v5601_v28 }
 0x1c6   : > { %v9998_v39 = vrot.slane %v7645_v20, 6  ;;  %v3870_v62 = vadd.f32 %v7680_v44, %v3778_v19  ;;  %v711_v61 = vadd.f32 %v695_v5, %v675_v34  ;;  %v807_v15 = vsel %vm786_vm1, %v805_v8, %v806_v22 }
 0x1c7   : > { %v746_v14 = vadd.f32 %v730_v40, %v710_v12  ;;  %v899_v26 = vsel %vm786_vm1, %v897_v13, %v898_v59  ;;  %v952_v4 = vmul.f32 %v7071_v10, %v5601_v28  ;;  %v989_v9 = vrot.slane %v951_v27, 1 }
 0x1c8   : > { %v3869_v41 = vadd.f32 %v9998_v39, %v3777_v0  ;;  %v9999_v49 = vrot.slane %v7656_v35, 6  ;;  %v3962_v18 = vadd.f32 %v7694_v17, %v3870_v62  ;;  %v747_v51 = vadd.f32 %v731_v54, %v711_v61 }
 0x1c9   : > { %v1043_v20 = vmul.f32 %v7754_v2, %v5628_v32  ;;  %v839_v44 = vadd.f32 %v807_v15, %v746_v14  ;;  %v990_v0 = vrot.slane %v952_v4, 1  ;;  %v1044_v40 = vmul.f32 %v7613_v47, %v5628_v32 }
 0x1ca   : > { %v3961_v11 = vadd.f32 %v9999_v49, %v3869_v41  ;;  %v1135_v5 = vmul.f32 %v7767_v6, %v5633_v24  ;;  %v10000_v10 = vrot.slane %v7671_v50, 6  ;;  %v4054_v35 = vadd.f32 %v7708_v37, %v3962_v18 }
 0x1cb   : > { %v840_v46 = vadd.f32 %v806_v22, %v747_v51  ;;  %v1081_v8 = vrot.slane %v1043_v20, 1  ;;  %v931_v17 = vadd.f32 %v899_v26, %v839_v44  ;;  %v991_v54 = vsel %vm786_vm1, %v989_v9, %v990_v0 }
 0x1cc   : > { %v4053_v56 = vadd.f32 %v10000_v10, %v3961_v11  ;;  %v1082_v36 = vrot.slane %v1044_v40, 1  ;;  %v1136_v3 = vmul.f32 %v7771_v31, %v5633_v24  ;;  %v10001_v19 = vrot.slane %v7685_v45, 6 }
 0x1cd   : > { %v4146_v12 = vadd.f32 %v7717_v48, %v4054_v35  ;;  %v932_v13 = vadd.f32 %v898_v59, %v840_v46  ;;  %v1173_v27 = vrot.slane %v1135_v5, 1  ;;  %v1023_v50 = vadd.f32 %v991_v54, %v931_v17 }
 0x1ce   : > { %v4145_v34 = vadd.f32 %v10001_v19, %v4053_v56  ;;  %v1083_v39 = vsel %vm786_vm1, %v1081_v8, %v1082_v36  ;;  %v1174_v37 = vrot.slane %v1136_v3, 1  ;;  %v1227_v22 = vmul.f32 %v9768_v52, %v7739_v33  ;;  %v7846_v56 = vld [vmem:[#allocation2 + $0x98] sm:$0xff] }
 0x1cf   : > { %v10002_v41 = vrot.slane %v7699_v16, 6  ;;  %v4238_v61 = vadd.f32 %v7730_v53, %v4146_v12  ;;  %v1024_v15 = vadd.f32 %v990_v0, %v932_v13  ;;  %v1228_v45 = vmul.f32 %v9768_v52, %v7750_v55 }
 0x1d0   : > { %v1115_v14 = vadd.f32 %v1083_v39, %v1023_v50  ;;  %v1175_v48 = vsel %vm786_vm1, %v1173_v27, %v1174_v37  ;;  %v1265_v59 = vrot.slane %v1227_v22, 1  ;;  %v1319_v26 = vmul.f32 %v9771_v21, %v7761_v42  ;;  %v7871_v22 = vld [vmem:[#allocation2 + $0xc8] sm:$0xff] }
 0x1d1   : > { %v4237_v62 = vadd.f32 %v10002_v41, %v4145_v34  ;;  %v10003_v4 = vrot.slane %v7712_v23, 6  ;;  %v4330_v49 = vadd.f32 %v7748_v1, %v4238_v61  ;;  %v1116_v16 = vadd.f32 %v1082_v36, %v1024_v15  ;;  %v7860_v36 = vld [vmem:[%s9129_s2] ss:$0 sm:$0xff] }
 0x1d2   : > { %v1266_v11 = vrot.slane %v1228_v45, 1  ;;  %v1207_v18 = vadd.f32 %v1175_v48, %v1115_v14  ;;  %v1320_v53 = vmul.f32 %v9771_v21, %v7763_v63  ;;  %v1357_v51 = vrot.slane %v1319_v26, 1  ;;  %10004 = vst [vmem:[#allocation22_spill] sm:$0xff] %v7860_v36 }
 0x1d3   : > { %v4329_v9 = vadd.f32 %v10003_v4, %v4237_v62  ;;  %v1411_v20 = vmul.f32 %v7330_v57, %v9774_v58  ;;  %v4365_v0 = vrot.slane %v4330_v49, 5  ;;  %v1208_v40 = vadd.f32 %v1174_v37, %v1116_v16  ;;  %v7853_v57 = vld [vmem:[#allocation2 + $0xb0] sm:$0xff] }
 0x1d4   : > { %v1267_v5 = vsel %vm786_vm1, %v1265_v59, %v1266_v11  ;;  %v1358_v23 = vrot.slane %v1320_v53, 1  ;;  %v1412_v1 = vmul.f32 %v7846_v56, %v9774_v58  ;;  %v1504_v17 = vmul.f32 %v7336_v7, %v9779_v29  ;;  %v10006_v59 = vld [vmem:[#allocation34_spill] sm:$0xff] }
 0x1d5   : > { %v4364_v44 = vrot.slane %v4329_v9, 5  ;;  %v1299_v10 = vadd.f32 %v1267_v5, %v1207_v18  ;;  %v1450_v35 = vrot.slane %v1411_v20, 2  ;;  %v1300_v8 = vadd.f32 %v1266_v11, %v1208_v40  ;;  %v10007_v11 = vld [vmem:[#allocation35_spill] sm:$0xff] }
 0x1d6   : > { %v1505_v54 = vmul.f32 %v7853_v57, %v9779_v29  ;;  %v1359_v19 = vsel %vm786_vm1, %v1357_v51, %v1358_v23  ;;  %v1451_v34 = vrot.slane %v1412_v1, 2  ;;  %v1596_v12 = vmul.f32 %v7345_v30, %v9929_v25 }
 0x1d7   : > { %v4366_v46 = vsel %vm3085_vm4, %v4364_v44, %v4365_v0  ;;  %v1391_v7 = vadd.f32 %v1359_v19, %v1299_v10  ;;  %v1392_v13 = vadd.f32 %v1358_v23, %v1300_v8  ;;  %v1542_v27 = vrot.slane %v1504_v17, 2 }
 0x1d8   : > { %v7863_v3 = vadd.f32 %v7860_v36, %v4366_v46  ;;  %v1543_v50 = vrot.slane %v1505_v54, 2  ;;  %v1452_v37 = vsel %vm1431_vm2, %v1450_v35, %v1451_v34  ;;  %v1597_v41 = vmul.f32 %v7871_v22, %v9929_v25  ;;  %v10008_v35 = vld [vmem:[#allocation36_spill] sm:$0xff]  ;;  %v10072_v25 = vld [vmem:[#allocation11_spill] sm:$0xff] }
 0x1d9   : > { %v1634_v62 = vrot.slane %v1596_v12, 2  ;;  %v1484_v61 = vadd.f32 %v1452_v37, %v1391_v7  ;;  %v1485_v15 = vadd.f32 %v1451_v34, %v1392_v13  ;;  %v1688_v45 = vmul.f32 %v7754_v2, %v9932_v38  ;;  %v10009_v34 = vld [vmem:[#allocation41_spill] sm:$0xff] }
 0x1da   : > { %10005 = vst [vmem:[#allocation24_spill] sm:$0xff] %v7863_v3  ;;  %v4411_v39 = vsel %vm396_vm0, %v7863_v3, 0.0  ;;  %v1544_v30 = vsel %vm1431_vm2, %v1542_v27, %v1543_v50  ;;  %v1635_v14 = vrot.slane %v1597_v41, 2  ;;  %v1689_v48 = vmul.f32 %v7613_v47, %v9932_v38  ;;  %v10010_v27 = vld [vmem:[#allocation42_spill] sm:$0xff]  ;;  %v10025_v3 = vld [vmem:[#allocation61_spill] sm:$0xff] }
 0x1db   : > { %4412 = vadd.xlane.f32.xlu1 %v4411_v39  ;;  %v1780_v26 = vmul.f32 %v7767_v6, %v10006_v59  ;;  %v1781_v4 = vmul.f32 %v7771_v31, %v10006_v59  ;;  %v1576_v9 = vadd.f32 %v1544_v30, %v1484_v61  ;;  %v1577_v49 = vadd.f32 %v1543_v50, %v1485_v15  ;;  %v10011_v39 = vld [vmem:[#allocation44_spill] sm:$0xff] }
 0x1dc   : > { %v1726_v16 = vrot.slane %v1688_v45, 2  ;;  %v1872_v18 = vmul.f32 %v10007_v11, %v7739_v33  ;;  %v1636_v53 = vsel %vm1431_vm2, %v1634_v62, %v1635_v14  ;;  %v1727_v51 = vrot.slane %v1689_v48, 2  ;;  %v10012_v45 = vld [vmem:[#allocation47_spill] sm:$0xff] }
 0x1dd   : > { %v1818_v20 = vrot.slane %v1780_v26, 2  ;;  %v1819_v44 = vrot.slane %v1781_v4, 2  ;;  %v1668_v0 = vadd.f32 %v1636_v53, %v1576_v9  ;;  %v1669_v40 = vadd.f32 %v1635_v14, %v1577_v49  ;;  %v10013_v4 = vld [vmem:[#allocation48_spill] sm:$0xff]  ;;  %v10014_v49 = vld [vmem:[#allocation50_spill] sm:$0xff]  ;;  %v10015_v53 = vld [vmem:[#allocation53_spill] sm:$0xff] }
 0x1de   : > { %v1873_v5 = vmul.f32 %v10007_v11, %v7750_v55  ;;  %v1910_v10 = vrot.slane %v1872_v18, 2  ;;  %v1728_v23 = vsel %vm1431_vm2, %v1726_v16, %v1727_v51  ;;  %v1964_v46 = vmul.f32 %v10008_v35, %v7761_v42 }
 0x1df   : > { %v1820_v1 = vsel %vm1431_vm2, %v1818_v20, %v1819_v44  ;;  %v1965_v8 = vmul.f32 %v10008_v35, %v7763_v63  ;;  %v1760_v17 = vadd.f32 %v1728_v23, %v1668_v0  ;;  %v1761_v54 = vadd.f32 %v1727_v51, %v1669_v40  ;;  %v10016_v20 = vld [vmem:[#allocation54_spill] sm:$0xff]  ;;  %v10017_v0 = vld [vmem:[#allocation25_spill] sm:$0xff] }
 0x1e0   : > { %v1911_v19 = vrot.slane %v1873_v5, 2  ;;  %v2050_v12 = vmul.f32 %v7846_v56, %v10009_v34  ;;  %v2002_v7 = vrot.slane %v1964_v46, 2  ;;  %v2102_v50 = vmul.f32 %v7853_v57, %v10010_v27 }
 0x1e1   : > { %v2003_v13 = vrot.slane %v1965_v8, 2  ;;  %v2154_v37 = vmul.f32 %v7871_v22, %v10011_v39  ;;  %v1852_v41 = vadd.f32 %v1820_v1, %v1760_v17  ;;  %v1853_v62 = vadd.f32 %v1819_v44, %v1761_v54  ;;  %v10018_v54 = vld [vmem:[#allocation55_spill] sm:$0xff]  ;;  %v7943_v8 = vld [vmem:[#allocation2 + $0xe8] sm:$0xff]  ;;  %v10034_v39 = vld [vmem:[#allocation64_spill] sm:$0xff] }
 0x1e2   : > { %v1912_v42 = vsel %vm1431_vm2, %v1910_v10, %v1911_v19  ;;  %v2066_v15 = vrot.slane %v2050_v12, 3  ;;  %v2118_v30 = vrot.slane %v2102_v50, 3  ;;  %v2206_v14 = vmul.f32 %v7613_v47, %v10012_v45  ;;  %v7924_v50 = vld [vmem:[#allocation2 + $0xb8] sm:$0xff]  ;;  %10024 = vst [vmem:[#allocation26_spill] sm:$0xff] %v7943_v8 }
 0x1e3   : > { %v2004_v61 = vsel %vm1431_vm2, %v2002_v7, %v2003_v13  ;;  %v1944_v48 = vadd.f32 %v1912_v42, %v1852_v41  ;;  %v1945_v26 = vadd.f32 %v1911_v19, %v1853_v62  ;;  %v2258_v9 = vmul.f32 %v7771_v31, %v10013_v4  ;;  %10019 = vst [vmem:[#allocation23_spill] sm:$0xff] %v7924_v50  ;;  %v10020_v41 = vld [vmem:[#allocation56_spill] sm:$0xff] }
 0x1e4   : > { %v2310_v16 = vmul.f32 %v10014_v49, %v7750_v55  ;;  %v2170_v18 = vrot.slane %v2154_v37, 3  ;;  %v7911_v51 = vmul.f32 %v10015_v53, %v7763_v63  ;;  %v7915_v44 = vmul.f32 %v7846_v56, %v10016_v20  ;;  %v10029_v53 = vld [vmem:[#allocation62_spill] sm:$0xff] }
 0x1e5   : > { %v2421_v40 = vmul.f32 %v10017_v0, %v10016_v20  ;;  %v2036_v5 = vadd.f32 %v2004_v61, %v1944_v48  ;;  %v2037_v10 = vadd.f32 %v2003_v13, %v1945_v26  ;;  %v2222_v23 = vrot.slane %v2206_v14, 3  ;;  %v10021_v61 = vld [vmem:[#allocation14_spill] sm:$0xff]  ;;  %v10022_v48 = vld [vmem:[#allocation60_spill] sm:$0xff]  ;;  %v10032_v20 = vld [vmem:[#allocation63_spill] sm:$0xff] }
 0x1e6   : > { %v2274_v1 = vrot.slane %v2258_v9, 3  ;;  %v2326_v46 = vrot.slane %v2310_v16, 3  ;;  %v7922_v19 = vmul.f32 %v7853_v57, %v10018_v54  ;;  %v2514_v37 = vmul.f32 %v7924_v50, %v10018_v54 }
 0x1e7   : > { %v2460_v17 = vrot.slane %v2421_v40, 4  ;;  %v2088_v12 = vadd.f32 %v2066_v15, %v2036_v5  ;;  %v2089_v7 = vadd.f32 %v2066_v15, %v2037_v10  ;;  %v7930_v13 = vmul.f32 %v7871_v22, %v10020_v41  ;;  %v7941_v5 = vld [vmem:[#allocation2 + $0x118] sm:$0xff] }
 0x1e8   : > { %v2378_v62 = vrot.slane %v7911_v51, 3  ;;  %v2606_v14 = vmul.f32 %v10021_v61, %v10020_v41  ;;  %v7938_v26 = vmul.f32 %v7613_v47, %v10022_v48  ;;  %v2552_v16 = vrot.slane %v2514_v37, 4  ;;  %10023 = vst [vmem:[#allocation18_spill] sm:$0xff] %v7941_v5  ;;  %v7955_v37 = vld [vmem:[#allocation2 + $0x100] sm:$0xff] }
 0x1e9   : > { %v2140_v15 = vadd.f32 %v2118_v30, %v2088_v12  ;;  %v2141_v9 = vadd.f32 %v2118_v30, %v2089_v7  ;;  %v2698_v51 = vmul.f32 %v7943_v8, %v10022_v48  ;;  %v7950_v41 = vmul.f32 %v7771_v31, %v10025_v3  ;;  %10027 = vst [vmem:[#allocation19_spill] sm:$0xff] %v7955_v37 }
 0x1ea   : > { %v2644_v10 = vrot.slane %v2606_v14, 4  ;;  %v10026_v30 = vrot.slane %v7915_v44, 4  ;;  %v2790_v14 = vmul.f32 %v7955_v37, %v10025_v3  ;;  %v10028_v40 = vrot.slane %v7922_v19, 4 }
 0x1eb   : > { %v2192_v54 = vadd.f32 %v2170_v18, %v2140_v15  ;;  %v2193_v12 = vadd.f32 %v2170_v18, %v2141_v9  ;;  %v2736_v42 = vrot.slane %v2698_v51, 4  ;;  %v7965_v15 = vmul.f32 %v10029_v53, %v7750_v55  ;;  %v7967_v18 = vld [vmem:[#allocation2 + $0x130] sm:$0xff] }
 0x1ec   : > { %v2461_v7 = vsel %vm2440_vm3, %v10026_v30, %v2460_v17  ;;  %v2553_v48 = vsel %vm2440_vm3, %v10028_v40, %v2552_v16  ;;  %v2828_v30 = vrot.slane %v2790_v14, 4  ;;  %v2882_v49 = vmul.f32 %v10029_v53, %v7941_v5 }
 0x1ed   : > { %v2244_v9 = vadd.f32 %v2222_v23, %v2192_v54  ;;  %v2245_v17 = vadd.f32 %v2222_v23, %v2193_v12  ;;  %v10030_v3 = vrot.slane %v7930_v13, 4  ;;  %v10031_v16 = vrot.slane %v7938_v26, 4 }
 0x1ee   : > { %v7980_v45 = vmul.f32 %v10032_v20, %v7763_v63  ;;  %v10033_v12 = vrot.slane %v7950_v41, 4  ;;  %v2920_v53 = vrot.slane %v2882_v49, 4  ;;  %v692_v36 = vmul.f32 %v7767_v6, %v10072_v25 }
 0x1ef   : > { %v2645_v4 = vsel %vm2440_vm3, %v10030_v3, %v2644_v10  ;;  %v2737_v40 = vsel %vm2440_vm3, %v10031_v16, %v2736_v42  ;;  %v2296_v54 = vadd.f32 %v2274_v1, %v2244_v9  ;;  %v2297_v23 = vadd.f32 %v2274_v1, %v2245_v17 }
 0x1f0   : > { %v2829_v14 = vsel %vm2440_vm3, %v10033_v12, %v2828_v30  ;;  %v2974_v3 = vmul.f32 %v10032_v20, %v7967_v18  ;;  %v7990_v42 = vmul.f32 %v7846_v56, %v10034_v39  ;;  %v3066_v16 = vmul.f32 %v10017_v0, %v10034_v39  ;;  %v10036_v30 = vld [vmem:[#allocation65_spill] sm:$0xff]  ;;  %v10040_v39 = vld [vmem:[#allocation67_spill] sm:$0xff] }
 0x1f1   : > { %v2348_v51 = vadd.f32 %v2326_v46, %v2296_v54  ;;  %v2349_v9 = vadd.f32 %v2326_v46, %v2297_v23  ;;  %v10035_v1 = vrot.slane %v7965_v15, 4  ;;  %v7999_v49 = vmul.f32 %v7853_v57, %v10036_v30  ;;  %v10037_v46 = vld [vmem:[#allocation66_spill] sm:$0xff] }
 0x1f2   : > { %v3012_v12 = vrot.slane %v2974_v3, 4  ;;  %v9489_v10 = vrot.slane %v7990_v42, 5  ;;  %v3105_v20 = vrot.slane %v3066_v16, 5  ;;  %v3159_v27 = vmul.f32 %v7924_v50, %v10036_v30 }
 0x1f3   : > { %v2921_v17 = vsel %vm2440_vm3, %v10035_v1, %v2920_v53  ;;  %v2400_v34 = vadd.f32 %v2378_v62, %v2348_v51  ;;  %v2401_v35 = vadd.f32 %v2378_v62, %v2349_v9  ;;  %v8007_v23 = vmul.f32 %v7871_v22, %v10037_v46 }
 0x1f4   : > { %v10038_v53 = vrot.slane %v7980_v45, 4  ;;  %v3106_v3 = vsel %vm3085_vm4, %v9489_v10, %v3105_v20  ;;  %v3197_v16 = vrot.slane %v3159_v27, 5  ;;  %v3251_v30 = vmul.f32 %v10021_v61, %v10037_v46  ;;  %v10042_v20 = vld [vmem:[#allocation68_spill] sm:$0xff] }
 0x1f5   : > { %v10039_v62 = vrot.slane %v7915_v44, 4  ;;  %v2494_v9 = vadd.f32 %v2461_v7, %v2401_v35  ;;  %v9493_v54 = vrot.slane %v8007_v23, 5  ;;  %v8022_v11 = vmul.f32 %v7613_v47, %v10040_v39 }
 0x1f6   : > { %v3013_v1 = vsel %vm2440_vm3, %v10038_v53, %v3012_v12  ;;  %v10041_v12 = vrot.slane %v7999_v49, 5  ;;  %v3289_v59 = vrot.slane %v3251_v30, 5  ;;  %v3343_v27 = vmul.f32 %v7943_v8, %v10040_v39  ;;  %v10044_v39 = vld [vmem:[#allocation69_spill] sm:$0xff] }
 0x1f7   : > { %v2493_v51 = vadd.f32 %v10039_v62, %v2400_v34  ;;  %v8031_v10 = vmul.f32 %v7771_v31, %v10042_v20  ;;  %v10043_v35 = vrot.slane %v7922_v19, 4  ;;  %v2586_v44 = vadd.f32 %v2553_v48, %v2494_v9 }
 0x1f8   : > { %v3198_v53 = vsel %vm3085_vm4, %v10041_v12, %v3197_v16  ;;  %v9494_v7 = vrot.slane %v8022_v11, 5  ;;  %v3435_v62 = vmul.f32 %v7955_v37, %v10042_v20  ;;  %v3290_v30 = vsel %vm3085_vm4, %v9493_v54, %v3289_v59  ;;  %v10048_v59 = vld [vmem:[#allocation71_spill] sm:$0xff] }
 0x1f9   : > { %v2585_v34 = vadd.f32 %v10043_v35, %v2493_v51  ;;  %v3381_v16 = vrot.slane %v3343_v27, 5  ;;  %v9497_v12 = vrot.slane %v8031_v10, 5  ;;  %v8044_v46 = vmul.f32 %v10044_v39, %v7750_v55  ;;  %v10046_v27 = vld [vmem:[#allocation70_spill] sm:$0xff] }
 0x1fa   : > { %v10045_v19 = vrot.slane %v7930_v13, 4  ;;  %v2678_v48 = vadd.f32 %v2645_v4, %v2586_v44  ;;  %v3473_v9 = vrot.slane %v3435_v62, 5  ;;  %v3527_v35 = vmul.f32 %v10044_v39, %v7941_v5 }
 0x1fb   : > { %v8053_v20 = vsel %vm3085_vm4, %v9494_v7, %v3381_v16  ;;  %v8058_v54 = vmul.f32 %v10046_v27, %v7763_v63  ;;  %v3619_v13 = vmul.f32 %v10046_v27, %v7967_v18  ;;  %v10047_v4 = vrot.slane %v7938_v26, 4 }
 0x1fc   : > { %v2677_v51 = vadd.f32 %v10045_v19, %v2585_v34  ;;  %v2770_v44 = vadd.f32 %v2737_v40, %v2678_v48  ;;  %v8067_v62 = vsel %vm3085_vm4, %v9497_v12, %v3473_v9  ;;  %v3565_v16 = vrot.slane %v3527_v35, 5  ;;  %v10051_v35 = vld [vmem:[#allocation72_spill] sm:$0xff] }
 0x1fd   : > { %v9498_v19 = vrot.slane %v8058_v54, 5  ;;  %v3657_v7 = vrot.slane %v3619_v13, 5  ;;  %v8072_v39 = vmul.f32 %v7846_v56, %v10048_v59  ;;  %v3711_v27 = vmul.f32 %v10017_v0, %v10048_v59 }
 0x1fe   : > { %v2769_v34 = vadd.f32 %v10047_v4, %v2677_v51  ;;  %v10049_v26 = vrot.slane %v7950_v41, 4  ;;  %v2862_v40 = vadd.f32 %v2829_v14, %v2770_v44  ;;  %v10050_v48 = vrot.slane %v8044_v46, 5 }
 0x1ff   : > { %v8085_v4 = vmul.f32 %v7853_v57, %v10051_v35  ;;  %v8090_v13 = vsel %vm3085_vm4, %v9498_v19, %v3657_v7  ;;  %v9500_v0 = vrot.slane %v8072_v39, 6  ;;  %v3750_v12 = vrot.slane %v3711_v27, 6 }
 0x200   : > { %v2861_v51 = vadd.f32 %v10049_v26, %v2769_v34  ;;  %v8081_v9 = vsel %vm3085_vm4, %v10050_v48, %v3565_v16  ;;  %v3804_v41 = vmul.f32 %v7924_v50, %v10051_v35  ;;  %v10052_v14 = vrot.slane %v7965_v15, 4  ;;  %v10053_v26 = vld [vmem:[#allocation73_spill] sm:$0xff]  ;;  %v10054_v35 = vld [vmem:[#allocation74_spill] sm:$0xff] }
 0x201   : > { %v2954_v44 = vadd.f32 %v2921_v17, %v2862_v40  ;;  %v8100_v48 = vmul.f32 %v7871_v22, %v10053_v26  ;;  %v8105_v7 = vsel %vm3730_vm5, %v9500_v0, %v3750_v12  ;;  %v3896_v27 = vmul.f32 %v10021_v61, %v10053_v26  ;;  %v10057_v26 = vld [vmem:[#allocation75_spill] sm:$0xff]  ;;  %v10071_v50 = vld [vmem:[#allocation10_spill] sm:$0xff] }
 0x202   : > { %v2953_v34 = vadd.f32 %v10052_v14, %v2861_v51  ;;  %v3842_v19 = vrot.slane %v3804_v41, 6  ;;  %v8111_v15 = vmul.f32 %v7613_v47, %v10054_v35  ;;  %v10055_v17 = vrot.slane %v7980_v45, 4 }
 0x203   : > { %v3046_v40 = vadd.f32 %v3013_v1, %v2954_v44  ;;  %v9503_v14 = vrot.slane %v8100_v48, 6  ;;  %v3988_v16 = vmul.f32 %v7943_v8, %v10054_v35  ;;  %v10056_v12 = vrot.slane %v8085_v4, 6 }
 0x204   : > { %v3045_v51 = vadd.f32 %v10055_v17, %v2953_v34  ;;  %v3934_v0 = vrot.slane %v3896_v27, 6  ;;  %v8126_v59 = vmul.f32 %v7771_v31, %v10057_v26  ;;  %v10058_v45 = vrot.slane %v7990_v42, 5 }
 0x205   : > { %v8121_v41 = vsel %vm3730_vm5, %v10056_v12, %v3842_v19  ;;  %v3139_v34 = vadd.f32 %v3106_v3, %v3046_v40  ;;  %v4026_v44 = vrot.slane %v3988_v16, 6  ;;  %v4080_v17 = vmul.f32 %v7955_v37, %v10057_v26  ;;  %v10059_v12 = vld [vmem:[#allocation76_spill] sm:$0xff]  ;;  %v10062_v26 = vld [vmem:[#allocation77_spill] sm:$0xff] }
 0x206   : > { %v3138_v1 = vadd.f32 %v10058_v45, %v3045_v51  ;;  %v8135_v19 = vsel %vm3730_vm5, %v9503_v14, %v3934_v0  ;;  %v8140_v61 = vmul.f32 %v10059_v12, %v7750_v55  ;;  %v4172_v42 = vmul.f32 %v10059_v12, %v7941_v5 }
 0x207   : > { %v10060_v3 = vrot.slane %v7999_v49, 5  ;;  %v3231_v51 = vadd.f32 %v3198_v53, %v3139_v34  ;;  %v10061_v40 = vrot.slane %v8111_v15, 6  ;;  %v4118_v0 = vrot.slane %v4080_v17, 6  ;;  %v8165_v17 = vld [vmem:[#allocation2 + $0x78] sm:$0xff] }
 0x208   : > { %v9508_v14 = vrot.slane %v8140_v61, 6  ;;  %v4210_v27 = vrot.slane %v4172_v42, 6  ;;  %v8154_v35 = vmul.f32 %v10062_v26, %v7763_v63  ;;  %v4264_v12 = vmul.f32 %v10062_v26, %v7967_v18 }
 0x209   : > { %v3230_v16 = vadd.f32 %v10060_v3, %v3138_v1  ;;  %v8149_v45 = vsel %vm3730_vm5, %v10061_v40, %v4026_v44  ;;  %v10063_v49 = vrot.slane %v8007_v23, 5  ;;  %v3323_v53 = vadd.f32 %v3290_v30, %v3231_v51  ;;  %v10065_v3 = vld [vmem:[#allocation6_spill] sm:$0xff] }
 0x20a   : > { %v10064_v34 = vrot.slane %v8126_v59, 6  ;;  %v512_v42 = vmul.f32 %v8165_v17, %v10065_v3  ;;  %v8172_v63 = vsel %vm3730_vm5, %v9508_v14, %v4210_v27  ;;  %v9515_v18 = vrot.slane %v8154_v35, 6  ;;  %v8193_v14 = vld [vmem:[#allocation2 + $0xa8] sm:$0xff] }
 0x20b   : > { %v3322_v1 = vadd.f32 %v10063_v49, %v3230_v16  ;;  %v4302_v23 = vrot.slane %v4264_v12, 6  ;;  %v8175_v16 = vld [vmem:[#allocation2 + $0x80] sm:$0xff]  ;;  %v10066_v51 = vrot.slane %v8022_v11, 5  ;;  %v8182_v49 = vld [vmem:[#allocation2 + $0x90] sm:$0xff]  ;;  %v656_v38 = vmul.f32 %v7754_v2, %v10071_v50 }
 0x20c   : > { %v8163_v44 = vsel %vm3730_vm5, %v10064_v34, %v4118_v0  ;;  %v513_v30 = vmul.f32 %v8175_v16, %v10065_v3  ;;  %v3415_v0 = vadd.f32 %v8053_v20, %v3323_v53  ;;  %v10067_v34 = vld [vmem:[#allocation7_spill] sm:$0xff]  ;;  %v10068_v3 = vld [vmem:[#allocation8_spill] sm:$0xff]  ;;  %v10069_v53 = vld [vmem:[#allocation9_spill] sm:$0xff]  ;;  %v10073_v29 = vrot.slane %v8044_v46, 5 }
 0x20d   : > { %v3414_v40 = vadd.f32 %v10066_v51, %v3322_v1  ;;  %v548_v26 = vmul.f32 %v8182_v49, %v10067_v34  ;;  %v549_v27 = vmul.f32 %v7846_v56, %v10067_v34  ;;  %v8191_v12 = vsel %vm3730_vm5, %v9515_v18, %v4302_v23  ;;  %v8199_v1 = vld [vmem:[#allocation2 + $0xc0] sm:$0xff] }
 0x20e   : > { %v584_v11 = vmul.f32 %v8193_v14, %v10068_v3  ;;  %v585_v20 = vmul.f32 %v7853_v57, %v10068_v3  ;;  %v620_v51 = vmul.f32 %v8199_v1, %v10069_v53  ;;  %v10070_v34 = vrot.slane %v8031_v10, 5 }
 0x20f   : > { %v3507_v37 = vadd.f32 %v8067_v62, %v3415_v0  ;;  %v564_v23 = vadd.f32 %v548_v26, %v512_v42  ;;  %v565_v18 = vadd.f32 %v549_v27, %v513_v30  ;;  %v621_v8 = vmul.f32 %v7871_v22, %v10069_v53  ;;  %v10074_v30 = vld [vmem:[#allocation12_spill] sm:$0xff] }
 0x210   : > { %v3506_v5 = vadd.f32 %v10070_v34, %v3414_v40  ;;  %v657_v3 = vmul.f32 %v7613_v47, %v10071_v50  ;;  %v693_v42 = vmul.f32 %v7771_v31, %v10072_v25  ;;  %v728_v0 = vmul.f32 %v10074_v30, %v7739_v33 }
 0x211   : > { %v3599_v40 = vadd.f32 %v8081_v9, %v3507_v37  ;;  %v600_v62 = vadd.f32 %v584_v11, %v564_v23  ;;  %v601_v26 = vadd.f32 %v585_v20, %v565_v18  ;;  %v729_v34 = vmul.f32 %v10074_v30, %v7750_v55 }
 0x212   : > { %v3598_v10 = vadd.f32 %v10073_v29, %v3506_v5  ;;  %v764_v27 = vmul.f32 %v8165_v17, %v9994_v60  ;;  %v10075_v50 = vrot.slane %v8058_v54, 5  ;;  %v765_v9 = vmul.f32 %v8175_v16, %v9994_v60 }
 0x213   : > { %v3691_v29 = vadd.f32 %v8090_v13, %v3599_v40  ;;  %v636_v5 = vadd.f32 %v620_v51, %v600_v62  ;;  %v637_v37 = vadd.f32 %v621_v8, %v601_v26  ;;  %v857_v11 = vmul.f32 %v8182_v49, %v9996_v43 }
 0x214   : > { %v3690_v46 = vadd.f32 %v10075_v50, %v3598_v10  ;;  %v802_v18 = vrot.slane %v764_v27, 1  ;;  %v858_v20 = vmul.f32 %v7846_v56, %v9996_v43  ;;  %v10076_v23 = vrot.slane %v8072_v39, 6 }
 0x215   : > { %v3784_v54 = vadd.f32 %v8105_v7, %v3691_v29  ;;  %v672_v50 = vadd.f32 %v656_v38, %v636_v5  ;;  %v673_v10 = vadd.f32 %v657_v3, %v637_v37  ;;  %v803_v13 = vrot.slane %v765_v9, 1 }
 0x216   : > { %v3783_v30 = vadd.f32 %v10076_v23, %v3690_v46  ;;  %v894_v51 = vrot.slane %v857_v11, 1  ;;  %v895_v8 = vrot.slane %v858_v20, 1  ;;  %v949_v40 = vmul.f32 %v8193_v14, %v5601_v28 }
 0x217   : > { %v10077_v62 = vrot.slane %v8085_v4, 6  ;;  %v3876_v27 = vadd.f32 %v8121_v41, %v3784_v54  ;;  %v708_v60 = vadd.f32 %v692_v36, %v672_v50  ;;  %v709_v43 = vadd.f32 %v693_v42, %v673_v10 }
 0x218   : > { %v804_v39 = vsel %vm786_vm1, %v802_v18, %v803_v13  ;;  %v896_v46 = vsel %vm786_vm1, %v894_v51, %v895_v8  ;;  %v950_v38 = vmul.f32 %v7853_v57, %v5601_v28  ;;  %v986_v7 = vrot.slane %v949_v40, 1 }
 0x219   : > { %v3875_v26 = vadd.f32 %v10077_v62, %v3783_v30  ;;  %v10078_v3 = vrot.slane %v8100_v48, 6  ;;  %v3968_v5 = vadd.f32 %v8135_v19, %v3876_v27  ;;  %v744_v37 = vadd.f32 %v728_v0, %v708_v60 }
 0x21a   : > { %v745_v4 = vadd.f32 %v729_v34, %v709_v43  ;;  %v987_v30 = vrot.slane %v950_v38, 1  ;;  %v1041_v36 = vmul.f32 %v8199_v1, %v5628_v32  ;;  %v1042_v41 = vmul.f32 %v7871_v22, %v5628_v32 }
 0x21b   : > { %v3967_v29 = vadd.f32 %v10078_v3, %v3875_v26  ;;  %v1133_v42 = vmul.f32 %v7754_v2, %v5633_v24  ;;  %v10079_v9 = vrot.slane %v8111_v15, 6  ;;  %v4060_v48 = vadd.f32 %v8149_v45, %v3968_v5 }
 0x21c   : > { %v837_v11 = vadd.f32 %v804_v39, %v744_v37  ;;  %v838_v20 = vadd.f32 %v803_v13, %v745_v4  ;;  %v988_v60 = vsel %vm786_vm1, %v986_v7, %v987_v30  ;;  %v1078_v43 = vrot.slane %v1041_v36, 1 }
 0x21d   : > { %v4059_v18 = vadd.f32 %v10079_v9, %v3967_v29  ;;  %v1079_v19 = vrot.slane %v1042_v41, 1  ;;  %v1134_v0 = vmul.f32 %v7613_v47, %v5633_v24  ;;  %v10080_v34 = vrot.slane %v8126_v59, 6 }
 0x21e   : > { %v4152_v54 = vadd.f32 %v8163_v44, %v4060_v48  ;;  %v929_v50 = vadd.f32 %v896_v46, %v837_v11  ;;  %v930_v10 = vadd.f32 %v895_v8, %v838_v20  ;;  %v1170_v51 = vrot.slane %v1133_v42, 1 }
 0x21f   : > { %v4151_v23 = vadd.f32 %v10080_v34, %v4059_v18  ;;  %v1080_v15 = vsel %vm786_vm1, %v1078_v43, %v1079_v19  ;;  %v1171_v45 = vrot.slane %v1134_v0, 1  ;;  %v1225_v13 = vmul.f32 %v7767_v6, %v9768_v52 }
 0x220   : > { %v10081_v40 = vrot.slane %v8140_v61, 6  ;;  %v4244_v26 = vadd.f32 %v8172_v63, %v4152_v54  ;;  %v1021_v27 = vadd.f32 %v988_v60, %v929_v50  ;;  %v1022_v39 = vadd.f32 %v987_v30, %v930_v10  ;;  %v10083_v60 = vld [vmem:[#allocation27_spill] sm:$0xff] }
 0x221   : > { %v1172_v59 = vsel %vm786_vm1, %v1170_v51, %v1171_v45  ;;  %v1226_v44 = vmul.f32 %v7771_v31, %v9768_v52  ;;  %v1262_v8 = vrot.slane %v1225_v13, 1  ;;  %v1317_v46 = vmul.f32 %v9771_v21, %v7739_v33 }
 0x222   : > { %v4243_v62 = vadd.f32 %v10081_v40, %v4151_v23  ;;  %v10082_v38 = vrot.slane %v8154_v35, 6  ;;  %v4336_v3 = vadd.f32 %v8191_v12, %v4244_v26  ;;  %v1113_v61 = vadd.f32 %v1080_v15, %v1021_v27  ;;  %v10086_v15 = vld [vmem:[#allocation28_spill] sm:$0xff] }
 0x223   : > { %v1114_v29 = vadd.f32 %v1079_v19, %v1022_v39  ;;  %v1263_v5 = vrot.slane %v1226_v44, 1  ;;  %v1318_v63 = vmul.f32 %v9771_v21, %v7750_v55  ;;  %v1354_v37 = vrot.slane %v1317_v46, 1  ;;  %v10084_v19 = vld [vmem:[#allocation22_spill] sm:$0xff]  ;;  %v10087_v39 = vld [vmem:[#allocation33_spill] sm:$0xff] }
 0x224   : > { %v4335_v7 = vadd.f32 %v10082_v38, %v4243_v62  ;;  %v1409_v4 = vmul.f32 %v8165_v17, %v9774_v58  ;;  %v4374_v36 = vrot.slane %v4336_v3, 5  ;;  %v1205_v41 = vadd.f32 %v1172_v59, %v1113_v61  ;;  %v10088_v38 = vld [vmem:[#allocation34_spill] sm:$0xff] }
 0x225   : > { %v1206_v42 = vadd.f32 %v1171_v45, %v1114_v29  ;;  %v1264_v9 = vsel %vm786_vm1, %v1262_v8, %v1263_v5  ;;  %v1355_v35 = vrot.slane %v1318_v63, 1  ;;  %v1410_v12 = vmul.f32 %v8175_v16, %v9774_v58 }
 0x226   : > { %v4373_v30 = vrot.slane %v4335_v7, 5  ;;  %v1447_v18 = vrot.slane %v1409_v4, 2  ;;  %v1297_v11 = vadd.f32 %v1264_v9, %v1205_v41  ;;  %v1502_v43 = vmul.f32 %v8182_v49, %v10083_v60 }
 0x227   : > { %v1298_v20 = vadd.f32 %v1263_v5, %v1206_v42  ;;  %v1356_v0 = vsel %vm786_vm1, %v1354_v37, %v1355_v35  ;;  %v1448_v34 = vrot.slane %v1410_v12, 2  ;;  %v1503_v23 = vmul.f32 %v7846_v56, %v10083_v60 }
 0x228   : > { %v4375_v48 = vsel %vm3085_vm4, %v4373_v30, %v4374_v36  ;;  %v1389_v54 = vadd.f32 %v1356_v0, %v1297_v11  ;;  %v1539_v10 = vrot.slane %v1502_v43, 2  ;;  %v1594_v51 = vmul.f32 %v8193_v14, %v10086_v15  ;;  %v10089_v30 = vld [vmem:[#allocation35_spill] sm:$0xff] }
 0x229   : > { %v8289_v17 = vadd.f32 %v10084_v19, %v4375_v48  ;;  %v1390_v50 = vadd.f32 %v1355_v35, %v1298_v20  ;;  %v1449_v49 = vsel %vm1431_vm2, %v1447_v18, %v1448_v34  ;;  %v1540_v13 = vrot.slane %v1503_v23, 2  ;;  %v10090_v18 = vld [vmem:[#allocation36_spill] sm:$0xff] }
 0x22a   : > { %v1595_v40 = vmul.f32 %v7853_v57, %v10086_v15  ;;  %v1482_v62 = vadd.f32 %v1449_v49, %v1389_v54  ;;  %v1631_v27 = vrot.slane %v1594_v51, 2  ;;  %v1686_v59 = vmul.f32 %v8199_v1, %v10087_v39  ;;  %v10092_v54 = vld [vmem:[#allocation42_spill] sm:$0xff] }
 0x22b   : > { %10085 = vst [vmem:[#allocation31_spill] sm:$0xff] %v8289_v17  ;;  %v4420_v45 = vsel %vm396_vm0, %v8289_v17, 0.0  ;;  %v1483_v26 = vadd.f32 %v1448_v34, %v1390_v50  ;;  %v1541_v44 = vsel %vm1431_vm2, %v1539_v10, %v1540_v13  ;;  %v1687_v46 = vmul.f32 %v7871_v22, %v10087_v39  ;;  %v10091_v34 = vld [vmem:[#allocation41_spill] sm:$0xff] }
 0x22c   : > { %4421 = vadd.xlane.f32.xlu0 %v4420_v45  ;;  %v1632_v8 = vrot.slane %v1595_v40, 2  ;;  %v1778_v7 = vmul.f32 %v7754_v2, %v10088_v38  ;;  %v1574_v3 = vadd.f32 %v1541_v44, %v1482_v62  ;;  %v1723_v29 = vrot.slane %v1686_v59, 2  ;;  %v10093_v45 = vld [vmem:[#allocation44_spill] sm:$0xff] }
 0x22d   : > { %v1575_v61 = vadd.f32 %v1540_v13, %v1483_v26  ;;  %v1779_v5 = vmul.f32 %v7613_v47, %v10088_v38  ;;  %v1724_v37 = vrot.slane %v1687_v46, 2  ;;  %v1870_v36 = vmul.f32 %v7767_v6, %v10089_v30  ;;  %v10094_v26 = vld [vmem:[#allocation47_spill] sm:$0xff]  ;;  %v8331_v46 = vld [vmem:[#allocation2 + $0xe0] sm:$0xff] }
 0x22e   : > { %v1633_v63 = vsel %vm1431_vm2, %v1631_v27, %v1632_v8  ;;  %v1815_v4 = vrot.slane %v1778_v7, 2  ;;  %v1871_v35 = vmul.f32 %v7771_v31, %v10089_v30  ;;  %v1962_v48 = vmul.f32 %v10090_v18, %v7739_v33  ;;  %v10095_v7 = vld [vmem:[#allocation48_spill] sm:$0xff] }
 0x22f   : > { %v1666_v41 = vadd.f32 %v1633_v63, %v1574_v3  ;;  %v1667_v42 = vadd.f32 %v1632_v8, %v1575_v61  ;;  %v1816_v9 = vrot.slane %v1779_v5, 2  ;;  %v1725_v2 = vsel %vm1431_vm2, %v1723_v29, %v1724_v37  ;;  %v10096_v29 = vld [vmem:[#allocation50_spill] sm:$0xff]  ;;  %v10097_v63 = vld [vmem:[#allocation53_spill] sm:$0xff] }
 0x230   : > { %v1907_v12 = vrot.slane %v1870_v36, 2  ;;  %v1963_v47 = vmul.f32 %v10090_v18, %v7750_v55  ;;  %v1908_v6 = vrot.slane %v1871_v35, 2  ;;  %v1999_v19 = vrot.slane %v1962_v48, 2  ;;  %v8345_v35 = vld [vmem:[#allocation2 + $0x88] sm:$0xff] }
 0x231   : > { %v1758_v11 = vadd.f32 %v1725_v2, %v1666_v41  ;;  %v1759_v20 = vadd.f32 %v1724_v37, %v1667_v42  ;;  %v1817_v43 = vsel %vm1431_vm2, %v1815_v4, %v1816_v9  ;;  %v2049_v23 = vmul.f32 %v8175_v16, %v10091_v34  ;;  %v10098_v4 = vld [vmem:[#allocation54_spill] sm:$0xff]  ;;  %v10121_v34 = vld [vmem:[#allocation71_spill] sm:$0xff] }
 0x232   : > { %v2000_v0 = vrot.slane %v1963_v47, 2  ;;  %v2101_v50 = vmul.f32 %v7846_v56, %v10092_v54  ;;  %v1909_v33 = vsel %vm1431_vm2, %v1907_v12, %v1908_v6  ;;  %v2153_v49 = vmul.f32 %v7853_v57, %v10093_v45  ;;  %v10117_v45 = vld [vmem:[#allocation69_spill] sm:$0xff] }
 0x233   : > { %v1850_v10 = vadd.f32 %v1817_v43, %v1758_v11  ;;  %v1851_v51 = vadd.f32 %v1816_v9, %v1759_v20  ;;  %v2065_v40 = vrot.slane %v2049_v23, 3  ;;  %v2205_v27 = vmul.f32 %v7871_v22, %v10094_v26  ;;  %v10099_v11 = vld [vmem:[#allocation55_spill] sm:$0xff]  ;;  %v8355_v23 = vld [vmem:[#allocation2 + $0xa0] sm:$0xff] }
 0x234   : > { %v2001_v13 = vsel %vm1431_vm2, %v1999_v19, %v2000_v0  ;;  %v2117_v62 = vrot.slane %v2101_v50, 3  ;;  %v2169_v8 = vrot.slane %v2153_v49, 3  ;;  %v2257_v3 = vmul.f32 %v8331_v46, %v10095_v7 }
 0x235   : > { %v1942_v59 = vadd.f32 %v1909_v33, %v1850_v10  ;;  %v1943_v44 = vadd.f32 %v1908_v6, %v1851_v51  ;;  %v2221_v61 = vrot.slane %v2205_v27, 3  ;;  %v2309_v5 = vmul.f32 %v7771_v31, %v10096_v29  ;;  %v10100_v10 = vld [vmem:[#allocation56_spill] sm:$0xff]  ;;  %v10101_v33 = vld [vmem:[#allocation23_spill] sm:$0xff] }
 0x236   : > { %v8339_v37 = vmul.f32 %v10097_v63, %v7750_v55  ;;  %v8343_v36 = vmul.f32 %v8175_v16, %v10098_v4  ;;  %v2273_v9 = vrot.slane %v2257_v3, 3  ;;  %v2419_v2 = vmul.f32 %v8345_v35, %v10098_v4 }
 0x237   : > { %v2034_v41 = vadd.f32 %v2001_v13, %v1942_v59  ;;  %v2035_v42 = vadd.f32 %v2000_v0, %v1943_v44  ;;  %v2325_v12 = vrot.slane %v2309_v5, 3  ;;  %v8353_v20 = vmul.f32 %v7846_v56, %v10099_v11  ;;  %v10102_v13 = vld [vmem:[#allocation60_spill] sm:$0xff] }
 0x238   : > { %v2377_v48 = vrot.slane %v8339_v37, 3  ;;  %v2456_v47 = vrot.slane %v8343_v36, 4  ;;  %v2457_v19 = vrot.slane %v2419_v2, 4  ;;  %v2512_v0 = vmul.f32 %v8355_v23, %v10099_v11  ;;  %v8372_v36 = vld [vmem:[#allocation2 + $0xd0] sm:$0xff] }
 0x239   : > { %v2086_v43 = vadd.f32 %v2065_v40, %v2034_v41  ;;  %v2087_v6 = vadd.f32 %v2065_v40, %v2035_v42  ;;  %v2548_v50 = vrot.slane %v8353_v20, 4  ;;  %v8362_v51 = vmul.f32 %v7853_v57, %v10100_v10  ;;  %10103 = vst [vmem:[#allocation32_spill] sm:$0xff] %v8372_v36 }
 0x23a   : > { %v2604_v49 = vmul.f32 %v10101_v33, %v10100_v10  ;;  %v8368_v27 = vmul.f32 %v7871_v22, %v10102_v13  ;;  %v2458_v44 = vsel %vm2440_vm3, %v2456_v47, %v2457_v19  ;;  %v2549_v3 = vrot.slane %v2512_v0, 4  ;;  %v10104_v10 = vld [vmem:[#allocation61_spill] sm:$0xff]  ;;  %v10105_v19 = vld [vmem:[#allocation26_spill] sm:$0xff] }
 0x23b   : > { %v2138_v40 = vadd.f32 %v2117_v62, %v2086_v43  ;;  %v2139_v59 = vadd.f32 %v2117_v62, %v2087_v6  ;;  %v2640_v5 = vrot.slane %v8362_v51, 4  ;;  %v2696_v41 = vmul.f32 %v8372_v36, %v10102_v13  ;;  %v10106_v51 = vld [vmem:[#allocation62_spill] sm:$0xff] }
 0x23c   : > { %v2641_v37 = vrot.slane %v2604_v49, 4  ;;  %v2550_v17 = vsel %vm2440_vm3, %v2548_v50, %v2549_v3  ;;  %v8380_v62 = vmul.f32 %v8331_v46, %v10104_v10  ;;  %v2788_v0 = vmul.f32 %v10105_v19, %v10104_v10  ;;  %v10109_v10 = vld [vmem:[#allocation63_spill] sm:$0xff] }
 0x23d   : > { %v2190_v2 = vadd.f32 %v2169_v8, %v2138_v40  ;;  %v2191_v20 = vadd.f32 %v2169_v8, %v2139_v59  ;;  %v2733_v6 = vrot.slane %v2696_v41, 4  ;;  %v8387_v49 = vmul.f32 %v7771_v31, %v10106_v51  ;;  %v10107_v40 = vld [vmem:[#allocation19_spill] sm:$0xff] }
 0x23e   : > { %v2642_v43 = vsel %vm2440_vm3, %v2640_v5, %v2641_v37  ;;  %v9537_v8 = vrot.slane %v8380_v62, 4  ;;  %v2880_v59 = vmul.f32 %v10107_v40, %v10106_v51  ;;  %v10108_v3 = vrot.slane %v8368_v27, 4 }
 0x23f   : > { %v2242_v13 = vadd.f32 %v2221_v61, %v2190_v2  ;;  %v2243_v42 = vadd.f32 %v2221_v61, %v2191_v20  ;;  %v2825_v37 = vrot.slane %v2788_v0, 4  ;;  %v9538_v41 = vrot.slane %v8387_v49, 4  ;;  %v10110_v61 = vld [vmem:[#allocation18_spill] sm:$0xff] }
 0x240   : > { %v2734_v11 = vsel %vm2440_vm3, %v10108_v3, %v2733_v6  ;;  %v8398_v4 = vmul.f32 %v10109_v10, %v7750_v55  ;;  %v2917_v2 = vrot.slane %v2880_v59, 4  ;;  %v2972_v20 = vmul.f32 %v10109_v10, %v10110_v61  ;;  %v10111_v6 = vld [vmem:[#allocation64_spill] sm:$0xff] }
 0x241   : > { %v2294_v31 = vadd.f32 %v2273_v9, %v2242_v13  ;;  %v2295_v63 = vadd.f32 %v2273_v9, %v2243_v42  ;;  %v2826_v51 = vsel %vm2440_vm3, %v9537_v8, %v2825_v37  ;;  %v8408_v0 = vmul.f32 %v8175_v16, %v10111_v6  ;;  %v10112_v37 = vld [vmem:[#allocation65_spill] sm:$0xff] }
 0x242   : > { %v3064_v55 = vmul.f32 %v8345_v35, %v10111_v6  ;;  %v2918_v9 = vsel %vm2440_vm3, %v9538_v41, %v2917_v2  ;;  %v3009_v42 = vrot.slane %v2972_v20, 4  ;;  %v8418_v8 = vmul.f32 %v7846_v56, %v10112_v37 }
 0x243   : > { %v2346_v3 = vadd.f32 %v2325_v12, %v2294_v31  ;;  %v2347_v13 = vadd.f32 %v2325_v12, %v2295_v63  ;;  %v9541_v59 = vrot.slane %v8408_v0, 5  ;;  %v3157_v29 = vmul.f32 %v8355_v23, %v10112_v37  ;;  %v10114_v12 = vld [vmem:[#allocation66_spill] sm:$0xff] }
 0x244   : > { %v3102_v10 = vrot.slane %v3064_v55, 5  ;;  %v10113_v31 = vrot.slane %v8398_v4, 4  ;;  %v8427_v2 = vmul.f32 %v7853_v57, %v10114_v12  ;;  %v9543_v55 = vrot.slane %v8418_v8, 5 }
 0x245   : > { %v2398_v7 = vadd.f32 %v2377_v48, %v2346_v3  ;;  %v2399_v26 = vadd.f32 %v2377_v48, %v2347_v13  ;;  %v3194_v41 = vrot.slane %v3157_v29, 5  ;;  %v3249_v3 = vmul.f32 %v10101_v33, %v10114_v12 }
 0x246   : > { %v3010_v63 = vsel %vm2440_vm3, %v10113_v31, %v3009_v42  ;;  %v8432_v20 = vsel %vm3085_vm4, %v9541_v59, %v3102_v10  ;;  %v9545_v37 = vrot.slane %v8427_v2, 5  ;;  %v10115_v42 = vld [vmem:[#allocation67_spill] sm:$0xff]  ;;  %v10116_v59 = vld [vmem:[#allocation68_spill] sm:$0xff]  ;;  %v8492_v18 = vmul.f32 %v8175_v16, %v10121_v34 }
 0x247   : > { %v2491_v48 = vadd.f32 %v2456_v47, %v2398_v7  ;;  %v2492_v13 = vadd.f32 %v2458_v44, %v2399_v26  ;;  %v8440_v31 = vmul.f32 %v7871_v22, %v10115_v42  ;;  %v8445_v6 = vsel %vm3085_vm4, %v9543_v55, %v3194_v41  ;;  %v10118_v55 = vld [vmem:[#allocation70_spill] sm:$0xff] }
 0x248   : > { %v3286_v10 = vrot.slane %v3249_v3, 5  ;;  %v3341_v29 = vmul.f32 %v8372_v36, %v10115_v42  ;;  %v8451_v12 = vmul.f32 %v8331_v46, %v10116_v59  ;;  %v3433_v44 = vmul.f32 %v10105_v19, %v10116_v59  ;;  %v8462_v42 = vld [vmem:[#allocation2 + $0xf8] sm:$0xff] }
 0x249   : > { %v2583_v26 = vadd.f32 %v2548_v50, %v2491_v48  ;;  %v2584_v7 = vadd.f32 %v2550_v17, %v2492_v13  ;;  %v9548_v47 = vrot.slane %v8440_v31, 5  ;;  %v8466_v54 = vmul.f32 %v8462_v42, %v10117_v45 }
 0x24a   : > { %v8459_v41 = vsel %vm3085_vm4, %v9545_v37, %v3286_v10  ;;  %v3378_v3 = vrot.slane %v3341_v29, 5  ;;  %v3470_v48 = vrot.slane %v3433_v44, 5  ;;  %v3525_v13 = vmul.f32 %v10107_v40, %v10117_v45  ;;  %v8474_v37 = vld [vmem:[#allocation2 + $0x110] sm:$0xff] }
 0x24b   : > { %v2675_v17 = vadd.f32 %v2640_v5, %v2583_v26  ;;  %v2676_v50 = vadd.f32 %v2642_v43, %v2584_v7  ;;  %v8478_v59 = vmul.f32 %v8474_v37, %v10118_v55  ;;  %v3617_v5 = vmul.f32 %v10118_v55, %v10110_v61 }
 0x24c   : > { %v3379_v10 = vsel %vm3085_vm4, %v9548_v47, %v3378_v3  ;;  %v10119_v43 = vrot.slane %v8368_v27, 4  ;;  %v10120_v44 = vrot.slane %v8451_v12, 5  ;;  %v3562_v3 = vrot.slane %v3525_v13, 5  ;;  %v10124_v13 = vld [vmem:[#allocation72_spill] sm:$0xff] }
 0x24d   : > { %v2768_v7 = vadd.f32 %v2734_v11, %v2676_v50  ;;  %v9552_v47 = vrot.slane %v8478_v59, 5  ;;  %v3654_v29 = vrot.slane %v3617_v5, 5  ;;  %v3709_v55 = vmul.f32 %v8345_v35, %v10121_v34  ;;  %v10145_v34 = vld [vmem:[#allocation13_spill] sm:$0xff] }
 0x24e   : > { %v2767_v26 = vadd.f32 %v10119_v43, %v2675_v17  ;;  %v8487_v45 = vsel %vm3085_vm4, %v10120_v44, %v3470_v48  ;;  %v10122_v27 = vrot.slane %v8380_v62, 4  ;;  %v10123_v50 = vrot.slane %v8466_v54, 5 }
 0x24f   : > { %v2860_v11 = vadd.f32 %v2826_v51, %v2768_v7  ;;  %v8505_v43 = vmul.f32 %v7846_v56, %v10124_v13  ;;  %v8510_v16 = vsel %vm3085_vm4, %v9552_v47, %v3654_v29  ;;  %v9551_v35 = vrot.slane %v8492_v18, 6 }
 0x250   : > { %v2859_v17 = vadd.f32 %v10122_v27, %v2767_v26  ;;  %v8501_v48 = vsel %vm3085_vm4, %v10123_v50, %v3562_v3  ;;  %v3747_v5 = vrot.slane %v3709_v55, 6  ;;  %v3802_v62 = vmul.f32 %v8355_v23, %v10124_v13  ;;  %v10126_v3 = vld [vmem:[#allocation73_spill] sm:$0xff]  ;;  %v10127_v23 = vld [vmem:[#allocation74_spill] sm:$0xff] }
 0x251   : > { %v10125_v51 = vrot.slane %v8387_v49, 4  ;;  %v2952_v7 = vadd.f32 %v2918_v9, %v2860_v11  ;;  %v9553_v44 = vrot.slane %v8505_v43, 6  ;;  %v8520_v56 = vmul.f32 %v7853_v57, %v10126_v3 }
 0x252   : > { %v8525_v29 = vsel %vm3730_vm5, %v9551_v35, %v3747_v5  ;;  %v3839_v27 = vrot.slane %v3802_v62, 6  ;;  %v3894_v55 = vmul.f32 %v10101_v33, %v10126_v3  ;;  %v8531_v49 = vmul.f32 %v7871_v22, %v10127_v23  ;;  %v10129_v35 = vld [vmem:[#allocation75_spill] sm:$0xff]  ;;  %v10144_v3 = vld [vmem:[#allocation12_spill] sm:$0xff] }
 0x253   : > { %v2951_v26 = vadd.f32 %v10125_v51, %v2859_v17  ;;  %v10128_v9 = vrot.slane %v8398_v4, 4  ;;  %v3044_v11 = vadd.f32 %v3010_v63, %v2952_v7  ;;  %v9554_v50 = vrot.slane %v8520_v56, 6 }
 0x254   : > { %v3986_v51 = vmul.f32 %v8372_v36, %v10127_v23  ;;  %v8541_v5 = vsel %vm3730_vm5, %v9553_v44, %v3839_v27  ;;  %v3931_v62 = vrot.slane %v3894_v55, 6  ;;  %v8546_v47 = vmul.f32 %v8331_v46, %v10129_v35  ;;  %v10131_v44 = vld [vmem:[#allocation76_spill] sm:$0xff]  ;;  %v10134_v55 = vld [vmem:[#allocation77_spill] sm:$0xff] }
 0x255   : > { %v3043_v17 = vadd.f32 %v10128_v9, %v2951_v26  ;;  %v10130_v4 = vrot.slane %v8408_v0, 5  ;;  %v3137_v26 = vadd.f32 %v8432_v20, %v3044_v11  ;;  %v4078_v9 = vmul.f32 %v10105_v19, %v10129_v35 }
 0x256   : > { %v4023_v7 = vrot.slane %v3986_v51, 6  ;;  %v8556_v27 = vsel %vm3730_vm5, %v9554_v50, %v3931_v62  ;;  %v8561_v33 = vmul.f32 %v8462_v42, %v10131_v44  ;;  %v4170_v0 = vmul.f32 %v10107_v40, %v10131_v44  ;;  %v10142_v44 = vld [vmem:[#allocation10_spill] sm:$0xff] }
 0x257   : > { %v3136_v63 = vadd.f32 %v10130_v4, %v3043_v17  ;;  %v10132_v20 = vrot.slane %v8418_v8, 5  ;;  %v3229_v11 = vadd.f32 %v8445_v6, %v3137_v26  ;;  %v10133_v19 = vrot.slane %v8531_v49, 6 }
 0x258   : > { %v4115_v62 = vrot.slane %v4078_v9, 6  ;;  %v9556_v4 = vrot.slane %v8561_v33, 6  ;;  %v4207_v50 = vrot.slane %v4170_v0, 6  ;;  %v8576_v35 = vmul.f32 %v8474_v37, %v10134_v55  ;;  %v10137_v9 = vld [vmem:[#allocation6_spill] sm:$0xff] }
 0x259   : > { %v3228_v17 = vadd.f32 %v10132_v20, %v3136_v63  ;;  %v8571_v51 = vsel %vm3730_vm5, %v10133_v19, %v4023_v7  ;;  %v4262_v40 = vmul.f32 %v10134_v55, %v10110_v61  ;;  %v10135_v8 = vrot.slane %v8427_v2, 5 }
 0x25a   : > { %v3321_v6 = vadd.f32 %v8459_v41, %v3229_v11  ;;  %v10136_v26 = vrot.slane %v8546_v47, 6  ;;  %v516_v0 = vmul.f32 %v8193_v14, %v10137_v9  ;;  %v8593_v20 = vsel %vm3730_vm5, %v9556_v4, %v4207_v50  ;;  %v8609_v4 = vld [vmem:[#allocation2 + $0xd8] sm:$0xff] }
 0x25b   : > { %v3320_v63 = vadd.f32 %v10135_v8, %v3228_v17  ;;  %v9557_v61 = vrot.slane %v8576_v35, 6  ;;  %v4299_v19 = vrot.slane %v4262_v40, 6  ;;  %v517_v2 = vmul.f32 %v7853_v57, %v10137_v9  ;;  %v10140_v40 = vld [vmem:[#allocation8_spill] sm:$0xff] }
 0x25c   : > { %v8586_v7 = vsel %vm3730_vm5, %v10136_v26, %v4115_v62  ;;  %v10138_v41 = vrot.slane %v8440_v31, 5  ;;  %v3413_v11 = vadd.f32 %v3379_v10, %v3321_v6  ;;  %v10139_v62 = vld [vmem:[#allocation7_spill] sm:$0xff]  ;;  %v588_v57 = vmul.f32 %v8609_v4, %v10140_v40 }
 0x25d   : > { %v552_v8 = vmul.f32 %v8199_v1, %v10139_v62  ;;  %v553_v26 = vmul.f32 %v7871_v22, %v10139_v62  ;;  %v8607_v50 = vsel %vm3730_vm5, %v9557_v61, %v4299_v19  ;;  %v589_v31 = vmul.f32 %v8331_v46, %v10140_v40  ;;  %v8615_v10 = vld [vmem:[#allocation2 + $0xf0] sm:$0xff]  ;;  %v8622_v19 = vld [vmem:[#allocation2 + $0x138] sm:$0xff]  ;;  %v8628_v40 = vld [vmem:[#allocation2 + $0x108] sm:$0xff] }
 0x25e   : > { %v3412_v17 = vadd.f32 %v10138_v41, %v3320_v63  ;;  %v624_v63 = vmul.f32 %v8615_v10, %v10069_v53  ;;  %v10141_v22 = vrot.slane %v8451_v12, 5  ;;  %v3505_v9 = vadd.f32 %v8487_v45, %v3413_v11  ;;  %v8624_v41 = vld [vmem:[#allocation2 + $0x140] sm:$0xff] }
 0x25f   : > { %v568_v62 = vadd.f32 %v552_v8, %v516_v0  ;;  %v569_v61 = vadd.f32 %v553_v26, %v517_v2  ;;  %v625_v55 = vmul.f32 %v8462_v42, %v10069_v53  ;;  %v660_v23 = vmul.f32 %v8628_v40, %v10142_v44  ;;  %v8641_v26 = vld [vmem:[#allocation2 + $0x128] sm:$0xff] }
 0x260   : > { %v3504_v6 = vadd.f32 %v10141_v22, %v3412_v17  ;;  %v661_v12 = vmul.f32 %v8474_v37, %v10142_v44  ;;  %v8634_v17 = vld [vmem:[#allocation2 + $0x120] sm:$0xff]  ;;  %v10143_v11 = vrot.slane %v8466_v54, 5  ;;  %v3597_v2 = vadd.f32 %v8501_v48, %v3505_v9 }
 0x261   : > { %v696_v45 = vmul.f32 %v8634_v17, %v10072_v25  ;;  %v604_v8 = vadd.f32 %v588_v57, %v568_v62  ;;  %v605_v53 = vadd.f32 %v589_v31, %v569_v61  ;;  %v697_v22 = vmul.f32 %v8641_v26, %v10072_v25  ;;  %v8654_v31 = vld [vmem:[#allocation2 + $0xb0] sm:$0xff]  ;;  %v10147_v62 = vld [vmem:[#allocation20_spill] sm:$0xff] }
 0x262   : > { %v3596_v0 = vadd.f32 %v10143_v11, %v3504_v6  ;;  %v732_v44 = vmul.f32 %v10144_v3, %v8622_v19  ;;  %v733_v13 = vmul.f32 %v10144_v3, %v8624_v41  ;;  %v768_v36 = vmul.f32 %v8193_v14, %v10145_v34  ;;  %v8660_v3 = vld [vmem:[#allocation2 + $0xc8] sm:$0xff] }
 0x263   : > { %v10146_v54 = vrot.slane %v8478_v59, 5  ;;  %v3689_v48 = vadd.f32 %v8510_v16, %v3597_v2  ;;  %v640_v61 = vadd.f32 %v624_v63, %v604_v8  ;;  %v641_v57 = vadd.f32 %v625_v55, %v605_v53 }
 0x264   : > { %v769_v25 = vmul.f32 %v8654_v31, %v10145_v34  ;;  %v808_v9 = vrot.slane %v768_v36, 1  ;;  %v861_v11 = vmul.f32 %v8199_v1, %v10147_v62  ;;  %v862_v30 = vmul.f32 %v8660_v3, %v10147_v62 }
 0x265   : > { %v3688_v6 = vadd.f32 %v10146_v54, %v3596_v0  ;;  %v10148_v59 = vrot.slane %v8492_v18, 6  ;;  %v3782_v16 = vadd.f32 %v8525_v29, %v3689_v48  ;;  %v676_v55 = vadd.f32 %v660_v23, %v640_v61 }
 0x266   : > { %v677_v63 = vadd.f32 %v661_v12, %v641_v57  ;;  %v809_v2 = vrot.slane %v769_v25, 1  ;;  %v900_v8 = vrot.slane %v861_v11, 1  ;;  %v901_v53 = vrot.slane %v862_v30, 1 }
 0x267   : > { %v3781_v0 = vadd.f32 %v10148_v59, %v3688_v6  ;;  %v953_v34 = vmul.f32 %v8609_v4, %v5601_v28  ;;  %v10149_v36 = vrot.slane %v8505_v43, 6  ;;  %v3874_v38 = vadd.f32 %v8541_v5, %v3782_v16 }
 0x268   : > { %v712_v39 = vadd.f32 %v696_v45, %v676_v55  ;;  %v713_v62 = vadd.f32 %v697_v22, %v677_v63  ;;  %v810_v18 = vsel %vm786_vm1, %v808_v9, %v809_v2  ;;  %v902_v6 = vsel %vm786_vm1, %v900_v8, %v901_v53 }
 0x269   : > { %v3873_v54 = vadd.f32 %v10149_v36, %v3781_v0  ;;  %v954_v29 = vmul.f32 %v8331_v46, %v5601_v28  ;;  %v992_v23 = vrot.slane %v953_v34, 1  ;;  %v10150_v30 = vrot.slane %v8520_v56, 6 }
 0x26a   : > { %v3966_v48 = vadd.f32 %v8556_v27, %v3874_v38  ;;  %v748_v61 = vadd.f32 %v732_v44, %v712_v39  ;;  %v749_v43 = vadd.f32 %v733_v13, %v713_v62  ;;  %v1045_v5 = vmul.f32 %v8615_v10, %v5628_v32 }
 0x26b   : > { %v3965_v12 = vadd.f32 %v10150_v30, %v3873_v54  ;;  %v993_v57 = vrot.slane %v954_v29, 1  ;;  %v1046_v45 = vmul.f32 %v8462_v42, %v5628_v32  ;;  %v1137_v22 = vmul.f32 %v8628_v40, %v5633_v24 }
 0x26c   : > { %v10151_v28 = vrot.slane %v8531_v49, 6  ;;  %v4058_v56 = vadd.f32 %v8571_v51, %v3966_v48  ;;  %v841_v9 = vadd.f32 %v810_v18, %v748_v61  ;;  %v842_v11 = vadd.f32 %v809_v2, %v749_v43 }
 0x26d   : > { %v994_v39 = vsel %vm786_vm1, %v992_v23, %v993_v57  ;;  %v1084_v38 = vrot.slane %v1045_v5, 1  ;;  %v1085_v13 = vrot.slane %v1046_v45, 1  ;;  %v1138_v27 = vmul.f32 %v8474_v37, %v5633_v24 }
 0x26e   : > { %v4057_v25 = vadd.f32 %v10151_v28, %v3965_v12  ;;  %v10152_v44 = vrot.slane %v8546_v47, 6  ;;  %v4150_v59 = vadd.f32 %v8586_v7, %v4058_v56  ;;  %v933_v0 = vadd.f32 %v902_v6, %v841_v9 }
 0x26f   : > { %v934_v16 = vadd.f32 %v901_v53, %v842_v11  ;;  %v1086_v49 = vsel %vm786_vm1, %v1084_v38, %v1085_v13  ;;  %v1176_v55 = vrot.slane %v1137_v22, 1  ;;  %v1177_v51 = vrot.slane %v1138_v27, 1 }
 0x270   : > { %v4149_v32 = vadd.f32 %v10152_v44, %v4057_v25  ;;  %v1229_v63 = vmul.f32 %v8634_v17, %v9768_v52  ;;  %v10153_v2 = vrot.slane %v8561_v33, 6  ;;  %v4242_v34 = vadd.f32 %v8593_v20, %v4150_v59 }
 0x271   : > { %v1025_v24 = vadd.f32 %v994_v39, %v933_v0  ;;  %v1026_v36 = vadd.f32 %v993_v57, %v934_v16  ;;  %v1178_v47 = vsel %vm786_vm1, %v1176_v55, %v1177_v51  ;;  %v1230_v7 = vmul.f32 %v8641_v26, %v9768_v52 }
 0x272   : > { %v4241_v8 = vadd.f32 %v10153_v2, %v4149_v32  ;;  %v1268_v53 = vrot.slane %v1229_v63, 1  ;;  %v1321_v54 = vmul.f32 %v9771_v21, %v8622_v19  ;;  %v10154_v62 = vrot.slane %v8576_v35, 6  ;;  %v10156_v63 = vld [vmem:[#allocation34_spill] sm:$0xff] }
 0x273   : > { %v4334_v6 = vadd.f32 %v8607_v50, %v4242_v34  ;;  %v1117_v33 = vadd.f32 %v1086_v49, %v1025_v24  ;;  %v1118_v29 = vadd.f32 %v1085_v13, %v1026_v36  ;;  %v1269_v23 = vrot.slane %v1230_v7, 1 }
 0x274   : > { %v4333_v18 = vadd.f32 %v10154_v62, %v4241_v8  ;;  %v1322_v20 = vmul.f32 %v9771_v21, %v8624_v41  ;;  %v1360_v30 = vrot.slane %v1321_v54, 1  ;;  %v1413_v12 = vmul.f32 %v8193_v14, %v9774_v58  ;;  %v8721_v14 = vld [vmem:[%s9129_s2] ss:$0 sm:$0xff] }
 0x275   : > { %v4371_v48 = vrot.slane %v4334_v6, 5  ;;  %v1209_v61 = vadd.f32 %v1178_v47, %v1117_v33  ;;  %v1210_v43 = vadd.f32 %v1177_v51, %v1118_v29  ;;  %v1270_v57 = vsel %vm786_vm1, %v1268_v53, %v1269_v23  ;;  %v10158_v29 = vld [vmem:[#allocation36_spill] sm:$0xff] }
 0x276   : > { %v4370_v52 = vrot.slane %v4333_v18, 5  ;;  %v1361_v35 = vrot.slane %v1322_v20, 1  ;;  %v1414_v50 = vmul.f32 %v8654_v31, %v9774_v58  ;;  %v1453_v5 = vrot.slane %v1413_v12, 2 }
 0x277   : > { %v1301_v22 = vadd.f32 %v1270_v57, %v1209_v61  ;;  %v1302_v28 = vadd.f32 %v1269_v23, %v1210_v43  ;;  %v1506_v21 = vmul.f32 %v8199_v1, %v10083_v60  ;;  %v1507_v58 = vmul.f32 %v8660_v3, %v10083_v60  ;;  %v10155_v60 = vld [vmem:[#allocation33_spill] sm:$0xff] }
 0x278   : > { %v4372_v45 = vsel %vm3085_vm4, %v4370_v52, %v4371_v48  ;;  %v1362_v56 = vsel %vm786_vm1, %v1360_v30, %v1361_v35  ;;  %v1454_v9 = vrot.slane %v1414_v50, 2  ;;  %v1598_v1 = vmul.f32 %v8609_v4, %v10086_v15  ;;  %v10159_v43 = vld [vmem:[#allocation41_spill] sm:$0xff] }
 0x279   : > { %v8724_v25 = vadd.f32 %v8721_v14, %v4372_v45  ;;  %v1393_v11 = vadd.f32 %v1362_v56, %v1301_v22  ;;  %v1394_v39 = vadd.f32 %v1361_v35, %v1302_v28  ;;  %v1545_v38 = vrot.slane %v1506_v21, 2  ;;  %v10160_v45 = vld [vmem:[#allocation42_spill] sm:$0xff] }
 0x27a   : > { %v1455_v27 = vsel %vm1431_vm2, %v1453_v5, %v1454_v9  ;;  %v1546_v44 = vrot.slane %v1507_v58, 2  ;;  %v1599_v32 = vmul.f32 %v8331_v46, %v10086_v15  ;;  %v1637_v16 = vrot.slane %v1598_v1, 2  ;;  %v10162_v1 = vld [vmem:[#allocation47_spill] sm:$0xff] }
 0x27b   : > { %v4417_v13 = vsel %vm396_vm0, %v8724_v25, 0.0  ;;  %v1486_v59 = vadd.f32 %v1455_v27, %v1393_v11  ;;  %v1487_v0 = vadd.f32 %v1454_v9, %v1394_v39  ;;  %v1690_v49 = vmul.f32 %v8615_v10, %v10155_v60  ;;  %v10157_v10 = vld [vmem:[#allocation35_spill] sm:$0xff]  ;;  %v10161_v9 = vld [vmem:[#allocation44_spill] sm:$0xff] }
 0x27c   : > { %4418 = vadd.xlane.f32.xlu1 %v4417_v13  ;;  %v1547_v55 = vsel %vm1431_vm2, %v1545_v38, %v1546_v44  ;;  %v1638_v51 = vrot.slane %v1599_v32, 2  ;;  %v1691_v4 = vmul.f32 %v8462_v42, %v10155_v60  ;;  %v1782_v2 = vmul.f32 %v8628_v40, %v10156_v63 }
 0x27d   : > { %v1578_v8 = vadd.f32 %v1547_v55, %v1486_v59  ;;  %v1579_v34 = vadd.f32 %v1546_v44, %v1487_v0  ;;  %v1729_v24 = vrot.slane %v1690_v49, 2  ;;  %v1783_v15 = vmul.f32 %v8474_v37, %v10156_v63  ;;  %v10163_v59 = vld [vmem:[#allocation48_spill] sm:$0xff]  ;;  %v10164_v55 = vld [vmem:[#allocation50_spill] sm:$0xff] }
 0x27e   : > { %v1639_v36 = vsel %vm1431_vm2, %v1637_v16, %v1638_v51  ;;  %v1730_v47 = vrot.slane %v1691_v4, 2  ;;  %v1821_v7 = vrot.slane %v1782_v2, 2  ;;  %v1874_v53 = vmul.f32 %v8634_v17, %v10157_v10  ;;  %v10165_v4 = vld [vmem:[#allocation53_spill] sm:$0xff]  ;;  %v10166_v2 = vld [vmem:[#allocation54_spill] sm:$0xff] }
 0x27f   : > { %v1670_v54 = vadd.f32 %v1639_v36, %v1578_v8  ;;  %v1671_v62 = vadd.f32 %v1638_v51, %v1579_v34  ;;  %v1822_v18 = vrot.slane %v1783_v15, 2  ;;  %v1875_v6 = vmul.f32 %v8641_v26, %v10157_v10  ;;  %v8774_v34 = vld [vmem:[#allocation2 + $0xb8] sm:$0xff] }
 0x280   : > { %v1731_v40 = vsel %vm1431_vm2, %v1729_v24, %v1730_v47  ;;  %v1913_v33 = vrot.slane %v1874_v53, 2  ;;  %v1966_v23 = vmul.f32 %v10158_v29, %v8622_v19  ;;  %v1967_v20 = vmul.f32 %v10158_v29, %v8624_v41  ;;  %v10168_v53 = vld [vmem:[#allocation32_spill] sm:$0xff] }
 0x281   : > { %v1762_v30 = vadd.f32 %v1731_v40, %v1670_v54  ;;  %v1763_v12 = vadd.f32 %v1730_v47, %v1671_v62  ;;  %v1823_v52 = vsel %vm1431_vm2, %v1821_v7, %v1822_v18  ;;  %v1914_v17 = vrot.slane %v1875_v6, 2  ;;  %v10167_v7 = vld [vmem:[#allocation55_spill] sm:$0xff]  ;;  %v10169_v62 = vld [vmem:[#allocation56_spill] sm:$0xff]  ;;  %v8784_v6 = vld [vmem:[#allocation2 + $0xe8] sm:$0xff] }
 0x282   : > { %v2005_v48 = vrot.slane %v1966_v23, 2  ;;  %v2006_v61 = vrot.slane %v1967_v20, 2  ;;  %v2051_v57 = vmul.f32 %v8654_v31, %v10159_v43  ;;  %v2103_v19 = vmul.f32 %v8660_v3, %v10160_v45  ;;  %v8792_v45 = vld [vmem:[#allocation2 + $0x100] sm:$0xff] }
 0x283   : > { %v1854_v35 = vadd.f32 %v1823_v52, %v1762_v30  ;;  %v1855_v50 = vadd.f32 %v1822_v18, %v1763_v12  ;;  %v1915_v5 = vsel %vm1431_vm2, %v1913_v33, %v1914_v17  ;;  %v2155_v58 = vmul.f32 %v8331_v46, %v10161_v9 }
 0x284   : > { %v2007_v22 = vsel %vm1431_vm2, %v2005_v48, %v2006_v61  ;;  %v2067_v56 = vrot.slane %v2051_v57, 3  ;;  %v2119_v38 = vrot.slane %v2103_v19, 3  ;;  %v2207_v13 = vmul.f32 %v8462_v42, %v10162_v1  ;;  %v8790_v57 = vld [vmem:[#allocation2 + $0x148] sm:$0xff] }
 0x285   : > { %v1946_v28 = vadd.f32 %v1915_v5, %v1854_v35  ;;  %v1947_v21 = vadd.f32 %v1914_v17, %v1855_v50  ;;  %v2171_v32 = vrot.slane %v2155_v58, 3  ;;  %v2259_v0 = vmul.f32 %v8474_v37, %v10163_v59  ;;  %v10172_v58 = vld [vmem:[#allocation61_spill] sm:$0xff] }
 0x286   : > { %v2223_v49 = vrot.slane %v2207_v13, 3  ;;  %v2311_v51 = vmul.f32 %v8641_v26, %v10164_v55  ;;  %v2363_v63 = vmul.f32 %v10165_v4, %v8624_v41  ;;  %v2422_v8 = vmul.f32 %v8654_v31, %v10166_v2 }
 0x287   : > { %v2038_v11 = vadd.f32 %v2007_v22, %v1946_v28  ;;  %v2039_v39 = vadd.f32 %v2006_v61, %v1947_v21  ;;  %v2423_v24 = vmul.f32 %v8774_v34, %v10166_v2  ;;  %v2275_v47 = vrot.slane %v2259_v0, 3  ;;  %v10170_v61 = vld [vmem:[#allocation60_spill] sm:$0xff]  ;;  %v8796_v22 = vld [vmem:[#allocation2 + $0x130] sm:$0xff]  ;;  %v10171_v28 = vld [vmem:[#allocation62_spill] sm:$0xff] }
 0x288   : > { %v2515_v10 = vmul.f32 %v8660_v3, %v10167_v7  ;;  %v2516_v54 = vmul.f32 %v10168_v53, %v10167_v7  ;;  %v2607_v18 = vmul.f32 %v8331_v46, %v10169_v62  ;;  %v2608_v40 = vmul.f32 %v8784_v6, %v10169_v62 }
 0x289   : > { %v2090_v27 = vadd.f32 %v2067_v56, %v2038_v11  ;;  %v2091_v44 = vadd.f32 %v2067_v56, %v2039_v39  ;;  %v2327_v23 = vrot.slane %v2311_v51, 3  ;;  %v2379_v20 = vrot.slane %v2363_v63, 3 }
 0x28a   : > { %v2462_v30 = vrot.slane %v2422_v8, 4  ;;  %v2463_v12 = vrot.slane %v2423_v24, 4  ;;  %v2554_v48 = vrot.slane %v2515_v10, 4  ;;  %v2699_v43 = vmul.f32 %v8462_v42, %v10170_v61 }
 0x28b   : > { %v2142_v16 = vadd.f32 %v2119_v38, %v2090_v27  ;;  %v2143_v60 = vadd.f32 %v2119_v38, %v2091_v44  ;;  %v2555_v35 = vrot.slane %v2516_v54, 4  ;;  %v2646_v50 = vrot.slane %v2607_v18, 4  ;;  %v8803_v38 = vld [vmem:[#allocation2 + $0x118] sm:$0xff] }
 0x28c   : > { %v2647_v5 = vrot.slane %v2608_v40, 4  ;;  %v2700_v19 = vmul.f32 %v8792_v45, %v10170_v61  ;;  %v2884_v21 = vmul.f32 %v8796_v22, %v10171_v28  ;;  %v2791_v11 = vmul.f32 %v8474_v37, %v10172_v58  ;;  %v10175_v40 = vld [vmem:[#allocation65_spill] sm:$0xff] }
 0x28d   : > { %v2194_v15 = vadd.f32 %v2171_v32, %v2142_v16  ;;  %v2195_v36 = vadd.f32 %v2171_v32, %v2143_v60  ;;  %v2464_v39 = vsel %vm2440_vm3, %v2462_v30, %v2463_v12  ;;  %v2792_v1 = vmul.f32 %v8803_v38, %v10172_v58  ;;  %v10173_v32 = vld [vmem:[#allocation63_spill] sm:$0xff] }
 0x28e   : > { %v2883_v13 = vmul.f32 %v8641_v26, %v10171_v28  ;;  %v2975_v59 = vmul.f32 %v10173_v32, %v8624_v41  ;;  %v2976_v0 = vmul.f32 %v10173_v32, %v8790_v57  ;;  %v2556_v16 = vsel %vm2440_vm3, %v2554_v48, %v2555_v35  ;;  %v10176_v35 = vld [vmem:[#allocation66_spill] sm:$0xff] }
 0x28f   : > { %v2246_v33 = vadd.f32 %v2223_v49, %v2194_v15  ;;  %v2247_v29 = vadd.f32 %v2223_v49, %v2195_v36  ;;  %v2648_v60 = vsel %vm2440_vm3, %v2646_v50, %v2647_v5  ;;  %v2738_v49 = vrot.slane %v2699_v43, 4  ;;  %v10174_v15 = vld [vmem:[#allocation64_spill] sm:$0xff] }
 0x290   : > { %v2739_v55 = vrot.slane %v2700_v19, 4  ;;  %v2830_v63 = vrot.slane %v2791_v11, 4  ;;  %v2923_v2 = vrot.slane %v2884_v21, 4  ;;  %v2831_v8 = vrot.slane %v2792_v1, 4  ;;  %v4404_v19 = vpop.xlane.xlu0 %4403  ;;  %v10178_v1 = vld [vmem:[#allocation68_spill] sm:$0xff] }
 0x291   : > { %v2298_v52 = vadd.f32 %v2275_v47, %v2246_v33  ;;  %v2299_v17 = vadd.f32 %v2275_v47, %v2247_v29  ;;  %v2922_v24 = vrot.slane %v2883_v13, 4  ;;  %v3067_v36 = vmul.f32 %v8654_v31, %v10174_v15 }
 0x292   : > { %v3068_v47 = vmul.f32 %v8774_v34, %v10174_v15  ;;  %v3014_v54 = vrot.slane %v2975_v59, 4  ;;  %v3015_v62 = vrot.slane %v2976_v0, 4  ;;  %v2740_v18 = vsel %vm2440_vm3, %v2738_v49, %v2739_v55  ;;  %v10180_v0 = vld [vmem:[#allocation70_spill] sm:$0xff] }
 0x293   : > { %v2350_v56 = vadd.f32 %v2327_v23, %v2298_v52  ;;  %v2351_v9 = vadd.f32 %v2327_v23, %v2299_v17  ;;  %v3160_v33 = vmul.f32 %v8660_v3, %v10175_v40  ;;  %v3161_v29 = vmul.f32 %v10168_v53, %v10175_v40 }
 0x294   : > { %v2924_v12 = vsel %vm2440_vm3, %v2922_v24, %v2923_v2  ;;  %v3107_v52 = vrot.slane %v3067_v36, 5  ;;  %v3108_v17 = vrot.slane %v3068_v47, 5  ;;  %v3016_v43 = vsel %vm2440_vm3, %v3014_v54, %v3015_v62 }
 0x295   : > { %v2402_v27 = vadd.f32 %v2379_v20, %v2350_v56  ;;  %v2403_v44 = vadd.f32 %v2379_v20, %v2351_v9  ;;  %v3252_v5 = vmul.f32 %v8331_v46, %v10176_v35  ;;  %v3199_v28 = vrot.slane %v3160_v33, 5  ;;  %v10177_v56 = vld [vmem:[#allocation67_spill] sm:$0xff] }
 0x296   : > { %v3200_v21 = vrot.slane %v3161_v29, 5  ;;  %v3344_v9 = vmul.f32 %v8462_v42, %v10177_v56  ;;  %v3436_v13 = vmul.f32 %v8474_v37, %v10178_v1  ;;  %v3109_v55 = vsel %vm3085_vm4, %v3107_v52, %v3108_v17 }
 0x297   : > { %v2495_v51 = vadd.f32 %v2462_v30, %v2402_v27  ;;  %v2496_v4 = vadd.f32 %v2464_v39, %v2403_v44  ;;  %v2832_v30 = vsel %vm2440_vm3, %v2830_v63, %v2831_v8  ;;  %v3345_v39 = vmul.f32 %v8792_v45, %v10177_v56  ;;  %v10179_v44 = vld [vmem:[#allocation69_spill] sm:$0xff] }
 0x298   : > { %v3437_v27 = vmul.f32 %v8803_v38, %v10178_v1  ;;  %v3528_v32 = vmul.f32 %v8641_v26, %v10179_v44  ;;  %v3529_v59 = vmul.f32 %v8796_v22, %v10179_v44  ;;  %v3383_v8 = vrot.slane %v3344_v9, 5 }
 0x299   : > { %v2587_v7 = vadd.f32 %v2554_v48, %v2495_v51  ;;  %v2588_v10 = vadd.f32 %v2556_v16, %v2496_v4  ;;  %v8845_v16 = vmul.f32 %v10180_v0, %v8624_v41  ;;  %v3621_v51 = vmul.f32 %v10180_v0, %v8790_v57  ;;  %v10185_v0 = vld [vmem:[#allocation74_spill] sm:$0xff] }
 0x29a   : > { %v3201_v4 = vsel %vm3085_vm4, %v3199_v28, %v3200_v21  ;;  %v3384_v47 = vrot.slane %v3345_v39, 5  ;;  %v3476_v62 = vrot.slane %v3437_v27, 5  ;;  %v10183_v39 = vld [vmem:[#allocation73_spill] sm:$0xff] }
 0x29b   : > { %v2679_v23 = vadd.f32 %v2646_v50, %v2587_v7  ;;  %v2680_v20 = vadd.f32 %v2648_v60, %v2588_v10  ;;  %v3253_v50 = vmul.f32 %v8784_v6, %v10176_v35  ;;  %v3475_v7 = vrot.slane %v3436_v13, 5  ;;  %v8851_v10 = vpop.xlane.xlu0 %4406  ;;  %v10184_v13 = vld [vmem:[#allocation17_spill] sm:$0xff] }
 0x29c   : > { %v3659_v40 = vrot.slane %v8845_v16, 5  ;;  %v3897_v1 = vmul.f32 %v8331_v46, %v10183_v39  ;;  %v3989_v16 = vmul.f32 %v8462_v42, %v10185_v0 }
 0x29d   : > { %v2771_v48 = vadd.f32 %v2738_v49, %v2679_v23  ;;  %v2772_v61 = vadd.f32 %v2740_v18, %v2680_v20  ;;  %v3292_v2 = vrot.slane %v3253_v50, 5  ;;  %v3567_v18 = vrot.slane %v3528_v32, 5  ;;  %v10181_v20 = vld [vmem:[#allocation71_spill] sm:$0xff]  ;;  %v4410_v50 = vpop.xlane.xlu1 %4409 }
 0x29e   : > { %v3660_v23 = vrot.slane %v3621_v51, 5  ;;  %v4429_v32 = vmul.f32 0.03125, %v4410_v50  ;;  %v10186_v51 = vld [vmem:[#allocation52_spill] sm:$0xff] }
 0x29f   : > { %v2863_v58 = vadd.f32 %v2830_v63, %v2771_v48  ;;  %v2864_v11 = vadd.f32 %v2832_v30, %v2772_v61  ;;  %v3291_v63 = vrot.slane %v3252_v5, 5  ;;  %v3712_v30 = vmul.f32 %v8654_v31, %v10181_v20 }
 0x2a0   : > { %v3385_v61 = vsel %vm3085_vm4, %v3383_v8, %v3384_v47  ;;  %v3477_v5 = vsel %vm3085_vm4, %v3475_v7, %v3476_v62  ;;  %v4427_v31 = vmul.f32 0.03125, %v4404_v19  ;;  %v10188_v62 = vld [vmem:[#allocation75_spill] sm:$0xff] }
 0x2a1   : > { %v2955_v60 = vadd.f32 %v2922_v24, %v2863_v58  ;;  %v2956_v49 = vadd.f32 %v2924_v12, %v2864_v11  ;;  %v3568_v24 = vrot.slane %v3529_v59, 5  ;;  %v3293_v12 = vsel %vm3085_vm4, %v3291_v63, %v3292_v2  ;;  %v4416_v58 = vpop.xlane.xlu0 %4415 }
 0x2a2   : > { %v8872_v27 = vsub.f32 %v10184_v13, %v4427_v31 }
 0x2a3   : > { %v3047_v15 = vadd.f32 %v3014_v54, %v2955_v60  ;;  %v3048_v36 = vadd.f32 %v3016_v43, %v2956_v49  ;;  %v3713_v54 = vmul.f32 %v8774_v34, %v10181_v20  ;;  %v10182_v43 = vld [vmem:[#allocation72_spill] sm:$0xff]  ;;  %v3661_v34 = vsel %vm3085_vm4, %v3659_v40, %v3660_v23 }
 0x2a4   : > { %v3805_v35 = vmul.f32 %v8660_v3, %v10182_v43  ;;  %v3806_v21 = vmul.f32 %v10168_v53, %v10182_v43  ;;  %v3898_v3 = vmul.f32 %v8784_v6, %v10183_v39  ;;  %v4443_v60 = vmul.f32 %v8872_v27, %v8872_v27 }
 0x2a5   : > { %v3140_v33 = vadd.f32 %v3107_v52, %v3047_v15  ;;  %v3141_v29 = vadd.f32 %v3109_v55, %v3048_v36  ;;  %v3569_v52 = vsel %vm3085_vm4, %v3567_v18, %v3568_v24  ;;  %v3753_v11 = vrot.slane %v3713_v54, 6  ;;  %v10187_v15 = vld [vmem:[#allocation29_spill] sm:$0xff]  ;;  %v10189_v54 = vld [vmem:[#allocation76_spill] sm:$0xff] }
 0x2a6   : > { %v3844_v19 = vrot.slane %v3805_v35, 6  ;;  %v3845_v59 = vrot.slane %v3806_v21, 6  ;;  %v4431_v49 = vmul.f32 0.03125, %v4416_v58  ;;  %v3990_v6 = vmul.f32 %v8792_v45, %v10185_v0 }
 0x2a7   : > { %v3232_v17 = vadd.f32 %v3199_v28, %v3140_v33  ;;  %v3233_v48 = vadd.f32 %v3201_v4, %v3141_v29  ;;  %v3752_v28 = vrot.slane %v3712_v30, 6  ;;  %v8881_v4 = vsub.f32 %v10186_v51, %v4429_v32 }
 0x2a8   : > { %v3937_v2 = vrot.slane %v3898_v3, 6  ;;  %v8885_v36 = vsub.f32 %v10187_v15, %v4431_v49  ;;  %v4081_v24 = vmul.f32 %v8474_v37, %v10188_v62  ;;  %v4082_v33 = vmul.f32 %v8803_v38, %v10188_v62 }
 0x2a9   : > { %v3324_v56 = vadd.f32 %v3291_v63, %v3232_v17  ;;  %v3325_v9 = vadd.f32 %v3293_v12, %v3233_v48  ;;  %v3936_v63 = vrot.slane %v3897_v1, 6  ;;  %v3754_v45 = vsel %vm3730_vm5, %v3752_v28, %v3753_v11 }
 0x2aa   : > { %v4447_v29 = vmul.f32 %v8885_v36, %v8885_v36  ;;  %v4028_v12 = vrot.slane %v3989_v16, 6  ;;  %v4029_v37 = vrot.slane %v3990_v6, 6  ;;  %v4173_v17 = vmul.f32 %v8641_v26, %v10189_v54 }
 0x2ab   : > { %v3416_v44 = vadd.f32 %v3383_v8, %v3324_v56  ;;  %v3417_v53 = vadd.f32 %v3385_v61, %v3325_v9  ;;  %v4451_v8 = vsel %vm396_vm0, %v4443_v60, 0.0  ;;  %v4174_v48 = vmul.f32 %v8796_v22, %v10189_v54  ;;  %v10191_v60 = vld [vmem:[#allocation16_spill] sm:$0xff] }
 0x2ac   : > { %4452 = vadd.xlane.f32.xlu0 %v4451_v8  ;;  %v3938_v38 = vsel %vm3730_vm5, %v3936_v63, %v3937_v2  ;;  %v4120_v35 = vrot.slane %v4081_v24, 6  ;;  %v4463_v31 = vsel %vm396_vm0, %v4447_v29, 0.0  ;;  %v4030_v56 = vsel %vm3730_vm5, %v4028_v12, %v4029_v37  ;;  %v10192_v2 = vld [vmem:[#allocation24_spill] sm:$0xff] }
 0x2ad   : > { %v3508_v55 = vadd.f32 %v3475_v7, %v3416_v44  ;;  %v3509_v46 = vadd.f32 %v3477_v5, %v3417_v53  ;;  %v4445_v7 = vmul.f32 %v8881_v4, %v8881_v4  ;;  %v10190_v5 = vld [vmem:[#allocation77_spill] sm:$0xff]  ;;  %v4212_v22 = vrot.slane %v4173_v17, 6 }
 0x2ae   : > { %v4266_v21 = vmul.f32 %v10190_v5, %v8790_v57  ;;  %v4213_v9 = vrot.slane %v4174_v48, 6  ;;  %v4428_v53 = vmul.f32 0.03125, %v8851_v10 }
 0x2af   : > { %v3600_v42 = vadd.f32 %v3567_v18, %v3508_v55  ;;  %v3601_v47 = vadd.f32 %v3569_v52, %v3509_v46  ;;  %v3846_v18 = vsel %vm3730_vm5, %v3844_v19, %v3845_v59  ;;  %v4457_v30 = vsel %vm396_vm0, %v4445_v7, 0.0  ;;  %v4413_v59 = vpop.xlane.xlu1 %4412 }
 0x2b0   : > { %4458 = vadd.xlane.f32.xlu0 %v4457_v30  ;;  %v4265_v52 = vmul.f32 %v10190_v5, %v8624_v41  ;;  %v4305_v39 = vrot.slane %v4266_v21, 6  ;;  %v4214_v3 = vsel %vm3730_vm5, %v4212_v22, %v4213_v9  ;;  %v4436_v49 = vsub.f32 %v10191_v60, %v4428_v53 }
 0x2b1   : > { %v3692_v23 = vadd.f32 %v3659_v40, %v3600_v42  ;;  %v3693_v20 = vadd.f32 %v3661_v34, %v3601_v47  ;;  %v4121_v40 = vrot.slane %v4082_v33, 6  ;;  %v4430_v55 = vmul.f32 0.03125, %v4413_v59 }
 0x2b2   : > { %v4304_v11 = vrot.slane %v4265_v52, 6  ;;  %v4444_v15 = vmul.f32 %v4436_v49, %v4436_v49 }
 0x2b3   : > { %v3785_v61 = vadd.f32 %v3752_v28, %v3692_v23  ;;  %v3786_v43 = vadd.f32 %v3754_v45, %v3693_v20  ;;  %v4122_v58 = vsel %vm3730_vm5, %v4120_v35, %v4121_v40  ;;  %v4438_v8 = vsub.f32 %v10192_v2, %v4430_v55  ;;  %v10193_v45 = vld [vmem:[#allocation31_spill] sm:$0xff] }
 0x2b4   : > { %4464 = vadd.xlane.f32.xlu0 %v4463_v31  ;;  %v4306_v44 = vsel %vm3730_vm5, %v4304_v11, %v4305_v39  ;;  %v4454_v10 = vsel %vm396_vm0, %v4444_v15, 0.0 }
 0x2b5   : > { %v3877_v50 = vadd.f32 %v3844_v19, %v3785_v61  ;;  %v3878_v26 = vadd.f32 %v3846_v18, %v3786_v43  ;;  %v4446_v47 = vmul.f32 %v4438_v8, %v4438_v8 }
 0x2b7   : > { %v3969_v34 = vadd.f32 %v3936_v63, %v3877_v50  ;;  %v3970_v28 = vadd.f32 %v3938_v38, %v3878_v26  ;;  %v4460_v24 = vsel %vm396_vm0, %v4446_v47, 0.0 }
 0x2b9   : > { %v4061_v1 = vadd.f32 %v4028_v12, %v3969_v34  ;;  %v4062_v41 = vadd.f32 %v4030_v56, %v3970_v28  ;;  %v4422_v62 = vpop.xlane.xlu0 %4421 }
 0x2ba   : > { %v4433_v7 = vmul.f32 0.03125, %v4422_v62 }
 0x2bb   : > { %v4153_v57 = vadd.f32 %v4120_v35, %v4061_v1  ;;  %v4154_v13 = vadd.f32 %v4122_v58, %v4062_v41  ;;  %v5024_v58 = vld [vmem:[%s9130_s3] ss:$0 sm:$0xff] }
 0x2bc   : > { %v8921_v33 = vsub.f32 %v10193_v45, %v4433_v7 }
 0x2bd   : > { %v4245_v19 = vadd.f32 %v4212_v22, %v4153_v57  ;;  %v4246_v32 = vadd.f32 %v4214_v3, %v4154_v13  ;;  %v5025_v3 = vld [vmem:[%s9131_s4] ss:$0 sm:$0xff] }
 0x2be   : > { %v5130_v13 = vld [vmem:[%s9132_s5] sm:$0xff]  }
 0x2bf   : > { %v4337_v0 = vadd.f32 %v4304_v11, %v4245_v19  ;;  %v4338_v16 = vadd.f32 %v4306_v44, %v4246_v32  ;;  %5085 = vmatprep.subr.bf16.mxu0 %v5130_v13 }
 0x2c0   : > { %5086 = vmatpush3.bf16.msra.mxu0 %v5130_v13 }
 0x2c1   : > { %v4376_v46 = vrot.slane %v4337_v0, 5  ;;  %v4377_v6 = vrot.slane %v4338_v16, 5 }
 0x2c3   : > { %v4378_v51 = vsel %vm3085_vm4, %v4376_v46, %v4377_v6 }
 0x2c4   : > { %v4401_v63 = vadd.f32 %v8721_v14, %v4378_v51  ;;  %v4449_v14 = vmul.f32 %v8921_v33, %v8921_v33 }
 0x2c6   : > { %v4423_v42 = vsel %vm396_vm0, %v4401_v63, 0.0  ;;  %v4469_v29 = vsel %vm396_vm0, %v4449_v14, 0.0 }
 0x2c7   : > { %4424 = vadd.xlane.f32.xlu1 %v4423_v42  ;;  %4470 = vadd.xlane.f32.xlu0 %v4469_v29 }
 0x2cb   : > { %4455 = vadd.xlane.f32.xlu1 %v4454_v10 }
 0x2cf   : > { %4461 = vadd.xlane.f32.xlu1 %v4460_v24 }
 0x309   : > { %v4419_v23 = vpop.xlane.xlu1 %4418 }
 0x30a   : > { %v4432_v20 = vmul.f32 0.03125, %v4419_v23 }
 0x30c   : > { %v8927_v18 = vsub.f32 %v8724_v25, %v4432_v20 }
 0x30e   : > { %v4448_v30 = vmul.f32 %v8927_v18, %v8927_v18 }
 0x310   : > { %v4466_v12 = vsel %vm396_vm0, %v4448_v30, 0.0 }
 0x311   : > { %4467 = vadd.xlane.f32.xlu1 %v4466_v12 }
 0x339   : > { %v4453_v37 = vpop.xlane.xlu0 %4452 }
 0x33a   : > { %v4475_v17 = vmul.f32 0.03125, %v4453_v37 }
 0x33c   : > { %v4483_v35 = vadd.f32 1e-06, %v4475_v17 }
 0x33d   : > { %v4459_v48 = vpop.xlane.xlu0 %4458 }
 0x33e   : > { %v4477_v38 = vmul.f32 0.03125, %v4459_v48  ;;  %5140 = vrsqrt.f32 %v4483_v35 }
 0x340   : > { %v4485_v21 = vadd.f32 1e-06, %v4477_v38 }
 0x342   : > { %5142 = vrsqrt.f32 %v4485_v21 }
 0x348   : > { %v5141_v22 = vpop.eup %5140 }
 0x349   : > { %v4499_v34 = vmul.f32 %v5141_v22, %v8872_v27 }
 0x34b   : > { %v4514_v41 = vmul.f32 %v5024_v58, %v4499_v34 }
 0x34c   : > { %v5143_v9 = vpop.eup %5142 }
 0x34d   : > { %v4501_v39 = vmul.f32 %v5143_v9, %v8881_v4  ;;  %v4529_v44 = vadd.f32 %v5025_v3, %v4514_v41  ;;  %v5131_v4 = vld [vmem:[%s9132_s5 + $0x8] sm:$0xff]  }
 0x34e   : > { %5087 = vmatprep.subr.bf16.mxu0 %v5131_v4 }
 0x34f   : > { %v4516_v19 = vmul.f32 %v5024_v58, %v4501_v39  ;;  %5088 = vmatpush3.bf16.msra.mxu0 %v5131_v4 }
 0x351   : > { %v4531_v0 = vadd.f32 %v5025_v3, %v4516_v19 }
 0x354   : > { %v4425_v54 = vpop.xlane.xlu1 %4424 }
 0x355   : > { %v4434_v61 = vmul.f32 0.03125, %v4425_v54 }
 0x357   : > { %v8932_v43 = vsub.f32 %v4401_v63, %v4434_v61 }
 0x358   : > { %v4456_v40 = vpop.xlane.xlu1 %4455 }
 0x359   : > { %v4450_v25 = vmul.f32 %v8932_v43, %v8932_v43  ;;  %v4476_v5 = vmul.f32 0.03125, %v4456_v40 }
 0x35b   : > { %v4472_v52 = vsel %vm396_vm0, %v4450_v25, 0.0  ;;  %v4484_v31 = vadd.f32 1e-06, %v4476_v5 }
 0x35c   : > { %4473 = vadd.xlane.f32.xlu1 %v4472_v52  ;;  %v4462_v50 = vpop.xlane.xlu1 %4461  ;;  %v5132_v52 = vld [vmem:[%s9136_s9] sm:$0xff]  }
 0x35d   : > { %v4478_v26 = vmul.f32 0.03125, %v4462_v50  ;;  %5144 = vrsqrt.f32 %v4484_v31  ;;  %5097 = vmatprep.subr.bf16.mxu1 %v5132_v52 }
 0x35e   : > { %5098 = vmatpush3.bf16.msra.mxu1 %v5132_v52 }
 0x35f   : > { %v4486_v56 = vadd.f32 1e-06, %v4478_v26 }
 0x361   : > { %5146 = vrsqrt.f32 %v4486_v56 }
 0x367   : > { %v5145_v28 = vpop.eup %5144 }
 0x368   : > { %v4500_v1 = vmul.f32 %v5145_v28, %v4436_v49  ;;  %v4465_v49 = vpop.xlane.xlu0 %4464 }
 0x369   : > { %v4479_v55 = vmul.f32 0.03125, %v4465_v49 }
 0x36a   : > { %v4515_v27 = vmul.f32 %v5024_v58, %v4500_v1 }
 0x36b   : > { %v5147_v11 = vpop.eup %5146  ;;  %v4487_v46 = vadd.f32 1e-06, %v4479_v55 }
 0x36c   : > { %v4502_v57 = vmul.f32 %v5147_v11, %v4438_v8  ;;  %v4530_v53 = vadd.f32 %v5025_v3, %v4515_v27  ;;  %v4471_v45 = vpop.xlane.xlu0 %4470 }
 0x36d   : > { %5148 = vrsqrt.f32 %v4487_v46  ;;  %v4481_v14 = vmul.f32 0.03125, %v4471_v45 }
 0x36e   : > { %v4537_v32 = vpack.c.bf16 %v4530_v53, %v4529_v44  ;;  %v4517_v59 = vmul.f32 %v5024_v58, %v4502_v57 }
 0x36f   : > { %v4489_v29 = vadd.f32 1e-06, %v4481_v14 }
 0x370   : > { %5089 = vmatprep.mubr.msk.bf16.mxu0 %vm396_vm0, %v4537_v32  ;;  %v4532_v16 = vadd.f32 %v5025_v3, %v4517_v59 }
 0x372   : > { %v4538_v60 = vpack.c.bf16 %v4532_v16, %v4531_v0 }
 0x374   : > { %5090 = vmatmul.mubr.msk.bf16.vlgmr.msra.gmra.mrb[0].mxu0 %vm396_vm0, %v4538_v60 }
 0x377   : > { %v5149_v2 = vpop.eup %5148 }
 0x378   : > { %v4503_v8 = vmul.f32 %v5149_v2, %v8885_v36 }
 0x37a   : > { %v4518_v10 = vmul.f32 %v5024_v58, %v4503_v8 }
 0x37c   : > { %v4533_v62 = vadd.f32 %v5025_v3, %v4518_v10 }
 0x39e   : > { %v4468_v6 = vpop.xlane.xlu1 %4467 }
 0x39f   : > { %v4480_v51 = vmul.f32 0.03125, %v4468_v6 }
 0x3a1   : > { %v4488_v63 = vadd.f32 1e-06, %v4480_v51 }
 0x3a3   : > { %5150 = vrsqrt.f32 %v4488_v63 }
 0x3a4   : > { %5152 = vrsqrt.f32 %v4489_v29 }
 0x3ad   : > { %v5151_v15 = vpop.eup %5150 }
 0x3ae   : > { %v4504_v42 = vmul.f32 %v5151_v15, %v8927_v18  ;;  %v5153_v12 = vpop.eup %5152 }
 0x3af   : > { %v4505_v36 = vmul.f32 %v5153_v12, %v8921_v33  ;;  %v5026_v33 = vld [vmem:[%s9133_s6] ss:$0 sm:$0xff] }
 0x3b0   : > { %v4519_v47 = vmul.f32 %v5024_v58, %v4504_v42 }
 0x3b1   : > { %v4520_v54 = vmul.f32 %v5024_v58, %v4505_v36 }
 0x3b2   : > { %v4534_v24 = vadd.f32 %v5025_v3, %v4519_v47 }
 0x3b3   : > { %v4535_v48 = vadd.f32 %v5025_v3, %v4520_v54 }
 0x3b4   : > { %v4539_v7 = vpack.c.bf16 %v4534_v24, %v4533_v62 }
 0x3b6   : > { %5093 = vmatprep.mubr.msk.bf16.mxu0 %vm396_vm0, %v4539_v7 }
 0x3e9   : > { %v4474_v23 = vpop.xlane.xlu1 %4473 }
 0x3ea   : > { %v4482_v20 = vmul.f32 0.03125, %v4474_v23 }
 0x3ec   : > { %v4490_v30 = vadd.f32 1e-06, %v4482_v20 }
 0x3ee   : > { %5154 = vrsqrt.f32 %v4490_v30 }
 0x3f8   : > { %v5155_v37 = vpop.eup %5154 }
 0x3f9   : > { %v4506_v18 = vmul.f32 %v5155_v37, %v8932_v43 }
 0x3fb   : > { %v4521_v17 = vmul.f32 %v5024_v58, %v4506_v18 }
 0x3fd   : > { %v4536_v61 = vadd.f32 %v5025_v3, %v4521_v17 }
 0x3ff   : > { %v4540_v38 = vpack.c.bf16 %v4536_v61, %v4535_v48 }
 0x401   : > { %5094 = vmatmul.mubr.msk.bf16.gmra.mrb[4].mxu0 %vm396_vm0, %v4540_v38 }
 0x447   : > { %v5091_v35 = vpop.f32.mrb[0].mxu0 }
 0x448   : > { %v4610_v40 = vpop.f32.mrb[1].mxu0  ;;  %v8971_v50 = vadd.f32 %v5091_v35, %v5026_v33 }
 0x449   : > { %v5092_v25 = vpop.f32.mrb[2].mxu0  ;;  %v8967_v21 = vadd.f32 %v5026_v33, %v4610_v40 }
 0x44a   : > { %v4613_v5 = vpop.f32.mrb[3].mxu0  ;;  %v4643_v22 = vmul.f32 %v8971_v50, %v8971_v50  ;;  %v8979_v34 = vadd.f32 %v5092_v25, %v5026_v33 }
 0x44b   : > { %v8965_v43 = vadd.f32 %v5026_v33, %v4613_v5  ;;  %v4641_v26 = vmul.f32 %v8967_v21, %v8967_v21 }
 0x44c   : > { %v4651_v58 = vmul.f32 %v4643_v22, %v8971_v50  ;;  %v4644_v39 = vmul.f32 %v8979_v34, %v8979_v34 }
 0x44d   : > { %v4642_v31 = vmul.f32 %v8965_v43, %v8965_v43  ;;  %v4649_v9 = vmul.f32 %v4641_v26, %v8967_v21 }
 0x44e   : > { %v4659_v41 = vmul.f32 0.044715, %v4651_v58  ;;  %v4652_v57 = vmul.f32 %v4644_v39, %v8979_v34 }
 0x44f   : > { %v4650_v56 = vmul.f32 %v4642_v31, %v8965_v43  ;;  %v4657_v11 = vmul.f32 0.044715, %v4649_v9 }
 0x450   : > { %v4667_v27 = vadd.f32 %v4659_v41, %v8971_v50  ;;  %v4660_v53 = vmul.f32 0.044715, %v4652_v57 }
 0x451   : > { %v4658_v28 = vmul.f32 0.044715, %v4650_v56  ;;  %v4665_v3 = vadd.f32 %v4657_v11, %v8967_v21 }
 0x452   : > { %v4675_v19 = vmul.f32 0.7978846, %v4667_v27  ;;  %v4668_v4 = vadd.f32 %v4660_v53, %v8979_v34 }
 0x453   : > { %v4666_v1 = vadd.f32 %v4658_v28, %v8965_v43  ;;  %v4673_v44 = vmul.f32 0.7978846, %v4665_v3 }
 0x454   : > { %v4676_v32 = vmul.f32 0.7978846, %v4668_v4 }
 0x455   : > { %v4674_v13 = vmul.f32 0.7978846, %v4666_v1 }
 0x457   : > { %5156 = vtanh.f32 %v4674_v13 }
 0x458   : > { %5158 = vtanh.f32 %v4673_v44 }
 0x459   : > { %5160 = vtanh.f32 %v4675_v19 }
 0x45a   : > { %5162 = vtanh.f32 %v4676_v32 }
 0x461   : > { %v5157_v60 = vpop.eup %5156 }
 0x462   : > { %v5159_v63 = vpop.eup %5158  ;;  %v4690_v15 = vadd.f32 1.0, %v5157_v60 }
 0x463   : > { %v4689_v24 = vadd.f32 1.0, %v5159_v63  ;;  %v5161_v14 = vpop.eup %5160 }
 0x464   : > { %v4698_v20 = vmul.f32 0.5, %v4690_v15  ;;  %v4691_v18 = vadd.f32 1.0, %v5161_v14  ;;  %v5163_v61 = vpop.eup %5162 }
 0x465   : > { %v4697_v54 = vmul.f32 0.5, %v4689_v24  ;;  %v4692_v31 = vadd.f32 1.0, %v5163_v61 }
 0x466   : > { %v9002_v40 = vmul.f32 %v4698_v20, %v8965_v43  ;;  %v4699_v52 = vmul.f32 0.5, %v4691_v18  ;;  %v5134_v20 = vld [vmem:[%s9136_s9 + $0x10] sm:$0xff]   ;;  %v5139_v18 = vld [vmem:[%s9136_s9 + $0x38] sm:$0xff]  }
 0x467   : > { %v4700_v22 = vmul.f32 0.5, %v4692_v31 }
 0x468   : > { %v4714_v26 = vmul.f32 %v9002_v40, %v9002_v40  ;;  %v9010_v56 = vmul.f32 %v4699_v52, %v8971_v50 }
 0x46a   : > { %v4715_v58 = vmul.f32 %v9010_v56, %v9010_v56 }
 0x4d4   : > { %v5095_v59 = vpop.f32.mrb[4].mxu0 }
 0x4d5   : > { %v8989_v0 = vadd.f32 %v5095_v59, %v5026_v33  ;;  %v4626_v16 = vpop.f32.mrb[5].mxu0 }
 0x4d6   : > { %v4627_v49 = vadd.f32 %v5026_v33, %v4626_v16  ;;  %v5096_v55 = vpop.f32.mrb[6].mxu0 }
 0x4d7   : > { %v4647_v46 = vmul.f32 %v8989_v0, %v8989_v0  ;;  %v8993_v6 = vadd.f32 %v5096_v55, %v5026_v33  ;;  %v4629_v51 = vpop.f32.mrb[7].mxu0 }
 0x4d8   : > { %v4645_v2 = vmul.f32 %v4627_v49, %v4627_v49  ;;  %v4630_v8 = vadd.f32 %v5026_v33, %v4629_v51  ;;  %v9005_v33 = vmul.f32 %v4697_v54, %v8967_v21  ;;  %v9017_v21 = vmul.f32 %v4700_v22, %v8979_v34 }
 0x4d9   : > { %v4655_v42 = vmul.f32 %v4647_v46, %v8989_v0  ;;  %v4648_v10 = vmul.f32 %v8993_v6, %v8993_v6 }
 0x4da   : > { %v4653_v47 = vmul.f32 %v4645_v2, %v4627_v49  ;;  %v4646_v62 = vmul.f32 %v4630_v8, %v4630_v8  ;;  %v4713_v43 = vmul.f32 %v9005_v33, %v9005_v33  ;;  %v4716_v13 = vmul.f32 %v9017_v21, %v9017_v21 }
 0x4db   : > { %v4663_v7 = vmul.f32 0.044715, %v4655_v42  ;;  %v4656_v45 = vmul.f32 %v4648_v10, %v8993_v6 }
 0x4dc   : > { %v4661_v29 = vmul.f32 0.044715, %v4653_v47  ;;  %v4654_v23 = vmul.f32 %v4646_v62, %v4630_v8  ;;  %v4721_v9 = vadd.f32 %v4714_v26, %v4713_v43  ;;  %v5034_v26 = vld [vmem:[%s9135_s8] ss:$0 sm:$0xff] }
 0x4dd   : > { %v4671_v30 = vadd.f32 %v4663_v7, %v8989_v0  ;;  %v4664_v12 = vmul.f32 0.044715, %v4656_v45 }
 0x4de   : > { %v4669_v36 = vadd.f32 %v4661_v29, %v4627_v49  ;;  %v4662_v37 = vmul.f32 0.044715, %v4654_v23  ;;  %v4722_v41 = vadd.f32 %v4721_v9, %v4715_v58  ;;  %v5133_v23 = vld [vmem:[%s9136_s9 + $0x8] sm:$0xff]  }
 0x4df   : > { %v4679_v17 = vmul.f32 0.7978846, %v4671_v30  ;;  %v4672_v48 = vadd.f32 %v4664_v12, %v8993_v6  ;;  %5099 = vmatprep.subr.bf16.mxu1 %v5133_v23  ;;  %v5135_v30 = vld [vmem:[%s9136_s9 + $0x18] sm:$0xff]   ;;  %v5136_v12 = vld [vmem:[%s9136_s9 + $0x20] sm:$0xff]  }
 0x4e0   : > { %v4677_v38 = vmul.f32 0.7978846, %v4669_v36  ;;  %v4670_v35 = vadd.f32 %v4662_v37, %v4630_v8  ;;  %v4723_v4 = vadd.f32 %v4722_v41, %v4716_v13  ;;  %5100 = vmatpush3.bf16.msra.mxu1 %v5133_v23  ;;  %v5137_v36 = vld [vmem:[%s9136_s9 + $0x28] sm:$0xff]   ;;  %v5138_v37 = vld [vmem:[%s9136_s9 + $0x30] sm:$0xff]  }
 0x4e1   : > { %5164 = vtanh.f32 %v4679_v17  ;;  %v4680_v25 = vmul.f32 0.7978846, %v4672_v48  ;;  %5101 = vmatprep.subr.bf16.mxu1 %v5134_v20 }
 0x4e2   : > { %5166 = vtanh.f32 %v4677_v38  ;;  %v4678_v5 = vmul.f32 0.7978846, %v4670_v35  ;;  %v5033_v35 = vld [vmem:[%s9134_s7] ss:$0 sm:$0xff] }
 0x4e3   : > { %5168 = vtanh.f32 %v4680_v25 }
 0x4e4   : > { %5170 = vtanh.f32 %v4678_v5  ;;  %5102 = vmatpush3.bf16.msra.mxu1 %v5134_v20 }
 0x4e5   : > { %5103 = vmatprep.subr.bf16.mxu1 %v5135_v30 }
 0x4e8   : > { %5104 = vmatpush3.bf16.msra.mxu1 %v5135_v30 }
 0x4e9   : > { %5105 = vmatprep.subr.bf16.mxu1 %v5136_v12 }
 0x4eb   : > { %v5165_v28 = vpop.eup %5164 }
 0x4ec   : > { %v5167_v11 = vpop.eup %5166  ;;  %v4695_v39 = vadd.f32 1.0, %v5165_v28  ;;  %5106 = vmatpush3.bf16.msra.mxu1 %v5136_v12 }
 0x4ed   : > { %v5169_v1 = vpop.eup %5168  ;;  %v4693_v3 = vadd.f32 1.0, %v5167_v11  ;;  %5107 = vmatprep.subr.bf16.mxu1 %v5137_v36 }
 0x4ee   : > { %v5171_v57 = vpop.eup %5170  ;;  %v4696_v50 = vadd.f32 1.0, %v5169_v1  ;;  %v4703_v27 = vmul.f32 0.5, %v4695_v39 }
 0x4ef   : > { %v4701_v44 = vmul.f32 0.5, %v4693_v3  ;;  %v4694_v53 = vadd.f32 1.0, %v5171_v57 }
 0x4f0   : > { %v4704_v32 = vmul.f32 0.5, %v4696_v50  ;;  %v9024_v34 = vmul.f32 %v4703_v27, %v8989_v0  ;;  %5108 = vmatpush3.bf16.msra.mxu1 %v5137_v36 }
 0x4f1   : > { %v9021_v19 = vmul.f32 %v4701_v44, %v4627_v49  ;;  %v4702_v59 = vmul.f32 0.5, %v4694_v53  ;;  %5109 = vmatprep.subr.bf16.mxu1 %v5138_v37 }
 0x4f2   : > { %v9031_v46 = vmul.f32 %v4704_v32, %v8993_v6  ;;  %v4719_v49 = vmul.f32 %v9024_v34, %v9024_v34 }
 0x4f3   : > { %v4717_v16 = vmul.f32 %v9021_v19, %v9021_v19  ;;  %v9028_v60 = vmul.f32 %v4702_v59, %v4630_v8 }
 0x4f4   : > { %v4720_v0 = vmul.f32 %v9031_v46, %v9031_v46  ;;  %5110 = vmatpush3.bf16.msra.mxu1 %v5138_v37 }
 0x4f5   : > { %v4724_v55 = vadd.f32 %v4723_v4, %v4717_v16  ;;  %v4718_v51 = vmul.f32 %v9028_v60, %v9028_v60  ;;  %5111 = vmatprep.subr.bf16.mxu1 %v5139_v18 }
 0x4f7   : > { %v4725_v63 = vadd.f32 %v4724_v55, %v4718_v51 }
 0x4f8   : > { %5112 = vmatpush3.bf16.msra.mxu1 %v5139_v18 }
 0x4f9   : > { %v4726_v2 = vadd.f32 %v4725_v63, %v4719_v49 }
 0x4fb   : > { %v4727_v15 = vadd.f32 %v4726_v2, %v4720_v0 }
 0x4fd   : > { %v4728_v42 = vrot.slane %v4727_v15, 4 }
 0x4ff   : > { %v4729_v10 = vadd.f32 %v4728_v42, %v4727_v15 }
 0x501   : > { %v4730_v8 = vrot.slane %v4729_v10, 2 }
 0x503   : > { %v4731_v47 = vadd.f32 %v4730_v8, %v4729_v10 }
 0x505   : > { %v4732_v62 = vrot.slane %v4731_v47, 1 }
 0x507   : > { %v4733_v24 = vadd.f32 %v4732_v62, %v4731_v47 }
 0x509   : > { %5172 = vrsqrt.f32 %v4733_v24  ;;  %vm4736_vm6 = vcmp.eq.f32.partialorder %v4733_v24, inf  ;;  %v4739_v45 = vand.u32 2147483648, %v4733_v24  ;;  %vm4738_vm7 = vcmp.eq.f32.partialorder %v4733_v24, 0.0 }
 0x513   : > { %v5173_v6 = vpop.eup %5172 }
 0x514   : > { %v4735_v7 = vmul.f32 %v5173_v6, %v4733_v24 }
 0x516   : > { %v4737_v14 = vsel %vm4736_vm6, %v4733_v24, %v4735_v7  ;;  %v10194_v24 = vld [vmem:[#allocation4_spill] sm:$0xff] }
 0x517   : > { %v4740_v29 = vsel %vm4738_vm7, %v4739_v45, %v4737_v14  ;;  %v10195_v6 = vunpack.c.l.bf16 %v10194_v24  ;;  %v10198_v30 = vunpack.c.h.bf16 %v10194_v24 }
 0x518   : > { %4741 = vadd.xlane.f32.xlu0 %v4740_v29 }
 0x5a5   : > { %v4742_v54 = vpop.xlane.xlu0 %4741 }
 0x5a6   : > { %v4744_v17 = vmul.f32 0.0078125, %v4742_v54 }
 0x5a8   : > { %v4745_v48 = vadd.f32 1e-06, %v4744_v17 }
 0x5aa   : > { %5174 = vrcp.f32 %v4745_v48 }
 0x5b4   : > { %v5175_v61 = vpop.eup %5174 }
 0x5b5   : > { %v4747_v38 = vmul.f32 %v5175_v61, %v4740_v29 }
 0x5b7   : > { %v4749_v25 = vmul.f32 %v4747_v38, %v9005_v33  ;;  %v4750_v5 = vmul.f32 %v4747_v38, %v9002_v40  ;;  %v4751_v52 = vmul.f32 %v4747_v38, %v9010_v56  ;;  %v4752_v31 = vmul.f32 %v4747_v38, %v9017_v21 }
 0x5b8   : > { %v4753_v43 = vmul.f32 %v4747_v38, %v9021_v19  ;;  %v4754_v22 = vmul.f32 %v4747_v38, %v9028_v60  ;;  %v4755_v9 = vmul.f32 %v4747_v38, %v9024_v34  ;;  %v4756_v28 = vmul.f32 %v4747_v38, %v9031_v46 }
 0x5b9   : > { %v4763_v58 = vmul.f32 %v5033_v35, %v4749_v25  ;;  %v4764_v11 = vmul.f32 %v5033_v35, %v4750_v5  ;;  %v4765_v39 = vmul.f32 %v5033_v35, %v4751_v52  ;;  %v4766_v1 = vmul.f32 %v5033_v35, %v4752_v31  ;;  %v10200_v5 = vld [vmem:[#allocation49_spill] sm:$0xff] }
 0x5ba   : > { %v4767_v41 = vmul.f32 %v5033_v35, %v4753_v43  ;;  %v4768_v3 = vmul.f32 %v5033_v35, %v4754_v22  ;;  %v4769_v4 = vmul.f32 %v5033_v35, %v4755_v9  ;;  %v4770_v32 = vmul.f32 %v5033_v35, %v4756_v28  ;;  %v10202_v22 = vld [vmem:[#allocation5_spill] sm:$0xff] }
 0x5bb   : > { %v4778_v57 = vadd.f32 %v5034_v26, %v4763_v58  ;;  %v4779_v50 = vadd.f32 %v5034_v26, %v4764_v11  ;;  %v4780_v13 = vadd.f32 %v5034_v26, %v4765_v39  ;;  %v4781_v27 = vadd.f32 %v5034_v26, %v4766_v1 }
 0x5bc   : > { %v4782_v44 = vadd.f32 %v5034_v26, %v4767_v41  ;;  %v4783_v53 = vadd.f32 %v5034_v26, %v4768_v3  ;;  %v4784_v15 = vadd.f32 %v5034_v26, %v4769_v4  ;;  %v4785_v42 = vadd.f32 %v5034_v26, %v4770_v32 }
 0x5bd   : > { %v4786_v59 = vadd.f32 %v4778_v57, %v9005_v33  ;;  %v4787_v16 = vadd.f32 %v4779_v50, %v9002_v40  ;;  %v4788_v55 = vadd.f32 %v4780_v13, %v9010_v56  ;;  %v4789_v51 = vadd.f32 %v4781_v27, %v9017_v21  ;;  %v5035_v21 = vld [vmem:[%s9137_s10] ss:$0 sm:$0xff] }
 0x5be   : > { %v4790_v49 = vadd.f32 %v4782_v44, %v9021_v19  ;;  %v4791_v63 = vadd.f32 %v4783_v53, %v9028_v60  ;;  %v4792_v33 = vadd.f32 %v4784_v15, %v9024_v34  ;;  %v4793_v40 = vadd.f32 %v4785_v42, %v9031_v46  ;;  %v10196_v34 = vld [vmem:[#allocation3_spill] sm:$0xff] }
 0x5bf   : > { %v4794_v0 = vpack.c.bf16 %v4787_v16, %v4786_v59  ;;  %v4795_v2 = vpack.c.bf16 %v4789_v51, %v4788_v55  ;;  %v10197_v46 = vunpack.c.l.bf16 %v10196_v34  ;;  %v10199_v37 = vunpack.c.h.bf16 %v10196_v34 }
 0x5c0   : > { %v4796_v10 = vpack.c.bf16 %v4791_v63, %v4790_v49  ;;  %v4797_v56 = vpack.c.bf16 %v4793_v40, %v4792_v33  ;;  %v10201_v52 = vunpack.c.l.bf16 %v10200_v5  ;;  %v10203_v9 = vunpack.c.l.bf16 %v10202_v22 }
 0x5c1   : > { %5113 = vmatprep.mubr.bf16.mxu1 %v4794_v0  ;;  %v10204_v39 = vunpack.c.h.bf16 %v10200_v5  ;;  %v10205_v3 = vunpack.c.h.bf16 %v10202_v22 }
 0x5c2   : > { %5114 = vmatmul.mubr.bf16.vlgmr.msra.gmra.mrb[0].mxu1 %v4795_v2 }
 0x5c3   : > { %5117 = vmatprep.mubr.bf16.mxu1 %v4796_v10 }
 0x5ca   : > { %5118 = vmatmul.mubr.bf16.gmra.mrb[4].mxu1 %v4797_v56 }
 0x695   : > { %v5115_v19 = vpop.f32.mrb[0].mxu1 }
 0x696   : > { %v4912_v60 = vadd.f32 %v5115_v19, %v5035_v21  ;;  %v4903_v8 = vpop.f32.mrb[1].mxu1 }
 0x697   : > { %v4904_v47 = vadd.f32 %v5035_v21, %v4903_v8  ;;  %v5116_v62 = vpop.f32.mrb[2].mxu1 }
 0x698   : > { %v4936_v7 = vadd.f32 %v10195_v6, %v4912_v60  ;;  %v4915_v45 = vadd.f32 %v5116_v62, %v5035_v21  ;;  %v4906_v14 = vpop.f32.mrb[3].mxu1 }
 0x699   : > { %v4934_v29 = vadd.f32 %v10197_v46, %v4904_v47  ;;  %v4907_v23 = vadd.f32 %v5035_v21, %v4906_v14 }
 0x69a   : > { %v4944_v20 = vpack.c.bf16 %v4936_v7, %v4936_v7  ;;  %v4937_v12 = vadd.f32 %v10198_v30, %v4915_v45 }
 0x69b   : > { %v4942_v36 = vpack.c.bf16 %v4934_v29, %v4934_v29  ;;  %v4935_v18 = vadd.f32 %v10199_v37, %v4907_v23 }
 0x69c   : > { %4953 = vst.msk [vmem:[%s9092_s13 + $0x8] sm:$0xf] %vm4950_vm8, %v4944_v20  ;;  %v4945_v54 = vpack.c.bf16 %v4937_v12, %v4937_v12 }
 0x69d   : > { %4951 = vst.msk [vmem:[%s9092_s13] sm:$0xf] %vm4950_vm8, %v4942_v36  ;;  %v4943_v17 = vpack.c.bf16 %v4935_v18, %v4935_v18  ;;  %v5119_v48 = vpop.f32.mrb[4].mxu1 }
 0x69e   : > { %4954 = vst.msk [vmem:[%s9092_s13 + $0xc] sm:$0xf] %vm4950_vm8, %v4945_v54  ;;  %v4928_v61 = vadd.f32 %v5119_v48, %v5035_v21  ;;  %v4919_v38 = vpop.f32.mrb[5].mxu1 }
 0x69f   : > { %4952 = vst.msk [vmem:[%s9092_s13 + $0x4] sm:$0xf] %vm4950_vm8, %v4943_v17  ;;  %v4920_v35 = vadd.f32 %v5035_v21, %v4919_v38  ;;  %v5120_v25 = vpop.f32.mrb[6].mxu1 }
 0x6a0   : > { %v4940_v31 = vadd.f32 %v10201_v52, %v4928_v61  ;;  %v4931_v26 = vadd.f32 %v5120_v25, %v5035_v21  ;;  %v4922_v43 = vpop.f32.mrb[7].mxu1 }
 0x6a1   : > { %v4938_v28 = vadd.f32 %v10203_v9, %v4920_v35  ;;  %v4923_v58 = vadd.f32 %v5035_v21, %v4922_v43 }
 0x6a2   : > { %v4948_v11 = vpack.c.bf16 %v4940_v31, %v4940_v31  ;;  %v4941_v1 = vadd.f32 %v10204_v39, %v4931_v26 }
 0x6a3   : > { %v4946_v41 = vpack.c.bf16 %v4938_v28, %v4938_v28  ;;  %v4939_v57 = vadd.f32 %v10205_v3, %v4923_v58 }
 0x6a4   : > { %4957 = vst.msk [vmem:[%s9092_s13 + $0x18] sm:$0xf] %vm4950_vm8, %v4948_v11  ;;  %v4949_v50 = vpack.c.bf16 %v4941_v1, %v4941_v1 }
 0x6a5   : > { %4955 = vst.msk [vmem:[%s9092_s13 + $0x10] sm:$0xf] %vm4950_vm8, %v4946_v41  ;;  %v4947_v13 = vpack.c.bf16 %v4939_v57, %v4939_v57 }
 0x6a6   : > { %4958 = vst.msk [vmem:[%s9092_s13 + $0x1c] sm:$0xf] %vm4950_vm8, %v4949_v50 }
 0x6a7   : > { %4956 = vst.msk [vmem:[%s9092_s13 + $0x14] sm:$0xf] %vm4950_vm8, %v4947_v13 }
 0x6a8 PF: > { %s21_s17 = sadd.s32 1, %s5254_s17  }
 0x6a9   : > { %p18_p4 = scmp.ge.s32.totalorder %s21_s17, 4  }
 0x6ab   :  { %20 = sbr.rel (!%p18_p4) target bundleno = 1 (0x1), region = 96 }

</bundles_post_ra>
